<compile_context>
chip_gen: v7x
topology: tpu7x:2x2x1
jax: 0.10.0
libtpu: 0.0.40
codegen_flags: <defaults>
</compile_context>

<pallas_src>
import jax
import jax.numpy as jnp
from jax import lax
from jax.experimental import pallas as pl
from jax.experimental.pallas import tpu as pltpu

NUM_CLASSES = 2
_OUT_PAD = 128          # lane-dense logits store; wrapper slices [:NUM_CLASSES]


def _silu(x):
    # x * sigmoid(x), written with tanh to avoid transient inf from exp(-x).
    return x * (0.5 * (jnp.tanh(0.5 * x) + 1.0))


def _round_up(x, m):
    return ((x + m - 1) // m) * m


# ----------------------------------------------------------------------------
# Fused kernel: conv stack + FC head, one batch tile per grid step.
# ----------------------------------------------------------------------------
def _make_kernel(layer_dims, b_tile, out_pad):
    """layer_dims: [(H, W, Cin, Cout, margin, rows), ...] per conv stage."""
    n_layers = len(layer_dims)

    def kernel(*refs):
        x_ref = refs[0]
        conv_w = [refs[1 + 2 * i] for i in range(n_layers)]   # (9*Cin, Cout)
        conv_b = [refs[2 + 2 * i] for i in range(n_layers)]   # (1, Cout)
        base = 1 + 2 * n_layers
        wf1_ref, bf1_ref, wf2_ref, bf2_ref = refs[base:base + 4]
        o_ref = refs[base + 4]
        scr = refs[base + 5:]                                  # flat activation scratches

        # One-time hygiene zero of the scratches (margins).  Boundary taps are
        # where-masked, so correctness never reads un-initialized margins.
        @pl.when(pl.program_id(0) == 0)
        def _init():
            for s_ref in scr:
                s_ref[...] = jnp.zeros(s_ref.shape, s_ref.dtype)

        # Stage the input batch tile into layer 0's scratch interior.
        H0, W0, _, _, off0, _ = layer_dims[0]
        scr[0][off0:off0 + b_tile * H0 * W0, :] = x_ref[...]

        pooled = None
        for li, (H, W, Cin, Cout, off, _) in enumerate(layer_dims):
            R = b_tile * H * W
            s_ref = scr[li]
            w_ref = conv_w[li]

            # Per-output-pixel boundary masks for the 3x3 halo (compact layout).
            ridx = lax.broadcasted_iota(jnp.int32, (R, 1), 0)
            if (W & (W - 1)) == 0 and (H & (H - 1)) == 0:      # pow2: shifts/ands
                xcol = jnp.bitwise_and(ridx, W - 1)
                yrow = jnp.bitwise_and(jnp.right_shift(ridx, W.bit_length() - 1),
                                       H - 1)
            else:                                              # generic fallback
                xcol = ridx % W
                yrow = (ridx // W) % H
            x_ok = [xcol >= 1, None, xcol <= W - 2]            # kx = 0, 1, 2
            y_ok = [yrow >= 1, None, yrow <= H - 2]            # ky = 0, 1, 2

            # Conv3x3(pad=1): 9 accumulated dots over shifted row-slices.
            acc = jnp.zeros((R, Cout), jnp.float32)
            for ky in range(3):
                for kx in range(3):
                    toff = (ky - 1) * W + (kx - 1)
                    tap = s_ref[off + toff: off + toff + R, :]     # (R, Cin)
                    m = y_ok[ky]
                    if x_ok[kx] is not None:
                        m = x_ok[kx] if m is None else jnp.logical_and(m, x_ok[kx])
                    if m is not None:
                        tap = jnp.where(m, tap, 0.0)
                    t = ky * 3 + kx
                    acc = acc + jnp.dot(tap, w_ref[t * Cin:(t + 1) * Cin, :],
                                        preferred_element_type=jnp.float32)

            acc = _silu(acc + conv_b[li][...])
            # TODO(synk): nn.Dropout treated as eval-mode identity (no RNG mask).

            # MaxPool2d(2): pair-max over x then over y (reshape + max).
            Ho, Wo = H // 2, W // 2
            acc = jnp.max(acc.reshape(b_tile * H * Wo, 2, Cout), axis=1)
            acc = jnp.max(acc.reshape(b_tile * Ho, 2, Wo, Cout), axis=1)
            pooled = acc.reshape(b_tile * Ho * Wo, Cout)

            if li + 1 < n_layers:
                noff = layer_dims[li + 1][4]
                scr[li + 1][noff:noff + b_tile * Ho * Wo, :] = pooled

        # FC head: Flatten (NHWC order; w1 rows pre-permuted) -> Linear -> SiLU
        # -> Linear (output lanes pre-padded to `out_pad`).
        Hl, Wl, _, Cl, _, _ = layer_dims[-1]
        S = (Hl // 2) * (Wl // 2)
        flat_rows = []
        for b in range(b_tile):
            chunk = pooled[b * S:(b + 1) * S, :]                       # (S, Cl)
            flat_rows.append(jnp.concatenate(
                [chunk[s:s + 1, :] for s in range(S)], axis=1))        # (1, S*Cl)
        f_flat = flat_rows[0] if b_tile == 1 else jnp.concatenate(flat_rows, axis=0)

        hid = _silu(jnp.dot(f_flat, wf1_ref[...],
                            preferred_element_type=jnp.float32) + bf1_ref[...])
        logits = jnp.dot(hid, wf2_ref[...],
                         preferred_element_type=jnp.float32) + bf2_ref[...]
        o_ref[0] = logits                                              # (b_tile, out_pad)

    return kernel


# ----------------------------------------------------------------------------
# Wrapper: parameter prep, BlockSpecs, grid over batch tiles.
# ----------------------------------------------------------------------------
def fmri_cnn_classifier_forward(x_nchw, params, b_tile=None):
    """Forward pass equivalent to FmriCNNClassifier (eval mode)."""
    N, Cin, H, W = x_nchw.shape
    if b_tile is None:
        # >= 2 grid steps whenever N >= 2 (feeds both v7x TCs); modest cap of 8
        # keeps layer-0 vreg pressure reasonable while filling MXU M.
        b_tile = 1 if N < 2 else min(8, -(-N // 2))
    n_steps = -(-N // b_tile)
    n_pad = n_steps * b_tile

    x_nhwc = jnp.transpose(x_nchw, (0, 2, 3, 1)).astype(jnp.float32)
    if n_pad != N:
        x_nhwc = jnp.pad(x_nhwc, ((0, n_pad - N), (0, 0), (0, 0), (0, 0)))
    x_flat = x_nhwc.reshape(n_pad * H * W, Cin)        # NHWC-flat rows (b, y, x)

    layer_dims = []
    inputs = [x_flat]
    ch, cw, cin = H, W, Cin
    for (wk, bk) in params["conv"]:
        cout = wk.shape[-1]
        margin = _round_up(cw + 2, 8)                  # >= cw+1 halo rows each side
        rows = margin + b_tile * ch * cw + margin
        layer_dims.append((ch, cw, cin, cout, margin, rows))
        inputs.append(wk.reshape(9 * cin, cout))       # rows ordered (ky, kx, ci)
        inputs.append(bk.reshape(1, cout))
        ch, cw, cin = ch // 2, cw // 2, cout

    emb = params["w1"].shape[1]
    S = ch * cw
    # Fold torch's NCHW flatten into w1: permute rows (c, y, x) -> (y, x, c).
    w1p = jnp.transpose(params["w1"].reshape(cin, ch, cw, emb),
                        (1, 2, 0, 3)).reshape(S * cin, emb)
    w2p = jnp.zeros((emb, _OUT_PAD), jnp.float32).at[:, :NUM_CLASSES].set(params["w2"])
    b2p = jnp.zeros((1, _OUT_PAD), jnp.float32).at[:, :NUM_CLASSES].set(
        params["b2"].reshape(1, NUM_CLASSES))
    inputs += [w1p, params["b1"].reshape(1, emb), w2p, b2p]

    in_specs = [pl.BlockSpec((b_tile * H * W, Cin), lambda n: (n, 0))]
    for arr in inputs[1:]:                             # weights: whole array
        in_specs.append(pl.BlockSpec(arr.shape, lambda n: (0, 0)))

    scratch_shapes = [pltpu.VMEM((rows, c_in), jnp.float32)
                      for (_, _, c_in, _, _, rows) in layer_dims]

    out = pl.pallas_call(
        _make_kernel(layer_dims, b_tile, _OUT_PAD),
        out_shape=jax.ShapeDtypeStruct((n_steps, b_tile, _OUT_PAD), jnp.float32),
        grid=(n_steps,),
        in_specs=in_specs,
        out_specs=pl.BlockSpec((1, b_tile, _OUT_PAD), lambda n: (n, 0, 0)),
        scratch_shapes=scratch_shapes,
        compiler_params=pltpu.CompilerParams(dimension_semantics=("parallel",)),
    )(*inputs)
    return out.reshape(n_pad, _OUT_PAD)[:N, :NUM_CLASSES]


# ----------------------------------------------------------------------------
# Parameter init (deterministic, synthetic).
# ----------------------------------------------------------------------------
def init_params(key, in_channels, hidden_channels, embedding_dimension, width):
    params = {"conv": []}
    cin = in_channels
    for cout in hidden_channels:
        key, kw, kb = jax.random.split(key, 3)
        fan_in = cin * 9
        w = jax.random.normal(kw, (3, 3, cin, cout), jnp.float32) / jnp.sqrt(fan_in)
        b = 0.01 * jax.random.normal(kb, (cout,), jnp.float32)
        params["conv"].append((w, b))
        cin = cout
    spatial = width // (2 ** len(hidden_channels))
    feature_size = cin * spatial * spatial
    key, k1, k2, k3, k4 = jax.random.split(key, 5)
    params["w1"] = jax.random.normal(k1, (feature_size, embedding_dimension),
                                     jnp.float32) / jnp.sqrt(feature_size)
    params["b1"] = 0.01 * jax.random.normal(k2, (embedding_dimension,), jnp.float32)
    params["w2"] = jax.random.normal(k3, (embedding_dimension, NUM_CLASSES),
                                     jnp.float32) / jnp.sqrt(embedding_dimension)
    params["b2"] = 0.01 * jax.random.normal(k4, (NUM_CLASSES,), jnp.float32)
    return params


# ----------------------------------------------------------------------------
# Pure-JAX reference (numerical sanity check only).
# ----------------------------------------------------------------------------
def ref_forward(x_nchw, params):
    h = x_nchw
    for w_hwio, b in params["conv"]:
        w_oihw = jnp.transpose(w_hwio, (3, 2, 0, 1))
        h = lax.conv_general_dilated(
            h, w_oihw, window_strides=(1, 1), padding="SAME",
            dimension_numbers=("NCHW", "OIHW", "NCHW"),
            precision=lax.Precision.HIGHEST) + b.reshape(1, -1, 1, 1)
        h = _silu(h)
        h = lax.reduce_window(h, -jnp.inf, lax.max,
                              window_dimensions=(1, 1, 2, 2),
                              window_strides=(1, 1, 2, 2), padding="VALID")
    f = h.reshape(h.shape[0], -1)
    f = _silu(jnp.dot(f, params["w1"], precision=lax.Precision.HIGHEST) + params["b1"])
    return jnp.dot(f, params["w2"], precision=lax.Precision.HIGHEST) + params["b2"]


if __name__ == "__main__":
    # Small shapes consistent with the module: batch=2, in_channels=3,
    # width=16, hidden_channels=[8, 16, 32], embedding_dimension=32.
    key = jax.random.PRNGKey(0)
    key, kx, kp = jax.random.split(key, 3)
    x = jax.random.normal(kx, (2, 3, 16, 16), jnp.float32)       # NCHW
    params = init_params(kp, in_channels=3, hidden_channels=[8, 16, 32],
                         embedding_dimension=32, width=16)

    fwd = jax.jit(fmri_cnn_classifier_forward)
    logits = jax.block_until_ready(fwd(x, params))

    ref = jax.block_until_ready(ref_forward(x, params))
    if not bool(jnp.allclose(logits, ref, rtol=2e-3, atol=2e-3)):
        raise AssertionError(
            f"Pallas output mismatch vs reference:\n{logits}\nvs\n{ref}")

    print("KERNEL_OK")
</pallas_src>

<mosaic_0001>
module attributes {stable_mosaic.version = 11 : i64} {
  func.func @kernel(%arg0: i32, %arg1: memref<256x3xf32, #tpu.memory_space<vmem>>, %arg2: memref<27x8xf32, #tpu.memory_space<vmem>>, %arg3: memref<1x8xf32, #tpu.memory_space<vmem>>, %arg4: memref<72x16xf32, #tpu.memory_space<vmem>>, %arg5: memref<1x16xf32, #tpu.memory_space<vmem>>, %arg6: memref<144x32xf32, #tpu.memory_space<vmem>>, %arg7: memref<1x32xf32, #tpu.memory_space<vmem>>, %arg8: memref<128x32xf32, #tpu.memory_space<vmem>>, %arg9: memref<1x32xf32, #tpu.memory_space<vmem>>, %arg10: memref<32x128xf32, #tpu.memory_space<vmem>>, %arg11: memref<1x128xf32, #tpu.memory_space<vmem>>, %arg12: memref<1x1x128xf32, #tpu.memory_space<vmem>>, %arg13: memref<304x3xf32, #tpu.memory_space<vmem>>, %arg14: memref<96x8xf32, #tpu.memory_space<vmem>>, %arg15: memref<32x16xf32, #tpu.memory_space<vmem>>) attributes {dimension_semantics = [#tpu.dimension_semantics<parallel>], iteration_bounds = array<i64: 2>, scalar_prefetch = 0 : i64, scratch_operands = 3 : i64, tpu.core_type = #tpu.core_type<tc>, window_params = [{transform_indices = @transform_0, window_bounds = array<i64: 256, 3>}, {pipeline_mode = #tpu.pipeline_mode<synchronous>, transform_indices = @transform_1, window_bounds = array<i64: 27, 8>}, {pipeline_mode = #tpu.pipeline_mode<synchronous>, transform_indices = @transform_2, window_bounds = array<i64: 1, 8>}, {pipeline_mode = #tpu.pipeline_mode<synchronous>, transform_indices = @transform_3, window_bounds = array<i64: 72, 16>}, {pipeline_mode = #tpu.pipeline_mode<synchronous>, transform_indices = @transform_4, window_bounds = array<i64: 1, 16>}, {pipeline_mode = #tpu.pipeline_mode<synchronous>, transform_indices = @transform_5, window_bounds = array<i64: 144, 32>}, {pipeline_mode = #tpu.pipeline_mode<synchronous>, transform_indices = @transform_6, window_bounds = array<i64: 1, 32>}, {pipeline_mode = #tpu.pipeline_mode<synchronous>, transform_indices = @transform_7, window_bounds = array<i64: 128, 32>}, {pipeline_mode = #tpu.pipeline_mode<synchronous>, transform_indices = @transform_8, window_bounds = array<i64: 1, 32>}, {pipeline_mode = #tpu.pipeline_mode<synchronous>, transform_indices = @transform_9, window_bounds = array<i64: 32, 128>}, {pipeline_mode = #tpu.pipeline_mode<synchronous>, transform_indices = @transform_10, window_bounds = array<i64: 1, 128>}, {transform_indices = @transform_11, window_bounds = array<i64: 1, 1, 128>}]} {
    %c0_i32 = arith.constant 0 : i32
    %0 = arith.cmpi eq, %arg0, %c0_i32 : i32
    %1 = arith.extui %0 : i1 to i32
    %c0_i32_0 = arith.constant 0 : i32
    %2 = arith.cmpi ne, %1, %c0_i32_0 : i32
    scf.if %2 {
      %cst_190 = arith.constant 0.000000e+00 : f32
      %343 = vector.broadcast %cst_190 : f32 to vector<304x3xf32>
      %c0_191 = arith.constant 0 : index
      %c0_192 = arith.constant 0 : index
      %344 = vector.load %arg13[%c0_191, %c0_192] : memref<304x3xf32, #tpu.memory_space<vmem>>, vector<304x3xf32>
      tpu.vector_store %arg13[%c0_191, %c0_192], %343 {strides = array<i32>} : memref<304x3xf32, #tpu.memory_space<vmem>>, vector<304x3xf32>,
      %cst_193 = arith.constant 0.000000e+00 : f32
      %345 = vector.broadcast %cst_193 : f32 to vector<96x8xf32>
      %c0_194 = arith.constant 0 : index
      %c0_195 = arith.constant 0 : index
      %346 = vector.load %arg14[%c0_194, %c0_195] : memref<96x8xf32, #tpu.memory_space<vmem>>, vector<96x8xf32>
      tpu.vector_store %arg14[%c0_194, %c0_195], %345 {strides = array<i32>} : memref<96x8xf32, #tpu.memory_space<vmem>>, vector<96x8xf32>,
      %cst_196 = arith.constant 0.000000e+00 : f32
      %347 = vector.broadcast %cst_196 : f32 to vector<32x16xf32>
      %c0_197 = arith.constant 0 : index
      %c0_198 = arith.constant 0 : index
      %348 = vector.load %arg15[%c0_197, %c0_198] : memref<32x16xf32, #tpu.memory_space<vmem>>, vector<32x16xf32>
      tpu.vector_store %arg15[%c0_197, %c0_198], %347 {strides = array<i32>} : memref<32x16xf32, #tpu.memory_space<vmem>>, vector<32x16xf32>,
    } else {
    }
    %c0 = arith.constant 0 : index
    %c0_1 = arith.constant 0 : index
    %3 = vector.load %arg1[%c0, %c0_1] : memref<256x3xf32, #tpu.memory_space<vmem>>, vector<256x3xf32>
    %c24 = arith.constant 24 : index
    %c0_2 = arith.constant 0 : index
    %4 = vector.load %arg13[%c24, %c0_2] : memref<304x3xf32, #tpu.memory_space<vmem>>, vector<256x3xf32>
    tpu.vector_store %arg13[%c24, %c0_2], %3 {strides = array<i32>} : memref<304x3xf32, #tpu.memory_space<vmem>>, vector<256x3xf32>,
    %5 = tpu.iota {dimensions = array<i32: 0>} : vector<256x1xi32>
    %c15_i32 = arith.constant 15 : i32
    %6 = vector.broadcast %c15_i32 : i32 to vector<256x1xi32>
    %7 = arith.andi %5, %6 : vector<256x1xi32>
    %c4_i32 = arith.constant 4 : i32
    %8 = vector.broadcast %c4_i32 : i32 to vector<256x1xi32>
    %9 = arith.shrsi %5, %8 : vector<256x1xi32>
    %c15_i32_3 = arith.constant 15 : i32
    %10 = vector.broadcast %c15_i32_3 : i32 to vector<256x1xi32>
    %11 = arith.andi %9, %10 : vector<256x1xi32>
    %c1_i32 = arith.constant 1 : i32
    %12 = vector.broadcast %c1_i32 : i32 to vector<256x1xi32>
    %13 = arith.cmpi sge, %7, %12 : vector<256x1xi32>
    %c14_i32 = arith.constant 14 : i32
    %14 = vector.broadcast %c14_i32 : i32 to vector<256x1xi32>
    %15 = arith.cmpi sle, %7, %14 : vector<256x1xi32>
    %c1_i32_4 = arith.constant 1 : i32
    %16 = vector.broadcast %c1_i32_4 : i32 to vector<256x1xi32>
    %17 = arith.cmpi sge, %11, %16 : vector<256x1xi32>
    %c14_i32_5 = arith.constant 14 : i32
    %18 = vector.broadcast %c14_i32_5 : i32 to vector<256x1xi32>
    %19 = arith.cmpi sle, %11, %18 : vector<256x1xi32>
    %cst = arith.constant 0.000000e+00 : f32
    %20 = vector.broadcast %cst : f32 to vector<256x8xf32>
    %c7 = arith.constant 7 : index
    %c0_6 = arith.constant 0 : index
    %21 = vector.load %arg13[%c7, %c0_6] : memref<304x3xf32, #tpu.memory_space<vmem>>, vector<256x3xf32>
    %22 = arith.andi %17, %13 : vector<256x1xi1>
    %cst_7 = arith.constant 0.000000e+00 : f32
    %23 = vector.shape_cast %22 : vector<256x1xi1> to vector<256x1xi1>
    %24 = vector.broadcast %23 : vector<256x1xi1> to vector<256x3xi1>
    %25 = vector.broadcast %cst_7 : f32 to vector<256x3xf32>
    %26 = arith.select %24, %21, %25 : vector<256x3xi1>, vector<256x3xf32>
    %c0_8 = arith.constant 0 : index
    %c0_9 = arith.constant 0 : index
    %27 = vector.load %arg2[%c0_8, %c0_9] : memref<27x8xf32, #tpu.memory_space<vmem>>, vector<3x8xf32>
    %cst_10 = arith.constant dense<0.000000e+00> : vector<256x8xf32>
    %28 = tpu.matmul %26, %27, %cst_10 {dimension_numbers = #tpu.dot_dimension_numbers<[1], [0], [0], [1], [0, 0, 1, 1], [], []>} : vector<256x3xf32>, vector<3x8xf32>, vector<256x8xf32> -> vector<256x8xf32>
    %29 = arith.addf %20, %28 : vector<256x8xf32>
    %c8 = arith.constant 8 : index
    %c0_11 = arith.constant 0 : index
    %30 = vector.load %arg13[%c8, %c0_11] : memref<304x3xf32, #tpu.memory_space<vmem>>, vector<256x3xf32>
    %cst_12 = arith.constant 0.000000e+00 : f32
    %31 = vector.shape_cast %17 : vector<256x1xi1> to vector<256x1xi1>
    %32 = vector.broadcast %31 : vector<256x1xi1> to vector<256x3xi1>
    %33 = vector.broadcast %cst_12 : f32 to vector<256x3xf32>
    %34 = arith.select %32, %30, %33 : vector<256x3xi1>, vector<256x3xf32>
    %c3 = arith.constant 3 : index
    %c0_13 = arith.constant 0 : index
    %35 = vector.load %arg2[%c3, %c0_13] : memref<27x8xf32, #tpu.memory_space<vmem>>, vector<3x8xf32>
    %cst_14 = arith.constant dense<0.000000e+00> : vector<256x8xf32>
    %36 = tpu.matmul %34, %35, %cst_14 {dimension_numbers = #tpu.dot_dimension_numbers<[1], [0], [0], [1], [0, 0, 1, 1], [], []>} : vector<256x3xf32>, vector<3x8xf32>, vector<256x8xf32> -> vector<256x8xf32>
    %37 = arith.addf %29, %36 : vector<256x8xf32>
    %c9 = arith.constant 9 : index
    %c0_15 = arith.constant 0 : index
    %38 = vector.load %arg13[%c9, %c0_15] : memref<304x3xf32, #tpu.memory_space<vmem>>, vector<256x3xf32>
    %39 = arith.andi %17, %15 : vector<256x1xi1>
    %cst_16 = arith.constant 0.000000e+00 : f32
    %40 = vector.shape_cast %39 : vector<256x1xi1> to vector<256x1xi1>
    %41 = vector.broadcast %40 : vector<256x1xi1> to vector<256x3xi1>
    %42 = vector.broadcast %cst_16 : f32 to vector<256x3xf32>
    %43 = arith.select %41, %38, %42 : vector<256x3xi1>, vector<256x3xf32>
    %c6 = arith.constant 6 : index
    %c0_17 = arith.constant 0 : index
    %44 = vector.load %arg2[%c6, %c0_17] : memref<27x8xf32, #tpu.memory_space<vmem>>, vector<3x8xf32>
    %cst_18 = arith.constant dense<0.000000e+00> : vector<256x8xf32>
    %45 = tpu.matmul %43, %44, %cst_18 {dimension_numbers = #tpu.dot_dimension_numbers<[1], [0], [0], [1], [0, 0, 1, 1], [], []>} : vector<256x3xf32>, vector<3x8xf32>, vector<256x8xf32> -> vector<256x8xf32>
    %46 = arith.addf %37, %45 : vector<256x8xf32>
    %c23 = arith.constant 23 : index
    %c0_19 = arith.constant 0 : index
    %47 = vector.load %arg13[%c23, %c0_19] : memref<304x3xf32, #tpu.memory_space<vmem>>, vector<256x3xf32>
    %cst_20 = arith.constant 0.000000e+00 : f32
    %48 = vector.shape_cast %13 : vector<256x1xi1> to vector<256x1xi1>
    %49 = vector.broadcast %48 : vector<256x1xi1> to vector<256x3xi1>
    %50 = vector.broadcast %cst_20 : f32 to vector<256x3xf32>
    %51 = arith.select %49, %47, %50 : vector<256x3xi1>, vector<256x3xf32>
    %c9_21 = arith.constant 9 : index
    %c0_22 = arith.constant 0 : index
    %52 = vector.load %arg2[%c9_21, %c0_22] : memref<27x8xf32, #tpu.memory_space<vmem>>, vector<3x8xf32>
    %cst_23 = arith.constant dense<0.000000e+00> : vector<256x8xf32>
    %53 = tpu.matmul %51, %52, %cst_23 {dimension_numbers = #tpu.dot_dimension_numbers<[1], [0], [0], [1], [0, 0, 1, 1], [], []>} : vector<256x3xf32>, vector<3x8xf32>, vector<256x8xf32> -> vector<256x8xf32>
    %54 = arith.addf %46, %53 : vector<256x8xf32>
    %c24_24 = arith.constant 24 : index
    %c0_25 = arith.constant 0 : index
    %55 = vector.load %arg13[%c24_24, %c0_25] : memref<304x3xf32, #tpu.memory_space<vmem>>, vector<256x3xf32>
    %c12 = arith.constant 12 : index
    %c0_26 = arith.constant 0 : index
    %56 = vector.load %arg2[%c12, %c0_26] : memref<27x8xf32, #tpu.memory_space<vmem>>, vector<3x8xf32>
    %cst_27 = arith.constant dense<0.000000e+00> : vector<256x8xf32>
    %57 = tpu.matmul %55, %56, %cst_27 {dimension_numbers = #tpu.dot_dimension_numbers<[1], [0], [0], [1], [0, 0, 1, 1], [], []>} : vector<256x3xf32>, vector<3x8xf32>, vector<256x8xf32> -> vector<256x8xf32>
    %58 = arith.addf %54, %57 : vector<256x8xf32>
    %c25 = arith.constant 25 : index
    %c0_28 = arith.constant 0 : index
    %59 = vector.load %arg13[%c25, %c0_28] : memref<304x3xf32, #tpu.memory_space<vmem>>, vector<256x3xf32>
    %cst_29 = arith.constant 0.000000e+00 : f32
    %60 = vector.shape_cast %15 : vector<256x1xi1> to vector<256x1xi1>
    %61 = vector.broadcast %60 : vector<256x1xi1> to vector<256x3xi1>
    %62 = vector.broadcast %cst_29 : f32 to vector<256x3xf32>
    %63 = arith.select %61, %59, %62 : vector<256x3xi1>, vector<256x3xf32>
    %c15 = arith.constant 15 : index
    %c0_30 = arith.constant 0 : index
    %64 = vector.load %arg2[%c15, %c0_30] : memref<27x8xf32, #tpu.memory_space<vmem>>, vector<3x8xf32>
    %cst_31 = arith.constant dense<0.000000e+00> : vector<256x8xf32>
    %65 = tpu.matmul %63, %64, %cst_31 {dimension_numbers = #tpu.dot_dimension_numbers<[1], [0], [0], [1], [0, 0, 1, 1], [], []>} : vector<256x3xf32>, vector<3x8xf32>, vector<256x8xf32> -> vector<256x8xf32>
    %66 = arith.addf %58, %65 : vector<256x8xf32>
    %c39 = arith.constant 39 : index
    %c0_32 = arith.constant 0 : index
    %67 = vector.load %arg13[%c39, %c0_32] : memref<304x3xf32, #tpu.memory_space<vmem>>, vector<256x3xf32>
    %68 = arith.andi %19, %13 : vector<256x1xi1>
    %cst_33 = arith.constant 0.000000e+00 : f32
    %69 = vector.shape_cast %68 : vector<256x1xi1> to vector<256x1xi1>
    %70 = vector.broadcast %69 : vector<256x1xi1> to vector<256x3xi1>
    %71 = vector.broadcast %cst_33 : f32 to vector<256x3xf32>
    %72 = arith.select %70, %67, %71 : vector<256x3xi1>, vector<256x3xf32>
    %c18 = arith.constant 18 : index
    %c0_34 = arith.constant 0 : index
    %73 = vector.load %arg2[%c18, %c0_34] : memref<27x8xf32, #tpu.memory_space<vmem>>, vector<3x8xf32>
    %cst_35 = arith.constant dense<0.000000e+00> : vector<256x8xf32>
    %74 = tpu.matmul %72, %73, %cst_35 {dimension_numbers = #tpu.dot_dimension_numbers<[1], [0], [0], [1], [0, 0, 1, 1], [], []>} : vector<256x3xf32>, vector<3x8xf32>, vector<256x8xf32> -> vector<256x8xf32>
    %75 = arith.addf %66, %74 : vector<256x8xf32>
    %c40 = arith.constant 40 : index
    %c0_36 = arith.constant 0 : index
    %76 = vector.load %arg13[%c40, %c0_36] : memref<304x3xf32, #tpu.memory_space<vmem>>, vector<256x3xf32>
    %cst_37 = arith.constant 0.000000e+00 : f32
    %77 = vector.shape_cast %19 : vector<256x1xi1> to vector<256x1xi1>
    %78 = vector.broadcast %77 : vector<256x1xi1> to vector<256x3xi1>
    %79 = vector.broadcast %cst_37 : f32 to vector<256x3xf32>
    %80 = arith.select %78, %76, %79 : vector<256x3xi1>, vector<256x3xf32>
    %c21 = arith.constant 21 : index
    %c0_38 = arith.constant 0 : index
    %81 = vector.load %arg2[%c21, %c0_38] : memref<27x8xf32, #tpu.memory_space<vmem>>, vector<3x8xf32>
    %cst_39 = arith.constant dense<0.000000e+00> : vector<256x8xf32>
    %82 = tpu.matmul %80, %81, %cst_39 {dimension_numbers = #tpu.dot_dimension_numbers<[1], [0], [0], [1], [0, 0, 1, 1], [], []>} : vector<256x3xf32>, vector<3x8xf32>, vector<256x8xf32> -> vector<256x8xf32>
    %83 = arith.addf %75, %82 : vector<256x8xf32>
    %c41 = arith.constant 41 : index
    %c0_40 = arith.constant 0 : index
    %84 = vector.load %arg13[%c41, %c0_40] : memref<304x3xf32, #tpu.memory_space<vmem>>, vector<256x3xf32>
    %85 = arith.andi %19, %15 : vector<256x1xi1>
    %cst_41 = arith.constant 0.000000e+00 : f32
    %86 = vector.shape_cast %85 : vector<256x1xi1> to vector<256x1xi1>
    %87 = vector.broadcast %86 : vector<256x1xi1> to vector<256x3xi1>
    %88 = vector.broadcast %cst_41 : f32 to vector<256x3xf32>
    %89 = arith.select %87, %84, %88 : vector<256x3xi1>, vector<256x3xf32>
    %c24_42 = arith.constant 24 : index
    %c0_43 = arith.constant 0 : index
    %90 = vector.load %arg2[%c24_42, %c0_43] : memref<27x8xf32, #tpu.memory_space<vmem>>, vector<3x8xf32>
    %cst_44 = arith.constant dense<0.000000e+00> : vector<256x8xf32>
    %91 = tpu.matmul %89, %90, %cst_44 {dimension_numbers = #tpu.dot_dimension_numbers<[1], [0], [0], [1], [0, 0, 1, 1], [], []>} : vector<256x3xf32>, vector<3x8xf32>, vector<256x8xf32> -> vector<256x8xf32>
    %92 = arith.addf %83, %91 : vector<256x8xf32>
    %c0_45 = arith.constant 0 : index
    %c0_46 = arith.constant 0 : index
    %93 = vector.load %arg3[%c0_45, %c0_46] : memref<1x8xf32, #tpu.memory_space<vmem>>, vector<1x8xf32>
    %94 = vector.broadcast %93 : vector<1x8xf32> to vector<256x8xf32>
    %95 = arith.addf %92, %94 : vector<256x8xf32>
    %cst_47 = arith.constant 5.000000e-01 : f32
    %96 = vector.broadcast %cst_47 : f32 to vector<256x8xf32>
    %97 = arith.mulf %96, %95 : vector<256x8xf32>
    %98 = math.tanh %97 : vector<256x8xf32>
    %cst_48 = arith.constant 1.000000e+00 : f32
    %99 = vector.broadcast %cst_48 : f32 to vector<256x8xf32>
    %100 = arith.addf %98, %99 : vector<256x8xf32>
    %cst_49 = arith.constant 5.000000e-01 : f32
    %101 = vector.broadcast %cst_49 : f32 to vector<256x8xf32>
    %102 = arith.mulf %101, %100 : vector<256x8xf32>
    %103 = arith.mulf %95, %102 : vector<256x8xf32>
    %104 = vector.shape_cast %103 : vector<256x8xf32> to vector<128x2x8xf32>
    %cst_50 = arith.constant dense<0xFF800000> : vector<128x8xf32>
    %105 = vector.multi_reduction <maximumf>, %104, %cst_50 [1] : vector<128x2x8xf32> to vector<128x8xf32>
    %106 = vector.shape_cast %105 : vector<128x8xf32> to vector<8x2x8x8xf32>
    %cst_51 = arith.constant dense<0xFF800000> : vector<8x8x8xf32>
    %107 = vector.multi_reduction <maximumf>, %106, %cst_51 [1] : vector<8x2x8x8xf32> to vector<8x8x8xf32>
    %108 = vector.shape_cast %107 : vector<8x8x8xf32> to vector<64x8xf32>
    %c16 = arith.constant 16 : index
    %c0_52 = arith.constant 0 : index
    %109 = vector.load %arg14[%c16, %c0_52] : memref<96x8xf32, #tpu.memory_space<vmem>>, vector<64x8xf32>
    tpu.vector_store %arg14[%c16, %c0_52], %108 {strides = array<i32>} : memref<96x8xf32, #tpu.memory_space<vmem>>, vector<64x8xf32>,
    %110 = tpu.iota {dimensions = array<i32: 0>} : vector<64x1xi32>
    %c7_i32 = arith.constant 7 : i32
    %111 = vector.broadcast %c7_i32 : i32 to vector<64x1xi32>
    %112 = arith.andi %110, %111 : vector<64x1xi32>
    %c3_i32 = arith.constant 3 : i32
    %113 = vector.broadcast %c3_i32 : i32 to vector<64x1xi32>
    %114 = arith.shrsi %110, %113 : vector<64x1xi32>
    %c7_i32_53 = arith.constant 7 : i32
    %115 = vector.broadcast %c7_i32_53 : i32 to vector<64x1xi32>
    %116 = arith.andi %114, %115 : vector<64x1xi32>
    %c1_i32_54 = arith.constant 1 : i32
    %117 = vector.broadcast %c1_i32_54 : i32 to vector<64x1xi32>
    %118 = arith.cmpi sge, %112, %117 : vector<64x1xi32>
    %c6_i32 = arith.constant 6 : i32
    %119 = vector.broadcast %c6_i32 : i32 to vector<64x1xi32>
    %120 = arith.cmpi sle, %112, %119 : vector<64x1xi32>
    %c1_i32_55 = arith.constant 1 : i32
    %121 = vector.broadcast %c1_i32_55 : i32 to vector<64x1xi32>
    %122 = arith.cmpi sge, %116, %121 : vector<64x1xi32>
    %c6_i32_56 = arith.constant 6 : i32
    %123 = vector.broadcast %c6_i32_56 : i32 to vector<64x1xi32>
    %124 = arith.cmpi sle, %116, %123 : vector<64x1xi32>
    %cst_57 = arith.constant 0.000000e+00 : f32
    %125 = vector.broadcast %cst_57 : f32 to vector<64x16xf32>
    %c7_58 = arith.constant 7 : index
    %c0_59 = arith.constant 0 : index
    %126 = vector.load %arg14[%c7_58, %c0_59] : memref<96x8xf32, #tpu.memory_space<vmem>>, vector<64x8xf32>
    %127 = arith.andi %122, %118 : vector<64x1xi1>
    %cst_60 = arith.constant 0.000000e+00 : f32
    %128 = vector.shape_cast %127 : vector<64x1xi1> to vector<64x1xi1>
    %129 = vector.broadcast %128 : vector<64x1xi1> to vector<64x8xi1>
    %130 = vector.broadcast %cst_60 : f32 to vector<64x8xf32>
    %131 = arith.select %129, %126, %130 : vector<64x8xi1>, vector<64x8xf32>
    %c0_61 = arith.constant 0 : index
    %c0_62 = arith.constant 0 : index
    %132 = vector.load %arg4[%c0_61, %c0_62] : memref<72x16xf32, #tpu.memory_space<vmem>>, vector<8x16xf32>
    %cst_63 = arith.constant dense<0.000000e+00> : vector<64x16xf32>
    %133 = tpu.matmul %131, %132, %cst_63 {dimension_numbers = #tpu.dot_dimension_numbers<[1], [0], [0], [1], [0, 0, 1, 1], [], []>} : vector<64x8xf32>, vector<8x16xf32>, vector<64x16xf32> -> vector<64x16xf32>
    %134 = arith.addf %125, %133 : vector<64x16xf32>
    %c8_64 = arith.constant 8 : index
    %c0_65 = arith.constant 0 : index
    %135 = vector.load %arg14[%c8_64, %c0_65] : memref<96x8xf32, #tpu.memory_space<vmem>>, vector<64x8xf32>
    %cst_66 = arith.constant 0.000000e+00 : f32
    %136 = vector.shape_cast %122 : vector<64x1xi1> to vector<64x1xi1>
    %137 = vector.broadcast %136 : vector<64x1xi1> to vector<64x8xi1>
    %138 = vector.broadcast %cst_66 : f32 to vector<64x8xf32>
    %139 = arith.select %137, %135, %138 : vector<64x8xi1>, vector<64x8xf32>
    %c8_67 = arith.constant 8 : index
    %c0_68 = arith.constant 0 : index
    %140 = vector.load %arg4[%c8_67, %c0_68] : memref<72x16xf32, #tpu.memory_space<vmem>>, vector<8x16xf32>
    %cst_69 = arith.constant dense<0.000000e+00> : vector<64x16xf32>
    %141 = tpu.matmul %139, %140, %cst_69 {dimension_numbers = #tpu.dot_dimension_numbers<[1], [0], [0], [1], [0, 0, 1, 1], [], []>} : vector<64x8xf32>, vector<8x16xf32>, vector<64x16xf32> -> vector<64x16xf32>
    %142 = arith.addf %134, %141 : vector<64x16xf32>
    %c9_70 = arith.constant 9 : index
    %c0_71 = arith.constant 0 : index
    %143 = vector.load %arg14[%c9_70, %c0_71] : memref<96x8xf32, #tpu.memory_space<vmem>>, vector<64x8xf32>
    %144 = arith.andi %122, %120 : vector<64x1xi1>
    %cst_72 = arith.constant 0.000000e+00 : f32
    %145 = vector.shape_cast %144 : vector<64x1xi1> to vector<64x1xi1>
    %146 = vector.broadcast %145 : vector<64x1xi1> to vector<64x8xi1>
    %147 = vector.broadcast %cst_72 : f32 to vector<64x8xf32>
    %148 = arith.select %146, %143, %147 : vector<64x8xi1>, vector<64x8xf32>
    %c16_73 = arith.constant 16 : index
    %c0_74 = arith.constant 0 : index
    %149 = vector.load %arg4[%c16_73, %c0_74] : memref<72x16xf32, #tpu.memory_space<vmem>>, vector<8x16xf32>
    %cst_75 = arith.constant dense<0.000000e+00> : vector<64x16xf32>
    %150 = tpu.matmul %148, %149, %cst_75 {dimension_numbers = #tpu.dot_dimension_numbers<[1], [0], [0], [1], [0, 0, 1, 1], [], []>} : vector<64x8xf32>, vector<8x16xf32>, vector<64x16xf32> -> vector<64x16xf32>
    %151 = arith.addf %142, %150 : vector<64x16xf32>
    %c15_76 = arith.constant 15 : index
    %c0_77 = arith.constant 0 : index
    %152 = vector.load %arg14[%c15_76, %c0_77] : memref<96x8xf32, #tpu.memory_space<vmem>>, vector<64x8xf32>
    %cst_78 = arith.constant 0.000000e+00 : f32
    %153 = vector.shape_cast %118 : vector<64x1xi1> to vector<64x1xi1>
    %154 = vector.broadcast %153 : vector<64x1xi1> to vector<64x8xi1>
    %155 = vector.broadcast %cst_78 : f32 to vector<64x8xf32>
    %156 = arith.select %154, %152, %155 : vector<64x8xi1>, vector<64x8xf32>
    %c24_79 = arith.constant 24 : index
    %c0_80 = arith.constant 0 : index
    %157 = vector.load %arg4[%c24_79, %c0_80] : memref<72x16xf32, #tpu.memory_space<vmem>>, vector<8x16xf32>
    %cst_81 = arith.constant dense<0.000000e+00> : vector<64x16xf32>
    %158 = tpu.matmul %156, %157, %cst_81 {dimension_numbers = #tpu.dot_dimension_numbers<[1], [0], [0], [1], [0, 0, 1, 1], [], []>} : vector<64x8xf32>, vector<8x16xf32>, vector<64x16xf32> -> vector<64x16xf32>
    %159 = arith.addf %151, %158 : vector<64x16xf32>
    %c16_82 = arith.constant 16 : index
    %c0_83 = arith.constant 0 : index
    %160 = vector.load %arg14[%c16_82, %c0_83] : memref<96x8xf32, #tpu.memory_space<vmem>>, vector<64x8xf32>
    %c32 = arith.constant 32 : index
    %c0_84 = arith.constant 0 : index
    %161 = vector.load %arg4[%c32, %c0_84] : memref<72x16xf32, #tpu.memory_space<vmem>>, vector<8x16xf32>
    %cst_85 = arith.constant dense<0.000000e+00> : vector<64x16xf32>
    %162 = tpu.matmul %160, %161, %cst_85 {dimension_numbers = #tpu.dot_dimension_numbers<[1], [0], [0], [1], [0, 0, 1, 1], [], []>} : vector<64x8xf32>, vector<8x16xf32>, vector<64x16xf32> -> vector<64x16xf32>
    %163 = arith.addf %159, %162 : vector<64x16xf32>
    %c17 = arith.constant 17 : index
    %c0_86 = arith.constant 0 : index
    %164 = vector.load %arg14[%c17, %c0_86] : memref<96x8xf32, #tpu.memory_space<vmem>>, vector<64x8xf32>
    %cst_87 = arith.constant 0.000000e+00 : f32
    %165 = vector.shape_cast %120 : vector<64x1xi1> to vector<64x1xi1>
    %166 = vector.broadcast %165 : vector<64x1xi1> to vector<64x8xi1>
    %167 = vector.broadcast %cst_87 : f32 to vector<64x8xf32>
    %168 = arith.select %166, %164, %167 : vector<64x8xi1>, vector<64x8xf32>
    %c40_88 = arith.constant 40 : index
    %c0_89 = arith.constant 0 : index
    %169 = vector.load %arg4[%c40_88, %c0_89] : memref<72x16xf32, #tpu.memory_space<vmem>>, vector<8x16xf32>
    %cst_90 = arith.constant dense<0.000000e+00> : vector<64x16xf32>
    %170 = tpu.matmul %168, %169, %cst_90 {dimension_numbers = #tpu.dot_dimension_numbers<[1], [0], [0], [1], [0, 0, 1, 1], [], []>} : vector<64x8xf32>, vector<8x16xf32>, vector<64x16xf32> -> vector<64x16xf32>
    %171 = arith.addf %163, %170 : vector<64x16xf32>
    %c23_91 = arith.constant 23 : index
    %c0_92 = arith.constant 0 : index
    %172 = vector.load %arg14[%c23_91, %c0_92] : memref<96x8xf32, #tpu.memory_space<vmem>>, vector<64x8xf32>
    %173 = arith.andi %124, %118 : vector<64x1xi1>
    %cst_93 = arith.constant 0.000000e+00 : f32
    %174 = vector.shape_cast %173 : vector<64x1xi1> to vector<64x1xi1>
    %175 = vector.broadcast %174 : vector<64x1xi1> to vector<64x8xi1>
    %176 = vector.broadcast %cst_93 : f32 to vector<64x8xf32>
    %177 = arith.select %175, %172, %176 : vector<64x8xi1>, vector<64x8xf32>
    %c48 = arith.constant 48 : index
    %c0_94 = arith.constant 0 : index
    %178 = vector.load %arg4[%c48, %c0_94] : memref<72x16xf32, #tpu.memory_space<vmem>>, vector<8x16xf32>
    %cst_95 = arith.constant dense<0.000000e+00> : vector<64x16xf32>
    %179 = tpu.matmul %177, %178, %cst_95 {dimension_numbers = #tpu.dot_dimension_numbers<[1], [0], [0], [1], [0, 0, 1, 1], [], []>} : vector<64x8xf32>, vector<8x16xf32>, vector<64x16xf32> -> vector<64x16xf32>
    %180 = arith.addf %171, %179 : vector<64x16xf32>
    %c24_96 = arith.constant 24 : index
    %c0_97 = arith.constant 0 : index
    %181 = vector.load %arg14[%c24_96, %c0_97] : memref<96x8xf32, #tpu.memory_space<vmem>>, vector<64x8xf32>
    %cst_98 = arith.constant 0.000000e+00 : f32
    %182 = vector.shape_cast %124 : vector<64x1xi1> to vector<64x1xi1>
    %183 = vector.broadcast %182 : vector<64x1xi1> to vector<64x8xi1>
    %184 = vector.broadcast %cst_98 : f32 to vector<64x8xf32>
    %185 = arith.select %183, %181, %184 : vector<64x8xi1>, vector<64x8xf32>
    %c56 = arith.constant 56 : index
    %c0_99 = arith.constant 0 : index
    %186 = vector.load %arg4[%c56, %c0_99] : memref<72x16xf32, #tpu.memory_space<vmem>>, vector<8x16xf32>
    %cst_100 = arith.constant dense<0.000000e+00> : vector<64x16xf32>
    %187 = tpu.matmul %185, %186, %cst_100 {dimension_numbers = #tpu.dot_dimension_numbers<[1], [0], [0], [1], [0, 0, 1, 1], [], []>} : vector<64x8xf32>, vector<8x16xf32>, vector<64x16xf32> -> vector<64x16xf32>
    %188 = arith.addf %180, %187 : vector<64x16xf32>
    %c25_101 = arith.constant 25 : index
    %c0_102 = arith.constant 0 : index
    %189 = vector.load %arg14[%c25_101, %c0_102] : memref<96x8xf32, #tpu.memory_space<vmem>>, vector<64x8xf32>
    %190 = arith.andi %124, %120 : vector<64x1xi1>
    %cst_103 = arith.constant 0.000000e+00 : f32
    %191 = vector.shape_cast %190 : vector<64x1xi1> to vector<64x1xi1>
    %192 = vector.broadcast %191 : vector<64x1xi1> to vector<64x8xi1>
    %193 = vector.broadcast %cst_103 : f32 to vector<64x8xf32>
    %194 = arith.select %192, %189, %193 : vector<64x8xi1>, vector<64x8xf32>
    %c64 = arith.constant 64 : index
    %c0_104 = arith.constant 0 : index
    %195 = vector.load %arg4[%c64, %c0_104] : memref<72x16xf32, #tpu.memory_space<vmem>>, vector<8x16xf32>
    %cst_105 = arith.constant dense<0.000000e+00> : vector<64x16xf32>
    %196 = tpu.matmul %194, %195, %cst_105 {dimension_numbers = #tpu.dot_dimension_numbers<[1], [0], [0], [1], [0, 0, 1, 1], [], []>} : vector<64x8xf32>, vector<8x16xf32>, vector<64x16xf32> -> vector<64x16xf32>
    %197 = arith.addf %188, %196 : vector<64x16xf32>
    %c0_106 = arith.constant 0 : index
    %c0_107 = arith.constant 0 : index
    %198 = vector.load %arg5[%c0_106, %c0_107] : memref<1x16xf32, #tpu.memory_space<vmem>>, vector<1x16xf32>
    %199 = vector.broadcast %198 : vector<1x16xf32> to vector<64x16xf32>
    %200 = arith.addf %197, %199 : vector<64x16xf32>
    %cst_108 = arith.constant 5.000000e-01 : f32
    %201 = vector.broadcast %cst_108 : f32 to vector<64x16xf32>
    %202 = arith.mulf %201, %200 : vector<64x16xf32>
    %203 = math.tanh %202 : vector<64x16xf32>
    %cst_109 = arith.constant 1.000000e+00 : f32
    %204 = vector.broadcast %cst_109 : f32 to vector<64x16xf32>
    %205 = arith.addf %203, %204 : vector<64x16xf32>
    %cst_110 = arith.constant 5.000000e-01 : f32
    %206 = vector.broadcast %cst_110 : f32 to vector<64x16xf32>
    %207 = arith.mulf %206, %205 : vector<64x16xf32>
    %208 = arith.mulf %200, %207 : vector<64x16xf32>
    %209 = vector.shape_cast %208 : vector<64x16xf32> to vector<32x2x16xf32>
    %cst_111 = arith.constant dense<0xFF800000> : vector<32x16xf32>
    %210 = vector.multi_reduction <maximumf>, %209, %cst_111 [1] : vector<32x2x16xf32> to vector<32x16xf32>
    %211 = vector.shape_cast %210 : vector<32x16xf32> to vector<4x2x4x16xf32>
    %cst_112 = arith.constant dense<0xFF800000> : vector<4x4x16xf32>
    %212 = vector.multi_reduction <maximumf>, %211, %cst_112 [1] : vector<4x2x4x16xf32> to vector<4x4x16xf32>
    %213 = vector.shape_cast %212 : vector<4x4x16xf32> to vector<16x16xf32>
    %c8_113 = arith.constant 8 : index
    %c0_114 = arith.constant 0 : index
    %214 = vector.load %arg15[%c8_113, %c0_114] : memref<32x16xf32, #tpu.memory_space<vmem>>, vector<16x16xf32>
    tpu.vector_store %arg15[%c8_113, %c0_114], %213 {strides = array<i32>} : memref<32x16xf32, #tpu.memory_space<vmem>>, vector<16x16xf32>,
    %215 = tpu.iota {dimensions = array<i32: 0>} : vector<16x1xi32>
    %c3_i32_115 = arith.constant 3 : i32
    %216 = vector.broadcast %c3_i32_115 : i32 to vector<16x1xi32>
    %217 = arith.andi %215, %216 : vector<16x1xi32>
    %c2_i32 = arith.constant 2 : i32
    %218 = vector.broadcast %c2_i32 : i32 to vector<16x1xi32>
    %219 = arith.shrsi %215, %218 : vector<16x1xi32>
    %c3_i32_116 = arith.constant 3 : i32
    %220 = vector.broadcast %c3_i32_116 : i32 to vector<16x1xi32>
    %221 = arith.andi %219, %220 : vector<16x1xi32>
    %c1_i32_117 = arith.constant 1 : i32
    %222 = vector.broadcast %c1_i32_117 : i32 to vector<16x1xi32>
    %223 = arith.cmpi sge, %217, %222 : vector<16x1xi32>
    %c2_i32_118 = arith.constant 2 : i32
    %224 = vector.broadcast %c2_i32_118 : i32 to vector<16x1xi32>
    %225 = arith.cmpi sle, %217, %224 : vector<16x1xi32>
    %c1_i32_119 = arith.constant 1 : i32
    %226 = vector.broadcast %c1_i32_119 : i32 to vector<16x1xi32>
    %227 = arith.cmpi sge, %221, %226 : vector<16x1xi32>
    %c2_i32_120 = arith.constant 2 : i32
    %228 = vector.broadcast %c2_i32_120 : i32 to vector<16x1xi32>
    %229 = arith.cmpi sle, %221, %228 : vector<16x1xi32>
    %cst_121 = arith.constant 0.000000e+00 : f32
    %230 = vector.broadcast %cst_121 : f32 to vector<16x32xf32>
    %c3_122 = arith.constant 3 : index
    %c0_123 = arith.constant 0 : index
    %231 = vector.load %arg15[%c3_122, %c0_123] : memref<32x16xf32, #tpu.memory_space<vmem>>, vector<16x16xf32>
    %232 = arith.andi %227, %223 : vector<16x1xi1>
    %cst_124 = arith.constant 0.000000e+00 : f32
    %233 = vector.shape_cast %232 : vector<16x1xi1> to vector<16x1xi1>
    %234 = vector.broadcast %233 : vector<16x1xi1> to vector<16x16xi1>
    %235 = vector.broadcast %cst_124 : f32 to vector<16x16xf32>
    %236 = arith.select %234, %231, %235 : vector<16x16xi1>, vector<16x16xf32>
    %c0_125 = arith.constant 0 : index
    %c0_126 = arith.constant 0 : index
    %237 = vector.load %arg6[%c0_125, %c0_126] : memref<144x32xf32, #tpu.memory_space<vmem>>, vector<16x32xf32>
    %cst_127 = arith.constant dense<0.000000e+00> : vector<16x32xf32>
    %238 = tpu.matmul %236, %237, %cst_127 {dimension_numbers = #tpu.dot_dimension_numbers<[1], [0], [0], [1], [0, 0, 1, 1], [], []>} : vector<16x16xf32>, vector<16x32xf32>, vector<16x32xf32> -> vector<16x32xf32>
    %239 = arith.addf %230, %238 : vector<16x32xf32>
    %c4 = arith.constant 4 : index
    %c0_128 = arith.constant 0 : index
    %240 = vector.load %arg15[%c4, %c0_128] : memref<32x16xf32, #tpu.memory_space<vmem>>, vector<16x16xf32>
    %cst_129 = arith.constant 0.000000e+00 : f32
    %241 = vector.shape_cast %227 : vector<16x1xi1> to vector<16x1xi1>
    %242 = vector.broadcast %241 : vector<16x1xi1> to vector<16x16xi1>
    %243 = vector.broadcast %cst_129 : f32 to vector<16x16xf32>
    %244 = arith.select %242, %240, %243 : vector<16x16xi1>, vector<16x16xf32>
    %c16_130 = arith.constant 16 : index
    %c0_131 = arith.constant 0 : index
    %245 = vector.load %arg6[%c16_130, %c0_131] : memref<144x32xf32, #tpu.memory_space<vmem>>, vector<16x32xf32>
    %cst_132 = arith.constant dense<0.000000e+00> : vector<16x32xf32>
    %246 = tpu.matmul %244, %245, %cst_132 {dimension_numbers = #tpu.dot_dimension_numbers<[1], [0], [0], [1], [0, 0, 1, 1], [], []>} : vector<16x16xf32>, vector<16x32xf32>, vector<16x32xf32> -> vector<16x32xf32>
    %247 = arith.addf %239, %246 : vector<16x32xf32>
    %c5 = arith.constant 5 : index
    %c0_133 = arith.constant 0 : index
    %248 = vector.load %arg15[%c5, %c0_133] : memref<32x16xf32, #tpu.memory_space<vmem>>, vector<16x16xf32>
    %249 = arith.andi %227, %225 : vector<16x1xi1>
    %cst_134 = arith.constant 0.000000e+00 : f32
    %250 = vector.shape_cast %249 : vector<16x1xi1> to vector<16x1xi1>
    %251 = vector.broadcast %250 : vector<16x1xi1> to vector<16x16xi1>
    %252 = vector.broadcast %cst_134 : f32 to vector<16x16xf32>
    %253 = arith.select %251, %248, %252 : vector<16x16xi1>, vector<16x16xf32>
    %c32_135 = arith.constant 32 : index
    %c0_136 = arith.constant 0 : index
    %254 = vector.load %arg6[%c32_135, %c0_136] : memref<144x32xf32, #tpu.memory_space<vmem>>, vector<16x32xf32>
    %cst_137 = arith.constant dense<0.000000e+00> : vector<16x32xf32>
    %255 = tpu.matmul %253, %254, %cst_137 {dimension_numbers = #tpu.dot_dimension_numbers<[1], [0], [0], [1], [0, 0, 1, 1], [], []>} : vector<16x16xf32>, vector<16x32xf32>, vector<16x32xf32> -> vector<16x32xf32>
    %256 = arith.addf %247, %255 : vector<16x32xf32>
    %c7_138 = arith.constant 7 : index
    %c0_139 = arith.constant 0 : index
    %257 = vector.load %arg15[%c7_138, %c0_139] : memref<32x16xf32, #tpu.memory_space<vmem>>, vector<16x16xf32>
    %cst_140 = arith.constant 0.000000e+00 : f32
    %258 = vector.shape_cast %223 : vector<16x1xi1> to vector<16x1xi1>
    %259 = vector.broadcast %258 : vector<16x1xi1> to vector<16x16xi1>
    %260 = vector.broadcast %cst_140 : f32 to vector<16x16xf32>
    %261 = arith.select %259, %257, %260 : vector<16x16xi1>, vector<16x16xf32>
    %c48_141 = arith.constant 48 : index
    %c0_142 = arith.constant 0 : index
    %262 = vector.load %arg6[%c48_141, %c0_142] : memref<144x32xf32, #tpu.memory_space<vmem>>, vector<16x32xf32>
    %cst_143 = arith.constant dense<0.000000e+00> : vector<16x32xf32>
    %263 = tpu.matmul %261, %262, %cst_143 {dimension_numbers = #tpu.dot_dimension_numbers<[1], [0], [0], [1], [0, 0, 1, 1], [], []>} : vector<16x16xf32>, vector<16x32xf32>, vector<16x32xf32> -> vector<16x32xf32>
    %264 = arith.addf %256, %263 : vector<16x32xf32>
    %c8_144 = arith.constant 8 : index
    %c0_145 = arith.constant 0 : index
    %265 = vector.load %arg15[%c8_144, %c0_145] : memref<32x16xf32, #tpu.memory_space<vmem>>, vector<16x16xf32>
    %c64_146 = arith.constant 64 : index
    %c0_147 = arith.constant 0 : index
    %266 = vector.load %arg6[%c64_146, %c0_147] : memref<144x32xf32, #tpu.memory_space<vmem>>, vector<16x32xf32>
    %cst_148 = arith.constant dense<0.000000e+00> : vector<16x32xf32>
    %267 = tpu.matmul %265, %266, %cst_148 {dimension_numbers = #tpu.dot_dimension_numbers<[1], [0], [0], [1], [0, 0, 1, 1], [], []>} : vector<16x16xf32>, vector<16x32xf32>, vector<16x32xf32> -> vector<16x32xf32>
    %268 = arith.addf %264, %267 : vector<16x32xf32>
    %c9_149 = arith.constant 9 : index
    %c0_150 = arith.constant 0 : index
    %269 = vector.load %arg15[%c9_149, %c0_150] : memref<32x16xf32, #tpu.memory_space<vmem>>, vector<16x16xf32>
    %cst_151 = arith.constant 0.000000e+00 : f32
    %270 = vector.shape_cast %225 : vector<16x1xi1> to vector<16x1xi1>
    %271 = vector.broadcast %270 : vector<16x1xi1> to vector<16x16xi1>
    %272 = vector.broadcast %cst_151 : f32 to vector<16x16xf32>
    %273 = arith.select %271, %269, %272 : vector<16x16xi1>, vector<16x16xf32>
    %c80 = arith.constant 80 : index
    %c0_152 = arith.constant 0 : index
    %274 = vector.load %arg6[%c80, %c0_152] : memref<144x32xf32, #tpu.memory_space<vmem>>, vector<16x32xf32>
    %cst_153 = arith.constant dense<0.000000e+00> : vector<16x32xf32>
    %275 = tpu.matmul %273, %274, %cst_153 {dimension_numbers = #tpu.dot_dimension_numbers<[1], [0], [0], [1], [0, 0, 1, 1], [], []>} : vector<16x16xf32>, vector<16x32xf32>, vector<16x32xf32> -> vector<16x32xf32>
    %276 = arith.addf %268, %275 : vector<16x32xf32>
    %c11 = arith.constant 11 : index
    %c0_154 = arith.constant 0 : index
    %277 = vector.load %arg15[%c11, %c0_154] : memref<32x16xf32, #tpu.memory_space<vmem>>, vector<16x16xf32>
    %278 = arith.andi %229, %223 : vector<16x1xi1>
    %cst_155 = arith.constant 0.000000e+00 : f32
    %279 = vector.shape_cast %278 : vector<16x1xi1> to vector<16x1xi1>
    %280 = vector.broadcast %279 : vector<16x1xi1> to vector<16x16xi1>
    %281 = vector.broadcast %cst_155 : f32 to vector<16x16xf32>
    %282 = arith.select %280, %277, %281 : vector<16x16xi1>, vector<16x16xf32>
    %c96 = arith.constant 96 : index
    %c0_156 = arith.constant 0 : index
    %283 = vector.load %arg6[%c96, %c0_156] : memref<144x32xf32, #tpu.memory_space<vmem>>, vector<16x32xf32>
    %cst_157 = arith.constant dense<0.000000e+00> : vector<16x32xf32>
    %284 = tpu.matmul %282, %283, %cst_157 {dimension_numbers = #tpu.dot_dimension_numbers<[1], [0], [0], [1], [0, 0, 1, 1], [], []>} : vector<16x16xf32>, vector<16x32xf32>, vector<16x32xf32> -> vector<16x32xf32>
    %285 = arith.addf %276, %284 : vector<16x32xf32>
    %c12_158 = arith.constant 12 : index
    %c0_159 = arith.constant 0 : index
    %286 = vector.load %arg15[%c12_158, %c0_159] : memref<32x16xf32, #tpu.memory_space<vmem>>, vector<16x16xf32>
    %cst_160 = arith.constant 0.000000e+00 : f32
    %287 = vector.shape_cast %229 : vector<16x1xi1> to vector<16x1xi1>
    %288 = vector.broadcast %287 : vector<16x1xi1> to vector<16x16xi1>
    %289 = vector.broadcast %cst_160 : f32 to vector<16x16xf32>
    %290 = arith.select %288, %286, %289 : vector<16x16xi1>, vector<16x16xf32>
    %c112 = arith.constant 112 : index
    %c0_161 = arith.constant 0 : index
    %291 = vector.load %arg6[%c112, %c0_161] : memref<144x32xf32, #tpu.memory_space<vmem>>, vector<16x32xf32>
    %cst_162 = arith.constant dense<0.000000e+00> : vector<16x32xf32>
    %292 = tpu.matmul %290, %291, %cst_162 {dimension_numbers = #tpu.dot_dimension_numbers<[1], [0], [0], [1], [0, 0, 1, 1], [], []>} : vector<16x16xf32>, vector<16x32xf32>, vector<16x32xf32> -> vector<16x32xf32>
    %293 = arith.addf %285, %292 : vector<16x32xf32>
    %c13 = arith.constant 13 : index
    %c0_163 = arith.constant 0 : index
    %294 = vector.load %arg15[%c13, %c0_163] : memref<32x16xf32, #tpu.memory_space<vmem>>, vector<16x16xf32>
    %295 = arith.andi %229, %225 : vector<16x1xi1>
    %cst_164 = arith.constant 0.000000e+00 : f32
    %296 = vector.shape_cast %295 : vector<16x1xi1> to vector<16x1xi1>
    %297 = vector.broadcast %296 : vector<16x1xi1> to vector<16x16xi1>
    %298 = vector.broadcast %cst_164 : f32 to vector<16x16xf32>
    %299 = arith.select %297, %294, %298 : vector<16x16xi1>, vector<16x16xf32>
    %c128 = arith.constant 128 : index
    %c0_165 = arith.constant 0 : index
    %300 = vector.load %arg6[%c128, %c0_165] : memref<144x32xf32, #tpu.memory_space<vmem>>, vector<16x32xf32>
    %cst_166 = arith.constant dense<0.000000e+00> : vector<16x32xf32>
    %301 = tpu.matmul %299, %300, %cst_166 {dimension_numbers = #tpu.dot_dimension_numbers<[1], [0], [0], [1], [0, 0, 1, 1], [], []>} : vector<16x16xf32>, vector<16x32xf32>, vector<16x32xf32> -> vector<16x32xf32>
    %302 = arith.addf %293, %301 : vector<16x32xf32>
    %c0_167 = arith.constant 0 : index
    %c0_168 = arith.constant 0 : index
    %303 = vector.load %arg7[%c0_167, %c0_168] : memref<1x32xf32, #tpu.memory_space<vmem>>, vector<1x32xf32>
    %304 = vector.broadcast %303 : vector<1x32xf32> to vector<16x32xf32>
    %305 = arith.addf %302, %304 : vector<16x32xf32>
    %cst_169 = arith.constant 5.000000e-01 : f32
    %306 = vector.broadcast %cst_169 : f32 to vector<16x32xf32>
    %307 = arith.mulf %306, %305 : vector<16x32xf32>
    %308 = math.tanh %307 : vector<16x32xf32>
    %cst_170 = arith.constant 1.000000e+00 : f32
    %309 = vector.broadcast %cst_170 : f32 to vector<16x32xf32>
    %310 = arith.addf %308, %309 : vector<16x32xf32>
    %cst_171 = arith.constant 5.000000e-01 : f32
    %311 = vector.broadcast %cst_171 : f32 to vector<16x32xf32>
    %312 = arith.mulf %311, %310 : vector<16x32xf32>
    %313 = arith.mulf %305, %312 : vector<16x32xf32>
    %314 = vector.shape_cast %313 : vector<16x32xf32> to vector<8x2x32xf32>
    %cst_172 = arith.constant dense<0xFF800000> : vector<8x32xf32>
    %315 = vector.multi_reduction <maximumf>, %314, %cst_172 [1] : vector<8x2x32xf32> to vector<8x32xf32>
    %316 = vector.shape_cast %315 : vector<8x32xf32> to vector<2x2x2x32xf32>
    %cst_173 = arith.constant dense<0xFF800000> : vector<2x2x32xf32>
    %317 = vector.multi_reduction <maximumf>, %316, %cst_173 [1] : vector<2x2x2x32xf32> to vector<2x2x32xf32>
    %318 = vector.shape_cast %317 : vector<2x2x32xf32> to vector<4x32xf32>
    %319 = vector.extract_strided_slice %318 {offsets = [0, 0], sizes = [1, 32], strides = [1, 1]} : vector<4x32xf32> to vector<1x32xf32>
    %320 = vector.extract_strided_slice %318 {offsets = [1, 0], sizes = [1, 32], strides = [1, 1]} : vector<4x32xf32> to vector<1x32xf32>
    %321 = vector.extract_strided_slice %318 {offsets = [2, 0], sizes = [1, 32], strides = [1, 1]} : vector<4x32xf32> to vector<1x32xf32>
    %322 = vector.extract_strided_slice %318 {offsets = [3, 0], sizes = [1, 32], strides = [1, 1]} : vector<4x32xf32> to vector<1x32xf32>
    %323 = tpu.concatenate %319, %320, %321, %322 in 1 : vector<1x32xf32>, vector<1x32xf32>, vector<1x32xf32>, vector<1x32xf32> -> vector<1x128xf32>
    %c0_174 = arith.constant 0 : index
    %c0_175 = arith.constant 0 : index
    %324 = vector.load %arg8[%c0_174, %c0_175] : memref<128x32xf32, #tpu.memory_space<vmem>>, vector<128x32xf32>
    %cst_176 = arith.constant dense<0.000000e+00> : vector<1x32xf32>
    %325 = tpu.matmul %323, %324, %cst_176 {dimension_numbers = #tpu.dot_dimension_numbers<[1], [0], [0], [1], [0, 0, 1, 1], [], []>} : vector<1x128xf32>, vector<128x32xf32>, vector<1x32xf32> -> vector<1x32xf32>
    %c0_177 = arith.constant 0 : index
    %c0_178 = arith.constant 0 : index
    %326 = vector.load %arg9[%c0_177, %c0_178] : memref<1x32xf32, #tpu.memory_space<vmem>>, vector<1x32xf32>
    %327 = arith.addf %325, %326 : vector<1x32xf32>
    %cst_179 = arith.constant 5.000000e-01 : f32
    %328 = vector.broadcast %cst_179 : f32 to vector<1x32xf32>
    %329 = arith.mulf %328, %327 : vector<1x32xf32>
    %330 = math.tanh %329 : vector<1x32xf32>
    %cst_180 = arith.constant 1.000000e+00 : f32
    %331 = vector.broadcast %cst_180 : f32 to vector<1x32xf32>
    %332 = arith.addf %330, %331 : vector<1x32xf32>
    %cst_181 = arith.constant 5.000000e-01 : f32
    %333 = vector.broadcast %cst_181 : f32 to vector<1x32xf32>
    %334 = arith.mulf %333, %332 : vector<1x32xf32>
    %335 = arith.mulf %327, %334 : vector<1x32xf32>
    %c0_182 = arith.constant 0 : index
    %c0_183 = arith.constant 0 : index
    %336 = vector.load %arg10[%c0_182, %c0_183] : memref<32x128xf32, #tpu.memory_space<vmem>>, vector<32x128xf32>
    %cst_184 = arith.constant dense<0.000000e+00> : vector<1x128xf32>
    %337 = tpu.matmul %335, %336, %cst_184 {dimension_numbers = #tpu.dot_dimension_numbers<[1], [0], [0], [1], [0, 0, 1, 1], [], []>} : vector<1x32xf32>, vector<32x128xf32>, vector<1x128xf32> -> vector<1x128xf32>
    %c0_185 = arith.constant 0 : index
    %c0_186 = arith.constant 0 : index
    %338 = vector.load %arg11[%c0_185, %c0_186] : memref<1x128xf32, #tpu.memory_space<vmem>>, vector<1x128xf32>
    %339 = arith.addf %337, %338 : vector<1x128xf32>
    %c0_187 = arith.constant 0 : index
    %c0_188 = arith.constant 0 : index
    %c0_189 = arith.constant 0 : index
    %340 = vector.load %arg12[%c0_187, %c0_188, %c0_189] : memref<1x1x128xf32, #tpu.memory_space<vmem>>, vector<1x1x128xf32>
    %341 = vector.shape_cast %340 : vector<1x1x128xf32> to vector<1x128xf32>
    %342 = vector.shape_cast %339 : vector<1x128xf32> to vector<1x1x128xf32>
    tpu.vector_store %arg12[%c0_187, %c0_188, %c0_189], %342 {strides = array<i32>} : memref<1x1x128xf32, #tpu.memory_space<vmem>>, vector<1x1x128xf32>,
    return
  }
  func.func @transform_0(%arg0: i32) -> (i32, i32) {
    %c0_i32 = arith.constant 0 : i32
    %c0_i32_0 = arith.constant 0 : i32
    return %arg0, %c0_i32 : i32, i32
  }
  func.func @transform_1(%arg0: i32) -> (i32, i32) {
    %c0_i32 = arith.constant 0 : i32
    %c0_i32_0 = arith.constant 0 : i32
    %c0_i32_1 = arith.constant 0 : i32
    return %c0_i32, %c0_i32_0 : i32, i32
  }
  func.func @transform_2(%arg0: i32) -> (i32, i32) {
    %c0_i32 = arith.constant 0 : i32
    %c0_i32_0 = arith.constant 0 : i32
    %c0_i32_1 = arith.constant 0 : i32
    return %c0_i32, %c0_i32_0 : i32, i32
  }
  func.func @transform_3(%arg0: i32) -> (i32, i32) {
    %c0_i32 = arith.constant 0 : i32
    %c0_i32_0 = arith.constant 0 : i32
    %c0_i32_1 = arith.constant 0 : i32
    return %c0_i32, %c0_i32_0 : i32, i32
  }
  func.func @transform_4(%arg0: i32) -> (i32, i32) {
    %c0_i32 = arith.constant 0 : i32
    %c0_i32_0 = arith.constant 0 : i32
    %c0_i32_1 = arith.constant 0 : i32
    return %c0_i32, %c0_i32_0 : i32, i32
  }
  func.func @transform_5(%arg0: i32) -> (i32, i32) {
    %c0_i32 = arith.constant 0 : i32
    %c0_i32_0 = arith.constant 0 : i32
    %c0_i32_1 = arith.constant 0 : i32
    return %c0_i32, %c0_i32_0 : i32, i32
  }
  func.func @transform_6(%arg0: i32) -> (i32, i32) {
    %c0_i32 = arith.constant 0 : i32
    %c0_i32_0 = arith.constant 0 : i32
    %c0_i32_1 = arith.constant 0 : i32
    return %c0_i32, %c0_i32_0 : i32, i32
  }
  func.func @transform_7(%arg0: i32) -> (i32, i32) {
    %c0_i32 = arith.constant 0 : i32
    %c0_i32_0 = arith.constant 0 : i32
    %c0_i32_1 = arith.constant 0 : i32
    return %c0_i32, %c0_i32_0 : i32, i32
  }
  func.func @transform_8(%arg0: i32) -> (i32, i32) {
    %c0_i32 = arith.constant 0 : i32
    %c0_i32_0 = arith.constant 0 : i32
    %c0_i32_1 = arith.constant 0 : i32
    return %c0_i32, %c0_i32_0 : i32, i32
  }
  func.func @transform_9(%arg0: i32) -> (i32, i32) {
    %c0_i32 = arith.constant 0 : i32
    %c0_i32_0 = arith.constant 0 : i32
    %c0_i32_1 = arith.constant 0 : i32
    return %c0_i32, %c0_i32_0 : i32, i32
  }
  func.func @transform_10(%arg0: i32) -> (i32, i32) {
    %c0_i32 = arith.constant 0 : i32
    %c0_i32_0 = arith.constant 0 : i32
    %c0_i32_1 = arith.constant 0 : i32
    return %c0_i32, %c0_i32_0 : i32, i32
  }
  func.func @transform_11(%arg0: i32) -> (i32, i32, i32) {
    %c0_i32 = arith.constant 0 : i32
    %c0_i32_0 = arith.constant 0 : i32
    %c0_i32_1 = arith.constant 0 : i32
    return %arg0, %c0_i32, %c0_i32_0 : i32, i32, i32
  }
}

</mosaic_0001>

<bundles_post_ra>
// kernel: fmri_cnn_classifier_forward.1
= control target key start
LH: loop header
LB: loop body
LE: loop exit
PB: predicated region body
PF: predicated region fallthrough
CT: control target
= control target key end

     0   :  { %s17117_s0 = inlined_call_operand.vmem [shape: f32[512,3], index: 0, kind: input, shape index: {}]   ;;  %s17118_s1 = inlined_call_operand.vmem [shape: f32[27,8], index: 1, kind: input, shape index: {}]   ;;  %s17119_s2 = inlined_call_operand.vmem [shape: f32[1,8], index: 2, kind: input, shape index: {}]   ;;  %s17120_s3 = inlined_call_operand.vmem [shape: f32[72,16], index: 3, kind: input, shape index: {}]   ;;  %s17121_s4 = inlined_call_operand.vmem [shape: f32[1,16], index: 4, kind: input, shape index: {}]   ;;  %s17122_s5 = inlined_call_operand.vmem [shape: f32[144,32], index: 5, kind: input, shape index: {}]   ;;  %s17123_s6 = inlined_call_operand.vmem [shape: f32[1,32], index: 6, kind: input, shape index: {}]   ;;  %s17124_s7 = inlined_call_operand.vmem [shape: f32[128,32], index: 7, kind: input, shape index: {}]   ;;  %s17125_s8 = inlined_call_operand.vmem [shape: f32[1,32], index: 8, kind: input, shape index: {}]   ;;  %s17126_s9 = inlined_call_operand.vmem [shape: f32[32,128], index: 9, kind: input, shape index: {}]   ;;  %s17127_s10 = inlined_call_operand.vmem [shape: f32[1,128], index: 10, kind: input, shape index: {}]   ;;  %s17128_s11 = inlined_call_operand.hbm [shape: f32[2,1,128], index: 11, kind: output, shape index: {}]  }
   0x1   :  { %17392 = sst [smem:[#allocation65_spill]] %s17117_s0 }
   0x2   :  { %16 = vsyncpa [#allocation6], 0 }
   0x3   :  { %18 = vsyncpa [#allocation6 + $0x1], 0  ;;  %s12789_s17 = smov 0   ;;  %s12791_s18 = smov 0  }
   0x4   :  { %s12793_s19 = smov 0   ;;  %s12795_s20 = smov 0  }
   0x5 LB: > { %s12810_s21 = sadd.s32 4294967295, %s12718_s20   ;;  %s10594_s22 = sadd.s32 4294967294, %s12718_s20   ;;  %s12718_s20 = sphi %s12795_s20, %s18131_s20   ;;  %s12714_s19 = sphi %s12793_s19, %s18130_s19   ;;  %s12710_s18 = sphi %s12791_s18, %s18129_s18   ;;  %s12706_s17 = sphi %s12789_s17, %s18128_s17  }
   0x6   : > { %s12814_s23 = sadd.s32 1, %s12718_s20   ;;  %s267_s24 = sadd.s32 1, %s12714_s19 }
   0x7   : > { %s264_s25 = ssub.s32 %s12718_s20, %s12814_s23  ;;  %p277_p0 = scmp.ne.s32.totalorder %s12714_s19, %s12710_s18 }
   0x8   : > { %p265_p1 = scmp.eq.s32.totalorder %s264_s25, 0  ;;  %p278_p2 = scmp.eq.s32.totalorder %s12810_s21, 1 }
   0x9   : > { %p283_p3 = scmp.ne.s32.totalorder %s12710_s18, %s12706_s17  ;;  %p284_p4 = scmp.eq.s32.totalorder %s10594_s22, 1 }
   0xa   : > { %s12825_s26 = scalar_select %p265_p1, %s12714_s19, %s267_s24  }
   0xb   : > { %p12827_p5 = por %p278_p2, %p277_p0  ;;  %p12831_p6 = por %p284_p4, %p283_p3 }
   0xc   : > { %p10597_p7 = scmp.ge.s32.totalorder %s12718_s20, 1  ;;  %p341_p8 = scmp.lt.s32.totalorder %s12718_s20, 3 }
   0xe   : > { %p342_p9 = pnand %p10597_p7, %p341_p8 }
  0x10   : > { %345 = sbr.rel (%p342_p9) target bundleno = 2382 (0x94e), region = 64 }
  0x17   : > { %s378_s29 = sand.u32 1, %s12710_s18   ;;  %s10598_s30 = sshll.u32 %s12810_s21, 5 }
  0x18   : > { %p381_p10 = scmp.lt.s32.totalorder %s10598_s30, 63  ;;  %s17395_s0 = sld [smem:[#allocation65_spill]] }
  0x19   : > { %s12846_s16 = scalar_lea.vmem [#allocation5], %s378_s29  ;;  %p10600_p11 = scmp.ne.s32.totalorder %s12810_s21, 0 }
  0x1a   : > { %s18133_s30 = smov (!%p381_p10, %s10598_s30), 63  ;;  %vm390_vm0 = vcmask (!%p10600_p11), 23552   ;;  %vm429_vm1 = vcmask (!%p10600_p11), 64512   ;;  %vm442_vm2 = vcmask (!%p10600_p11), 130048   ;;  %v12720_v0 = vmov (!%p10600_p11), 0.0  }
  0x1b   : > { %s10599_s12 = sshll.u32 %s18133_s30, 3  ;;  %389 = sbr.rel (%p10600_p11) target bundleno = 54 (0x36), region = 68  ;;  %391 = vst.msk [vmem:[#allocation2] sm:$0xff] (!%p10600_p11), %vm390_vm0, %v12720_v0  ;;  %392 = vst.msk [vmem:[#allocation2 + $0x8] sm:$0xff] (!%p10600_p11), %vm390_vm0, %v12720_v0 }
  0x1c   : > { %393 = vst.msk [vmem:[#allocation2 + $0x10] sm:$0xff] (!%p10600_p11), %vm390_vm0, %v12720_v0  ;;  %394 = vst.msk [vmem:[#allocation2 + $0x18] sm:$0xff] (!%p10600_p11), %vm390_vm0, %v12720_v0 }
  0x1d   : > { %395 = vst.msk [vmem:[#allocation2 + $0x20] sm:$0xff] (!%p10600_p11), %vm390_vm0, %v12720_v0  ;;  %396 = vst.msk [vmem:[#allocation2 + $0x28] sm:$0xff] (!%p10600_p11), %vm390_vm0, %v12720_v0 }
  0x1e   : > { %s12842_s15 = scalar_lea.vmem %s17395_s0, %s10599_s12  ;;  %397 = vst.msk [vmem:[#allocation2 + $0x30] sm:$0xff] (!%p10600_p11), %vm390_vm0, %v12720_v0  ;;  %398 = vst.msk [vmem:[#allocation2 + $0x38] sm:$0xff] (!%p10600_p11), %vm390_vm0, %v12720_v0 }
  0x1f   : > { %399 = vst.msk [vmem:[#allocation2 + $0x40] sm:$0xff] (!%p10600_p11), %vm390_vm0, %v12720_v0  ;;  %400 = vst.msk [vmem:[#allocation2 + $0x48] sm:$0xff] (!%p10600_p11), %vm390_vm0, %v12720_v0 }
  0x20   : > { %401 = vst.msk [vmem:[#allocation2 + $0x50] sm:$0xff] (!%p10600_p11), %vm390_vm0, %v12720_v0  ;;  %402 = vst.msk [vmem:[#allocation2 + $0x58] sm:$0xff] (!%p10600_p11), %vm390_vm0, %v12720_v0 }
  0x21   : > { %403 = vst.msk [vmem:[#allocation2 + $0x60] sm:$0xff] (!%p10600_p11), %vm390_vm0, %v12720_v0  ;;  %404 = vst.msk [vmem:[#allocation2 + $0x68] sm:$0xff] (!%p10600_p11), %vm390_vm0, %v12720_v0 }
  0x22   : > { %405 = vst.msk [vmem:[#allocation2 + $0x70] sm:$0xff] %vm390_vm0, %v12720_v0  ;;  %406 = vst.msk [vmem:[#allocation2 + $0x78] sm:$0xff] %vm390_vm0, %v12720_v0 }
  0x23   : > { %407 = vst.msk [vmem:[#allocation2 + $0x80] sm:$0xff] %vm390_vm0, %v12720_v0  ;;  %408 = vst.msk [vmem:[#allocation2 + $0x88] sm:$0xff] %vm390_vm0, %v12720_v0 }
  0x24   : > { %409 = vst.msk [vmem:[#allocation2 + $0x90] sm:$0xff] %vm390_vm0, %v12720_v0  ;;  %410 = vst.msk [vmem:[#allocation2 + $0x98] sm:$0xff] %vm390_vm0, %v12720_v0 }
  0x25   : > { %411 = vst.msk [vmem:[#allocation2 + $0xa0] sm:$0xff] %vm390_vm0, %v12720_v0  ;;  %412 = vst.msk [vmem:[#allocation2 + $0xa8] sm:$0xff] %vm390_vm0, %v12720_v0 }
  0x26   : > { %413 = vst.msk [vmem:[#allocation2 + $0xb0] sm:$0xff] %vm390_vm0, %v12720_v0  ;;  %414 = vst.msk [vmem:[#allocation2 + $0xb8] sm:$0xff] %vm390_vm0, %v12720_v0 }
  0x27   : > { %415 = vst.msk [vmem:[#allocation2 + $0xc0] sm:$0xff] %vm390_vm0, %v12720_v0  ;;  %416 = vst.msk [vmem:[#allocation2 + $0xc8] sm:$0xff] %vm390_vm0, %v12720_v0 }
  0x28   : > { %417 = vst.msk [vmem:[#allocation2 + $0xd0] sm:$0xff] %vm390_vm0, %v12720_v0  ;;  %418 = vst.msk [vmem:[#allocation2 + $0xd8] sm:$0xff] %vm390_vm0, %v12720_v0 }
  0x29   : > { %419 = vst.msk [vmem:[#allocation2 + $0xe0] sm:$0xff] %vm390_vm0, %v12720_v0  ;;  %420 = vst.msk [vmem:[#allocation2 + $0xe8] sm:$0xff] %vm390_vm0, %v12720_v0 }
  0x2a   : > { %421 = vst.msk [vmem:[#allocation2 + $0xf0] sm:$0xff] %vm390_vm0, %v12720_v0  ;;  %422 = vst.msk [vmem:[#allocation2 + $0xf8] sm:$0xff] %vm390_vm0, %v12720_v0 }
  0x2b   : > { %423 = vst.msk [vmem:[#allocation2 + $0x100] sm:$0xff] %vm390_vm0, %v12720_v0  ;;  %424 = vst.msk [vmem:[#allocation2 + $0x108] sm:$0xff] %vm390_vm0, %v12720_v0 }
  0x2c   : > { %425 = vst.msk [vmem:[#allocation2 + $0x110] sm:$0xff] %vm390_vm0, %v12720_v0  ;;  %426 = vst.msk [vmem:[#allocation2 + $0x118] sm:$0xff] %vm390_vm0, %v12720_v0 }
  0x2d   : > { %427 = vst.msk [vmem:[#allocation2 + $0x120] sm:$0xff] %vm390_vm0, %v12720_v0  ;;  %428 = vst.msk [vmem:[#allocation2 + $0x128] sm:$0xff] %vm390_vm0, %v12720_v0 }
  0x2e   : > { %430 = vst.msk [vmem:[#allocation3] sm:$0xff] %vm429_vm1, %v12720_v0  ;;  %431 = vst.msk [vmem:[#allocation3 + $0x8] sm:$0xff] %vm429_vm1, %v12720_v0 }
  0x2f   : > { %432 = vst.msk [vmem:[#allocation3 + $0x10] sm:$0xff] %vm429_vm1, %v12720_v0  ;;  %433 = vst.msk [vmem:[#allocation3 + $0x18] sm:$0xff] %vm429_vm1, %v12720_v0 }
  0x30   : > { %434 = vst.msk [vmem:[#allocation3 + $0x20] sm:$0xff] %vm429_vm1, %v12720_v0  ;;  %435 = vst.msk [vmem:[#allocation3 + $0x28] sm:$0xff] %vm429_vm1, %v12720_v0 }
  0x31   : > { %436 = vst.msk [vmem:[#allocation3 + $0x30] sm:$0xff] %vm429_vm1, %v12720_v0  ;;  %437 = vst.msk [vmem:[#allocation3 + $0x38] sm:$0xff] %vm429_vm1, %v12720_v0 }
  0x32   : > { %438 = vst.msk [vmem:[#allocation3 + $0x40] sm:$0xff] %vm429_vm1, %v12720_v0  ;;  %439 = vst.msk [vmem:[#allocation3 + $0x48] sm:$0xff] %vm429_vm1, %v12720_v0 }
  0x33   : > { %440 = vst.msk [vmem:[#allocation3 + $0x50] sm:$0xff] %vm429_vm1, %v12720_v0  ;;  %441 = vst.msk [vmem:[#allocation3 + $0x58] sm:$0xff] %vm429_vm1, %v12720_v0 }
  0x34   : > { %443 = vst.msk [vmem:[#allocation4] sm:$0xff] %vm442_vm2, %v12720_v0  ;;  %444 = vst.msk [vmem:[#allocation4 + $0x8] sm:$0xff] %vm442_vm2, %v12720_v0 }
  0x35   : > { %445 = vst.msk [vmem:[#allocation4 + $0x10] sm:$0xff] %vm442_vm2, %v12720_v0  ;;  %446 = vst.msk [vmem:[#allocation4 + $0x18] sm:$0xff] %vm442_vm2, %v12720_v0 }
  0x36 PF: > { %vm17151_vm3 = vcmask 1042432   ;;  %v12906_v1 = vld [vmem:[%s17118_s1 + $0x6] sm:$0x7]  ;;  %vm479_vm4 = vcmask 23552   ;;  %v512_v2 = vlaneseq  ;;  %v12914_v4 = vld [vmem:[%s17118_s1 + $0x9] sm:$0x7] }
  0x37   : > { %v447_v3 = vld [vmem:[%s12842_s15] sm:$0xff]  ;;  %11531 = vmatprep.subr.msk.mxu0 %vm17151_vm3, %v12906_v1  ;;  %v448_v5 = vld [vmem:[%s12842_s15 + $0x8] sm:$0xff]  ;;  %v449_v6 = vld [vmem:[%s12842_s15 + $0x10] sm:$0xff]  ;;  %v17403_v38 = vmov 0  ;;  %v17410_v46 = vmov 0  ;;  %v17415_v54 = vmov 0 }
  0x38   : > { %480 = vst.msk [vmem:[#allocation2 + $0x18] sm:$0xff] %vm479_vm4, %v447_v3  ;;  %11532 = vmatpush3.msk.msra.mxu0 %vm17151_vm3, %v12906_v1  ;;  %v12921_v7 = vshrl.u32 %v512_v2, 7  ;;  %481 = vst.msk [vmem:[#allocation2 + $0x20] sm:$0xff] %vm479_vm4, %v448_v5  ;;  %v450_v8 = vld [vmem:[%s12842_s15 + $0x18] sm:$0xff]  ;;  %v451_v9 = vld [vmem:[%s12842_s15 + $0x20] sm:$0xff]  ;;  %v17426_v3 = vmov 0 }
  0x39   : > { %482 = vst.msk [vmem:[#allocation2 + $0x28] sm:$0xff] %vm479_vm4, %v449_v6  ;;  %v452_v10 = vld [vmem:[%s12842_s15 + $0x28] sm:$0xff]  ;;  %11581 = vmatprep.subr.msk.mxu0 %vm17151_vm3, %v12914_v4  ;;  %483 = vst.msk [vmem:[#allocation2 + $0x30] sm:$0xff] %vm479_vm4, %v450_v8  ;;  %v453_v11 = vld [vmem:[%s12842_s15 + $0x30] sm:$0xff]  ;;  %v17440_v63 = vmov 0  ;;  %s12725_s22 = smov 96  }
  0x3a   : > { %17396 = vst [vmem:[#allocation8_spill] sm:$0xff] %v12921_v7  ;;  %484 = vst.msk [vmem:[#allocation2 + $0x38] sm:$0xff] %vm479_vm4, %v451_v9  ;;  %v454_v12 = vld [vmem:[%s12842_s15 + $0x38] sm:$0xff]  ;;  %v577_v13 = vshra.s32 %v12921_v7, 4  ;;  %v12937_v14 = vadd.s32 8, %v12921_v7  ;;  %v12940_v15 = vadd.s32 16, %v12921_v7 }
  0x3b   : > { %485 = vst.msk [vmem:[#allocation2 + $0x40] sm:$0xff] %vm479_vm4, %v452_v10  ;;  %v12943_v16 = vadd.s32 24, %v12921_v7  ;;  %486 = vst.msk [vmem:[#allocation2 + $0x48] sm:$0xff] %vm479_vm4, %v453_v11  ;;  %v455_v17 = vld [vmem:[%s12842_s15 + $0x40] sm:$0xff]  ;;  %v456_v18 = vld [vmem:[%s12842_s15 + $0x48] sm:$0xff]  ;;  %v12950_v20 = vadd.s32 32, %v12921_v7 }
  0x3c   : > { %17397 = vst [vmem:[#allocation9_spill] sm:$0xff] %v12937_v14  ;;  %17398 = vst [vmem:[#allocation10_spill] sm:$0xff] %v12940_v15  ;;  %v1708_v19 = vld [vmem:[#allocation2 + $0x9] sm:$0xff]  ;;  %v12953_v21 = vadd.s32 40, %v12921_v7  ;;  %v12956_v22 = vadd.s32 48, %v12921_v7  ;;  %v458_v24 = vld [vmem:[%s12842_s15 + $0x58] sm:$0xff] }
  0x3d   : > { %17399 = vst [vmem:[#allocation11_spill] sm:$0xff] %v12943_v16  ;;  %487 = vst.msk [vmem:[#allocation2 + $0x50] sm:$0xff] %vm479_vm4, %v454_v12  ;;  %v457_v23 = vld [vmem:[%s12842_s15 + $0x50] sm:$0xff]  ;;  %v12962_v25 = vand.u32 15, %v577_v13  ;;  %v546_v26 = vand.u32 15, %v12937_v14  ;;  %v578_v27 = vshra.s32 %v12937_v14, 4 }
  0x3e   : > { %17400 = vst [vmem:[#allocation12_spill] sm:$0xff] %v12950_v20  ;;  %17401 = vst [vmem:[#allocation13_spill] sm:$0xff] %v12953_v21  ;;  %v579_v28 = vshra.s32 %v12940_v15, 4  ;;  %v459_v29 = vld [vmem:[%s12842_s15 + $0x60] sm:$0xff]  ;;  %v460_v30 = vld [vmem:[%s12842_s15 + $0x68] sm:$0xff]  ;;  %v548_v31 = vand.u32 15, %v12943_v16 }
  0x3f   : > { %17402 = vst [vmem:[#allocation14_spill] sm:$0xff] %v12956_v22  ;;  %488 = vst.msk [vmem:[#allocation2 + $0x58] sm:$0xff] %vm479_vm4, %v455_v17  ;;  %v580_v32 = vshra.s32 %v12943_v16, 4  ;;  %v581_v33 = vshra.s32 %v12950_v20, 4  ;;  %v550_v34 = vand.u32 15, %v12953_v21  ;;  %v461_v35 = vld [vmem:[%s12842_s15 + $0x70] sm:$0xff] }
  0x40   : > { %489 = vst.msk [vmem:[#allocation2 + $0x60] sm:$0xff] %vm479_vm4, %v456_v18  ;;  %490 = vst.msk [vmem:[#allocation2 + $0x68] sm:$0xff] %vm479_vm4, %v457_v23  ;;  %v462_v36 = vld [vmem:[%s12842_s15 + $0x78] sm:$0xff]  ;;  %vm17133_vm5 = vcmp.ge.s32.totalorder %v12962_v25, 1  ;;  %v12980_v37 = vand.u32 15, %v578_v27  ;;  %vm12982_vm6 = vcmp.le.s32.totalorder %v546_v26, 14 }
  0x41   : > { %491 = vst.msk [vmem:[#allocation2 + $0x70] sm:$0xff] %vm479_vm4, %v458_v24  ;;  %492 = vst.msk [vmem:[#allocation2 + $0x78] sm:$0xff] %vm479_vm4, %v459_v29  ;;  %v17404_v38 = vsel %vm12982_vm6, 4294967295, %v17403_v38  ;;  %v12986_v39 = vand.u32 15, %v579_v28  ;;  %v1836_v40 = vsel %vm17133_vm5, %v1708_v19, 0.0  ;;  %v1709_v41 = vld [vmem:[#allocation2 + $0x11] sm:$0xff] }
  0x42   : > { %493 = vst.msk [vmem:[#allocation2 + $0x80] sm:$0xff] %vm479_vm4, %v460_v30  ;;  %17405 = vst [vmem:[#allocation15_spill] sm:$0xff] %v17404_v38  ;;  %v1710_v42 = vld [vmem:[#allocation2 + $0x19] sm:$0xff]  ;;  %v12992_v43 = vand.u32 15, %v580_v32  ;;  %v12994_v44 = vand.u32 15, %v581_v33  ;;  %v12997_v45 = vadd.s32 56, %v12921_v7  ;;  %11533 = vmatprep.mubr.msk.f32.mxu0 %vm479_vm4, %v1836_v40 }
  0x43   : > { %17406 = vst [vmem:[#allocation16_spill] sm:$0xff] %v12986_v39  ;;  %494 = vst.msk [vmem:[#allocation2 + $0x88] sm:$0xff] %vm479_vm4, %v461_v35  ;;  %vm17134_vm7 = vcmp.ge.s32.totalorder %v12980_v37, 1  ;;  %vm17142_vm8 = vcmp.ge.s32.totalorder %v12986_v39, 1  ;;  %vm13002_vm9 = vcmp.le.s32.totalorder %v548_v31, 14  ;;  %v582_v47 = vshra.s32 %v12953_v21, 4 }
  0x44   : > { %495 = vst.msk [vmem:[#allocation2 + $0x90] sm:$0xff] %vm479_vm4, %v462_v36  ;;  %17407 = vst [vmem:[#allocation17_spill] sm:$0xff] %v12992_v43  ;;  %v17411_v46 = vsel %vm13002_vm9, 4294967295, %v17410_v46  ;;  %v1838_v48 = vsel %vm17142_vm8, %v1710_v42, 0.0  ;;  %vm17135_vm11 = vcmp.ge.s32.totalorder %v12992_v43, 1  ;;  %v13014_v49 = vld [vmem:[#allocation2 + $0x21] sm:$0xff] }
  0x45   : > { %17408 = vst [vmem:[#allocation18_spill] sm:$0xff] %v12994_v44  ;;  %17409 = vst [vmem:[#allocation19_spill] sm:$0xff] %v12997_v45  ;;  %vm17132_vm12 = vcmp.ge.s32.totalorder %v12994_v44, 1  ;;  %v13020_v50 = vld [vmem:[%s17118_s1 + $0xc] sm:$0x7]  ;;  %v13022_v53 = vand.u32 15, %v582_v47 }
  0x46   : > { %17412 = vst [vmem:[#allocation20_spill] sm:$0xff] %v17411_v46  ;;  %vm1741_vm10 = vmand %vm17134_vm7, %vm12982_vm6  ;;  %v1712_v52 = vld [vmem:[#allocation2 + $0x29] sm:$0xff]  ;;  %vm13024_vm13 = vcmp.le.s32.totalorder %v550_v34, 14  ;;  %v583_v55 = vshra.s32 %v12956_v22, 4  ;;  %v552_v57 = vand.u32 15, %v12997_v45  ;;  %v584_v58 = vshra.s32 %v12997_v45, 4 }
  0x47   : > { %17413 = vst [vmem:[#allocation21_spill] sm:$0xff] %v13014_v49  ;;  %v1837_v51 = vsel %vm1741_vm10, %v1709_v41, 0.0  ;;  %17414 = vst [vmem:[#allocation22_spill] sm:$0xff] %v13022_v53  ;;  %v17416_v54 = vsel %vm13024_vm13, 4294967295, %v17415_v54  ;;  %vm17129_vm15 = vcmp.ge.s32.totalorder %v13022_v53, 1  ;;  %v1840_v61 = vsel %vm17132_vm12, %v1712_v52, 0.0 }
  0x48   : > { %17417 = vst [vmem:[#allocation23_spill] sm:$0xff] %v17416_v54  ;;  %11534 = vmatmul.mubr.msk.f32.vlgmr.msra.gmra.mrb[0].mxu0 %vm479_vm4, %v1837_v51  ;;  %vm13034_vm14 = vmand %vm17135_vm11, %vm13002_vm9  ;;  %v13047_v60 = vand.u32 15, %v583_v55  ;;  %v13051_v62 = vld [vmem:[#allocation2 + $0x31] sm:$0xff]  ;;  %v13061_v0 = vand.u32 15, %v584_v58  ;;  %v13066_v2 = vld [vmem:[#allocation2 + $0x39] sm:$0xff]  ;;  %vm13068_vm2 = vcmp.le.s32.totalorder %v552_v57, 14 }
  0x49   : > { %11582 = vmatpush3.msk.msra.mxu0 %vm17151_vm3, %v12914_v4  ;;  %11536 = vmatprep.mubr.msk.f32.mxu0 %vm479_vm4, %v1838_v48  ;;  %v1839_v59 = vsel %vm13034_vm14, %v13014_v49, 0.0  ;;  %17421 = vst [vmem:[#allocation25_spill] sm:$0xff] %v13051_v62  ;;  %vm13057_vm0 = vmand %vm17129_vm15, %vm13024_vm13  ;;  %v17427_v3 = vsel %vm13068_vm2, 4294967295, %v17426_v3  ;;  %v545_v4 = vand.u32 15, %v12921_v7  ;;  %v13082_v8 = vld [vmem:[#allocation2 + $0x41] sm:$0xff]  ;;  %v13097_v12 = vld [vmem:[#allocation2 + $0x17] sm:$0xff] }
  0x4a   : > { %17420 = vst [vmem:[#allocation24_spill] sm:$0xff] %v13047_v60  ;;  %17424 = vst [vmem:[#allocation26_spill] sm:$0xff] %v13061_v0  ;;  %11631 = vmatprep.subr.msk.mxu0 %vm17151_vm3, %v13020_v50  ;;  %vm17131_vm1 = vcmp.ge.s32.totalorder %v13047_v60, 1  ;;  %vm17130_vm10 = vcmp.ge.s32.totalorder %v13061_v0, 1  ;;  %v1841_v5 = vsel %vm13057_vm0, %v13051_v62, 0.0  ;;  %v463_v10 = vld [vmem:[%s12842_s15 + $0x80] sm:$0xff] }
  0x4b   : > { %17425 = vst [vmem:[#allocation27_spill] sm:$0xff] %v13066_v2  ;;  %17428 = vst [vmem:[#allocation28_spill] sm:$0xff] %v17427_v3  ;;  %v1842_v6 = vsel %vm17131_vm1, %v13066_v2, 0.0  ;;  %vm13093_vm15 = vcmp.ge.s32.totalorder %v545_v4, 1  ;;  %v547_v13 = vand.u32 15, %v12940_v15  ;;  %v464_v17 = vld [vmem:[%s12842_s15 + $0x88] sm:$0xff] }
  0x4c   : > { %11537 = vmatmul.mubr.msk.f32.gmra.mrb[2].mxu0 %vm479_vm4, %v1839_v59  ;;  %17429 = vst [vmem:[#allocation29_spill] sm:$0xff] %v13082_v8  ;;  %vm13088_vm14 = vmand %vm17130_vm10, %vm13068_vm2  ;;  %v465_v18 = vld [vmem:[%s12842_s15 + $0x90] sm:$0xff]  ;;  %v466_v19 = vld [vmem:[%s12842_s15 + $0x98] sm:$0xff]  ;;  %v2321_v28 = vsel %vm13093_vm15, %v13097_v12, 0.0  ;;  %v17434_v31 = vmov 0  ;;  %v549_v33 = vand.u32 15, %v12950_v20 }
  0x4d   : > { %11539 = vmatprep.mubr.msk.f32.mxu0 %vm479_vm4, %v1840_v61  ;;  %496 = vst.msk [vmem:[#allocation2 + $0x98] sm:$0xff] %vm479_vm4, %v463_v10  ;;  %497 = vst.msk [vmem:[#allocation2 + $0xa0] sm:$0xff] %vm479_vm4, %v464_v17  ;;  %v467_v23 = vld [vmem:[%s12842_s15 + $0xa0] sm:$0xff]  ;;  %v1843_v24 = vsel %vm13088_vm14, %v13082_v8, 0.0  ;;  %v468_v26 = vld [vmem:[%s12842_s15 + $0xa8] sm:$0xff]  ;;  %vm13123_vm0 = vcmp.ge.s32.totalorder %v547_v13, 1 }
  0x4e   : > { %498 = vst.msk [vmem:[#allocation2 + $0xa8] sm:$0xff] %vm479_vm4, %v465_v18  ;;  %499 = vst.msk [vmem:[#allocation2 + $0xb0] sm:$0xff] %vm479_vm4, %v466_v19  ;;  %v469_v27 = vld [vmem:[%s12842_s15 + $0xb0] sm:$0xff]  ;;  %v470_v29 = vld [vmem:[%s12842_s15 + $0xb8] sm:$0xff]  ;;  %v17435_v31 = vsel %vm13123_vm0, 4294967295, %v17434_v31  ;;  %vm13153_vm14 = vcmp.ge.s32.totalorder %v549_v33, 1 }
  0x4f   : > { %500 = vst.msk [vmem:[#allocation2 + $0xb8] sm:$0xff] %vm479_vm4, %v467_v23  ;;  %501 = vst.msk [vmem:[#allocation2 + $0xc0] sm:$0xff] %vm479_vm4, %v468_v26  ;;  %v471_v30 = vld [vmem:[%s12842_s15 + $0xc0] sm:$0xff]  ;;  %v472_v34 = vld [vmem:[%s12842_s15 + $0xc8] sm:$0xff]  ;;  %v17437_v52 = vmov 0  ;;  %v551_v56 = vand.u32 15, %v12956_v22 }
  0x50   : > { %11540 = vmatmul.mubr.msk.f32.gmra.mrb[4].mxu0 %vm479_vm4, %v1841_v5  ;;  %502 = vst.msk [vmem:[#allocation2 + $0xc8] sm:$0xff] %vm479_vm4, %v469_v27  ;;  %17436 = vst [vmem:[#allocation30_spill] sm:$0xff] %v17435_v31  ;;  %v13127_v32 = vld [vmem:[#allocation2 + $0x27] sm:$0xff]  ;;  %v473_v35 = vld [vmem:[%s12842_s15 + $0xd0] sm:$0xff]  ;;  %v17438_v52 = vsel %vm13153_vm14, 4294967295, %v17437_v52  ;;  %v521_v57 = vadd.s32 64, %v12921_v7 }
  0x51   : > { %11542 = vmatprep.mubr.msk.f32.mxu0 %vm479_vm4, %v1842_v6  ;;  %503 = vst.msk [vmem:[#allocation2 + $0xd0] sm:$0xff] %vm479_vm4, %v470_v29  ;;  %504 = vst.msk [vmem:[#allocation2 + $0xd8] sm:$0xff] %vm479_vm4, %v471_v30  ;;  %v13135_v36 = vld [vmem:[#allocation2 + $0x1f] sm:$0xff]  ;;  %v476_v42 = vld [vmem:[%s12842_s15 + $0xe8] sm:$0xff]  ;;  %v2323_v51 = vsel %vm13123_vm0, %v13127_v32, 0.0  ;;  %vm13178_vm10 = vcmp.ge.s32.totalorder %v551_v56, 1 }
  0x52   : > { %505 = vst.msk [vmem:[#allocation2 + $0xe0] sm:$0xff] %vm479_vm4, %v472_v34  ;;  %506 = vst.msk [vmem:[#allocation2 + $0xe8] sm:$0xff] %vm479_vm4, %v473_v35  ;;  %v474_v40 = vld [vmem:[%s12842_s15 + $0xd8] sm:$0xff]  ;;  %v475_v41 = vld [vmem:[%s12842_s15 + $0xe0] sm:$0xff]  ;;  %v17441_v63 = vsel %vm13178_vm10, 4294967295, %v17440_v63  ;;  %v553_v5 = vand.u32 15, %v521_v57 }
  0x53   : > { %507 = vst.msk [vmem:[#allocation2 + $0xf0] sm:$0xff] %vm479_vm4, %v474_v40  ;;  %508 = vst.msk [vmem:[#allocation2 + $0xf8] sm:$0xff] %vm479_vm4, %v475_v41  ;;  %v477_v47 = vld [vmem:[%s12842_s15 + $0xf0] sm:$0xff]  ;;  %v478_v48 = vld [vmem:[%s12842_s15 + $0xf8] sm:$0xff]  ;;  %v13193_v9 = vadd.s32 96, %v12921_v7  ;;  %v13221_v33 = vadd.s32 72, %v12921_v7 }
  0x54   : > { %11543 = vmatmul.mubr.msk.f32.gmra.mrb[6].mxu0 %vm479_vm4, %v1843_v24  ;;  %509 = vst.msk [vmem:[#allocation2 + $0x100] sm:$0xff] %vm479_vm4, %v476_v42  ;;  %510 = vst.msk [vmem:[#allocation2 + $0x108] sm:$0xff] %vm479_vm4, %v477_v47  ;;  %v13157_v55 = vld [vmem:[#allocation2 + $0x37] sm:$0xff]  ;;  %v13164_v58 = vld [vmem:[%s17118_s1 + $0xf] sm:$0x7]  ;;  %vm13198_vm1 = vcmp.ge.s32.totalorder %v553_v5, 1 }
  0x55   : > { %11583 = vmatprep.mubr.msk.f32.mxu0 %vm479_vm4, %v2321_v28  ;;  %511 = vst.msk [vmem:[#allocation2 + $0x110] sm:$0xff] %vm479_vm4, %v478_v48  ;;  %17439 = vst [vmem:[#allocation31_spill] sm:$0xff] %v17438_v52  ;;  %v13171_v59 = vld [vmem:[#allocation2 + $0x2f] sm:$0xff]  ;;  %v2325_v61 = vsel %vm13153_vm14, %v13157_v55, 0.0  ;;  %v13182_v4 = vld [vmem:[#allocation2 + $0x47] sm:$0xff]  ;;  %v557_v23 = vand.u32 15, %v13193_v9 }
  0x56   : > { %17442 = vst [vmem:[#allocation32_spill] sm:$0xff] %v17441_v63  ;;  %v13190_v6 = vld [vmem:[#allocation2 + $0x3f] sm:$0xff]  ;;  %v2327_v10 = vsel %vm13178_vm10, %v13182_v4, 0.0  ;;  %v2233_v17 = vld [vmem:[#allocation2 + $0x57] sm:$0xff]  ;;  %v13206_v19 = vld [vmem:[#allocation2 + $0x4f] sm:$0xff]  ;;  %v13210_v24 = vadd.s32 112, %v12921_v7 }
  0x57   : > { %v1058_v26 = vld [vmem:[%s17118_s1 + $0x3] sm:$0x7]  ;;  %v2329_v27 = vsel %vm13198_vm1, %v2233_v17, 0.0  ;;  %v13217_v28 = vld [vmem:[#allocation2 + $0x18] sm:$0xff]  ;;  %v930_v29 = vld [vmem:[#allocation2 + $0x8] sm:$0xff]  ;;  %17445 = vst [vmem:[#allocation33_spill] sm:$0xff] %v13221_v33 }
  0x58   : > { %11584 = vmatmul.mubr.msk.f32.vlgmr.msra.gmra.mrb[0].mxu0 %vm479_vm4, %v13135_v36  ;;  %11431 = vmatprep.subr.msk.mxu1 %vm17151_vm3, %v1058_v26  ;;  %v931_v30 = vld [vmem:[#allocation2 + $0x10] sm:$0xff]  ;;  %v2235_v35 = vld [vmem:[#allocation2 + $0x67] sm:$0xff]  ;;  %v1026_v40 = vsel %vm17133_vm5, %v930_v29, 0.0  ;;  %v1028_v42 = vsel %vm17142_vm8, %v13217_v28, 0.0  ;;  %v13238_v47 = vadd.s32 128, %v12921_v7  ;;  %v585_v48 = vshra.s32 %v521_v57, 4 }
  0x59   : > { %11632 = vmatpush3.msk.msra.mxu0 %vm17151_vm3, %v13020_v50  ;;  %11586 = vmatprep.mubr.msk.f32.mxu0 %vm479_vm4, %v2323_v51  ;;  %v13185_v50 = vadd.s32 80, %v12921_v7  ;;  %v1027_v41 = vsel %vm17134_vm7, %v931_v30, 0.0  ;;  %v2234_v51 = vld [vmem:[#allocation2 + $0x5f] sm:$0xff]  ;;  %vm13242_vm5 = vcmp.ge.s32.totalorder %v557_v23, 1  ;;  %v17448_v56 = vmov 0  ;;  %v2237_v17 = vld [vmem:[#allocation2 + $0x77] sm:$0xff] }
  0x5a   : > { %11681 = vmatprep.subr.msk.mxu0 %vm17151_vm3, %v13164_v58  ;;  %11432 = vmatpush3.msk.msra.mxu1 %vm17151_vm3, %v1058_v26  ;;  %v17449_v56 = vsel %vm13242_vm5, 4294967295, %v17448_v56  ;;  %v13247_v5 = vld [vmem:[#allocation2 + $0x20] sm:$0xff]  ;;  %v586_v23 = vshra.s32 %v13221_v33, 4  ;;  %v13260_v26 = vadd.s32 88, %v12921_v7  ;;  %vm17452_vm7 = vcmp.ge.s32.totalorder %v12994_v44, 1  ;;  %v13323_v3 = vld [vmem:[#allocation2 + $0x48] sm:$0xff] }
  0x5b   : > { %v555_v18 = vand.u32 15, %v13185_v50  ;;  %11433 = vmatprep.mubr.msk.f32.mxu1 %vm479_vm4, %v1026_v40  ;;  %17450 = vst [vmem:[#allocation34_spill] sm:$0xff] %v17449_v56  ;;  %v1029_v57 = vsel %vm17135_vm11, %v13247_v5, 0.0  ;;  %v561_v29 = vand.u32 15, %v13238_v47  ;;  %v13267_v30 = vand.u32 15, %v585_v48  ;;  %v2236_v40 = vld [vmem:[#allocation2 + $0x6f] sm:$0xff] }
  0x5c   : > { %11587 = vmatmul.mubr.msk.f32.gmra.mrb[2].mxu0 %vm479_vm4, %v13171_v59  ;;  %11434 = vmatmul.mubr.msk.f32.vlgmr.msra.gmra.mrb[0].mxu1 %vm479_vm4, %v1027_v41  ;;  %17451 = vst [vmem:[#allocation35_spill] sm:$0xff] %v13260_v26  ;;  %v2333_v41 = vsel %vm13242_vm5, %v2237_v17, 0.0  ;;  %v13278_v45 = vadd.s32 144, %v12921_v7  ;;  %v2239_v48 = vld [vmem:[#allocation2 + $0x87] sm:$0xff]  ;;  %v13292_v17 = vand.u32 15, %v586_v23  ;;  %v588_v22 = vshra.s32 %v13260_v26, 4 }
  0x5d   : > { %11589 = vmatprep.mubr.msk.f32.mxu0 %vm479_vm4, %v2325_v61  ;;  %vm13223_vm12 = vcmp.ge.s32.totalorder %v555_v18, 1  ;;  %v559_v61 = vand.u32 15, %v13210_v24  ;;  %v13252_v18 = vld [vmem:[#allocation2 + $0x28] sm:$0xff]  ;;  %11436 = vmatprep.mubr.msk.f32.mxu1 %vm479_vm4, %v1028_v42  ;;  %v17453_v42 = vmov 0  ;;  %v13296_v21 = vadd.s32 104, %v12921_v7  ;;  %v13306_v20 = vld [vmem:[#allocation2 + $0x40] sm:$0xff] }
  0x5e   : > { %17457 = vst [vmem:[#allocation37_spill] sm:$0xff] %v13292_v17  ;;  %vm17459_vm8 = vcmp.ge.s32.totalorder %v13047_v60, 1  ;;  %v2238_v16 = vld [vmem:[#allocation2 + $0x7f] sm:$0xff]  ;;  %v17461_v14 = vmov 0  ;;  %vm17464_vm3 = vcmp.ge.s32.totalorder %v13061_v0, 1  ;;  %vm17467_vm2 = vcmp.ge.s32.totalorder %v13267_v30, 1 }
  0x5f   : > { %vm13273_vm11 = vcmp.ge.s32.totalorder %v559_v61, 1  ;;  %17458 = vst [vmem:[#allocation38_spill] sm:$0xff] %v13296_v21  ;;  %v591_v54 = vshra.s32 %v13210_v24, 4  ;;  %v2243_v2 = vld [vmem:[#allocation2 + $0xa7] sm:$0xff]  ;;  %v13358_v33 = vld [vmem:[#allocation2 + $0x58] sm:$0xff]  ;;  %v13373_v62 = vadd.s32 136, %v12921_v7 }
  0x60   : > { %11590 = vmatmul.mubr.msk.f32.gmra.mrb[4].mxu0 %vm479_vm4, %v13190_v6  ;;  %v17454_v42 = vsel %vm13273_vm11, 4294967295, %v17453_v42  ;;  %11437 = vmatmul.mubr.msk.f32.gmra.mrb[2].mxu1 %vm479_vm4, %v1029_v57  ;;  %v2335_v15 = vsel %vm13273_vm11, %v2239_v48, 0.0  ;;  %v13331_v48 = vadd.s32 120, %v12921_v7  ;;  %v17476_v49 = vmov 0  ;;  %v13392_v38 = vld [vmem:[#allocation2 + $0x68] sm:$0xff]  ;;  %v13476_v31 = vld [vmem:[#allocation2 + $0x80] sm:$0xff] }
  0x61   : > { %11592 = vmatprep.mubr.msk.f32.mxu0 %vm479_vm4, %v2327_v10  ;;  %v2331_v10 = vsel %vm13223_vm12, %v2235_v35, 0.0  ;;  %v587_v35 = vshra.s32 %v13185_v50, 4  ;;  %17455 = vst [vmem:[#allocation36_spill] sm:$0xff] %v17454_v42  ;;  %v589_v50 = vshra.s32 %v13193_v9, 4  ;;  %v563_v9 = vand.u32 15, %v13278_v45  ;;  %17475 = vst [vmem:[#allocation47_spill] sm:$0xff] %v13373_v62 }
  0x62   : > { %17466 = vst [vmem:[#allocation42_spill] sm:$0xff] %v13331_v48  ;;  %v13370_v46 = vand.u32 15, %v591_v54  ;;  %vm17481_vm6 = vcmask 1042432   ;;  %v595_v42 = vshra.s32 %v13278_v45, 4  ;;  %v2247_v56 = vld [vmem:[#allocation2 + $0xc7] sm:$0xff]  ;;  %v13498_v52 = vadd.s32 184, %v12921_v7 }
  0x63   : > { %v13309_v23 = vand.u32 15, %v587_v35  ;;  %v2241_v35 = vld [vmem:[#allocation2 + $0x97] sm:$0xff]  ;;  %v13336_v26 = vand.u32 15, %v589_v50  ;;  %v17469_v50 = vmov 0  ;;  %s12726_s24 = smov 32   ;;  %s12727_s25 = smov 64  }
  0x64   : > { %11593 = vmatmul.mubr.msk.f32.gmra.mrb[6].mxu0 %vm479_vm4, %v13206_v19  ;;  %17474 = vst [vmem:[#allocation46_spill] sm:$0xff] %v13370_v46  ;;  %17500 = vst [vmem:[#allocation55_spill] sm:$0xff] %v13498_v52  ;;  %s10992_s15 = sshll.u32 %s12810_s21, 4  ;;  %s10527_s12 = scalar_lea.sflag [#allocation6], %s378_s29 }
  0x65   : > { %11595 = vmatprep.mubr.msk.f32.mxu0 %vm479_vm4, %v2329_v27  ;;  %v1030_v27 = vsel %vm17452_vm7, %v13252_v18, 0.0  ;;  %vm17456_vm7 = vcmp.ge.s32.totalorder %v13022_v53, 1  ;;  %17460 = vst [vmem:[#allocation39_spill] sm:$0xff] %v13309_v23  ;;  %17468 = vst [vmem:[#allocation43_spill] sm:$0xff] %v13336_v26  ;;  %vm17473_vm13 = vcmp.ge.s32.totalorder %v13309_v23, 1  ;;  %vm17187_vm9 = vcmp.ge.s32.totalorder %v13336_v26, 1  ;;  %s17072_s30 = scalar_lea.hbm %s17128_s11, %s10992_s15 }
  0x66   : > { %11439 = vmatprep.mubr.msk.f32.mxu1 %vm479_vm4, %v1030_v27  ;;  %v13304_v27 = vadd.s32 160, %v12921_v7  ;;  %v13434_v26 = vld [vmem:[#allocation2 + $0x78] sm:$0xff]  ;;  %v13456_v23 = vadd.s32 240, %v12921_v7  ;;  %s12728_s21 = smov [#allocation5]  }
  0x67   : > { %s12660_s14 = sshll.u32 %s12728_s21, 4  ;;  %s12661_s14 = int_to_ptr.vmem [resolvable:$false] %s12660_s14 }
  0x68   : > { %11596 = vmatmul.mubr.msk.f32.gmra.mrb[8].mxu0 %vm479_vm4, %v2234_v51  ;;  %v13280_v51 = vld [vmem:[#allocation2 + $0x30] sm:$0xff]  ;;  %v565_v24 = vand.u32 15, %v13304_v27  ;;  %s12662_s0 = scalar_lea.vmem %s12661_s14, 32 }
  0x69   : > { %11598 = vmatprep.mubr.msk.f32.mxu0 %vm479_vm4, %v2331_v10  ;;  %v13286_v10 = vld [vmem:[#allocation2 + $0x38] sm:$0xff]  ;;  %v1031_v61 = vsel %vm17456_vm7, %v13280_v51, 0.0  ;;  %vm17176_vm7 = vcmp.ge.s32.totalorder %v13292_v17, 1 }
  0x6a   : > { %v1032_v57 = vsel %vm17459_vm8, %v13286_v10, 0.0  ;;  %vm13314_vm8 = vcmp.ge.s32.totalorder %v561_v29, 1  ;;  %11440 = vmatmul.mubr.msk.f32.gmra.mrb[4].mxu1 %vm479_vm4, %v1031_v61  ;;  %v590_v29 = vshra.s32 %v13296_v21, 4  ;;  %v1034_v61 = vsel %vm17467_vm2, %v13323_v3, 0.0  ;;  %v2240_v21 = vld [vmem:[#allocation2 + $0x8f] sm:$0xff] }
  0x6b   : > { %v17462_v14 = vsel %vm13314_vm8, 4294967295, %v17461_v14  ;;  %11442 = vmatprep.mubr.msk.f32.mxu1 %vm479_vm4, %v1032_v57  ;;  %v13341_v57 = vadd.s32 176, %v12921_v7  ;;  %v2337_v8 = vsel %vm13314_vm8, %v2241_v35, 0.0  ;;  %vm13349_vm2 = vcmp.ge.s32.totalorder %v563_v9, 1 }
  0x6c   : > { %11599 = vmatmul.mubr.msk.f32.gmra.mrb[10].mxu0 %vm479_vm4, %v2236_v40  ;;  %17463 = vst [vmem:[#allocation40_spill] sm:$0xff] %v17462_v14  ;;  %v1033_v40 = vsel %vm17464_vm3, %v13306_v20, 0.0  ;;  %v17470_v50 = vsel %vm13349_vm2, 4294967295, %v17469_v50  ;;  %v592_v9 = vshra.s32 %v13331_v48, 4  ;;  %v593_v35 = vshra.s32 %v13238_v47, 4  ;;  %v2242_v48 = vld [vmem:[#allocation2 + $0x9f] sm:$0xff] }
  0x6d   : > { %11601 = vmatprep.mubr.msk.f32.mxu0 %vm479_vm4, %v2333_v41  ;;  %v13327_v41 = vand.u32 15, %v588_v22  ;;  %v13343_v22 = vld [vmem:[#allocation2 + $0x50] sm:$0xff]  ;;  %17471 = vst [vmem:[#allocation44_spill] sm:$0xff] %v17470_v50  ;;  %v929_v47 = vld [vmem:[%s17118_s1] sm:$0x7]  ;;  %v2339_v54 = vsel %vm13349_vm2, %v2243_v2, 0.0 }
  0x6e   : > { %11443 = vmatmul.mubr.msk.f32.gmra.mrb[6].mxu1 %vm479_vm4, %v1033_v40  ;;  %v1036_v40 = vsel %vm17473_vm13, %v13358_v33, 0.0  ;;  %vm13385_vm13 = vcmp.ge.s32.totalorder %v565_v24, 1  ;;  %v1038_v2 = vsel %vm17187_vm9, %v13392_v38, 0.0  ;;  %v13403_v24 = vand.u32 15, %v592_v9  ;;  %11481 = vmatprep.subr.msk.mxu1 %vm17481_vm6, %v929_v47 }
  0x6f   : > { %17465 = vst [vmem:[#allocation41_spill] sm:$0xff] %v13327_v41  ;;  %11445 = vmatprep.mubr.msk.f32.mxu1 %vm479_vm4, %v1034_v61  ;;  %vm17185_vm3 = vcmp.ge.s32.totalorder %v13327_v41, 1  ;;  %v13377_v61 = vld [vmem:[#allocation2 + $0x60] sm:$0xff]  ;;  %v17477_v49 = vsel %vm13385_vm13, 4294967295, %v17476_v49  ;;  %v13405_v50 = vand.u32 15, %v593_v35  ;;  %vm17203_vm2 = vcmp.ge.s32.totalorder %v13370_v46, 1 }
  0x70   : > { %11602 = vmatmul.mubr.msk.f32.gmra.mrb[12].mxu0 %vm479_vm4, %v2238_v16  ;;  %v1035_v16 = vsel %vm17176_vm7, %v13343_v22, 0.0  ;;  %17478 = vst [vmem:[#allocation48_spill] sm:$0xff] %v17477_v49  ;;  %v1037_v14 = vsel %vm17185_vm3, %v13377_v61, 0.0  ;;  %17479 = vst [vmem:[#allocation49_spill] sm:$0xff] %v13403_v24  ;;  %v13417_v9 = vadd.s32 208, %v12921_v7  ;;  %v13420_v35 = vadd.s32 224, %v12921_v7 }
  0x71   : > { %11604 = vmatprep.mubr.msk.f32.mxu0 %vm479_vm4, %v2335_v15  ;;  %v13362_v15 = vand.u32 15, %v590_v29  ;;  %v567_v29 = vand.u32 15, %v13341_v57  ;;  %17480 = vst [vmem:[#allocation50_spill] sm:$0xff] %v13405_v50  ;;  %vm17483_vm3 = vmmov %vm17481_vm6  ;;  %v17485_v41 = vmov 0  ;;  %v13448_v49 = vand.u32 15, %v595_v42 }
  0x72   : > { %11446 = vmatmul.mubr.msk.f32.gmra.mrb[8].mxu1 %vm479_vm4, %v1035_v16  ;;  %v594_v16 = vshra.s32 %v13373_v62, 4  ;;  %vm17484_vm6 = vmmov %vm17483_vm3  ;;  %v2244_v62 = vld [vmem:[#allocation2 + $0xaf] sm:$0xff]  ;;  %v597_v46 = vshra.s32 %v13304_v27, 4  ;;  %v573_v27 = vand.u32 15, %v13420_v35 }
  0x73   : > { %17472 = vst [vmem:[#allocation45_spill] sm:$0xff] %v13362_v15  ;;  %11448 = vmatprep.mubr.msk.f32.mxu1 %vm479_vm4, %v1036_v40  ;;  %vm17202_vm7 = vcmp.ge.s32.totalorder %v13362_v15, 1  ;;  %v13412_v40 = vadd.s32 152, %v12921_v7  ;;  %11482 = vmatpush3.msk.msra.mxu1 %vm17483_vm3, %v929_v47  ;;  %vm13427_vm9 = vcmp.ge.s32.totalorder %v567_v29, 1  ;;  %v13432_v47 = vld [vmem:[#allocation2 + $0x70] sm:$0xff]  ;;  %v1040_v29 = vsel %vm17203_vm2, %v13434_v26, 0.0 }
  0x74   : > { %11605 = vmatmul.mubr.msk.f32.gmra.mrb[14].mxu0 %vm479_vm4, %v2240_v21  ;;  %v13390_v21 = vadd.s32 192, %v12921_v7  ;;  %12182 = vmatprep.subr.msk.mxu1 %vm17484_vm6, %v12906_v1  ;;  %v17486_v41 = vsel %vm13427_vm9, 4294967295, %v17485_v41  ;;  %v2246_v15 = vld [vmem:[#allocation2 + $0xbf] sm:$0xff] }
  0x75   : > { %11607 = vmatprep.mubr.msk.f32.mxu0 %vm479_vm4, %v2337_v8  ;;  %v2245_v8 = vld [vmem:[#allocation2 + $0xb7] sm:$0xff]  ;;  %17482 = vst [vmem:[#allocation51_spill] sm:$0xff] %v13412_v40  ;;  %17487 = vst [vmem:[#allocation52_spill] sm:$0xff] %v17486_v41 }
  0x76   : > { %v2341_v45 = vsel %vm13385_vm13, %v2245_v8, 0.0  ;;  %11449 = vmatmul.mubr.msk.f32.gmra.mrb[10].mxu1 %vm479_vm4, %v1037_v14  ;;  %v13446_v8 = vand.u32 15, %v594_v16  ;;  %v596_v14 = vshra.s32 %v13412_v40, 4  ;;  %v2343_v16 = vsel %vm13427_vm9, %v2247_v56, 0.0 }
  0x77   : > { %11451 = vmatprep.mubr.msk.f32.mxu1 %vm479_vm4, %v1038_v2  ;;  %v13452_v2 = vadd.s32 168, %v12921_v7  ;;  %v571_v40 = vand.u32 15, %v13417_v9  ;;  %vm17499_vm9 = vcmp.ge.s32.totalorder %v13405_v50, 1 }
  0x78   : > { %11608 = vmatmul.mubr.msk.f32.gmra.mrb[16].mxu0 %vm479_vm4, %v2242_v48  ;;  %v569_v48 = vand.u32 15, %v13390_v21 }
  0x79   : > { %11610 = vmatprep.mubr.msk.f32.mxu0 %vm479_vm4, %v2339_v54  ;;  %v1039_v54 = vsel %vm17202_vm7, %v13432_v47, 0.0  ;;  %17488 = vst [vmem:[#allocation53_spill] sm:$0xff] %v13452_v2  ;;  %vm17489_vm7 = vcmp.ge.s32.totalorder %v12986_v39, 1  ;;  %v13478_v39 = vld [vmem:[#allocation2 + $0x88] sm:$0xff] }
  0x7a   : > { %vm13463_vm2 = vmand %vm17489_vm7, %vm13123_vm0  ;;  %vm13470_vm6 = vcmp.ge.s32.totalorder %v569_v48, 1  ;;  %11452 = vmatmul.mubr.msk.f32.gmra.mrb[12].mxu1 %vm479_vm4, %v1039_v54  ;;  %vm17495_vm7 = vcmp.ge.s32.totalorder %v12994_v44, 1  ;;  %vm17498_vm0 = vcmp.ge.s32.totalorder %v13403_v24, 1  ;;  %v1042_v41 = vsel %vm17499_vm9, %v13478_v39, 0.0  ;;  %v17544_v42 = vld [vmem:[#allocation45_spill] sm:$0xff] }
  0x7b   : > { %vm13485_vm3 = vmand %vm17495_vm7, %vm13153_vm14  ;;  %11454 = vmatprep.mubr.msk.f32.mxu1 %vm479_vm4, %v1040_v29  ;;  %v1041_v48 = vsel %vm17498_vm0, %v13476_v31, 0.0  ;;  %v599_v54 = vshra.s32 %v13341_v57, 4  ;;  %vm17227_vm7 = vcmp.ge.s32.totalorder %v13446_v8, 1  ;;  %v13502_v44 = vand.u32 15, %v596_v14  ;;  %v13536_v14 = vld [vmem:[#allocation2 + $0x98] sm:$0xff] }
  0x7c   : > { %11611 = vmatmul.mubr.msk.f32.gmra.mrb[18].mxu0 %vm479_vm4, %v2244_v62  ;;  %v17492_v62 = vmov 0  ;;  %v598_v29 = vshra.s32 %v13452_v2, 4  ;;  %v13506_v24 = vand.u32 15, %v597_v46  ;;  %vm17502_vm9 = vcmp.ge.s32.totalorder %v12992_v43, 1  ;;  %v13534_v43 = vld [vmem:[#allocation2 + $0x90] sm:$0xff]  ;;  %v2250_v2 = vld [vmem:[#allocation2 + $0xdf] sm:$0xff] }
  0x7d   : > { %11613 = vmatprep.mubr.msk.f32.mxu0 %vm479_vm4, %v2341_v45  ;;  %v17493_v62 = vsel %vm13470_vm6, 4294967295, %v17492_v62  ;;  %v2249_v45 = vld [vmem:[#allocation2 + $0xd7] sm:$0xff]  ;;  %17501 = vst [vmem:[#allocation56_spill] sm:$0xff] %v13502_v44  ;;  %v13514_v57 = vsel %vm17502_vm9, %v13135_v36, 0.0  ;;  %vm17503_vm0 = vcmp.ge.s32.totalorder %v13047_v60, 1  ;;  %vm13530_vm9 = vcmp.ge.s32.totalorder %v571_v40, 1 }
  0x7e   : > { %17494 = vst [vmem:[#allocation54_spill] sm:$0xff] %v17493_v62  ;;  %vm13523_vm14 = vmand %vm17503_vm0, %vm13178_vm10  ;;  %v2345_v50 = vsel %vm13470_vm6, %v2249_v45, 0.0  ;;  %v17506_v36 = vmov 0  ;;  %11455 = vmatmul.mubr.msk.f32.gmra.mrb[14].mxu1 %vm479_vm4, %v1041_v48  ;;  %vm17509_vm0 = vcmp.ge.s32.totalorder %v13022_v53, 1  ;;  %v1043_v40 = vsel %vm17227_vm7, %v13534_v43, 0.0  ;;  %v2251_v60 = vld [vmem:[#allocation2 + $0xe7] sm:$0xff] }
  0x7f   : > { %v17507_v36 = vsel %vm13530_vm9, 4294967295, %v17506_v36  ;;  %v13542_v63 = vsel %vm17509_vm0, %v13171_v59, 0.0  ;;  %11457 = vmatprep.mubr.msk.f32.mxu1 %vm479_vm4, %v1042_v41  ;;  %vm17510_vm10 = vcmp.ge.s32.totalorder %v13448_v49, 1  ;;  %v600_v45 = vshra.s32 %v13498_v52, 4  ;;  %v13577_v62 = vld [vmem:[#allocation2 + $0xa0] sm:$0xff] }
  0x80   : > { %11614 = vmatmul.mubr.msk.f32.gmra.mrb[20].mxu0 %vm479_vm4, %v2246_v15  ;;  %v2248_v15 = vld [vmem:[#allocation2 + $0xcf] sm:$0xff]  ;;  %17508 = vst [vmem:[#allocation57_spill] sm:$0xff] %v17507_v36  ;;  %v13556_v59 = vand.u32 15, %v598_v29  ;;  %v13559_v41 = vadd.s32 200, %v12921_v7  ;;  %vm17513_vm7 = vcmp.ge.s32.totalorder %v13061_v0, 1  ;;  %v13568_v52 = vand.u32 15, %v599_v54 }
  0x81   : > { %11616 = vmatprep.mubr.msk.f32.mxu0 %vm479_vm4, %v2343_v16  ;;  %v1044_v16 = vsel %vm17510_vm10, %v13536_v14, 0.0  ;;  %v13564_v53 = vsel %vm17513_vm7, %v13190_v6, 0.0  ;;  %vm17246_vm10 = vcmp.ge.s32.totalorder %v13506_v24, 1  ;;  %v601_v48 = vshra.s32 %v13390_v21, 4  ;;  %v2252_v36 = vld [vmem:[#allocation2 + $0xef] sm:$0xff] }
  0x82   : > { %17511 = vst [vmem:[#allocation58_spill] sm:$0xff] %v13556_v59  ;;  %17512 = vst [vmem:[#allocation59_spill] sm:$0xff] %v13559_v41  ;;  %vm17515_vm0 = vcmp.ge.s32.totalorder %v13292_v17, 1  ;;  %11458 = vmatmul.mubr.msk.f32.gmra.mrb[16].mxu1 %vm479_vm4, %v1043_v40  ;;  %v2347_v6 = vsel %vm13530_vm9, %v2251_v60, 0.0  ;;  %vm13582_vm7 = vcmp.ge.s32.totalorder %v573_v27, 1  ;;  %v17516_v54 = vmov 0 }
  0x83   : > { %17514 = vst [vmem:[#allocation60_spill] sm:$0xff] %v13568_v52  ;;  %v13574_v29 = vsel %vm17515_vm0, %v13206_v19, 0.0  ;;  %v17517_v54 = vsel %vm13582_vm7, 4294967295, %v17516_v54  ;;  %v575_v21 = vand.u32 15, %v13456_v23  ;;  %11460 = vmatprep.mubr.msk.f32.mxu1 %vm479_vm4, %v1044_v16  ;;  %vm17519_vm0 = vcmp.ge.s32.totalorder %v13502_v44, 1  ;;  %v13609_v44 = vld [vmem:[#allocation2 + $0xb0] sm:$0xff] }
  0x84   : > { %11617 = vmatmul.mubr.msk.f32.gmra.mrb[22].mxu0 %vm479_vm4, %v2248_v15  ;;  %17518 = vst [vmem:[#allocation61_spill] sm:$0xff] %v17517_v54  ;;  %v13587_v15 = vld [vmem:[#allocation2 + $0xa8] sm:$0xff]  ;;  %v1045_v19 = vsel %vm17519_vm0, %v13577_v62, 0.0  ;;  %vm17256_vm9 = vcmp.ge.s32.totalorder %v13556_v59, 1  ;;  %v13597_v60 = vand.u32 15, %v600_v45  ;;  %v602_v27 = vshra.s32 %v13559_v41, 4 }
  0x85   : > { %11619 = vmatprep.mubr.msk.f32.mxu0 %vm479_vm4, %v2345_v50  ;;  %v2253_v50 = vld [vmem:[#allocation2 + $0xf7] sm:$0xff]  ;;  %v1046_v40 = vsel %vm17246_vm10, %v13587_v15, 0.0  ;;  %vm17257_vm6 = vcmp.ge.s32.totalorder %v13568_v52, 1  ;;  %v13602_v16 = vand.u32 15, %v601_v48  ;;  %v603_v0 = vshra.s32 %v13417_v9, 4  ;;  %v2254_v54 = vld [vmem:[#allocation2 + $0xff] sm:$0xff] }
  0x86   : > { %17520 = vst [vmem:[#allocation62_spill] sm:$0xff] %v13597_v60  ;;  %v13606_v17 = vadd.s32 216, %v12921_v7  ;;  %11461 = vmatmul.mubr.msk.f32.gmra.mrb[18].mxu1 %vm479_vm4, %v1045_v19  ;;  %v2349_v45 = vsel %vm13582_vm7, %v2253_v50, 0.0  ;;  %v1047_v9 = vsel %vm17256_vm9, %v13609_v44, 0.0  ;;  %vm13620_vm0 = vcmp.ge.s32.totalorder %v575_v21, 1  ;;  %v13639_v59 = vld [vmem:[#allocation2 + $0xc0] sm:$0xff] }
  0x87   : > { %11463 = vmatprep.mubr.msk.f32.mxu1 %vm479_vm4, %v1046_v40  ;;  %v17522_v48 = vmov 0  ;;  %vm17263_vm10 = vcmp.ge.s32.totalorder %v13597_v60, 1  ;;  %v13628_v50 = vand.u32 15, %v602_v27  ;;  %vm17264_vm7 = vcmp.ge.s32.totalorder %v13602_v16, 1  ;;  %v13645_v52 = vld [vmem:[#allocation2 + $0xc8] sm:$0xff]  ;;  %v13670_v60 = vld [vmem:[#allocation2 + $0xd8] sm:$0xff] }
  0x88   : > { %11620 = vmatmul.mubr.msk.f32.gmra.mrb[24].mxu0 %vm479_vm4, %v2250_v2  ;;  %17521 = vst [vmem:[#allocation63_spill] sm:$0xff] %v13606_v17  ;;  %v13614_v2 = vld [vmem:[#allocation2 + $0xb8] sm:$0xff]  ;;  %v17523_v48 = vsel %vm13620_vm0, 4294967295, %v17522_v48  ;;  %v13632_v40 = vand.u32 15, %v603_v0  ;;  %v604_v21 = vshra.s32 %v13606_v17, 4  ;;  %v13636_v41 = vadd.s32 232, %v12921_v7 }
  0x89   : > { %11622 = vmatprep.mubr.msk.f32.mxu0 %vm479_vm4, %v2347_v6  ;;  %17524 = vst [vmem:[#allocation64_spill] sm:$0xff] %v17523_v48  ;;  %v2255_v6 = vld [vmem:[#allocation2 + $0x107] sm:$0xff]  ;;  %v1048_v19 = vsel %vm17257_vm6, %v13614_v2, 0.0  ;;  %v605_v27 = vshra.s32 %v13420_v35, 4  ;;  %v1049_v0 = vsel %vm17263_vm10, %v13639_v59, 0.0  ;;  %vm17265_vm9 = vcmp.ge.s32.totalorder %v13628_v50, 1 }
  0x8a   : > { %11464 = vmatmul.mubr.msk.f32.gmra.mrb[20].mxu1 %vm479_vm4, %v1047_v9  ;;  %vm17266_vm6 = vcmp.ge.s32.totalorder %v13632_v40, 1  ;;  %v13657_v35 = vand.u32 15, %v604_v21  ;;  %v606_v9 = vshra.s32 %v13636_v41, 4  ;;  %v13664_v17 = vld [vmem:[#allocation2 + $0xd0] sm:$0xff] }
  0x8b   : > { %11466 = vmatprep.mubr.msk.f32.mxu1 %vm479_vm4, %v1048_v19  ;;  %v2256_v19 = vld [vmem:[#allocation2 + $0x10f] sm:$0xff]  ;;  %v13667_v48 = vand.u32 15, %v605_v27  ;;  %v1051_v21 = vsel %vm17265_vm9, %v13664_v17, 0.0 }
  0x8c   : > { %11623 = vmatmul.mubr.msk.f32.gmra.mrb[26].mxu0 %vm479_vm4, %v2252_v36  ;;  %v2351_v36 = vsel %vm13620_vm0, %v2255_v6, 0.0  ;;  %v13661_v6 = vadd.s32 248, %v12921_v7  ;;  %vm17269_vm10 = vcmp.ge.s32.totalorder %v13657_v35, 1  ;;  %v13681_v27 = vand.u32 15, %v606_v9  ;;  %v13698_v9 = vld [vmem:[%s17118_s1 + $0x12] sm:$0x7] }
  0x8d   : > { %11625 = vmatprep.mubr.msk.f32.mxu0 %vm479_vm4, %v2349_v45  ;;  %v1050_v45 = vsel %vm17264_vm7, %v13645_v52, 0.0  ;;  %vm17270_vm7 = vcmp.ge.s32.totalorder %v13667_v48, 1  ;;  %v13955_v7 = vld [vmem:[#allocation2 + $0xe7] sm:$0xff] }
  0x8e   : > { %11467 = vmatmul.mubr.msk.f32.gmra.mrb[22].mxu1 %vm479_vm4, %v1049_v0  ;;  %vm17272_vm9 = vcmp.ge.s32.totalorder %v13681_v27, 1 }
  0x8f   : > { %11469 = vmatprep.mubr.msk.f32.mxu1 %vm479_vm4, %v1050_v45  ;;  %v13690_v45 = vld [vmem:[#allocation2 + $0xe0] sm:$0xff] }
  0x90   : > { %11626 = vmatmul.mubr.msk.f32.gmra.mrb[28].mxu0 %vm479_vm4, %v2254_v54  ;;  %v607_v54 = vshra.s32 %v13456_v23, 4  ;;  %v608_v23 = vshra.s32 %v13661_v6, 4 }
  0x91   : > { %11628 = vmatprep.mubr.msk.f32.mxu0 %vm479_vm4, %v2351_v36  ;;  %v1052_v36 = vsel %vm17266_vm6, %v13670_v60, 0.0  ;;  %vm17525_vm6 = vcmask 1042432  }
  0x92   : > { %11470 = vmatmul.mubr.msk.f32.gmra.mrb[24].mxu1 %vm479_vm4, %v1051_v21  ;;  %v13688_v0 = vand.u32 15, %v607_v54  ;;  %v13709_v21 = vand.u32 15, %v608_v23  ;;  %v769_v23 = vld [vmem:[#allocation2 + $0x7] sm:$0xff] }
  0x93   : > { %11472 = vmatprep.mubr.msk.f32.mxu1 %vm479_vm4, %v1052_v36  ;;  %v13716_v36 = vld [vmem:[#allocation2 + $0xf0] sm:$0xff] }
  0x94   : > { %11629 = vmatmul.mubr.msk.f32.gmra.mrb[30].mxu0 %vm479_vm4, %v2256_v19  ;;  %v13693_v19 = vld [vmem:[#allocation2 + $0xe8] sm:$0xff]  ;;  %vm17273_vm0 = vcmp.ge.s32.totalorder %v13688_v0, 1 }
  0x95   : > { %11633 = vmatprep.mubr.msk.f32.mxu0 %vm479_vm4, %v13217_v28  ;;  %v1053_v28 = vsel %vm17269_vm10, %v13690_v45, 0.0  ;;  %v1054_v54 = vsel %vm17270_vm7, %v13693_v19, 0.0  ;;  %vm17526_vm10 = vmmov %vm17525_vm6 }
  0x96   : > { %11473 = vmatmul.mubr.msk.f32.gmra.mrb[26].mxu1 %vm479_vm4, %v1053_v28  ;;  %v13739_v28 = vld [vmem:[#allocation2 + $0x100] sm:$0xff] }
  0x97   : > { %11475 = vmatprep.mubr.msk.f32.mxu1 %vm479_vm4, %v1054_v54  ;;  %v770_v54 = vld [vmem:[#allocation2 + $0xf] sm:$0xff] }
  0x98   : > { %11634 = vmatmul.mubr.msk.f32.vlgmr.msra.gmra.mrb[0].mxu0 %vm479_vm4, %v13247_v5  ;;  %v13721_v5 = vld [vmem:[#allocation2 + $0xf8] sm:$0xff] }
  0x99   : > { %11682 = vmatpush3.msk.msra.mxu0 %vm17525_vm6, %v13164_v58  ;;  %11636 = vmatprep.mubr.msk.f32.mxu0 %vm479_vm4, %v13252_v18  ;;  %v1055_v58 = vsel %vm17272_vm9, %v13716_v36, 0.0  ;;  %v1056_v18 = vsel %vm17273_vm0, %v13721_v5, 0.0  ;;  %vm17271_vm6 = vcmp.ge.s32.totalorder %v13709_v21, 1 }
  0x9a   : > { %11731 = vmatprep.subr.msk.mxu0 %vm17526_vm10, %v13698_v9  ;;  %vm17527_vm10 = vcmp.ge.s32.totalorder %v12962_v25, 1  ;;  %11476 = vmatmul.mubr.msk.f32.gmra.mrb[28].mxu1 %vm479_vm4, %v1055_v58 }
  0x9b   : > { %vm801_vm7 = vmand %vm17527_vm10, %vm13093_vm15  ;;  %11478 = vmatprep.mubr.msk.f32.mxu1 %vm479_vm4, %v1056_v18  ;;  %vm17528_vm10 = vcmp.ge.s32.totalorder %v12980_v37, 1  ;;  %v13864_v18 = vld [vmem:[#allocation2 + $0x8f] sm:$0xff] }
  0x9c   : > { %11637 = vmatmul.mubr.msk.f32.gmra.mrb[2].mxu0 %vm479_vm4, %v13280_v51  ;;  %v1057_v51 = vsel %vm17271_vm6, %v13739_v28, 0.0  ;;  %v898_v58 = vsel %vm17528_vm10, %v770_v54, 0.0  ;;  %v13886_v54 = vld [vmem:[#allocation2 + $0xa7] sm:$0xff] }
  0x9d   : > { %11639 = vmatprep.mubr.msk.f32.mxu0 %vm479_vm4, %v13286_v10  ;;  %v897_v10 = vsel %vm801_vm7, %v769_v23, 0.0  ;;  %vm17530_vm7 = vcmask 1042432   ;;  %v13868_v23 = vld [vmem:[#allocation2 + $0x97] sm:$0xff] }
  0x9e   : > { %11479 = vmatmul.mubr.msk.f32.gmra.mrb[30].mxu1 %vm479_vm4, %v1057_v51  ;;  %v17551_v51 = vld [vmem:[#allocation44_spill] sm:$0xff] }
  0x9f   : > { %11483 = vmatprep.mubr.msk.f32.mxu1 %vm479_vm4, %v897_v10  ;;  %v13882_v10 = vld [vmem:[#allocation2 + $0x9f] sm:$0xff] }
  0xa0   : > { %11640 = vmatmul.mubr.msk.f32.gmra.mrb[4].mxu0 %vm479_vm4, %v13306_v20  ;;  %v17529_v20 = vsel %vm13463_vm2, %v13097_v12, 0.0  ;;  %vm17532_vm2 = vcmp.ge.s32.totalorder %v13267_v30, 1  ;;  %v13797_v12 = vld [vmem:[#allocation2 + $0x57] sm:$0xff] }
  0xa1   : > { %11642 = vmatprep.mubr.msk.f32.mxu0 %vm479_vm4, %v13323_v3  ;;  %v17531_v3 = vsel %vm13485_vm3, %v13127_v32, 0.0  ;;  %vm809_vm10 = vmand %vm17532_vm2, %vm13198_vm1  ;;  %v17534_v32 = vld [vmem:[#allocation39_spill] sm:$0xff] }
  0xa2   : > { %11484 = vmatmul.mubr.msk.f32.vlgmr.msra.gmra.mrb[0].mxu1 %vm479_vm4, %v898_v58  ;;  %vm17535_vm3 = vcmp.ge.s32.totalorder %v17534_v32, 1 }
  0xa3   : > { %11486 = vmatprep.mubr.msk.f32.mxu1 %vm479_vm4, %v17529_v20  ;;  %12183 = vmatpush3.msk.msra.mxu1 %vm17530_vm7, %v12906_v1  ;;  %v17533_v1 = vsel %vm13523_vm14, %v13157_v55, 0.0  ;;  %vm811_vm7 = vmand %vm17535_vm3, %vm13223_vm12  ;;  %v13809_v55 = vld [vmem:[#allocation2 + $0x5f] sm:$0xff] }
  0xa4   : > { %11643 = vmatmul.mubr.msk.f32.gmra.mrb[6].mxu0 %vm479_vm4, %v13343_v22  ;;  %v13832_v22 = vld [vmem:[#allocation2 + $0x77] sm:$0xff] }
  0xa5   : > { %11645 = vmatprep.mubr.msk.f32.mxu0 %vm479_vm4, %v13358_v33 }
  0xa6   : > { %11487 = vmatmul.mubr.msk.f32.gmra.mrb[2].mxu1 %vm479_vm4, %v13514_v57  ;;  %v13846_v57 = vld [vmem:[#allocation2 + $0x7f] sm:$0xff] }
  0xa7   : > { %11489 = vmatprep.mubr.msk.f32.mxu1 %vm479_vm4, %v17531_v3  ;;  %v13900_v3 = vld [vmem:[#allocation2 + $0xaf] sm:$0xff] }
  0xa8   : > { %11646 = vmatmul.mubr.msk.f32.gmra.mrb[8].mxu0 %vm479_vm4, %v13377_v61 }
  0xa9   : > { %11648 = vmatprep.mubr.msk.f32.mxu0 %vm479_vm4, %v13392_v38  ;;  %v905_v38 = vsel %vm809_vm10, %v13182_v4, 0.0  ;;  %v17537_v4 = vld [vmem:[#allocation43_spill] sm:$0xff] }
  0xaa   : > { %11490 = vmatmul.mubr.msk.f32.gmra.mrb[4].mxu1 %vm479_vm4, %v13542_v63  ;;  %vm17538_vm14 = vcmp.ge.s32.totalorder %v17537_v4, 1 }
  0xab   : > { %11492 = vmatprep.mubr.msk.f32.mxu1 %vm479_vm4, %v17533_v1  ;;  %vm813_vm2 = vmand %vm17538_vm14, %vm13242_vm5  ;;  %vm17545_vm14 = vcmp.ge.s32.totalorder %v17544_v42, 1  ;;  %v13904_v1 = vld [vmem:[#allocation2 + $0xb7] sm:$0xff] }
  0xac   : > { %11649 = vmatmul.mubr.msk.f32.gmra.mrb[10].mxu0 %vm479_vm4, %v13432_v47  ;;  %v17542_v47 = vld [vmem:[#allocation46_spill] sm:$0xff] }
  0xad   : > { %11651 = vmatprep.mubr.msk.f32.mxu0 %vm479_vm4, %v13434_v26  ;;  %v13828_v26 = vld [vmem:[#allocation2 + $0x6f] sm:$0xff]  ;;  %vm17543_vm3 = vcmp.ge.s32.totalorder %v17542_v47, 1  ;;  %17579 = vst [vmem:[#allocation46_spill] sm:$0xff] %v13955_v7 }
  0xae   : > { %11493 = vmatmul.mubr.msk.f32.gmra.mrb[6].mxu1 %vm479_vm4, %v13564_v53 }
  0xaf   : > { %11495 = vmatprep.mubr.msk.f32.mxu1 %vm479_vm4, %v905_v38  ;;  %v17559_v38 = vld [vmem:[#allocation52_spill] sm:$0xff] }
  0xb0   : > { %11652 = vmatmul.mubr.msk.f32.gmra.mrb[12].mxu0 %vm479_vm4, %v13476_v31  ;;  %v907_v31 = vsel %vm811_vm7, %v13797_v12, 0.0  ;;  %vm815_vm7 = vmand %vm17543_vm3, %vm13273_vm11 }
  0xb1   : > { %11654 = vmatprep.mubr.msk.f32.mxu0 %vm479_vm4, %v13478_v39  ;;  %v13813_v39 = vld [vmem:[#allocation2 + $0x67] sm:$0xff]  ;;  %v911_v56 = vsel %vm815_vm7, %v13832_v22, 0.0  ;;  %vm17552_vm7 = vnez %v17551_v51 }
  0xb2   : > { %11496 = vmatmul.mubr.msk.f32.gmra.mrb[8].mxu1 %vm479_vm4, %v13574_v29  ;;  %v909_v33 = vsel %vm813_vm2, %v13813_v39, 0.0  ;;  %v17547_v29 = vld [vmem:[#allocation50_spill] sm:$0xff] }
  0xb3   : > { %11498 = vmatprep.mubr.msk.f32.mxu1 %vm479_vm4, %v907_v31  ;;  %vm17548_vm2 = vcmp.ge.s32.totalorder %v17547_v29, 1  ;;  %v17561_v31 = vld [vmem:[#allocation60_spill] sm:$0xff] }
  0xb4   : > { %11655 = vmatmul.mubr.msk.f32.gmra.mrb[14].mxu0 %vm479_vm4, %v13534_v43  ;;  %v17539_v43 = vld [vmem:[#allocation41_spill] sm:$0xff] }
  0xb5   : > { %11657 = vmatprep.mubr.msk.f32.mxu0 %vm479_vm4, %v13536_v14  ;;  %vm17540_vm10 = vcmp.ge.s32.totalorder %v17539_v43, 1  ;;  %v13850_v14 = vld [vmem:[#allocation2 + $0x87] sm:$0xff] }
  0xb6   : > { %v908_v53 = vsel %vm17540_vm10, %v13809_v55, 0.0  ;;  %vm817_vm10 = vmand %vm17548_vm2, %vm13314_vm8 }
  0xb7   : > { %11499 = vmatmul.mubr.msk.f32.gmra.mrb[10].mxu1 %vm479_vm4, %v908_v53 }
  0xb8   : > { %11658 = vmatmul.mubr.msk.f32.gmra.mrb[16].mxu0 %vm479_vm4, %v13577_v62  ;;  %11501 = vmatprep.mubr.msk.f32.mxu1 %vm479_vm4, %v909_v33  ;;  %v910_v62 = vsel %vm17545_vm14, %v13828_v26, 0.0  ;;  %vm17553_vm14 = vcmp.ge.s32.totalorder %v13448_v49, 1  ;;  %v13918_v33 = vld [vmem:[#allocation2 + $0xbf] sm:$0xff] }
  0xb9   : > { %11660 = vmatprep.mubr.msk.f32.mxu0 %vm479_vm4, %v13587_v15  ;;  %vm819_vm2 = vmand %vm17553_vm14, %vm17552_vm7  ;;  %17565 = vst [vmem:[#allocation39_spill] sm:$0xff] %v13918_v33 }
  0xbb   : > { %11502 = vmatmul.mubr.msk.f32.gmra.mrb[12].mxu1 %vm479_vm4, %v910_v62  ;;  %v13922_v62 = vld [vmem:[#allocation2 + $0xc7] sm:$0xff] }
  0xbc   : > { %11661 = vmatmul.mubr.msk.f32.gmra.mrb[18].mxu0 %vm479_vm4, %v13609_v44  ;;  %11504 = vmatprep.mubr.msk.f32.mxu1 %vm479_vm4, %v911_v56  ;;  %v17549_v44 = vld [vmem:[#allocation49_spill] sm:$0xff]  ;;  %17566 = vst [vmem:[#allocation34_spill] sm:$0xff] %v13922_v62  ;;  %v17567_v56 = vld [vmem:[#allocation54_spill] sm:$0xff] }
  0xbd   : > { %11663 = vmatprep.mubr.msk.f32.mxu0 %vm479_vm4, %v13614_v2  ;;  %vm17550_vm3 = vcmp.ge.s32.totalorder %v17549_v44, 1  ;;  %v913_v2 = vsel %vm817_vm10, %v13850_v14, 0.0  ;;  %vm17556_vm10 = vcmp.ge.s32.totalorder %v13506_v24, 1 }
  0xbe   : > { %v912_v15 = vsel %vm17550_vm3, %v13846_v57, 0.0  ;;  %vm17554_vm3 = vcmp.ge.s32.totalorder %v13446_v8, 1  ;;  %vm821_vm14 = vmand %vm17556_vm10, %vm13385_vm13  ;;  %vm17562_vm10 = vcmp.ge.s32.totalorder %v17561_v31, 1 }
  0xbf   : > { %11505 = vmatmul.mubr.msk.f32.gmra.mrb[14].mxu1 %vm479_vm4, %v912_v15  ;;  %v2740_v15 = vld [vmem:[#allocation2 + $0x108] sm:$0xff] }
  0xc0   : > { %11664 = vmatmul.mubr.msk.f32.gmra.mrb[20].mxu0 %vm479_vm4, %v13639_v59  ;;  %11507 = vmatprep.mubr.msk.f32.mxu1 %vm479_vm4, %v913_v2  ;;  %v914_v59 = vsel %vm17554_vm3, %v13864_v18, 0.0  ;;  %v17727_v46 = vld [vmem:[#allocation39_spill] sm:$0xff] }
  0xc1   : > { %11666 = vmatprep.mubr.msk.f32.mxu0 %vm479_vm4, %v13645_v52  ;;  %v915_v52 = vsel %vm819_vm2, %v13868_v23, 0.0  ;;  %vm17560_vm2 = vnez %v17559_v38  ;;  %v13991_v38 = vld [vmem:[#allocation2 + $0xf7] sm:$0xff] }
  0xc2   : > { %vm823_vm6 = vmand %vm17562_vm10, %vm17560_vm2  ;;  %vm17569_vm10 = vcmp.ge.s32.totalorder %v13602_v16, 1  ;;  %17595 = vst [vmem:[#allocation40_spill] sm:$0xff] %v13991_v38 }
  0xc3   : > { %11508 = vmatmul.mubr.msk.f32.gmra.mrb[16].mxu1 %vm479_vm4, %v914_v59  ;;  %v13936_v59 = vld [vmem:[#allocation2 + $0xcf] sm:$0xff] }
  0xc4   : > { %11667 = vmatmul.mubr.msk.f32.gmra.mrb[22].mxu0 %vm479_vm4, %v13664_v17  ;;  %11510 = vmatprep.mubr.msk.f32.mxu1 %vm479_vm4, %v915_v52  ;;  %v17557_v17 = vld [vmem:[#allocation56_spill] sm:$0xff]  ;;  %17572 = vst [vmem:[#allocation43_spill] sm:$0xff] %v13936_v59 }
  0xc5   : > { %11669 = vmatprep.mubr.msk.f32.mxu0 %vm479_vm4, %v13670_v60  ;;  %vm17558_vm3 = vcmp.ge.s32.totalorder %v17557_v17, 1  ;;  %v917_v60 = vsel %vm821_vm14, %v13886_v54, 0.0  ;;  %vm17568_vm14 = vnez %v17567_v56  ;;  %v2741_v52 = vld [vmem:[#allocation2 + $0x110] sm:$0xff] }
  0xc6   : > { %v916_v20 = vsel %vm17558_vm3, %v13882_v10, 0.0  ;;  %vm825_vm9 = vmand %vm17569_vm10, %vm17568_vm14  ;;  %vm17576_vm10 = vcmp.ge.s32.totalorder %v13632_v40, 1 }
  0xc7   : > { %11511 = vmatmul.mubr.msk.f32.gmra.mrb[18].mxu1 %vm479_vm4, %v916_v20  ;;  %v13939_v20 = vld [vmem:[#allocation2 + $0xd7] sm:$0xff] }
  0xc8   : > { %11670 = vmatmul.mubr.msk.f32.gmra.mrb[24].mxu0 %vm479_vm4, %v13690_v45  ;;  %11513 = vmatprep.mubr.msk.f32.mxu1 %vm479_vm4, %v917_v60  ;;  %v17563_v45 = vld [vmem:[#allocation58_spill] sm:$0xff]  ;;  %17573 = vst [vmem:[#allocation41_spill] sm:$0xff] %v13939_v20  ;;  %v17574_v60 = vld [vmem:[#allocation57_spill] sm:$0xff] }
  0xc9   : > { %11672 = vmatprep.mubr.msk.f32.mxu0 %vm479_vm4, %v13693_v19  ;;  %vm17564_vm3 = vcmp.ge.s32.totalorder %v17563_v45, 1  ;;  %v919_v19 = vsel %vm823_vm6, %v13904_v1, 0.0 }
  0xca   : > { %v918_v53 = vsel %vm17564_vm3, %v13900_v3, 0.0  ;;  %vm17575_vm3 = vnez %v17574_v60  ;;  %v17580_v60 = vld [vmem:[#allocation61_spill] sm:$0xff] }
  0xcb   : > { %11514 = vmatmul.mubr.msk.f32.gmra.mrb[20].mxu1 %vm479_vm4, %v918_v53  ;;  %vm827_vm0 = vmand %vm17576_vm10, %vm17575_vm3  ;;  %vm17582_vm10 = vcmp.ge.s32.totalorder %v13667_v48, 1 }
  0xcc   : > { %11673 = vmatmul.mubr.msk.f32.gmra.mrb[26].mxu0 %vm479_vm4, %v13716_v36  ;;  %11516 = vmatprep.mubr.msk.f32.mxu1 %vm479_vm4, %v919_v19  ;;  %v17570_v36 = vld [vmem:[#allocation62_spill] sm:$0xff]  ;;  %v923_v53 = vsel %vm827_vm0, %v13939_v20, 0.0  ;;  %vm17585_vm0 = vcmp.ge.s32.totalorder %v13657_v35, 1  ;;  %v13983_v20 = vld [vmem:[#allocation2 + $0xef] sm:$0xff] }
  0xcd   : > { %11675 = vmatprep.mubr.msk.f32.mxu0 %vm479_vm4, %v13721_v5  ;;  %vm17571_vm6 = vcmp.ge.s32.totalorder %v17570_v36, 1  ;;  %v921_v5 = vsel %vm825_vm9, %v13922_v62, 0.0  ;;  %v13952_v19 = vld [vmem:[#allocation2 + $0xdf] sm:$0xff]  ;;  %vm17581_vm9 = vnez %v17580_v60  ;;  %17590 = vst [vmem:[#allocation45_spill] sm:$0xff] %v13983_v20  ;;  %v3106_v62 = vld [vmem:[#allocation2 + $0x51] sm:$0xff] }
  0xce   : > { %v920_v2 = vsel %vm17571_vm6, %v13918_v33, 0.0  ;;  %vm17577_vm6 = vcmp.ge.s32.totalorder %v13628_v50, 1  ;;  %17578 = vst [vmem:[#allocation36_spill] sm:$0xff] %v13952_v19  ;;  %vm13961_vm3 = vmand %vm17582_vm10, %vm17581_vm9  ;;  %v17588_v60 = vld [vmem:[#allocation21_spill] sm:$0xff]  ;;  %vm17591_vm10 = vcmask 1042432   ;;  %vm17598_vm9 = vcmp.ge.s32.totalorder %v13688_v0, 1 }
  0xcf   : > { %11517 = vmatmul.mubr.msk.f32.gmra.mrb[22].mxu1 %vm479_vm4, %v920_v2 }
  0xd0   : > { %11676 = vmatmul.mubr.msk.f32.gmra.mrb[28].mxu0 %vm479_vm4, %v13739_v28  ;;  %11519 = vmatprep.mubr.msk.f32.mxu1 %vm479_vm4, %v921_v5  ;;  %v922_v28 = vsel %vm17577_vm6, %v13936_v59, 0.0  ;;  %v13969_v5 = vld [vmem:[%s17118_s1 + $0x15] sm:$0x7]  ;;  %v17592_v59 = vld [vmem:[#allocation25_spill] sm:$0xff] }
  0xd1   : > { %11678 = vmatprep.mubr.msk.f32.mxu0 %vm479_vm4, %v2740_v15  ;;  %v12653_v15 = vld [vmem:[#allocation2 + $0x19] sm:$0xff] }
  0xd3   : > { %11520 = vmatmul.mubr.msk.f32.gmra.mrb[24].mxu1 %vm479_vm4, %v922_v28  ;;  %v925_v28 = vsel %vm13961_vm3, %v13955_v7, 0.0  ;;  %vm17601_vm3 = vmmov %vm17591_vm10  ;;  %v17607_v7 = vld [vmem:[#allocation23_spill] sm:$0xff] }
  0xd4   : > { %11679 = vmatmul.mubr.msk.f32.gmra.mrb[30].mxu0 %vm479_vm4, %v2741_v52  ;;  %11522 = vmatprep.mubr.msk.f32.mxu1 %vm479_vm4, %v923_v53  ;;  %v924_v52 = vsel %vm17585_vm0, %v13952_v19, 0.0  ;;  %v12654_v53 = vld [vmem:[#allocation2 + $0x29] sm:$0xff]  ;;  %v17593_v19 = vld [vmem:[#allocation20_spill] sm:$0xff] }
  0xd5   : > { %11683 = vmatprep.mubr.msk.f32.mxu0 %vm479_vm4, %v12653_v15  ;;  %v17586_v15 = vld [vmem:[#allocation15_spill] sm:$0xff]  ;;  %vm17594_vm0 = vnez %v17593_v19  ;;  %v14013_v19 = vld [vmem:[#allocation2 + $0xff] sm:$0xff] }
  0xd6   : > { %vm17587_vm6 = vnez %v17586_v15  ;;  %v3198_v15 = vsel %vm17594_vm0, %v17592_v59, 0.0  ;;  %17604 = vst [vmem:[#allocation50_spill] sm:$0xff] %v14013_v19  ;;  %vm17618_vm0 = vcmp.ge.s32.totalorder %v13267_v30, 1 }
  0xd7   : > { %v17589_v56 = vsel %vm17587_vm6, %v17588_v60, 0.0  ;;  %v17596_v60 = vld [vmem:[#allocation64_spill] sm:$0xff]  ;;  %11523 = vmatmul.mubr.msk.f32.gmra.mrb[26].mxu1 %vm479_vm4, %v924_v52  ;;  %v17606_v52 = vld [vmem:[#allocation29_spill] sm:$0xff] }
  0xd8   : > { %11684 = vmatmul.mubr.msk.f32.vlgmr.msra.gmra.mrb[0].mxu0 %vm479_vm4, %v17589_v56  ;;  %vm17597_vm6 = vnez %v17596_v60  ;;  %11525 = vmatprep.mubr.msk.f32.mxu1 %vm479_vm4, %v925_v28  ;;  %v17605_v60 = vld [vmem:[#allocation27_spill] sm:$0xff] }
  0xd9   : > { %11732 = vmatpush3.msk.msra.mxu0 %vm17591_vm10, %v13698_v9  ;;  %11686 = vmatprep.mubr.msk.f32.mxu0 %vm479_vm4, %v12654_v53  ;;  %vm13997_vm14 = vmand %vm17598_vm9, %vm17597_vm6  ;;  %v17602_v9 = vld [vmem:[#allocation33_spill] sm:$0xff]  ;;  %vm17603_vm10 = vcmp.ge.s32.totalorder %v13681_v27, 1  ;;  %vm17608_vm9 = vnez %v17607_v7  ;;  %v3105_v28 = vld [vmem:[#allocation2 + $0x49] sm:$0xff] }
  0xda   : > { %11781 = vmatprep.subr.msk.mxu0 %vm17601_vm3, %v13969_v5  ;;  %v554_v2 = vand.u32 15, %v17602_v9  ;;  %v926_v59 = vsel %vm17603_vm10, %v13983_v20, 0.0  ;;  %v927_v53 = vsel %vm13997_vm14, %v13991_v38, 0.0  ;;  %v3200_v9 = vsel %vm17608_vm9, %v17606_v52, 0.0  ;;  %v17614_v52 = vld [vmem:[#allocation37_spill] sm:$0xff]  ;;  %v17624_v38 = vld [vmem:[#allocation38_spill] sm:$0xff] }
  0xdb   : > { %11526 = vmatmul.mubr.msk.f32.gmra.mrb[28].mxu1 %vm479_vm4, %v926_v59  ;;  %v17609_v20 = vmov 0  ;;  %vm17613_vm14 = vcmp.ge.s32.totalorder %v13709_v21, 1  ;;  %vm17615_vm10 = vcmp.ge.s32.totalorder %v17614_v52, 1  ;;  %v3107_v7 = vld [vmem:[#allocation2 + $0x59] sm:$0xff]  ;;  %v558_v33 = vand.u32 15, %v17624_v38 }
  0xdc   : > { %11687 = vmatmul.mubr.msk.f32.gmra.mrb[2].mxu0 %vm479_vm4, %v3198_v15  ;;  %vm14021_vm3 = vcmp.le.s32.totalorder %v554_v2, 14  ;;  %v17612_v15 = vld [vmem:[#allocation35_spill] sm:$0xff]  ;;  %11528 = vmatprep.mubr.msk.f32.mxu1 %vm479_vm4, %v927_v53  ;;  %v1844_v2 = vsel %vm17618_vm0, %v3105_v28, 0.0  ;;  %v17619_v53 = vld [vmem:[#allocation28_spill] sm:$0xff]  ;;  %vm17625_vm0 = vcmp.ge.s32.totalorder %v17534_v32, 1  ;;  %v17629_v59 = vmov 0 }
  0xdd   : > { %11689 = vmatprep.mubr.msk.f32.mxu0 %vm479_vm4, %v17605_v60  ;;  %v17610_v20 = vsel %vm14021_vm3, 4294967295, %v17609_v20  ;;  %v556_v56 = vand.u32 15, %v17612_v15  ;;  %v928_v60 = vsel %vm17613_vm14, %v14013_v19, 0.0  ;;  %vm14035_vm9 = vmand %vm17615_vm10, %vm14021_vm3  ;;  %vm17620_vm6 = vnez %v17619_v53  ;;  %v3108_v19 = vld [vmem:[#allocation2 + $0x61] sm:$0xff] }
  0xde   : > { %17611 = vst [vmem:[#allocation49_spill] sm:$0xff] %v17610_v20  ;;  %v3202_v15 = vsel %vm17620_vm6, %v3106_v62, 0.0  ;;  %v1845_v58 = vsel %vm14035_vm9, %v3106_v62, 0.0  ;;  %vm17626_vm10 = vcmp.ge.s32.totalorder %v17539_v43, 1  ;;  %v3204_v38 = vsel %vm14021_vm3, %v3108_v19, 0.0  ;;  %v3110_v62 = vld [vmem:[#allocation2 + $0x71] sm:$0xff] }
  0xdf   : > { %11529 = vmatmul.mubr.msk.f32.gmra.mrb[30].mxu1 %vm479_vm4, %v928_v60  ;;  %vm14045_vm14 = vcmp.le.s32.totalorder %v556_v56, 14  ;;  %v3109_v60 = vld [vmem:[#allocation2 + $0x69] sm:$0xff]  ;;  %vm14068_vm9 = vcmp.le.s32.totalorder %v558_v33, 14  ;;  %v17637_v56 = vmov 0 }
  0xe0   : > { %11690 = vmatmul.mubr.msk.f32.gmra.mrb[4].mxu0 %vm479_vm4, %v3200_v9  ;;  %v17621_v9 = vmov 0  ;;  %11545 = vmatprep.mubr.msk.f32.mxu1 %vm479_vm4, %v1844_v2  ;;  %vm14060_vm6 = vmand %vm17626_vm10, %vm14045_vm14  ;;  %v17630_v59 = vsel %vm14068_vm9, 4294967295, %v17629_v59  ;;  %v17632_v2 = vld [vmem:[#allocation42_spill] sm:$0xff]  ;;  %vm17634_vm10 = vcmp.ge.s32.totalorder %v17544_v42, 1  ;;  %v3206_v33 = vsel %vm14045_vm14, %v3110_v62, 0.0 }
  0xe1   : > { %11692 = vmatprep.mubr.msk.f32.mxu0 %vm479_vm4, %v3105_v28  ;;  %v17622_v9 = vsel %vm14045_vm14, 4294967295, %v17621_v9  ;;  %v1846_v28 = vsel %vm17625_vm0, %v3107_v7, 0.0  ;;  %17631 = vst [vmem:[#allocation56_spill] sm:$0xff] %v17630_v59  ;;  %v1847_v53 = vsel %vm14060_vm6, %v3108_v19, 0.0  ;;  %vm17633_vm0 = vcmp.ge.s32.totalorder %v17537_v4, 1  ;;  %vm14083_vm3 = vmand %vm17634_vm10, %vm14068_vm9  ;;  %v3112_v19 = vld [vmem:[#allocation2 + $0x81] sm:$0xff] }
  0xe2   : > { %17623 = vst [vmem:[#allocation44_spill] sm:$0xff] %v17622_v9  ;;  %v1849_v20 = vsel %vm14083_vm3, %v3110_v62, 0.0  ;;  %vm17642_vm10 = vcmp.ge.s32.totalorder %v17549_v44, 1  ;;  %v3114_v62 = vld [vmem:[#allocation2 + $0x91] sm:$0xff] }
  0xe3   : > { %11546 = vmatmul.mubr.msk.f32.vlgmr.msra.gmra.mrb[8].mxu1 %vm479_vm4, %v1845_v58  ;;  %v17645_v58 = vmov 0 }
  0xe4   : > { %11693 = vmatmul.mubr.msk.f32.gmra.mrb[6].mxu0 %vm479_vm4, %v3202_v15  ;;  %v560_v15 = vand.u32 15, %v17632_v2  ;;  %11548 = vmatprep.mubr.msk.f32.mxu1 %vm479_vm4, %v1846_v28  ;;  %v3111_v28 = vld [vmem:[#allocation2 + $0x79] sm:$0xff] }
  0xe5   : > { %11695 = vmatprep.mubr.msk.f32.mxu0 %vm479_vm4, %v3107_v7  ;;  %v1848_v7 = vsel %vm17633_vm0, %v3109_v60, 0.0  ;;  %vm17641_vm0 = vcmp.ge.s32.totalorder %v17542_v47, 1 }
  0xe6   : > { %vm14091_vm6 = vcmp.le.s32.totalorder %v560_v15, 14  ;;  %v3208_v15 = vsel %vm14068_vm9, %v3112_v19, 0.0 }
  0xe7   : > { %11549 = vmatmul.mubr.msk.f32.gmra.mrb[10].mxu1 %vm479_vm4, %v1847_v53  ;;  %v17638_v56 = vsel %vm14091_vm6, 4294967295, %v17637_v56  ;;  %vm14106_vm14 = vmand %vm17642_vm10, %vm14091_vm6  ;;  %vm17650_vm10 = vcmp.ge.s32.totalorder %v13446_v8, 1  ;;  %v17653_v53 = vmov 0 }
  0xe8   : > { %11696 = vmatmul.mubr.msk.f32.gmra.mrb[8].mxu0 %vm479_vm4, %v3204_v38  ;;  %17639 = vst [vmem:[#allocation60_spill] sm:$0xff] %v17638_v56  ;;  %v17640_v38 = vld [vmem:[#allocation47_spill] sm:$0xff]  ;;  %11551 = vmatprep.mubr.msk.f32.mxu1 %vm479_vm4, %v1848_v7  ;;  %v1851_v9 = vsel %vm14106_vm14, %v3112_v19, 0.0  ;;  %v3116_v19 = vld [vmem:[#allocation2 + $0xa1] sm:$0xff] }
  0xe9   : > { %11698 = vmatprep.mubr.msk.f32.mxu0 %vm479_vm4, %v3109_v60  ;;  %v562_v2 = vand.u32 15, %v17640_v38  ;;  %v1850_v60 = vsel %vm17641_vm0, %v3111_v28, 0.0  ;;  %v3113_v7 = vld [vmem:[#allocation2 + $0x89] sm:$0xff]  ;;  %vm17649_vm0 = vcmp.ge.s32.totalorder %v17547_v29, 1 }
  0xeb   : > { %11552 = vmatmul.mubr.msk.f32.gmra.mrb[12].mxu1 %vm479_vm4, %v1849_v20  ;;  %vm14114_vm3 = vcmp.le.s32.totalorder %v562_v2, 14  ;;  %v3210_v2 = vsel %vm14091_vm6, %v3114_v62, 0.0  ;;  %v17661_v20 = vmov 0 }
  0xec   : > { %11699 = vmatmul.mubr.msk.f32.gmra.mrb[10].mxu0 %vm479_vm4, %v3206_v33  ;;  %v17646_v58 = vsel %vm14114_vm3, 4294967295, %v17645_v58  ;;  %v17648_v33 = vld [vmem:[#allocation51_spill] sm:$0xff]  ;;  %11554 = vmatprep.mubr.msk.f32.mxu1 %vm479_vm4, %v1850_v60  ;;  %vm14129_vm9 = vmand %vm17650_vm10, %vm14114_vm3  ;;  %v3115_v60 = vld [vmem:[#allocation2 + $0x99] sm:$0xff]  ;;  %vm17658_vm10 = vcmp.ge.s32.totalorder %v17557_v17, 1 }
  0xed   : > { %11701 = vmatprep.mubr.msk.f32.mxu0 %vm479_vm4, %v3111_v28  ;;  %17647 = vst [vmem:[#allocation58_spill] sm:$0xff] %v17646_v58  ;;  %v564_v38 = vand.u32 15, %v17648_v33  ;;  %v1852_v28 = vsel %vm17649_vm0, %v3113_v7, 0.0  ;;  %v1853_v59 = vsel %vm14129_vm9, %v3114_v62, 0.0  ;;  %vm17657_vm0 = vcmp.ge.s32.totalorder %v13448_v49, 1  ;;  %v3118_v62 = vld [vmem:[#allocation2 + $0xb1] sm:$0xff] }
  0xef   : > { %11555 = vmatmul.mubr.msk.f32.gmra.mrb[14].mxu1 %vm479_vm4, %v1851_v9  ;;  %vm14137_vm14 = vcmp.le.s32.totalorder %v564_v38, 14  ;;  %v3212_v38 = vsel %vm14114_vm3, %v3116_v19, 0.0  ;;  %v17668_v9 = vmov 0 }
  0xf0   : > { %11702 = vmatmul.mubr.msk.f32.gmra.mrb[12].mxu0 %vm479_vm4, %v3208_v15  ;;  %v17654_v53 = vsel %vm14137_vm14, 4294967295, %v17653_v53  ;;  %v17656_v15 = vld [vmem:[#allocation53_spill] sm:$0xff]  ;;  %11557 = vmatprep.mubr.msk.f32.mxu1 %vm479_vm4, %v1852_v28  ;;  %vm14152_vm6 = vmand %vm17658_vm10, %vm14137_vm14  ;;  %v3117_v28 = vld [vmem:[#allocation2 + $0xa9] sm:$0xff]  ;;  %vm17665_vm10 = vcmp.ge.s32.totalorder %v17563_v45, 1 }
  0xf1   : > { %11704 = vmatprep.mubr.msk.f32.mxu0 %vm479_vm4, %v3113_v7  ;;  %17655 = vst [vmem:[#allocation62_spill] sm:$0xff] %v17654_v53  ;;  %v566_v33 = vand.u32 15, %v17656_v15  ;;  %v1854_v7 = vsel %vm17657_vm0, %v3115_v60, 0.0  ;;  %v1855_v56 = vsel %vm14152_vm6, %v3116_v19, 0.0  ;;  %vm17664_vm0 = vcmp.ge.s32.totalorder %v13506_v24, 1  ;;  %v3120_v19 = vld [vmem:[#allocation2 + $0xc1] sm:$0xff] }
  0xf3   : > { %11558 = vmatmul.mubr.msk.f32.gmra.mrb[16].mxu1 %vm479_vm4, %v1853_v59  ;;  %vm14160_vm9 = vcmp.le.s32.totalorder %v566_v33, 14  ;;  %v3214_v33 = vsel %vm14137_vm14, %v3118_v62, 0.0  ;;  %v17675_v59 = vmov 0 }
  0xf4   : > { %11705 = vmatmul.mubr.msk.f32.gmra.mrb[14].mxu0 %vm479_vm4, %v3210_v2  ;;  %v17662_v20 = vsel %vm14160_vm9, 4294967295, %v17661_v20  ;;  %v17663_v2 = vld [vmem:[#allocation55_spill] sm:$0xff]  ;;  %11560 = vmatprep.mubr.msk.f32.mxu1 %vm479_vm4, %v1854_v7  ;;  %vm14175_vm3 = vmand %vm17665_vm10, %vm14160_vm9  ;;  %v3119_v7 = vld [vmem:[#allocation2 + $0xb9] sm:$0xff]  ;;  %vm17672_vm10 = vcmp.ge.s32.totalorder %v17570_v36, 1 }
  0xf5   : > { %11707 = vmatprep.mubr.msk.f32.mxu0 %vm479_vm4, %v3115_v60  ;;  %v568_v15 = vand.u32 15, %v17663_v2  ;;  %v1856_v60 = vsel %vm17664_vm0, %v3117_v28, 0.0  ;;  %v1857_v58 = vsel %vm14175_vm3, %v3118_v62, 0.0  ;;  %vm17671_vm0 = vcmp.ge.s32.totalorder %v17561_v31, 1  ;;  %v3122_v62 = vld [vmem:[#allocation2 + $0xd1] sm:$0xff] }
  0xf7   : > { %11561 = vmatmul.mubr.msk.f32.gmra.mrb[18].mxu1 %vm479_vm4, %v1855_v56  ;;  %vm14183_vm6 = vcmp.le.s32.totalorder %v568_v15, 14  ;;  %v3216_v15 = vsel %vm14160_vm9, %v3120_v19, 0.0  ;;  %v17683_v56 = vmov 0 }
  0xf8   : > { %11708 = vmatmul.mubr.msk.f32.gmra.mrb[16].mxu0 %vm479_vm4, %v3212_v38  ;;  %v17669_v9 = vsel %vm14183_vm6, 4294967295, %v17668_v9  ;;  %v17670_v38 = vld [vmem:[#allocation59_spill] sm:$0xff]  ;;  %11563 = vmatprep.mubr.msk.f32.mxu1 %vm479_vm4, %v1856_v60  ;;  %vm14198_vm14 = vmand %vm17672_vm10, %vm14183_vm6  ;;  %vm17680_vm10 = vcmp.ge.s32.totalorder %v13628_v50, 1 }
  0xf9   : > { %11710 = vmatprep.mubr.msk.f32.mxu0 %vm479_vm4, %v3117_v28  ;;  %v570_v2 = vand.u32 15, %v17670_v38  ;;  %v1858_v28 = vsel %vm17671_vm0, %v3119_v7, 0.0  ;;  %v3121_v60 = vld [vmem:[#allocation2 + $0xc9] sm:$0xff]  ;;  %v1859_v53 = vsel %vm14198_vm14, %v3120_v19, 0.0  ;;  %vm17679_vm0 = vcmp.ge.s32.totalorder %v13602_v16, 1  ;;  %v14230_v19 = vld [vmem:[#allocation2 + $0xe1] sm:$0xff] }
  0xfb   : > { %11564 = vmatmul.mubr.msk.f32.gmra.mrb[20].mxu1 %vm479_vm4, %v1857_v58  ;;  %vm14206_vm3 = vcmp.le.s32.totalorder %v570_v2, 14  ;;  %v3218_v2 = vsel %vm14183_vm6, %v3122_v62, 0.0  ;;  %v576_v58 = vand.u32 15, %v13661_v6 }
  0xfc   : > { %11711 = vmatmul.mubr.msk.f32.gmra.mrb[18].mxu0 %vm479_vm4, %v3214_v33  ;;  %v17676_v59 = vsel %vm14206_vm3, 4294967295, %v17675_v59  ;;  %v17678_v33 = vld [vmem:[#allocation63_spill] sm:$0xff]  ;;  %11566 = vmatprep.mubr.msk.f32.mxu1 %vm479_vm4, %v1858_v28  ;;  %vm14221_vm9 = vmand %vm17680_vm10, %vm14206_vm3  ;;  %v14228_v28 = vld [vmem:[#allocation2 + $0xd9] sm:$0xff]  ;;  %vm17687_vm10 = vcmp.ge.s32.totalorder %v13657_v35, 1 }
  0xfd   : > { %11713 = vmatprep.mubr.msk.f32.mxu0 %vm479_vm4, %v3119_v7  ;;  %17677 = vst [vmem:[#allocation21_spill] sm:$0xff] %v17676_v59  ;;  %v572_v38 = vand.u32 15, %v17678_v33  ;;  %v1860_v7 = vsel %vm17679_vm0, %v3121_v60, 0.0  ;;  %vm17686_vm0 = vcmp.ge.s32.totalorder %v13632_v40, 1 }
  0xfe   : > { %v1862_v33 = vsel %vm17686_vm0, %v14228_v28, 0.0  ;;  %vm17695_vm0 = vcmp.ge.s32.totalorder %v13667_v48, 1 }
  0xff   : > { %11567 = vmatmul.mubr.msk.f32.gmra.mrb[22].mxu1 %vm479_vm4, %v1859_v53  ;;  %vm14233_vm14 = vcmp.le.s32.totalorder %v572_v38, 14  ;;  %v14260_v38 = vld [vmem:[#allocation2 + $0xf1] sm:$0xff]  ;;  %v17701_v53 = vmov 0 }
 0x100   : > { %11714 = vmatmul.mubr.msk.f32.gmra.mrb[20].mxu0 %vm479_vm4, %v3216_v15  ;;  %v17684_v56 = vsel %vm14233_vm14, 4294967295, %v17683_v56  ;;  %v574_v15 = vand.u32 15, %v13636_v41  ;;  %11569 = vmatprep.mubr.msk.f32.mxu1 %vm479_vm4, %v1860_v7  ;;  %vm14249_vm6 = vmand %vm17687_vm10, %vm14233_vm14  ;;  %v3220_v41 = vsel %vm14206_vm3, %v14230_v19, 0.0  ;;  %17691 = vst [vmem:[#allocation27_spill] sm:$0xff] %v14260_v38  ;;  %v17692_v7 = vmov 0 }
 0x101   : > { %11716 = vmatprep.mubr.msk.f32.mxu0 %vm479_vm4, %v3121_v60  ;;  %17685 = vst [vmem:[#allocation25_spill] sm:$0xff] %v17684_v56  ;;  %v1861_v60 = vsel %vm14221_vm9, %v3122_v62, 0.0  ;;  %v14258_v62 = vld [vmem:[#allocation2 + $0xe9] sm:$0xff]  ;;  %vm17696_vm10 = vcmp.ge.s32.totalorder %v13681_v27, 1  ;;  %v3222_v6 = vsel %vm14233_vm14, %v14260_v38, 0.0  ;;  %vm17705_vm14 = vcmp.ge.s32.totalorder %v13709_v21, 1 }
 0x102   : > { %17690 = vst [vmem:[#allocation33_spill] sm:$0xff] %v14258_v62  ;;  %vm14263_vm9 = vcmp.le.s32.totalorder %v574_v15, 14  ;;  %v1864_v59 = vsel %vm17695_vm0, %v14258_v62, 0.0  ;;  %vm17307_vm0 = vcmp.le.s32.totalorder %v12962_v25, 14  ;;  %v14322_v15 = vld [vmem:[#allocation2 + $0x111] sm:$0xff] }
 0x103   : > { %11570 = vmatmul.mubr.msk.f32.gmra.mrb[24].mxu1 %vm479_vm4, %v1861_v60  ;;  %v17693_v7 = vsel %vm14263_vm9, 4294967295, %v17692_v7  ;;  %vm14280_vm3 = vmand %vm17696_vm10, %vm14263_vm9  ;;  %v14289_v60 = vld [vmem:[#allocation2 + $0xf9] sm:$0xff]  ;;  %vm17704_vm10 = vcmp.ge.s32.totalorder %v13688_v0, 1  ;;  %17709 = vst [vmem:[#allocation47_spill] sm:$0xff] %v14322_v15 }
 0x104   : > { %11717 = vmatmul.mubr.msk.f32.gmra.mrb[22].mxu0 %vm479_vm4, %v3218_v2  ;;  %17694 = vst [vmem:[#allocation29_spill] sm:$0xff] %v17693_v7  ;;  %11572 = vmatprep.mubr.msk.f32.mxu1 %vm479_vm4, %v1862_v33  ;;  %v1863_v2 = vsel %vm14249_vm6, %v14230_v19, 0.0  ;;  %17699 = vst [vmem:[#allocation35_spill] sm:$0xff] %v14289_v60  ;;  %v14291_v33 = vld [vmem:[#allocation2 + $0x101] sm:$0xff]  ;;  %vm14294_vm6 = vcmp.le.s32.totalorder %v576_v58, 14  ;;  %v1866_v56 = vsel %vm17704_vm10, %v14289_v60, 0.0 }
 0x105   : > { %11719 = vmatprep.mubr.msk.f32.mxu0 %vm479_vm4, %v14228_v28  ;;  %17700 = vst [vmem:[#allocation37_spill] sm:$0xff] %v14291_v33  ;;  %v17702_v53 = vsel %vm14294_vm6, 4294967295, %v17701_v53  ;;  %vm14311_vm2 = vmand %vm17705_vm14, %vm14294_vm6  ;;  %v3226_v11 = vsel %vm14294_vm6, %v14322_v15, 0.0  ;;  %v3586_v58 = vld [vmem:[#allocation2 + $0x37] sm:$0xff]  ;;  %v3587_v15 = vld [vmem:[#allocation2 + $0x3f] sm:$0xff] }
 0x106   : > { %17703 = vst [vmem:[#allocation38_spill] sm:$0xff] %v17702_v53  ;;  %v1867_v7 = vsel %vm14311_vm2, %v14291_v33, 0.0 }
 0x107   : > { %11573 = vmatmul.mubr.msk.f32.gmra.mrb[26].mxu1 %vm479_vm4, %v1863_v2  ;;  %v14320_v2 = vld [vmem:[#allocation2 + $0x109] sm:$0xff] }
 0x108   : > { %11720 = vmatmul.mubr.msk.f32.gmra.mrb[24].mxu0 %vm479_vm4, %v3220_v41  ;;  %11575 = vmatprep.mubr.msk.f32.mxu1 %vm479_vm4, %v1864_v59  ;;  %v1865_v41 = vsel %vm14280_vm3, %v14260_v38, 0.0  ;;  %v3224_v59 = vsel %vm14263_vm9, %v14291_v33, 0.0  ;;  %17708 = vst [vmem:[#allocation42_spill] sm:$0xff] %v14320_v2  ;;  %vm14329_vm3 = vmand %vm17307_vm0, %vm13093_vm15  ;;  %vm17316_vm15 = vcmp.le.s32.totalorder %v12980_v37, 14  ;;  %v17713_v33 = vld [vmem:[#allocation30_spill] sm:$0xff] }
 0x109   : > { %11722 = vmatprep.mubr.msk.f32.mxu0 %vm479_vm4, %v14258_v62  ;;  %vm17714_vm2 = vnez %v17713_v33  ;;  %v14365_v33 = vld [vmem:[%s17118_s1 + $0x18] sm:$0x7] }
 0x10a   : > { %v17723_v62 = vld [vmem:[#allocation32_spill] sm:$0xff] }
 0x10b   : > { %11576 = vmatmul.mubr.msk.f32.gmra.mrb[28].mxu1 %vm479_vm4, %v1865_v41  ;;  %v3585_v41 = vld [vmem:[#allocation2 + $0x2f] sm:$0xff] }
 0x10c   : > { %11723 = vmatmul.mubr.msk.f32.gmra.mrb[26].mxu0 %vm479_vm4, %v3222_v6  ;;  %v3584_v6 = vld [vmem:[#allocation2 + $0x27] sm:$0xff]  ;;  %11578 = vmatprep.mubr.msk.f32.mxu1 %vm479_vm4, %v1866_v56  ;;  %v3713_v53 = vsel %vm17316_vm15, %v3585_v41, 0.0 }
 0x10d   : > { %11725 = vmatprep.mubr.msk.f32.mxu0 %vm479_vm4, %v14289_v60  ;;  %v17712_v60 = vld [vmem:[#allocation16_spill] sm:$0xff]  ;;  %v3712_v56 = vsel %vm14329_vm3, %v3584_v6, 0.0  ;;  %v17716_v6 = vld [vmem:[#allocation17_spill] sm:$0xff]  ;;  %v17721_v41 = vld [vmem:[#allocation22_spill] sm:$0xff] }
 0x10e   : > { %vm17315_vm14 = vcmp.le.s32.totalorder %v17712_v60, 14  ;;  %vm740_vm3 = vcmp.le.s32.totalorder %v17716_v6, 14 }
 0x10f   : > { %11579 = vmatmul.mubr.msk.f32.gmra.mrb[30].mxu1 %vm479_vm4, %v1867_v7  ;;  %vm3618_vm10 = vmand %vm17315_vm14, %vm17714_vm2  ;;  %v3588_v7 = vld [vmem:[#allocation2 + $0x47] sm:$0xff]  ;;  %vm17724_vm14 = vnez %v17723_v62 }
 0x110   : > { %11726 = vmatmul.mubr.msk.f32.gmra.mrb[28].mxu0 %vm479_vm4, %v3224_v59  ;;  %v17715_v59 = vld [vmem:[#allocation18_spill] sm:$0xff]  ;;  %v3714_v38 = vsel %vm3618_vm10, %v3586_v58, 0.0  ;;  %vm17720_vm10 = vcmask 1042432   ;;  %v3589_v58 = vld [vmem:[#allocation2 + $0x4f] sm:$0xff] }
 0x111   : > { %11728 = vmatprep.mubr.msk.f32.mxu0 %vm479_vm4, %v14320_v2  ;;  %vm17313_vm0 = vcmp.le.s32.totalorder %v17715_v59, 14  ;;  %v17717_v2 = vld [vmem:[#allocation31_spill] sm:$0xff] }
 0x112   : > { %vm17718_vm6 = vnez %v17717_v2  ;;  %v3715_v2 = vsel %vm740_vm3, %v3587_v15, 0.0  ;;  %v17725_v15 = vld [vmem:[#allocation26_spill] sm:$0xff] }
 0x113   : > { %vm3620_vm9 = vmand %vm17313_vm0, %vm17718_vm6  ;;  %vm742_vm6 = vcmp.le.s32.totalorder %v17721_v41, 14 }
 0x114   : > { %11729 = vmatmul.mubr.msk.f32.gmra.mrb[30].mxu0 %vm479_vm4, %v3226_v11  ;;  %v17719_v11 = vld [vmem:[#allocation24_spill] sm:$0xff]  ;;  %vm17722_vm0 = vmmov %vm17720_vm10 }
 0x115   : > { %11733 = vmatprep.mubr.msk.f32.mxu0 %vm479_vm4, %v3712_v56  ;;  %vm17317_vm2 = vcmp.le.s32.totalorder %v17719_v11, 14  ;;  %v3716_v56 = vsel %vm3620_vm9, %v3588_v7, 0.0  ;;  %vm744_vm9 = vcmp.le.s32.totalorder %v17725_v15, 14 }
 0x116   : > { %vm3622_vm15 = vmand %vm17317_vm2, %vm17724_vm14  ;;  %vm17319_vm14 = vcmp.le.s32.totalorder %v17534_v32, 14  ;;  %v3719_v62 = vsel %vm744_vm9, %v13809_v55, 0.0 }
 0x117   : > { %vm3626_vm2 = vmand %vm17319_vm14, %vm13223_vm12  ;;  %vm17321_vm12 = vcmp.le.s32.totalorder %v17542_v47, 14 }
 0x118   : > { %11734 = vmatmul.mubr.msk.f32.vlgmr.msra.gmra.mrb[0].mxu0 %vm479_vm4, %v3713_v53  ;;  %v3718_v53 = vsel %vm3622_vm15, %v13797_v12, 0.0  ;;  %vm746_vm15 = vcmp.le.s32.totalorder %v17614_v52, 14  ;;  %v3722_v12 = vsel %vm3626_vm2, %v13832_v22, 0.0  ;;  %vm750_vm2 = vcmp.le.s32.totalorder %v17544_v42, 14  ;;  %vm3630_vm14 = vmand %vm17321_vm12, %vm13273_vm11 }
 0x119   : > { %11782 = vmatpush3.msk.msra.mxu0 %vm17720_vm10, %v13969_v5  ;;  %11736 = vmatprep.mubr.msk.f32.mxu0 %vm479_vm4, %v3714_v38  ;;  %vm17318_vm10 = vcmp.le.s32.totalorder %v13267_v30, 14  ;;  %v3717_v5 = vsel %vm742_vm6, %v3589_v58, 0.0  ;;  %v3721_v13 = vsel %vm746_vm15, %v13828_v26, 0.0  ;;  %v3726_v63 = vsel %vm3630_vm14, %v13868_v23, 0.0  ;;  %v17728_v23 = vld [vmem:[#allocation34_spill] sm:$0xff] }
 0x11a   : > { %11831 = vmatprep.subr.msk.mxu0 %vm17722_vm0, %v14365_v33  ;;  %vm3624_vm0 = vmand %vm17318_vm10, %vm13198_vm1  ;;  %vm17320_vm1 = vcmp.le.s32.totalorder %v17537_v4, 14  ;;  %vm17323_vm11 = vcmp.le.s32.totalorder %v13448_v49, 14  ;;  %vm17324_vm14 = vcmp.le.s32.totalorder %v13446_v8, 14 }
 0x11b   : > { %v3720_v38 = vsel %vm3624_vm0, %v13813_v39, 0.0  ;;  %vm748_vm0 = vcmp.le.s32.totalorder %v17539_v43, 14  ;;  %vm3628_vm10 = vmand %vm17320_vm1, %vm13242_vm5  ;;  %vm17322_vm5 = vcmp.le.s32.totalorder %v17547_v29, 14  ;;  %v3725_v39 = vsel %vm750_vm2, %v13864_v18, 0.0 }
 0x11c   : > { %11737 = vmatmul.mubr.msk.f32.gmra.mrb[2].mxu0 %vm479_vm4, %v3715_v2  ;;  %v3723_v34 = vsel %vm748_vm0, %v13846_v57, 0.0  ;;  %v3724_v55 = vsel %vm3628_vm10, %v13850_v14, 0.0  ;;  %vm752_vm10 = vcmp.le.s32.totalorder %v17549_v44, 14  ;;  %vm3632_vm1 = vmand %vm17322_vm5, %vm13314_vm8  ;;  %vm17325_vm8 = vcmp.le.s32.totalorder %v13506_v24, 14  ;;  %v17733_v2 = vld [vmem:[#allocation54_spill] sm:$0xff]  ;;  %v17744_v14 = vld [vmem:[#allocation64_spill] sm:$0xff] }
 0x11d   : > { %11739 = vmatprep.mubr.msk.f32.mxu0 %vm479_vm4, %v3716_v56  ;;  %v3727_v26 = vsel %vm752_vm10, %v13882_v10, 0.0  ;;  %v3728_v22 = vsel %vm3632_vm1, %v13886_v54, 0.0  ;;  %vm3634_vm12 = vmand %vm17323_vm11, %vm17552_vm7  ;;  %v3729_v61 = vsel %vm17324_vm14, %v13900_v3, 0.0  ;;  %vm17326_vm1 = vcmp.le.s32.totalorder %v17557_v17, 14  ;;  %v17729_v10 = vld [vmem:[#allocation52_spill] sm:$0xff]  ;;  %v17731_v54 = vld [vmem:[#allocation43_spill] sm:$0xff] }
 0x11e   : > { %v3730_v57 = vsel %vm3634_vm12, %v13904_v1, 0.0  ;;  %vm3636_vm5 = vmand %vm17325_vm8, %vm13385_vm13  ;;  %vm17327_vm7 = vcmp.le.s32.totalorder %v17561_v31, 14  ;;  %v3731_v18 = vsel %vm17326_vm1, %v17727_v46, 0.0  ;;  %vm17328_vm12 = vcmp.le.s32.totalorder %v17563_v45, 14  ;;  %v17732_v1 = vld [vmem:[#allocation41_spill] sm:$0xff]  ;;  %v17735_v56 = vld [vmem:[#allocation36_spill] sm:$0xff] }
 0x11f   : > { %v3732_v51 = vsel %vm3636_vm5, %v17728_v23, 0.0  ;;  %vm17730_vm11 = vnez %v17729_v10  ;;  %vm17329_vm13 = vcmp.le.s32.totalorder %v13602_v16, 14  ;;  %v3733_v3 = vsel %vm17328_vm12, %v17731_v54, 0.0  ;;  %v3615_v23 = vld [vmem:[#allocation2 + $0x11f] sm:$0xff] }
 0x120   : > { %11740 = vmatmul.mubr.msk.f32.gmra.mrb[4].mxu0 %vm479_vm4, %v3717_v5  ;;  %vm3638_vm14 = vmand %vm17327_vm7, %vm17730_vm11  ;;  %vm760_vm5 = vcmp.le.s32.totalorder %v17570_v36, 14  ;;  %vm17734_vm8 = vnez %v17733_v2  ;;  %vm17330_vm11 = vcmp.le.s32.totalorder %v13632_v40, 14  ;;  %v17736_v5 = vld [vmem:[#allocation46_spill] sm:$0xff] }
 0x121   : > { %11742 = vmatprep.mubr.msk.f32.mxu0 %vm479_vm4, %v3718_v53  ;;  %v3734_v7 = vsel %vm3638_vm14, %v17732_v1, 0.0  ;;  %vm3640_vm1 = vmand %vm17329_vm13, %vm17734_vm8  ;;  %v3735_v58 = vsel %vm760_vm5, %v17735_v56, 0.0  ;;  %vm17331_vm14 = vcmp.le.s32.totalorder %v13628_v50, 14  ;;  %vm17332_vm8 = vcmp.le.s32.totalorder %v13667_v48, 14  ;;  %v4103_v1 = vld [vmem:[#allocation2 + $0x38] sm:$0xff]  ;;  %v4104_v56 = vld [vmem:[#allocation2 + $0x40] sm:$0xff] }
 0x122   : > { %v3736_v53 = vsel %vm3640_vm1, %v17736_v5, 0.0  ;;  %vm17334_vm1 = vcmp.le.s32.totalorder %v13657_v35, 14  ;;  %v4200_v5 = vsel %vm740_vm3, %v4104_v56, 0.0  ;;  %v4118_v56 = vld [vmem:[#allocation2 + $0xb0] sm:$0xff] }
 0x124   : > { %11743 = vmatmul.mubr.msk.f32.gmra.mrb[6].mxu0 %vm479_vm4, %v3719_v62  ;;  %v17737_v62 = vld [vmem:[#allocation57_spill] sm:$0xff] }
 0x125   : > { %11745 = vmatprep.mubr.msk.f32.mxu0 %vm479_vm4, %v3720_v38  ;;  %vm17738_vm7 = vnez %v17737_v62  ;;  %v17739_v38 = vld [vmem:[#allocation45_spill] sm:$0xff]  ;;  %v4106_v62 = vld [vmem:[#allocation2 + $0x50] sm:$0xff] }
 0x126   : > { %vm3642_vm12 = vmand %vm17330_vm11, %vm17738_vm7  ;;  %vm17335_vm11 = vcmp.le.s32.totalorder %v13688_v0, 14 }
 0x128   : > { %11746 = vmatmul.mubr.msk.f32.gmra.mrb[8].mxu0 %vm479_vm4, %v3721_v13  ;;  %v3737_v13 = vsel %vm17331_vm14, %v17739_v38, 0.0  ;;  %vm17745_vm14 = vnez %v17744_v14  ;;  %v4107_v38 = vld [vmem:[#allocation2 + $0x58] sm:$0xff]  ;;  %v4113_v14 = vld [vmem:[#allocation2 + $0x88] sm:$0xff] }
 0x129   : > { %11748 = vmatprep.mubr.msk.f32.mxu0 %vm479_vm4, %v3722_v12  ;;  %v17740_v12 = vld [vmem:[#allocation40_spill] sm:$0xff] }
 0x12c   : > { %11749 = vmatmul.mubr.msk.f32.gmra.mrb[10].mxu0 %vm479_vm4, %v3723_v34  ;;  %v3738_v34 = vsel %vm3642_vm12, %v17740_v12, 0.0  ;;  %vm17336_vm12 = vcmp.le.s32.totalorder %v13681_v27, 14  ;;  %v4108_v12 = vld [vmem:[#allocation2 + $0x60] sm:$0xff] }
 0x12d   : > { %11751 = vmatprep.mubr.msk.f32.mxu0 %vm479_vm4, %v3724_v55  ;;  %v3612_v55 = vld [vmem:[#allocation2 + $0x107] sm:$0xff] }
 0x130   : > { %11752 = vmatmul.mubr.msk.f32.gmra.mrb[12].mxu0 %vm479_vm4, %v3725_v39  ;;  %v17741_v39 = vld [vmem:[#allocation61_spill] sm:$0xff] }
 0x131   : > { %11754 = vmatprep.mubr.msk.f32.mxu0 %vm479_vm4, %v3726_v63  ;;  %vm17742_vm13 = vnez %v17741_v39  ;;  %v17743_v63 = vld [vmem:[#allocation50_spill] sm:$0xff] }
 0x132   : > { %vm3644_vm7 = vmand %vm17332_vm8, %vm17742_vm13  ;;  %vm17333_vm8 = vcmp.le.s32.totalorder %v13709_v21, 14 }
 0x133   : > { %vm3646_vm13 = vmand %vm17335_vm11, %vm17745_vm14  ;;  %v3743_v10 = vsel %vm17333_vm8, %v3615_v23, 0.0  ;;  %vm17746_vm14 = vcmp.le.s32.totalorder %v12962_v25, 14  ;;  %vm17749_vm8 = vcmask 1042432   ;;  %v4114_v23 = vld [vmem:[#allocation2 + $0x90] sm:$0xff] }
 0x134   : > { %11755 = vmatmul.mubr.msk.f32.gmra.mrb[14].mxu0 %vm479_vm4, %v3727_v26  ;;  %v3739_v26 = vsel %vm17334_vm1, %v17743_v63, 0.0  ;;  %v4110_v63 = vld [vmem:[#allocation2 + $0x70] sm:$0xff] }
 0x135   : > { %11757 = vmatprep.mubr.msk.f32.mxu0 %vm479_vm4, %v3728_v22  ;;  %v3740_v22 = vsel %vm3644_vm7, %v3612_v55, 0.0  ;;  %vm17747_vm7 = vcmp.le.s32.totalorder %v12980_v37, 14  ;;  %v4204_v55 = vsel %vm744_vm9, %v4108_v12, 0.0 }
 0x138   : > { %11758 = vmatmul.mubr.msk.f32.gmra.mrb[16].mxu0 %vm479_vm4, %v3729_v61  ;;  %v3613_v61 = vld [vmem:[#allocation2 + $0x10f] sm:$0xff] }
 0x139   : > { %11760 = vmatprep.mubr.msk.f32.mxu0 %vm479_vm4, %v3730_v57  ;;  %v3614_v57 = vld [vmem:[#allocation2 + $0x117] sm:$0xff]  ;;  %v3741_v46 = vsel %vm17336_vm12, %v3613_v61, 0.0 }
 0x13c   : > { %11761 = vmatmul.mubr.msk.f32.gmra.mrb[18].mxu0 %vm479_vm4, %v3731_v18  ;;  %v3742_v18 = vsel %vm3646_vm13, %v3614_v57, 0.0  ;;  %vm17748_vm13 = vcmp.le.s32.totalorder %v17712_v60, 14  ;;  %v4112_v57 = vld [vmem:[#allocation2 + $0x80] sm:$0xff] }
 0x13d   : > { %11763 = vmatprep.mubr.msk.f32.mxu0 %vm479_vm4, %v3732_v51  ;;  %v4101_v51 = vld [vmem:[#allocation2 + $0x28] sm:$0xff]  ;;  %v4199_v2 = vsel %vm17748_vm13, %v4103_v1, 0.0  ;;  %vm17753_vm13 = vcmp.le.s32.totalorder %v17534_v32, 14 }
 0x13e   : > { %v4197_v54 = vsel %vm17746_vm14, %v4101_v51, 0.0  ;;  %vm17750_vm14 = vcmp.le.s32.totalorder %v17715_v59, 14  ;;  %v4115_v51 = vld [vmem:[#allocation2 + $0x98] sm:$0xff]  ;;  %v4117_v1 = vld [vmem:[#allocation2 + $0xa8] sm:$0xff] }
 0x140   : > { %11764 = vmatmul.mubr.msk.f32.gmra.mrb[20].mxu0 %vm479_vm4, %v3733_v3  ;;  %v4102_v3 = vld [vmem:[#allocation2 + $0x30] sm:$0xff] }
 0x141   : > { %11766 = vmatprep.mubr.msk.f32.mxu0 %vm479_vm4, %v3734_v7  ;;  %v4198_v7 = vsel %vm17747_vm7, %v4102_v3, 0.0  ;;  %vm17751_vm7 = vcmp.le.s32.totalorder %v17719_v11, 14  ;;  %v4116_v3 = vld [vmem:[#allocation2 + $0xa0] sm:$0xff] }
 0x144   : > { %11767 = vmatmul.mubr.msk.f32.gmra.mrb[22].mxu0 %vm479_vm4, %v3735_v58  ;;  %v4105_v58 = vld [vmem:[#allocation2 + $0x48] sm:$0xff] }
 0x145   : > { %11769 = vmatprep.mubr.msk.f32.mxu0 %vm479_vm4, %v3736_v53  ;;  %v4201_v53 = vsel %vm17750_vm14, %v4105_v58, 0.0  ;;  %vm17754_vm14 = vcmp.le.s32.totalorder %v17537_v4, 14  ;;  %v4119_v58 = vld [vmem:[#allocation2 + $0xb8] sm:$0xff] }
 0x148   : > { %11770 = vmatmul.mubr.msk.f32.gmra.mrb[24].mxu0 %vm479_vm4, %v3737_v13  ;;  %v4202_v13 = vsel %vm742_vm6, %v4106_v62, 0.0  ;;  %v4120_v62 = vld [vmem:[#allocation2 + $0xc0] sm:$0xff] }
 0x149   : > { %11772 = vmatprep.mubr.msk.f32.mxu0 %vm479_vm4, %v3738_v34  ;;  %v4109_v34 = vld [vmem:[#allocation2 + $0x68] sm:$0xff] }
 0x14c   : > { %11773 = vmatmul.mubr.msk.f32.gmra.mrb[26].mxu0 %vm479_vm4, %v3739_v26  ;;  %v4111_v26 = vld [vmem:[#allocation2 + $0x78] sm:$0xff] }
 0x14d   : > { %11775 = vmatprep.mubr.msk.f32.mxu0 %vm479_vm4, %v3740_v22  ;;  %v4206_v22 = vsel %vm746_vm15, %v4110_v63, 0.0  ;;  %v4207_v61 = vsel %vm17753_vm13, %v4111_v26, 0.0  ;;  %vm17757_vm13 = vcmp.le.s32.totalorder %v13446_v8, 14 }
 0x150   : > { %11776 = vmatmul.mubr.msk.f32.gmra.mrb[28].mxu0 %vm479_vm4, %v3741_v46  ;;  %v4208_v46 = vsel %vm748_vm0, %v4112_v57, 0.0 }
 0x151   : > { %11778 = vmatprep.mubr.msk.f32.mxu0 %vm479_vm4, %v3742_v18  ;;  %v4209_v18 = vsel %vm17754_vm14, %v4113_v14, 0.0  ;;  %vm17758_vm14 = vcmp.le.s32.totalorder %v13448_v49, 14  ;;  %v4125_v14 = vld [vmem:[#allocation2 + $0xe8] sm:$0xff] }
 0x154   : > { %11779 = vmatmul.mubr.msk.f32.gmra.mrb[30].mxu0 %vm479_vm4, %v3743_v10  ;;  %v4210_v10 = vsel %vm750_vm2, %v4114_v23, 0.0 }
 0x155   : > { %11783 = vmatprep.mubr.msk.f32.mxu0 %vm479_vm4, %v4197_v54 }
 0x158   : > { %11784 = vmatmul.mubr.msk.f32.vlgmr.msra.gmra.mrb[0].mxu0 %vm479_vm4, %v4198_v7  ;;  %v4212_v7 = vsel %vm752_vm10, %v4116_v3, 0.0 }
 0x159   : > { %11832 = vmatpush3.msk.msra.mxu0 %vm17749_vm8, %v14365_v33  ;;  %11786 = vmatprep.mubr.msk.f32.mxu0 %vm479_vm4, %v4199_v2  ;;  %v4203_v33 = vsel %vm17751_vm7, %v4107_v38, 0.0  ;;  %vm17752_vm8 = vcmp.le.s32.totalorder %v13267_v30, 14  ;;  %vm17755_vm7 = vcmp.le.s32.totalorder %v17542_v47, 14  ;;  %v4121_v38 = vld [vmem:[#allocation2 + $0xc8] sm:$0xff] }
 0x15a   : > { %v4205_v39 = vsel %vm17752_vm8, %v4109_v34, 0.0  ;;  %v4211_v54 = vsel %vm17755_vm7, %v4115_v51, 0.0  ;;  %vm17756_vm8 = vcmp.le.s32.totalorder %v17547_v29, 14  ;;  %vm17759_vm7 = vcmp.le.s32.totalorder %v17557_v17, 14  ;;  %v4122_v34 = vld [vmem:[#allocation2 + $0xd0] sm:$0xff] }
 0x15b   : > { %v4213_v2 = vsel %vm17756_vm8, %v4117_v1, 0.0  ;;  %vm17760_vm8 = vcmp.le.s32.totalorder %v13506_v24, 14  ;;  %v4126_v51 = vld [vmem:[#allocation2 + $0xf0] sm:$0xff] }
 0x15c   : > { %11787 = vmatmul.mubr.msk.f32.gmra.mrb[2].mxu0 %vm479_vm4, %v4200_v5  ;;  %v4214_v5 = vsel %vm17757_vm13, %v4118_v56, 0.0  ;;  %v4217_v12 = vsel %vm17760_vm8, %v4121_v38, 0.0  ;;  %vm17761_vm13 = vcmp.le.s32.totalorder %v17563_v45, 14  ;;  %vm17764_vm8 = vcmp.le.s32.totalorder %v13628_v50, 14  ;;  %v4131_v38 = vld [vmem:[#allocation2 + $0x118] sm:$0xff] }
 0x15d   : > { %11789 = vmatprep.mubr.msk.f32.mxu0 %vm479_vm4, %v4201_v53  ;;  %v4215_v53 = vsel %vm17758_vm14, %v4119_v58, 0.0  ;;  %v4218_v63 = vsel %vm17761_vm13, %v4122_v34, 0.0  ;;  %vm17762_vm14 = vcmp.le.s32.totalorder %v17561_v31, 14  ;;  %v4222_v3 = vsel %vm17764_vm8, %v4126_v51, 0.0  ;;  %v4129_v58 = vld [vmem:[#allocation2 + $0x108] sm:$0xff]  ;;  %v4132_v34 = vld [vmem:[#allocation2 + $0x120] sm:$0xff] }
 0x15e   : > { %vm17765_vm13 = vcmp.le.s32.totalorder %v13632_v40, 14 }
 0x160   : > { %11790 = vmatmul.mubr.msk.f32.gmra.mrb[4].mxu0 %vm479_vm4, %v4202_v13  ;;  %v4216_v13 = vsel %vm17759_vm7, %v4120_v62, 0.0  ;;  %vm17763_vm7 = vcmp.le.s32.totalorder %v13602_v16, 14  ;;  %v4130_v62 = vld [vmem:[#allocation2 + $0x110] sm:$0xff] }
 0x161   : > { %11792 = vmatprep.mubr.msk.f32.mxu0 %vm479_vm4, %v4203_v33  ;;  %v4221_v23 = vsel %vm17763_vm7, %v4125_v14, 0.0  ;;  %vm17767_vm7 = vcmp.le.s32.totalorder %v13709_v21, 14  ;;  %v4587_v14 = vld [vmem:[#allocation2 + $0x31] sm:$0xff] }
 0x164   : > { %11793 = vmatmul.mubr.msk.f32.gmra.mrb[6].mxu0 %vm479_vm4, %v4204_v55 }
 0x165   : > { %11795 = vmatprep.mubr.msk.f32.mxu0 %vm479_vm4, %v4205_v39  ;;  %v4123_v39 = vld [vmem:[#allocation2 + $0xd8] sm:$0xff] }
 0x168   : > { %11796 = vmatmul.mubr.msk.f32.gmra.mrb[8].mxu0 %vm479_vm4, %v4206_v22  ;;  %v4219_v22 = vsel %vm17762_vm14, %v4123_v39, 0.0  ;;  %vm17766_vm14 = vcmp.le.s32.totalorder %v13667_v48, 14  ;;  %v4586_v39 = vld [vmem:[#allocation2 + $0x29] sm:$0xff] }
 0x169   : > { %11798 = vmatprep.mubr.msk.f32.mxu0 %vm479_vm4, %v4207_v61  ;;  %v4124_v61 = vld [vmem:[#allocation2 + $0xe0] sm:$0xff] }
 0x16c   : > { %11799 = vmatmul.mubr.msk.f32.gmra.mrb[10].mxu0 %vm479_vm4, %v4208_v46  ;;  %v4220_v46 = vsel %vm760_vm5, %v4124_v61, 0.0 }
 0x16d   : > { %11801 = vmatprep.mubr.msk.f32.mxu0 %vm479_vm4, %v4209_v18 }
 0x170   : > { %11802 = vmatmul.mubr.msk.f32.gmra.mrb[12].mxu0 %vm479_vm4, %v4210_v10 }
 0x171   : > { %11804 = vmatprep.mubr.msk.f32.mxu0 %vm479_vm4, %v4211_v54  ;;  %v4127_v54 = vld [vmem:[#allocation2 + $0xf8] sm:$0xff] }
 0x174   : > { %11805 = vmatmul.mubr.msk.f32.gmra.mrb[14].mxu0 %vm479_vm4, %v4212_v7  ;;  %v4223_v7 = vsel %vm17765_vm13, %v4127_v54, 0.0  ;;  %vm17770_vm13 = vcmp.le.s32.totalorder %v12980_v37, 14  ;;  %v4589_v54 = vld [vmem:[#allocation2 + $0x41] sm:$0xff]  ;;  %v4590_v37 = vld [vmem:[#allocation2 + $0x49] sm:$0xff] }
 0x175   : > { %11807 = vmatprep.mubr.msk.f32.mxu0 %vm479_vm4, %v4213_v2  ;;  %v14594_v33 = vpop.f32.mrb[0].mxu1  ;;  %v4128_v2 = vld [vmem:[#allocation2 + $0x100] sm:$0xff] }
 0x176   : > { %v14598_v55 = vpop.f32.mrb[1].mxu1 }
 0x178   : > { %11808 = vmatmul.mubr.msk.f32.gmra.mrb[16].mxu0 %vm479_vm4, %v4214_v5  ;;  %v4224_v5 = vsel %vm17334_vm1, %v4128_v2, 0.0  ;;  %vm17771_vm1 = vcmp.le.s32.totalorder %v12962_v25, 14  ;;  %v4591_v2 = vld [vmem:[#allocation2 + $0x51] sm:$0xff] }
 0x179   : > { %11810 = vmatprep.mubr.msk.f32.mxu0 %vm479_vm4, %v4215_v53  ;;  %v14604_v26 = vpop.f32.mrb[2].mxu1  ;;  %v4225_v53 = vsel %vm17766_vm14, %v4129_v58, 0.0  ;;  %v4714_v61 = vsel %vm17771_vm1, %v4586_v39, 0.0  ;;  %vm17775_vm1 = vcmp.le.s32.totalorder %v17715_v59, 14  ;;  %v17776_v58 = vld [vmem:[#allocation23_spill] sm:$0xff]  ;;  %v4597_v39 = vld [vmem:[#allocation2 + $0x81] sm:$0xff] }
 0x17a   : > { %v14608_v57 = vpop.f32.mrb[3].mxu1  ;;  %v4594_v59 = vld [vmem:[#allocation2 + $0x69] sm:$0xff] }
 0x17c   : > { %11811 = vmatmul.mubr.msk.f32.gmra.mrb[18].mxu0 %vm479_vm4, %v4216_v13  ;;  %v4226_v13 = vsel %vm17336_vm12, %v4130_v62, 0.0  ;;  %v17779_v62 = vld [vmem:[#allocation28_spill] sm:$0xff] }
 0x17d   : > { %11813 = vmatprep.mubr.msk.f32.mxu0 %vm479_vm4, %v4217_v12  ;;  %v14614_v18 = vpop.f32.mrb[4].mxu1  ;;  %v4227_v12 = vsel %vm17335_vm11, %v4131_v38, 0.0  ;;  %vm17772_vm11 = vcmp.le.s32.totalorder %v17712_v60, 14  ;;  %v4592_v60 = vld [vmem:[#allocation2 + $0x59] sm:$0xff] }
 0x17e   : > { %v14618_v10 = vpop.f32.mrb[5].mxu1 }
 0x180   : > { %11814 = vmatmul.mubr.msk.f32.gmra.mrb[20].mxu0 %vm479_vm4, %v4218_v63  ;;  %v4228_v63 = vsel %vm17767_vm7, %v4132_v34, 0.0 }
 0x181   : > { %11816 = vmatprep.mubr.msk.f32.mxu0 %vm479_vm4, %v4219_v22  ;;  %v14624_v1 = vpop.f32.mrb[6].mxu1  ;;  %v17768_v22 = vld [vmem:[#allocation15_spill] sm:$0xff] }
 0x182   : > { %v14628_v56 = vpop.f32.mrb[7].mxu1  ;;  %vm17769_vm8 = vnez %v17768_v22 }
 0x183   : > { %vm4619_vm14 = vmand %vm17770_vm13, %vm17769_vm8  ;;  %vm17777_vm8 = vnez %v17776_v58 }
 0x184   : > { %11817 = vmatmul.mubr.msk.f32.gmra.mrb[22].mxu0 %vm479_vm4, %v4220_v46  ;;  %v4588_v46 = vld [vmem:[#allocation2 + $0x39] sm:$0xff] }
 0x185   : > { %11819 = vmatprep.mubr.msk.f32.mxu0 %vm479_vm4, %v4221_v23  ;;  %v4715_v23 = vsel %vm4619_vm14, %v4587_v14, 0.0  ;;  %v4716_v51 = vsel %vm17772_vm11, %v4588_v46, 0.0  ;;  %vm4623_vm11 = vmand %vm742_vm6, %vm17777_vm8  ;;  %vm17781_vm6 = vcmp.le.s32.totalorder %v13267_v30, 14  ;;  %v4598_v30 = vld [vmem:[#allocation2 + $0x89] sm:$0xff]  ;;  %v17788_v14 = vld [vmem:[#allocation56_spill] sm:$0xff] }
 0x186   : > { %v4719_v6 = vsel %vm4623_vm11, %v4591_v2, 0.0  ;;  %v4722_v38 = vsel %vm17781_vm6, %v4594_v59, 0.0  ;;  %vm17789_vm11 = vnez %v17788_v14  ;;  %v17798_v2 = vld [vmem:[#allocation62_spill] sm:$0xff] }
 0x188   : > { %11820 = vmatmul.mubr.msk.f32.gmra.mrb[24].mxu0 %vm479_vm4, %v4222_v3  ;;  %v17773_v3 = vld [vmem:[#allocation20_spill] sm:$0xff] }
 0x189   : > { %11822 = vmatprep.mubr.msk.f32.mxu0 %vm479_vm4, %v4223_v7  ;;  %vm17774_vm7 = vnez %v17773_v3  ;;  %v4718_v7 = vsel %vm17775_vm1, %v4590_v37, 0.0  ;;  %v4603_v3 = vld [vmem:[#allocation2 + $0xb1] sm:$0xff]  ;;  %v17794_v37 = vld [vmem:[#allocation58_spill] sm:$0xff] }
 0x18a   : > { %vm4621_vm12 = vmand %vm740_vm3, %vm17774_vm7  ;;  %vm17778_vm3 = vcmp.le.s32.totalorder %v17719_v11, 14  ;;  %v4596_v11 = vld [vmem:[#allocation2 + $0x79] sm:$0xff]  ;;  %vm17795_vm6 = vnez %v17794_v37 }
 0x18b   : > { %v4717_v25 = vsel %vm4621_vm12, %v4589_v54, 0.0  ;;  %vm17780_vm12 = vnez %v17779_v62  ;;  %v17806_v62 = vld [vmem:[#allocation33_spill] sm:$0xff] }
 0x18c   : > { %11823 = vmatmul.mubr.msk.f32.gmra.mrb[26].mxu0 %vm479_vm4, %v4224_v5  ;;  %v4720_v5 = vsel %vm17778_vm3, %v4592_v60, 0.0  ;;  %vm4625_vm13 = vmand %vm744_vm9, %vm17780_vm12  ;;  %vm17784_vm9 = vcmp.le.s32.totalorder %v17534_v32, 14  ;;  %v4600_v32 = vld [vmem:[#allocation2 + $0x99] sm:$0xff] }
 0x18d   : > { %11825 = vmatprep.mubr.msk.f32.mxu0 %vm479_vm4, %v4225_v53  ;;  %v4593_v53 = vld [vmem:[#allocation2 + $0x61] sm:$0xff]  ;;  %v4724_v34 = vsel %vm17784_vm9, %v4596_v11, 0.0  ;;  %vm4631_vm3 = vmand %vm750_vm2, %vm17789_vm11  ;;  %vm17793_vm2 = vcmp.le.s32.totalorder %v17547_v29, 14  ;;  %vm17799_vm9 = vnez %v17798_v2  ;;  %v4606_v29 = vld [vmem:[#allocation2 + $0xc9] sm:$0xff]  ;;  %vm17802_vm11 = vnez %v17662_v20 }
 0x18e   : > { %v4721_v41 = vsel %vm4625_vm13, %v4593_v53, 0.0 }
 0x190   : > { %11826 = vmatmul.mubr.msk.f32.gmra.mrb[28].mxu0 %vm479_vm4, %v4226_v13  ;;  %v4595_v13 = vld [vmem:[#allocation2 + $0x71] sm:$0xff] }
 0x191   : > { %11828 = vmatprep.mubr.msk.f32.mxu0 %vm479_vm4, %v4227_v12  ;;  %v17782_v12 = vld [vmem:[#allocation49_spill] sm:$0xff] }
 0x192   : > { %vm17783_vm14 = vnez %v17782_v12 }
 0x193   : > { %vm4627_vm7 = vmand %vm746_vm15, %vm17783_vm14  ;;  %vm17787_vm15 = vcmp.le.s32.totalorder %v17537_v4, 14  ;;  %v4602_v4 = vld [vmem:[#allocation2 + $0xa9] sm:$0xff]  ;;  %vm17796_vm14 = vcmp.le.s32.totalorder %v13446_v8, 14 }
 0x194   : > { %11829 = vmatmul.mubr.msk.f32.gmra.mrb[30].mxu0 %vm479_vm4, %v4228_v63  ;;  %v4723_v15 = vsel %vm4627_vm7, %v4595_v13, 0.0  ;;  %v17785_v63 = vld [vmem:[#allocation44_spill] sm:$0xff]  ;;  %v4726_v22 = vsel %vm17787_vm15, %v4598_v30, 0.0  ;;  %v4730_v54 = vsel %vm17793_vm2, %v4602_v4, 0.0  ;;  %vm4635_vm7 = vmand %vm17796_vm14, %vm17795_vm6  ;;  %vm17801_vm15 = vcmp.le.s32.totalorder %v13506_v24, 14  ;;  %v17817_v13 = vld [vmem:[#allocation37_spill] sm:$0xff] }
 0x195   : > { %11833 = vmatprep.mubr.msk.f32.mxu0 %vm479_vm4, %v4714_v61  ;;  %vm17786_vm1 = vnez %v17785_v63  ;;  %v4599_v61 = vld [vmem:[#allocation2 + $0x91] sm:$0xff]  ;;  %v4731_v44 = vsel %vm4635_vm7, %v4603_v3, 0.0  ;;  %v4734_v60 = vsel %vm17801_vm15, %v4606_v29, 0.0  ;;  %vm17807_vm6 = vcmp.le.s32.totalorder %v13602_v16, 14 }
 0x196   : > { %vm4629_vm8 = vmand %vm748_vm0, %vm17786_vm1  ;;  %v4727_v43 = vsel %vm4631_vm3, %v4599_v61, 0.0  ;;  %vm17790_vm0 = vcmp.le.s32.totalorder %v17542_v47, 14  ;;  %v4604_v47 = vld [vmem:[#allocation2 + $0xb9] sm:$0xff]  ;;  %vm17800_vm1 = vcmp.le.s32.totalorder %v17557_v17, 14  ;;  %vm17803_vm3 = vcmp.le.s32.totalorder %v17563_v45, 14  ;;  %v17825_v63 = vld [vmem:[#allocation47_spill] sm:$0xff] }
 0x197   : > { %v4725_v52 = vsel %vm4629_vm8, %v4597_v39, 0.0  ;;  %v4728_v46 = vsel %vm17790_vm0, %v4600_v32, 0.0  ;;  %vm4637_vm8 = vmand %vm17800_vm1, %vm17799_vm9  ;;  %vm17810_vm7 = vcmp.le.s32.totalorder %v13628_v50, 14  ;;  %vm17816_vm1 = vcmp.le.s32.totalorder %v13657_v35, 14  ;;  %v4616_v39 = vld [vmem:[#allocation2 + $0x119] sm:$0xff]  ;;  %v17828_v61 = vld [vmem:[#allocation38_spill] sm:$0xff] }
 0x198   : > { %11834 = vmatmul.mubr.msk.f32.vlgmr.msra.gmra.mrb[0].mxu0 %vm479_vm4, %v4715_v23  ;;  %v4601_v23 = vld [vmem:[#allocation2 + $0xa1] sm:$0xff]  ;;  %vm4639_vm0 = vmand %vm17803_vm3, %vm17802_vm11  ;;  %vm17820_vm15 = vcmp.le.s32.totalorder %v13667_v48, 14  ;;  %vm17823_vm3 = vcmp.le.s32.totalorder %v13681_v27, 14 }
 0x199   : > { %11836 = vmatprep.mubr.msk.f32.mxu0 %vm479_vm4, %v4716_v51  ;;  %v17791_v51 = vld [vmem:[#allocation60_spill] sm:$0xff] }
 0x19a   : > { %vm17792_vm12 = vnez %v17791_v51 }
 0x19b   : > { %vm4633_vm13 = vmand %vm752_vm10, %vm17792_vm12  ;;  %vm17797_vm10 = vcmp.le.s32.totalorder %v13448_v49, 14  ;;  %vm17804_vm12 = vcmp.le.s32.totalorder %v17561_v31, 14  ;;  %v4738_v31 = vsel %vm17807_vm6, %v17806_v62, 0.0 }
 0x19c   : > { %11837 = vmatmul.mubr.msk.f32.gmra.mrb[2].mxu0 %vm479_vm4, %v4717_v25  ;;  %v4729_v42 = vsel %vm4633_vm13, %v4601_v23, 0.0  ;;  %v4732_v25 = vsel %vm17797_vm10, %v4604_v47, 0.0  ;;  %v4736_v24 = vsel %vm17804_vm12, %v14228_v28, 0.0  ;;  %vm17805_vm13 = vnez %v17669_v9  ;;  %v17808_v28 = vld [vmem:[#allocation21_spill] sm:$0xff]  ;;  %v17811_v9 = vld [vmem:[#allocation27_spill] sm:$0xff] }
 0x19d   : > { %11839 = vmatprep.mubr.msk.f32.mxu0 %vm479_vm4, %v4718_v7  ;;  %v4605_v7 = vld [vmem:[#allocation2 + $0xc1] sm:$0xff]  ;;  %vm4641_vm2 = vmand %vm760_vm5, %vm17805_vm13  ;;  %vm17809_vm14 = vnez %v17808_v28  ;;  %vm17813_vm5 = vcmp.le.s32.totalorder %v13632_v40, 14  ;;  %vm17827_vm12 = vcmp.le.s32.totalorder %v13688_v0, 14  ;;  %vm17829_vm13 = vnez %v17828_v61 }
 0x19e   : > { %v4733_v8 = vsel %vm4637_vm8, %v4605_v7, 0.0  ;;  %v4737_v20 = vsel %vm4641_vm2, %v14230_v19, 0.0  ;;  %vm4643_vm10 = vmand %vm17810_vm7, %vm17809_vm14  ;;  %v4744_v48 = vsel %vm17827_vm12, %v4616_v39, 0.0  ;;  %vm17830_vm2 = vcmp.le.s32.totalorder %v13709_v21, 14 }
 0x19f   : > { %v4739_v59 = vsel %vm4643_vm10, %v17811_v9, 0.0  ;;  %vm4649_vm6 = vmand %vm17830_vm2, %vm17829_vm13  ;;  %vm17360_vm14 = vcmask 64512   ;;  %vm17343_vm7 = vcmask 1041409   ;;  %vm17344_vm10 = vcmask 1042434  }
 0x1a0   : > { %11840 = vmatmul.mubr.msk.f32.gmra.mrb[4].mxu0 %vm479_vm4, %v4719_v6  ;;  %v4607_v6 = vld [vmem:[#allocation2 + $0xd1] sm:$0xff] }
 0x1a1   : > { %11842 = vmatprep.mubr.msk.f32.mxu0 %vm479_vm4, %v4720_v5  ;;  %v4735_v17 = vsel %vm4639_vm0, %v4607_v6, 0.0 }
 0x1a4   : > { %11843 = vmatmul.mubr.msk.f32.gmra.mrb[6].mxu0 %vm479_vm4, %v4721_v41  ;;  %v17812_v41 = vld [vmem:[#allocation35_spill] sm:$0xff] }
 0x1a5   : > { %11845 = vmatprep.mubr.msk.f32.mxu0 %vm479_vm4, %v4722_v38  ;;  %v4740_v16 = vsel %vm17813_vm5, %v17812_v41, 0.0  ;;  %v17814_v38 = vld [vmem:[#allocation25_spill] sm:$0xff]  ;;  %vm17347_vm5 = vcmask 1043459  }
 0x1a6   : > { %vm17815_vm9 = vnez %v17814_v38 }
 0x1a7   : > { %vm4645_vm8 = vmand %vm17816_vm1, %vm17815_vm9  ;;  %vm17346_vm9 = vcmask 1044484   ;;  %vm17348_vm1 = vcmask 1045509  }
 0x1a8   : > { %11846 = vmatmul.mubr.msk.f32.gmra.mrb[8].mxu0 %vm479_vm4, %v4723_v15  ;;  %v4741_v12 = vsel %vm4645_vm8, %v17817_v13, 0.0  ;;  %v17819_v15 = vld [vmem:[#allocation42_spill] sm:$0xff]  ;;  %vm17338_vm8 = vcmask 1046534  }
 0x1a9   : > { %11848 = vmatprep.mubr.msk.f32.mxu0 %vm479_vm4, %v4724_v34  ;;  %v4742_v40 = vsel %vm17820_vm15, %v17819_v15, 0.0  ;;  %v17821_v34 = vld [vmem:[#allocation29_spill] sm:$0xff]  ;;  %vm17337_vm15 = vcmask 1047559  }
 0x1aa   : > { %vm17822_vm11 = vnez %v17821_v34 }
 0x1ab   : > { %vm4647_vm0 = vmand %vm17823_vm3, %vm17822_vm11 }
 0x1ac   : > { %11849 = vmatmul.mubr.msk.f32.gmra.mrb[10].mxu0 %vm479_vm4, %v4725_v52  ;;  %v4743_v30 = vsel %vm4647_vm0, %v17825_v63, 0.0 }
 0x1ad   : > { %11851 = vmatprep.mubr.msk.f32.mxu0 %vm479_vm4, %v4726_v22  ;;  %v4617_v22 = vld [vmem:[#allocation2 + $0x121] sm:$0xff] }
 0x1ae   : > { %v4745_v14 = vsel %vm4649_vm6, %v4617_v22, 0.0 }
 0x1b0   : > { %11852 = vmatmul.mubr.msk.f32.gmra.mrb[12].mxu0 %vm479_vm4, %v4727_v43 }
 0x1b1   : > { %11854 = vmatprep.mubr.msk.f32.mxu0 %vm479_vm4, %v4728_v46 }
 0x1b4   : > { %11855 = vmatmul.mubr.msk.f32.gmra.mrb[14].mxu0 %vm479_vm4, %v4729_v42 }
 0x1b5   : > { %11857 = vmatprep.mubr.msk.f32.mxu0 %vm479_vm4, %v4730_v54 }
 0x1b6   : > { %v14726_v58 = vpop.f32.mrb[8].mxu1 }
 0x1b7   : > { %v14734_v49 = vpop.f32.mrb[9].mxu1 }
 0x1b8   : > { %11858 = vmatmul.mubr.msk.f32.gmra.mrb[16].mxu0 %vm479_vm4, %v4731_v44  ;;  %v14834_v44 = vld [vmem:[%s17119_s2] ss:$0 sm:$0xff] }
 0x1b9   : > { %11860 = vmatprep.mubr.msk.f32.mxu0 %vm479_vm4, %v4732_v25 }
 0x1ba   : > { %v14738_v5 = vpop.f32.mrb[10].mxu1 }
 0x1bb   : > { %v14747_v45 = vpop.f32.mrb[11].mxu1 }
 0x1bc   : > { %11861 = vmatmul.mubr.msk.f32.gmra.mrb[18].mxu0 %vm479_vm4, %v4733_v8 }
 0x1bd   : > { %11863 = vmatprep.mubr.msk.f32.mxu0 %vm479_vm4, %v4734_v60 }
 0x1be   : > { %v14752_v53 = vpop.f32.mrb[12].mxu1 }
 0x1bf   : > { %v14761_v36 = vpop.f32.mrb[13].mxu1 }
 0x1c0   : > { %11864 = vmatmul.mubr.msk.f32.gmra.mrb[20].mxu0 %vm479_vm4, %v4735_v17 }
 0x1c1   : > { %11866 = vmatprep.mubr.msk.f32.mxu0 %vm479_vm4, %v4736_v24 }
 0x1c2   : > { %v14766_v19 = vpop.f32.mrb[14].mxu1 }
 0x1c3   : > { %v14775_v50 = vpop.f32.mrb[15].mxu1 }
 0x1c4   : > { %11867 = vmatmul.mubr.msk.f32.gmra.mrb[22].mxu0 %vm479_vm4, %v4737_v20 }
 0x1c5   : > { %11869 = vmatprep.mubr.msk.f32.mxu0 %vm479_vm4, %v4738_v31 }
 0x1c6   : > { %v14780_v11 = vpop.f32.mrb[16].mxu1 }
 0x1c7   : > { %17818 = vst [vmem:[#allocation51_spill] sm:$0xff] %v14780_v11  ;;  %v14789_v35 = vpop.f32.mrb[17].mxu1 }
 0x1c8   : > { %11870 = vmatmul.mubr.msk.f32.gmra.mrb[24].mxu0 %vm479_vm4, %v4739_v59  ;;  %17824 = vst [vmem:[#allocation53_spill] sm:$0xff] %v14789_v35 }
 0x1c9   : > { %11872 = vmatprep.mubr.msk.f32.mxu0 %vm479_vm4, %v4740_v16  ;;  %v12721_v16 = vmov 1983009808  }
 0x1ca   : > { %v14794_v52 = vpop.f32.mrb[18].mxu1 }
 0x1cb   : > { %17826 = vst [vmem:[#allocation55_spill] sm:$0xff] %v14794_v52  ;;  %v14802_v27 = vpop.f32.mrb[19].mxu1 }
 0x1cc   : > { %11873 = vmatmul.mubr.msk.f32.gmra.mrb[26].mxu0 %vm479_vm4, %v4741_v12  ;;  %17831 = vst [vmem:[#allocation59_spill] sm:$0xff] %v14802_v27 }
 0x1cd   : > { %11875 = vmatprep.mubr.msk.f32.mxu0 %vm479_vm4, %v4742_v40 }
 0x1ce   : > { %v14806_v32 = vpop.f32.mrb[20].mxu1 }
 0x1cf   : > { %17832 = vst [vmem:[#allocation63_spill] sm:$0xff] %v14806_v32  ;;  %v14808_v43 = vpop.f32.mrb[21].mxu1 }
 0x1d0   : > { %11876 = vmatmul.mubr.msk.f32.gmra.mrb[28].mxu0 %vm479_vm4, %v4743_v30  ;;  %17833 = vst [vmem:[#allocation16_spill] sm:$0xff] %v14808_v43 }
 0x1d1   : > { %11878 = vmatprep.mubr.msk.f32.mxu0 %vm479_vm4, %v4744_v48 }
 0x1d2   : > { %v14811_v0 = vpop.f32.mrb[22].mxu1 }
 0x1d3   : > { %17834 = vst [vmem:[#allocation30_spill] sm:$0xff] %v14811_v0  ;;  %v14813_v46 = vpop.f32.mrb[23].mxu1 }
 0x1d4   : > { %11879 = vmatmul.mubr.msk.f32.gmra.mrb[30].mxu0 %vm479_vm4, %v4745_v14  ;;  %17835 = vst [vmem:[#allocation18_spill] sm:$0xff] %v14813_v46  ;;  %vm6006_vm4 = vcmask 58368  }
 0x1d6   : > { %v14815_v23 = vpop.f32.mrb[24].mxu1 }
 0x1d7   : > { %17836 = vst [vmem:[#allocation17_spill] sm:$0xff] %v14815_v23  ;;  %v14817_v21 = vpop.f32.mrb[25].mxu1 }
 0x1d8   : > { %17837 = vst [vmem:[#allocation31_spill] sm:$0xff] %v14817_v21 }
 0x1da   : > { %v14819_v51 = vpop.f32.mrb[26].mxu1 }
 0x1db   : > { %17838 = vst [vmem:[#allocation24_spill] sm:$0xff] %v14819_v51  ;;  %v14821_v4 = vpop.f32.mrb[27].mxu1 }
 0x1dc   : > { %17839 = vst [vmem:[#allocation22_spill] sm:$0xff] %v14821_v4 }
 0x1de   : > { %v14823_v42 = vpop.f32.mrb[28].mxu1 }
 0x1df   : > { %17840 = vst [vmem:[#allocation32_spill] sm:$0xff] %v14823_v42  ;;  %v14825_v54 = vpop.f32.mrb[29].mxu1 }
 0x1e0   : > { %17841 = vst [vmem:[#allocation26_spill] sm:$0xff] %v14825_v54 }
 0x1e2   : > { %v14827_v3 = vpop.f32.mrb[30].mxu1 }
 0x1e3   : > { %17842 = vst [vmem:[#allocation48_spill] sm:$0xff] %v14827_v3  ;;  %v14829_v37 = vpop.f32.mrb[31].mxu1 }
 0x1e4   : > { %17843 = vst [vmem:[#allocation39_spill] sm:$0xff] %v14829_v37 }
 0x26b   : > { %v11835_v47 = vpop.f32.mrb[0].mxu0 }
 0x26c   : > { %v12184_v25 = vadd.f32 %v11835_v47, %v14594_v33  ;;  %v4912_v7 = vpop.f32.mrb[1].mxu0 }
 0x26d   : > { %v12185_v2 = vadd.f32 %v4912_v7, %v14598_v55 }
 0x26e   : > { %v5111_v29 = vadd.f32 %v12184_v25, %v14834_v44 }
 0x26f   : > { %v5110_v8 = vadd.f32 %v12185_v2, %v14834_v44  ;;  %v11838_v60 = vpop.f32.mrb[2].mxu0  ;;  %v17844_v2 = vld [vmem:[#allocation8_spill] sm:$0xff] }
 0x270   : > { %v5143_v6 = vmul.f32 0.5, %v5111_v29  ;;  %v12186_v17 = vadd.f32 %v11838_v60, %v14604_v26  ;;  %v4922_v24 = vpop.f32.mrb[3].mxu0 }
 0x271   : > { %v5142_v20 = vmul.f32 0.5, %v5110_v8  ;;  %v12187_v62 = vadd.f32 %v4922_v24, %v14608_v57  ;;  %v5336_v57 = vunpack.c.l.s4 %v12721_v16 }
 0x272   : > { %12567 = vtanh.f32 %v5143_v6  ;;  %v14843_v31 = vadd.f32 %v12186_v17, %v14834_v44 }
 0x273   : > { %12569 = vtanh.f32 %v5142_v20  ;;  %v14846_v33 = vadd.f32 %v12187_v62, %v14834_v44  ;;  %v11841_v55 = vpop.f32.mrb[4].mxu0  ;;  %v5337_v39 = vunpack.c.0.s8 %v5336_v57 }
 0x274   : > { %v5145_v28 = vmul.f32 0.5, %v14843_v31  ;;  %v12188_v9 = vadd.f32 %v11841_v55, %v14614_v18  ;;  %v4932_v59 = vpop.f32.mrb[5].mxu0 }
 0x275   : > { %v5144_v26 = vmul.f32 0.5, %v14846_v33  ;;  %v12189_v41 = vadd.f32 %v4932_v59, %v14618_v10  ;;  %v14873_v60 = vsub.s32 %v5337_v39, %v17844_v2 }
 0x276   : > { %12571 = vtanh.f32 %v5145_v28  ;;  %v14853_v38 = vadd.f32 %v12188_v9, %v14834_v44 }
 0x277   : > { %12573 = vtanh.f32 %v5144_v26  ;;  %v14856_v13 = vadd.f32 %v12189_v41, %v14834_v44  ;;  %v11844_v12 = vpop.f32.mrb[6].mxu0  ;;  %17845 = vst [vmem:[#allocation34_spill] sm:$0xff] %v14873_v60 }
 0x278   : > { %v12190_v15 = vadd.f32 %v11844_v12, %v14624_v1  ;;  %v4942_v40 = vpop.f32.mrb[7].mxu0  ;;  %v5147_v18 = vmul.f32 0.5, %v14853_v38 }
 0x279   : > { %v12191_v34 = vadd.f32 %v4942_v40, %v14628_v56  ;;  %v5146_v10 = vmul.f32 0.5, %v14856_v13 }
 0x27a   : > { %v14863_v63 = vadd.f32 %v12190_v15, %v14834_v44  ;;  %12575 = vtanh.f32 %v5147_v18 }
 0x27b   : > { %v14866_v30 = vadd.f32 %v12191_v34, %v14834_v44  ;;  %v11847_v48 = vpop.f32.mrb[8].mxu0  ;;  %12577 = vtanh.f32 %v5146_v10 }
 0x27c   : > { %v12568_v22 = vpop.eup %12567  ;;  %v5149_v61 = vmul.f32 0.5, %v14863_v63  ;;  %v12192_v1 = vadd.f32 %v11847_v48, %v14726_v58  ;;  %v4952_v14 = vpop.f32.mrb[9].mxu0 }
 0x27d   : > { %v12570_v47 = vpop.eup %12569  ;;  %v5207_v25 = vadd.f32 1.0, %v12568_v22  ;;  %v5148_v56 = vmul.f32 0.5, %v14866_v30  ;;  %v12193_v7 = vadd.f32 %v4952_v14, %v14734_v49 }
 0x27e   : > { %v5206_v6 = vadd.f32 1.0, %v12570_v47  ;;  %v14876_v17 = vadd.f32 %v12192_v1, %v14834_v44  ;;  %12579 = vtanh.f32 %v5149_v61 }
 0x27f   : > { %v5239_v24 = vmul.f32 0.5, %v5207_v25  ;;  %v14879_v58 = vadd.f32 %v12193_v7, %v14834_v44  ;;  %v11850_v20 = vpop.f32.mrb[10].mxu0  ;;  %12581 = vtanh.f32 %v5148_v56 }
 0x280   : > { %v12572_v62 = vpop.eup %12571  ;;  %v5238_v55 = vmul.f32 0.5, %v5206_v6  ;;  %v5151_v49 = vmul.f32 0.5, %v14876_v17  ;;  %v12194_v28 = vadd.f32 %v11850_v20, %v14738_v5  ;;  %v4962_v9 = vpop.f32.mrb[11].mxu0 }
 0x281   : > { %v12574_v59 = vpop.eup %12573  ;;  %v5271_v26 = vmul.f32 %v5239_v24, %v5111_v29  ;;  %v5209_v41 = vadd.f32 1.0, %v12572_v62  ;;  %v5150_v16 = vmul.f32 0.5, %v14879_v58  ;;  %v14885_v57 = vadd.f32 %v4962_v9, %v14747_v45 }
 0x282   : > { %v5270_v12 = vmul.f32 %v5238_v55, %v5110_v8  ;;  %v5208_v15 = vadd.f32 1.0, %v12574_v59  ;;  %12583 = vtanh.f32 %v5151_v49  ;;  %v14888_v40 = vadd.f32 %v12194_v28, %v14834_v44 }
 0x283   : > { %v5351_v18 = vcombine.high %v5271_v26, %v5271_v26  ;;  %v5358_v34 = vrot.slane %v5271_v26, %v14873_v60  ;;  %v5241_v39 = vmul.f32 0.5, %v5209_v41  ;;  %12585 = vtanh.f32 %v5150_v16  ;;  %v14891_v5 = vpop.f32.mrb[12].mxu0 }
 0x284   : > { %v5334_v29 = vcombine.high %v5270_v12, %v5270_v12  ;;  %v5341_v10 = vrot.slane %v5270_v12, %v14873_v60  ;;  %v14894_v48 = vmul.f32 0.5, %v5208_v15  ;;  %v14897_v45 = vmul.f32 0.5, %v14888_v40  ;;  %v14899_v8 = vpop.f32.mrb[13].mxu0  ;;  %v14908_v6 = vpop.eup %12575 }
 0x285   : > { %v5365_v22 = vrot.slane %v5351_v18, %v14873_v60  ;;  %v5366_v61 = vcombine.high %v5358_v34, %v5358_v34  ;;  %v6035_v1 = vsel %vm6006_vm4, %v5358_v34, -inf  ;;  %v14904_v14 = vmul.f32 %v5241_v39, %v14843_v31  ;;  %v14914_v28 = vpop.eup %12577 }
 0x286   : > { %v6036_v47 = vrot.slane %v6035_v1, 4  ;;  %v5348_v25 = vrot.slane %v5334_v29, %v14873_v60  ;;  %v5349_v56 = vcombine.high %v5341_v10, %v5341_v10  ;;  %v6007_v7 = vsel %vm6006_vm4, %v5341_v10, -inf }
 0x287   : > { %v5367_v24 = vcombine.high %v5365_v22, %v5365_v22  ;;  %v6042_v20 = vsel %vm6006_vm4, %v5366_v61, -inf  ;;  %v6049_v62 = vsel %vm6006_vm4, %v5365_v22, -inf  ;;  %v6008_v55 = vrot.slane %v6007_v7, 4  ;;  %v14912_v49 = vpop.f32.mrb[14].mxu0 }
 0x288   : > { %v6037_v31 = vmax.f32 %v6035_v1, %v6036_v47  ;;  %v6043_v9 = vrot.slane %v6042_v20, 4  ;;  %v6050_v59 = vrot.slane %v6049_v62, 4  ;;  %v5350_v26 = vcombine.high %v5348_v25, %v5348_v25  ;;  %v14916_v41 = vpop.f32.mrb[15].mxu0  ;;  %v14918_v16 = vpop.eup %12579 }
 0x289   : > { %17846 = vst [vmem:[#allocation52_spill] sm:$0xff] %v14916_v41  ;;  %v6056_v12 = vsel %vm6006_vm4, %v5367_v24, -inf  ;;  %v6009_v15 = vmax.f32 %v6007_v7, %v6008_v55  ;;  %v6014_v18 = vsel %vm6006_vm4, %v5349_v56, -inf  ;;  %v6021_v34 = vsel %vm6006_vm4, %v5348_v25, -inf  ;;  %v14923_v39 = vpop.eup %12581 }
 0x28a   : > { %v6038_v29 = vrot.slane %v6037_v31, 2  ;;  %v6044_v10 = vmax.f32 %v6042_v20, %v6043_v9  ;;  %v6051_v22 = vmax.f32 %v6049_v62, %v6050_v59  ;;  %v6057_v61 = vrot.slane %v6056_v12, 4 }
 0x28b   : > { %v6010_v1 = vrot.slane %v6009_v15, 2  ;;  %v6015_v47 = vrot.slane %v6014_v18, 4  ;;  %v6022_v2 = vrot.slane %v6021_v34, 4  ;;  %v6028_v37 = vsel %vm6006_vm4, %v5350_v26, -inf }
 0x28c   : > { %v14926_v3 = vpop.eup %12583  ;;  %v6039_v54 = vmax.f32 %v6037_v31, %v6038_v29  ;;  %v6045_v24 = vrot.slane %v6044_v10, 2  ;;  %v6052_v7 = vrot.slane %v6051_v22, 2  ;;  %v6058_v55 = vmax.f32 %v6056_v12, %v6057_v61 }
 0x28d   : > { %v14928_v56 = vpop.eup %12585  ;;  %v6011_v25 = vmax.f32 %v6009_v15, %v6010_v1  ;;  %v6016_v42 = vmax.f32 %v6014_v18, %v6015_v47  ;;  %v6023_v4 = vmax.f32 %v6021_v34, %v6022_v2  ;;  %v6029_v51 = vrot.slane %v6028_v37, 4 }
 0x28e   : > { %v6040_v20 = vrot.slane %v6039_v54, 1  ;;  %v6046_v62 = vmax.f32 %v6044_v10, %v6045_v24  ;;  %v6053_v9 = vmax.f32 %v6051_v22, %v6052_v7  ;;  %v6059_v59 = vrot.slane %v6058_v55, 2 }
 0x28f   : > { %v6012_v21 = vrot.slane %v6011_v25, 1  ;;  %v6017_v23 = vrot.slane %v6016_v42, 2  ;;  %v6024_v46 = vrot.slane %v6023_v4, 2  ;;  %v6030_v26 = vmax.f32 %v6028_v37, %v6029_v51  ;;  %v14936_v51 = vpop.f32.mrb[16].mxu0 }
 0x290   : > { %v6041_v0 = vmax.f32 %v6039_v54, %v6040_v20  ;;  %v6047_v43 = vrot.slane %v6046_v62, 1  ;;  %v6054_v31 = vrot.slane %v6053_v9, 1  ;;  %v6060_v29 = vmax.f32 %v6058_v55, %v6059_v59  ;;  %17847 = vst [vmem:[#allocation43_spill] sm:$0xff] %v14936_v51 }
 0x291   : > { %v6013_v32 = vmax.f32 %v6011_v25, %v6012_v21  ;;  %v6018_v12 = vmax.f32 %v6016_v42, %v6017_v23  ;;  %v6025_v61 = vmax.f32 %v6023_v4, %v6024_v46  ;;  %v6031_v27 = vrot.slane %v6030_v26, 2 }
 0x292   : > { %v6048_v15 = vmax.f32 %v6046_v62, %v6047_v43  ;;  %v6055_v18 = vmax.f32 %v6053_v9, %v6054_v31  ;;  %v6061_v2 = vrot.slane %v6060_v29, 1  ;;  %v14931_v34 = vsel %vm17360_vm14, %v6041_v0, -inf  ;;  %v14967_v31 = vpop.f32.mrb[17].mxu0 }
 0x293   : > { %v6019_v10 = vrot.slane %v6018_v12, 1  ;;  %v6026_v22 = vrot.slane %v6025_v61, 1  ;;  %v6032_v1 = vmax.f32 %v6030_v26, %v6031_v27  ;;  %v14934_v47 = vsel %vm17360_vm14, %v6013_v32, -inf  ;;  %17848 = vst [vmem:[#allocation41_spill] sm:$0xff] %v14967_v31 }
 0x294   : > { %v6062_v54 = vmax.f32 %v6060_v29, %v6061_v2  ;;  %v14939_v21 = vsel %vm17360_vm14, %v6048_v15, -inf  ;;  %v14942_v46 = vsel %vm17360_vm14, %v6055_v18, -inf  ;;  %v5385_v43 = vcombine.high %v14904_v14, %v14904_v14 }
 0x295   : > { %v6020_v0 = vmax.f32 %v6018_v12, %v6019_v10  ;;  %v6027_v23 = vmax.f32 %v6025_v61, %v6026_v22  ;;  %v6033_v4 = vrot.slane %v6032_v1, 1  ;;  %v5392_v27 = vrot.slane %v14904_v14, %v14873_v60 }
 0x296   : > { %v14949_v32 = vsel %vm17360_vm14, %v6062_v54, -inf  ;;  %v5399_v42 = vrot.slane %v5385_v43, %v14873_v60  ;;  %v5272_v37 = vmul.f32 %v14894_v48, %v14846_v33  ;;  %v5211_v24 = vadd.f32 1.0, %v14908_v6 }
 0x297   : > { %v6034_v7 = vmax.f32 %v6032_v1, %v6033_v4  ;;  %v14956_v55 = vsel %vm17360_vm14, %v6020_v0, -inf  ;;  %v14959_v25 = vsel %vm17360_vm14, %v6027_v23, -inf  ;;  %v5400_v20 = vcombine.high %v5392_v27, %v5392_v27 }
 0x298   : > { %v5401_v62 = vcombine.high %v5399_v42, %v5399_v42  ;;  %v6091_v14 = vsel %vm6006_vm4, %v5392_v27, -inf  ;;  %v6105_v9 = vsel %vm6006_vm4, %v5399_v42, -inf  ;;  %v5368_v59 = vcombine.high %v5272_v37, %v5272_v37 }
 0x299   : > { %v14964_v26 = vsel %vm17360_vm14, %v6034_v7, -inf  ;;  %v6092_v33 = vrot.slane %v6091_v14, 4  ;;  %v6098_v48 = vsel %vm6006_vm4, %v5400_v20, -inf  ;;  %v6106_v6 = vrot.slane %v6105_v9, 4 }
 0x29a   : > { %v6099_v29 = vrot.slane %v6098_v48, 4  ;;  %v6112_v12 = vsel %vm6006_vm4, %v5401_v62, -inf  ;;  %v5375_v61 = vrot.slane %v5272_v37, %v14873_v60  ;;  %v5382_v15 = vrot.slane %v5368_v59, %v14873_v60 }
 0x29b   : > { %v6093_v18 = vmax.f32 %v6091_v14, %v6092_v33  ;;  %v6107_v2 = vmax.f32 %v6105_v9, %v6106_v6  ;;  %v6113_v10 = vrot.slane %v6112_v12, 4  ;;  %v5243_v22 = vmul.f32 0.5, %v5211_v24 }
 0x29c   : > { %v6100_v1 = vmax.f32 %v6098_v48, %v6099_v29  ;;  %v5383_v54 = vcombine.high %v5375_v61, %v5375_v61  ;;  %v5384_v43 = vcombine.high %v5382_v15, %v5382_v15  ;;  %v6063_v0 = vsel %vm6006_vm4, %v5375_v61, -inf }
 0x29d   : > { %v6094_v23 = vrot.slane %v6093_v18, 2  ;;  %v6108_v4 = vrot.slane %v6107_v2, 2  ;;  %v6114_v27 = vmax.f32 %v6112_v12, %v6113_v10  ;;  %v6064_v42 = vrot.slane %v6063_v0, 4 }
 0x29e   : > { %v6101_v7 = vrot.slane %v6100_v1, 2  ;;  %v6070_v20 = vsel %vm6006_vm4, %v5383_v54, -inf  ;;  %v6077_v37 = vsel %vm6006_vm4, %v5382_v15, -inf  ;;  %v6084_v62 = vsel %vm6006_vm4, %v5384_v43, -inf }
 0x29f   : > { %v6095_v14 = vmax.f32 %v6093_v18, %v6094_v23  ;;  %v6109_v9 = vmax.f32 %v6107_v2, %v6108_v4  ;;  %v6115_v59 = vrot.slane %v6114_v27, 2  ;;  %v6065_v24 = vmax.f32 %v6063_v0, %v6064_v42 }
 0x2a0   : > { %v6102_v33 = vmax.f32 %v6100_v1, %v6101_v7  ;;  %v6071_v48 = vrot.slane %v6070_v20, 4  ;;  %v6078_v6 = vrot.slane %v6077_v37, 4  ;;  %v6085_v29 = vrot.slane %v6084_v62, 4 }
 0x2a1   : > { %v6096_v61 = vrot.slane %v6095_v14, 1  ;;  %v6110_v52 = vrot.slane %v6109_v9, 1  ;;  %v6116_v31 = vmax.f32 %v6114_v27, %v6115_v59  ;;  %v6066_v12 = vrot.slane %v6065_v24, 2 }
 0x2a2   : > { %v6103_v10 = vrot.slane %v6102_v33, 1  ;;  %v6072_v35 = vmax.f32 %v6070_v20, %v6071_v48  ;;  %v6079_v51 = vmax.f32 %v6077_v37, %v6078_v6  ;;  %v6086_v54 = vmax.f32 %v6084_v62, %v6085_v29 }
 0x2a3   : > { %v6097_v11 = vmax.f32 %v6095_v14, %v6096_v61  ;;  %v6111_v15 = vmax.f32 %v6109_v9, %v6110_v52  ;;  %v6117_v41 = vrot.slane %v6116_v31, 1  ;;  %v6067_v43 = vmax.f32 %v6065_v24, %v6066_v12 }
 0x2a4   : > { %v6104_v18 = vmax.f32 %v6102_v33, %v6103_v10  ;;  %v6073_v2 = vrot.slane %v6072_v35, 2  ;;  %v6080_v23 = vrot.slane %v6079_v51, 2  ;;  %v6087_v0 = vrot.slane %v6086_v54, 2 }
 0x2a5   : > { %v6118_v1 = vmax.f32 %v6116_v31, %v6117_v41  ;;  %v6917_v4 = vsel %vm17360_vm14, %v6097_v11, -inf  ;;  %v14978_v42 = vsel %vm17360_vm14, %v6111_v15, -inf  ;;  %v6068_v27 = vrot.slane %v6067_v43, 1 }
 0x2a6   : > { %v6918_v7 = vmax.f32 %v14931_v34, %v6917_v4  ;;  %v6920_v20 = vsel %vm17360_vm14, %v6104_v18, -inf  ;;  %v6924_v52 = vmax.f32 %v14942_v46, %v14978_v42  ;;  %v6074_v37 = vmax.f32 %v6072_v35, %v6073_v2 }
 0x2a7   : > { %v6921_v62 = vmax.f32 %v14939_v21, %v6920_v20  ;;  %v6926_v41 = vsel %vm17360_vm14, %v6118_v1, -inf  ;;  %v6069_v31 = vmax.f32 %v6067_v43, %v6068_v27  ;;  %v6081_v11 = vmax.f32 %v6079_v51, %v6080_v23 }
 0x2a8   : > { %v6927_v14 = vmax.f32 %v14949_v32, %v6926_v41  ;;  %v6075_v9 = vrot.slane %v6074_v37, 1  ;;  %v6088_v59 = vmax.f32 %v6086_v54, %v6087_v0  ;;  %v5275_v34 = vmul.f32 %v5243_v22, %v14853_v38 }
 0x2a9   : > { %v6082_v24 = vrot.slane %v6081_v11, 1  ;;  %v6905_v33 = vsel %vm17360_vm14, %v6069_v31, -inf  ;;  %v5210_v35 = vadd.f32 1.0, %v14914_v28  ;;  %v5213_v21 = vadd.f32 1.0, %v14918_v16 }
 0x2aa   : > { %v6076_v46 = vmax.f32 %v6074_v37, %v6075_v9  ;;  %v6089_v48 = vrot.slane %v6088_v59, 1  ;;  %v6906_v51 = vmax.f32 %v14934_v47, %v6905_v33  ;;  %v5419_v6 = vcombine.high %v5275_v34, %v5275_v34 }
 0x2ab   : > { %v6083_v32 = vmax.f32 %v6081_v11, %v6082_v24  ;;  %v5426_v29 = vrot.slane %v5275_v34, %v14873_v60  ;;  %v5242_v61 = vmul.f32 0.5, %v5210_v35  ;;  %v5245_v12 = vmul.f32 0.5, %v5213_v21 }
 0x2ac   : > { %v6090_v38 = vmax.f32 %v6088_v59, %v6089_v48  ;;  %v6908_v22 = vsel %vm17360_vm14, %v6076_v46, -inf  ;;  %v5433_v10 = vrot.slane %v5419_v6, %v14873_v60  ;;  %v14996_v28 = vadd.f32 1.0, %v14923_v39 }
 0x2ad   : > { %v6909_v16 = vmax.f32 %v14956_v55, %v6908_v22  ;;  %v6911_v54 = vsel %vm17360_vm14, %v6083_v32, -inf  ;;  %v5434_v47 = vcombine.high %v5426_v29, %v5426_v29  ;;  %v6147_v15 = vsel %vm6006_vm4, %v5426_v29, -inf }
 0x2ae   : > { %v6912_v43 = vmax.f32 %v14959_v25, %v6911_v54  ;;  %v6914_v18 = vsel %vm17360_vm14, %v6090_v38, -inf  ;;  %v5435_v2 = vcombine.high %v5433_v10, %v5433_v10  ;;  %v6148_v23 = vrot.slane %v6147_v15, 4 }
 0x2af   : > { %v6915_v0 = vmax.f32 %v14964_v26, %v6914_v18  ;;  %v7161_v1 = vsel %vm17343_vm7, %v6909_v16, %v6906_v51  ;;  %v6154_v39 = vsel %vm6006_vm4, %v5434_v47, -inf  ;;  %v6161_v4 = vsel %vm6006_vm4, %v5433_v10, -inf }
 0x2b0   : > { %v7163_v55 = vsel %vm17344_vm10, %v6912_v43, %v7161_v1  ;;  %v6149_v42 = vmax.f32 %v6147_v15, %v6148_v23  ;;  %v6155_v27 = vrot.slane %v6154_v39, 4  ;;  %v6162_v20 = vrot.slane %v6161_v4, 4 }
 0x2b1   : > { %v7165_v37 = vsel %vm17347_vm5, %v6915_v0, %v7163_v55  ;;  %v6168_v25 = vsel %vm6006_vm4, %v5435_v2, -inf  ;;  %v5274_v41 = vmul.f32 %v5242_v61, %v14856_v13  ;;  %v5277_v31 = vmul.f32 %v5245_v12, %v14863_v63 }
 0x2b2   : > { %v7167_v26 = vsel %vm17346_vm9, %v6918_v7, %v7165_v37  ;;  %v6150_v11 = vrot.slane %v6149_v42, 2  ;;  %v6156_v9 = vmax.f32 %v6154_v39, %v6155_v27  ;;  %v6163_v59 = vmax.f32 %v6161_v4, %v6162_v20  ;;  %v15026_v27 = vpop.f32.mrb[18].mxu0 }
 0x2b3   : > { %v7169_v34 = vsel %vm17348_vm1, %v6921_v62, %v7167_v26  ;;  %v6169_v24 = vrot.slane %v6168_v25, 4  ;;  %v5402_v33 = vcombine.high %v5274_v41, %v5274_v41  ;;  %v5409_v35 = vrot.slane %v5274_v41, %v14873_v60 }
 0x2b4   : > { %v7171_v21 = vsel %vm17338_vm8, %v6924_v52, %v7169_v34  ;;  %v6151_v46 = vmax.f32 %v6149_v42, %v6150_v11  ;;  %v6157_v48 = vrot.slane %v6156_v9, 2  ;;  %v6164_v51 = vrot.slane %v6163_v59, 2 }
 0x2b5   : > { %v7173_v13 = vsel %vm17337_vm15, %v6927_v14, %v7171_v21  ;;  %v6170_v6 = vmax.f32 %v6168_v25, %v6169_v24  ;;  %v5416_v63 = vrot.slane %v5402_v33, %v14873_v60  ;;  %v5417_v7 = vcombine.high %v5409_v35, %v5409_v35 }
 0x2b6   : > { %7231 = vst.msk [vmem:[#allocation3 + $0x10] sm:$0xff] %vm17360_vm14, %v7173_v13  ;;  %v6152_v32 = vrot.slane %v6151_v46, 1  ;;  %v6158_v29 = vmax.f32 %v6156_v9, %v6157_v48  ;;  %v6165_v62 = vmax.f32 %v6163_v59, %v6164_v51  ;;  %v6119_v61 = vsel %vm6006_vm4, %v5409_v35, -inf }
 0x2b7   : > { %v6171_v12 = vrot.slane %v6170_v6, 2  ;;  %v5418_v38 = vcombine.high %v5416_v63, %v5416_v63  ;;  %v6120_v22 = vrot.slane %v6119_v61, 4  ;;  %v6126_v52 = vsel %vm6006_vm4, %v5417_v7, -inf }
 0x2b8   : > { %v6153_v10 = vmax.f32 %v6151_v46, %v6152_v32  ;;  %v6159_v16 = vrot.slane %v6158_v29, 1  ;;  %v6166_v54 = vrot.slane %v6165_v62, 1  ;;  %v6127_v14 = vrot.slane %v6126_v52, 4  ;;  %v15041_v32 = vpop.f32.mrb[19].mxu0 }
 0x2b9   : > { %v6172_v47 = vmax.f32 %v6170_v6, %v6171_v12  ;;  %v6121_v15 = vmax.f32 %v6119_v61, %v6120_v22  ;;  %v6133_v43 = vsel %vm6006_vm4, %v5416_v63, -inf  ;;  %v6140_v18 = vsel %vm6006_vm4, %v5418_v38, -inf }
 0x2ba   : > { %v6160_v2 = vmax.f32 %v6158_v29, %v6159_v16  ;;  %v6167_v23 = vmax.f32 %v6165_v62, %v6166_v54  ;;  %v15024_v0 = vsel %vm17360_vm14, %v6153_v10, -inf  ;;  %v6128_v1 = vmax.f32 %v6126_v52, %v6127_v14 }
 0x2bb   : > { %v6173_v39 = vrot.slane %v6172_v47, 1  ;;  %v6122_v4 = vrot.slane %v6121_v15, 2  ;;  %v6134_v55 = vrot.slane %v6133_v43, 4  ;;  %v6141_v42 = vrot.slane %v6140_v18, 4 }
 0x2bc   : > { %v15029_v20 = vsel %vm17360_vm14, %v6160_v2, -inf  ;;  %v15032_v37 = vsel %vm17360_vm14, %v6167_v23, -inf  ;;  %v6129_v25 = vrot.slane %v6128_v1, 2  ;;  %v5453_v41 = vcombine.high %v5277_v31, %v5277_v31 }
 0x2bd   : > { %v6174_v26 = vmax.f32 %v6172_v47, %v6173_v39  ;;  %v6123_v11 = vmax.f32 %v6121_v15, %v6122_v4  ;;  %v6135_v9 = vmax.f32 %v6133_v43, %v6134_v55  ;;  %v6142_v59 = vmax.f32 %v6140_v18, %v6141_v42 }
 0x2be   : > { %v6130_v34 = vmax.f32 %v6128_v1, %v6129_v25  ;;  %v5460_v24 = vrot.slane %v5277_v31, %v14873_v60  ;;  %v5467_v33 = vrot.slane %v5453_v41, %v14873_v60  ;;  %v5244_v35 = vmul.f32 0.5, %v14996_v28 }
 0x2bf   : > { %v15038_v21 = vsel %vm17360_vm14, %v6174_v26, -inf  ;;  %v6124_v46 = vrot.slane %v6123_v11, 1  ;;  %v6136_v48 = vrot.slane %v6135_v9, 2  ;;  %v6143_v51 = vrot.slane %v6142_v59, 2 }
 0x2c0   : > { %v6131_v13 = vrot.slane %v6130_v34, 1  ;;  %v5468_v6 = vcombine.high %v5460_v24, %v5460_v24  ;;  %v5469_v63 = vcombine.high %v5467_v33, %v5467_v33  ;;  %v6203_v7 = vsel %vm6006_vm4, %v5460_v24, -inf }
 0x2c1   : > { %v6125_v29 = vmax.f32 %v6123_v11, %v6124_v46  ;;  %v6137_v62 = vmax.f32 %v6135_v9, %v6136_v48  ;;  %v6144_v31 = vmax.f32 %v6142_v59, %v6143_v51  ;;  %v6204_v61 = vrot.slane %v6203_v7, 4 }
 0x2c2   : > { %v6132_v12 = vmax.f32 %v6130_v34, %v6131_v13  ;;  %v6210_v28 = vsel %vm6006_vm4, %v5468_v6, -inf  ;;  %v6217_v38 = vsel %vm6006_vm4, %v5467_v33, -inf  ;;  %v6224_v22 = vsel %vm6006_vm4, %v5469_v63, -inf }
 0x2c3   : > { %v6138_v52 = vrot.slane %v6137_v62, 1  ;;  %v6145_v10 = vrot.slane %v6144_v31, 1  ;;  %v15047_v16 = vsel %vm17360_vm14, %v6125_v29, -inf  ;;  %v6205_v54 = vmax.f32 %v6203_v7, %v6204_v61 }
 0x2c4   : > { %v15050_v14 = vsel %vm17360_vm14, %v6132_v12, -inf  ;;  %v6211_v47 = vrot.slane %v6210_v28, 4  ;;  %v6218_v15 = vrot.slane %v6217_v38, 4  ;;  %v6225_v43 = vrot.slane %v6224_v22, 4 }
 0x2c5   : > { %v6139_v18 = vmax.f32 %v6137_v62, %v6138_v52  ;;  %v6146_v2 = vmax.f32 %v6144_v31, %v6145_v10  ;;  %v6206_v23 = vrot.slane %v6205_v54, 2  ;;  %v5276_v1 = vmul.f32 %v5244_v35, %v14866_v30 }
 0x2c6   : > { %v6212_v39 = vmax.f32 %v6210_v28, %v6211_v47  ;;  %v6219_v4 = vmax.f32 %v6217_v38, %v6218_v15  ;;  %v6226_v55 = vmax.f32 %v6224_v22, %v6225_v43  ;;  %v5215_v42 = vadd.f32 1.0, %v14926_v3  ;;  %v15072_v15 = vpop.f32.mrb[20].mxu0 }
 0x2c7   : > { %v15055_v25 = vsel %vm17360_vm14, %v6139_v18, -inf  ;;  %v15058_v41 = vsel %vm17360_vm14, %v6146_v2, -inf  ;;  %v6207_v26 = vmax.f32 %v6205_v54, %v6206_v23  ;;  %v5436_v11 = vcombine.high %v5276_v1, %v5276_v1 }
 0x2c8   : > { %v6213_v9 = vrot.slane %v6212_v39, 2  ;;  %v6220_v59 = vrot.slane %v6219_v4, 2  ;;  %v6227_v34 = vrot.slane %v6226_v55, 2  ;;  %v5443_v24 = vrot.slane %v5276_v1, %v14873_v60 }
 0x2c9   : > { %v6208_v33 = vrot.slane %v6207_v26, 1  ;;  %v5450_v30 = vrot.slane %v5436_v11, %v14873_v60  ;;  %v5247_v35 = vmul.f32 0.5, %v5215_v42  ;;  %v5214_v46 = vadd.f32 1.0, %v14928_v56 }
 0x2ca   : > { %v6214_v3 = vmax.f32 %v6212_v39, %v6213_v9  ;;  %v6221_v48 = vmax.f32 %v6219_v4, %v6220_v59  ;;  %v6228_v51 = vmax.f32 %v6226_v55, %v6227_v34  ;;  %v5451_v13 = vcombine.high %v5443_v24, %v5443_v24 }
 0x2cb   : > { %v6209_v6 = vmax.f32 %v6207_v26, %v6208_v33  ;;  %v5452_v63 = vcombine.high %v5450_v30, %v5450_v30  ;;  %v6175_v7 = vsel %vm6006_vm4, %v5443_v24, -inf  ;;  %v6189_v29 = vsel %vm6006_vm4, %v5450_v30, -inf }
 0x2cc   : > { %v6215_v62 = vrot.slane %v6214_v3, 1  ;;  %v6222_v31 = vrot.slane %v6221_v48, 1  ;;  %v6229_v61 = vrot.slane %v6228_v51, 1  ;;  %v6176_v12 = vrot.slane %v6175_v7, 4 }
 0x2cd   : > { %v15066_v28 = vsel %vm17360_vm14, %v6209_v6, -inf  ;;  %v6182_v38 = vsel %vm6006_vm4, %v5451_v13, -inf  ;;  %v6190_v56 = vrot.slane %v6189_v29, 4  ;;  %v6196_v22 = vsel %vm6006_vm4, %v5452_v63, -inf }
 0x2ce   : > { %v6216_v52 = vmax.f32 %v6214_v3, %v6215_v62  ;;  %v6223_v10 = vmax.f32 %v6221_v48, %v6222_v31  ;;  %v6230_v54 = vmax.f32 %v6228_v51, %v6229_v61  ;;  %v6942_v47 = vmax.f32 %v15024_v0, %v15066_v28 }
 0x2cf   : > { %v6177_v43 = vmax.f32 %v6175_v7, %v6176_v12  ;;  %v6183_v18 = vrot.slane %v6182_v38, 4  ;;  %v6191_v2 = vmax.f32 %v6189_v29, %v6190_v56  ;;  %v6197_v23 = vrot.slane %v6196_v22, 4 }
 0x2d0   : > { %v15075_v1 = vsel %vm17360_vm14, %v6216_v52, -inf  ;;  %v15078_v39 = vsel %vm17360_vm14, %v6223_v10, -inf  ;;  %v15081_v4 = vsel %vm17360_vm14, %v6230_v54, -inf  ;;  %v5279_v55 = vmul.f32 %v5247_v35, %v14876_v17 }
 0x2d1   : > { %v6945_v42 = vmax.f32 %v15029_v20, %v15075_v1  ;;  %v6948_v26 = vmax.f32 %v15032_v37, %v15078_v39  ;;  %v6951_v11 = vmax.f32 %v15038_v21, %v15081_v4  ;;  %v6178_v9 = vrot.slane %v6177_v43, 2 }
 0x2d2   : > { %v6184_v59 = vmax.f32 %v6182_v38, %v6183_v18  ;;  %v6192_v34 = vrot.slane %v6191_v2, 2  ;;  %v6198_v24 = vmax.f32 %v6196_v22, %v6197_v23  ;;  %v5487_v33 = vcombine.high %v5279_v55, %v5279_v55  ;;  %v15095_v38 = vpop.f32.mrb[21].mxu0 }
 0x2d3   : > { %v6179_v30 = vmax.f32 %v6177_v43, %v6178_v9  ;;  %v5494_v3 = vrot.slane %v5279_v55, %v14873_v60  ;;  %v5246_v48 = vmul.f32 0.5, %v5214_v46  ;;  %12587 = vtanh.f32 %v14897_v45 }
 0x2d4   : > { %v6185_v17 = vrot.slane %v6184_v59, 2  ;;  %v6193_v35 = vmax.f32 %v6191_v2, %v6192_v34  ;;  %v6199_v51 = vrot.slane %v6198_v24, 2  ;;  %v5501_v13 = vrot.slane %v5487_v33, %v14873_v60 }
 0x2d5   : > { %v6180_v6 = vrot.slane %v6179_v30, 1  ;;  %v5502_v63 = vcombine.high %v5494_v3, %v5494_v3  ;;  %v6259_v7 = vsel %vm6006_vm4, %v5494_v3, -inf  ;;  %v5278_v29 = vmul.f32 %v5246_v48, %v14879_v58 }
 0x2d6   : > { %v6186_v62 = vmax.f32 %v6184_v59, %v6185_v17  ;;  %v6194_v31 = vrot.slane %v6193_v35, 1  ;;  %v6200_v61 = vmax.f32 %v6198_v24, %v6199_v51  ;;  %v5503_v12 = vcombine.high %v5501_v13, %v5501_v13 }
 0x2d7   : > { %v6181_v46 = vmax.f32 %v6179_v30, %v6180_v6  ;;  %v6260_v56 = vrot.slane %v6259_v7, 4  ;;  %v6266_v45 = vsel %vm6006_vm4, %v5502_v63, -inf  ;;  %v6273_v22 = vsel %vm6006_vm4, %v5501_v13, -inf }
 0x2d8   : > { %v6187_v52 = vrot.slane %v6186_v62, 1  ;;  %v6195_v10 = vmax.f32 %v6193_v35, %v6194_v31  ;;  %v6201_v54 = vrot.slane %v6200_v61, 1  ;;  %v6267_v43 = vrot.slane %v6266_v45, 4 }
 0x2d9   : > { %v6929_v18 = vsel %vm17360_vm14, %v6181_v46, -inf  ;;  %v6261_v2 = vmax.f32 %v6259_v7, %v6260_v56  ;;  %v6274_v58 = vrot.slane %v6273_v22, 4  ;;  %v6280_v23 = vsel %vm6006_vm4, %v5503_v12, -inf }
 0x2da   : > { %v6188_v55 = vmax.f32 %v6186_v62, %v6187_v52  ;;  %v6202_v9 = vmax.f32 %v6200_v61, %v6201_v54  ;;  %v6930_v59 = vmax.f32 %v15047_v16, %v6929_v18  ;;  %v6935_v34 = vsel %vm17360_vm14, %v6195_v10, -inf }
 0x2db   : > { %v6936_v24 = vmax.f32 %v15055_v25, %v6935_v34  ;;  %v6262_v33 = vrot.slane %v6261_v2, 2  ;;  %v6268_v30 = vmax.f32 %v6266_v45, %v6267_v43  ;;  %v6275_v3 = vmax.f32 %v6273_v22, %v6274_v58 }
 0x2dc   : > { %v6932_v48 = vsel %vm17360_vm14, %v6188_v55, -inf  ;;  %v6938_v17 = vsel %vm17360_vm14, %v6202_v9, -inf  ;;  %v6281_v35 = vrot.slane %v6280_v23, 4  ;;  %v5470_v51 = vcombine.high %v5278_v29, %v5278_v29 }
 0x2dd   : > { %v12588_v13 = vpop.eup %12587  ;;  %v6933_v6 = vmax.f32 %v15050_v14, %v6932_v48  ;;  %v6939_v63 = vmax.f32 %v15058_v41, %v6938_v17  ;;  %v6263_v7 = vmax.f32 %v6261_v2, %v6262_v33  ;;  %v6269_v16 = vrot.slane %v6268_v30, 2 }
 0x2de   : > { %v6276_v62 = vrot.slane %v6275_v3, 2  ;;  %v6282_v31 = vmax.f32 %v6280_v23, %v6281_v35  ;;  %v5477_v25 = vrot.slane %v5278_v29, %v14873_v60  ;;  %v5484_v61 = vrot.slane %v5470_v51, %v14873_v60 }
 0x2df   : > { %v7174_v12 = vsel %vm17343_vm7, %v6933_v6, %v6930_v59  ;;  %v6264_v46 = vrot.slane %v6263_v7, 1  ;;  %v6270_v56 = vmax.f32 %v6268_v30, %v6269_v16  ;;  %v5217_v45 = vadd.f32 1.0, %v12588_v13  ;;  %v15137_v30 = vpop.f32.mrb[22].mxu0 }
 0x2e0   : > { %v7175_v22 = vsel %vm17344_vm10, %v6936_v24, %v7174_v12  ;;  %v6277_v52 = vmax.f32 %v6275_v3, %v6276_v62  ;;  %v6283_v10 = vrot.slane %v6282_v31, 2  ;;  %v5485_v14 = vcombine.high %v5477_v25, %v5477_v25 }
 0x2e1   : > { %v7176_v41 = vsel %vm17347_vm5, %v6939_v63, %v7175_v22  ;;  %v6265_v54 = vmax.f32 %v6263_v7, %v6264_v46  ;;  %v6271_v43 = vrot.slane %v6270_v56, 1  ;;  %v5486_v18 = vcombine.high %v5484_v61, %v5484_v61 }
 0x2e2   : > { %v7177_v29 = vsel %vm17346_vm9, %v6942_v47, %v7176_v41  ;;  %v6278_v2 = vrot.slane %v6277_v52, 1  ;;  %v6284_v58 = vmax.f32 %v6282_v31, %v6283_v10  ;;  %v6231_v23 = vsel %vm6006_vm4, %v5477_v25, -inf  ;;  %v15159_v25 = vld [vmem:[%s17119_s2] ss:$0 sm:$0xff] }
 0x2e3   : > { %v7178_v55 = vsel %vm17348_vm1, %v6945_v42, %v7177_v29  ;;  %v6272_v9 = vmax.f32 %v6270_v56, %v6271_v43  ;;  %v15123_v59 = vsel %vm17360_vm14, %v6265_v54, -inf  ;;  %v6232_v34 = vrot.slane %v6231_v23, 4 }
 0x2e4   : > { %v7179_v0 = vsel %vm17338_vm8, %v6948_v26, %v7178_v55  ;;  %v6279_v28 = vmax.f32 %v6277_v52, %v6278_v2  ;;  %v6285_v47 = vrot.slane %v6284_v58, 1  ;;  %v6238_v24 = vsel %vm6006_vm4, %v5485_v14, -inf }
 0x2e5   : > { %v7180_v20 = vsel %vm17337_vm15, %v6951_v11, %v7179_v0  ;;  %v15135_v1 = vsel %vm17360_vm14, %v6272_v9, -inf  ;;  %v6233_v42 = vmax.f32 %v6231_v23, %v6232_v34  ;;  %v6239_v33 = vrot.slane %v6238_v24, 4 }
 0x2e6   : > { %7232 = vst.msk [vmem:[#allocation3 + $0x18] sm:$0xff] %vm17360_vm14, %v7180_v20  ;;  %v6286_v37 = vmax.f32 %v6284_v58, %v6285_v47  ;;  %v15141_v39 = vsel %vm17360_vm14, %v6279_v28, -inf  ;;  %v6245_v26 = vsel %vm6006_vm4, %v5484_v61, -inf  ;;  %v6252_v3 = vsel %vm6006_vm4, %v5486_v18, -inf }
 0x2e7   : > { %v6234_v21 = vrot.slane %v6233_v42, 2  ;;  %v6240_v4 = vmax.f32 %v6238_v24, %v6239_v33  ;;  %v6246_v11 = vrot.slane %v6245_v26, 4  ;;  %v6253_v48 = vrot.slane %v6252_v3, 4 }
 0x2e8   : > { %v15146_v17 = vsel %vm17360_vm14, %v6286_v37, -inf  ;;  %v5249_v35 = vmul.f32 0.5, %v5217_v45  ;;  %v15150_v51 = vadd.f32 %v14885_v57, %v14834_v44  ;;  %v12196_v13 = vadd.f32 %v14891_v5, %v14752_v53 }
 0x2e9   : > { %v6235_v6 = vmax.f32 %v6233_v42, %v6234_v21  ;;  %v6241_v63 = vrot.slane %v6240_v4, 2  ;;  %v6247_v7 = vmax.f32 %v6245_v26, %v6246_v11  ;;  %v6254_v16 = vmax.f32 %v6252_v3, %v6253_v48 }
 0x2ea   : > { %v5281_v62 = vmul.f32 %v5249_v35, %v14888_v40  ;;  %v5152_v31 = vmul.f32 0.5, %v15150_v51  ;;  %v15162_v61 = vadd.f32 %v15159_v25, %v12196_v13  ;;  %v12197_v44 = vadd.f32 %v14899_v8, %v14761_v36  ;;  %v15170_v36 = vpop.f32.mrb[23].mxu0 }
 0x2eb   : > { %v6236_v53 = vrot.slane %v6235_v6, 1  ;;  %v6242_v57 = vmax.f32 %v6240_v4, %v6241_v63  ;;  %v6248_v5 = vrot.slane %v6247_v7, 2  ;;  %v6255_v12 = vrot.slane %v6254_v16, 2 }
 0x2ec   : > { %v5521_v46 = vcombine.high %v5281_v62, %v5281_v62  ;;  %v5528_v40 = vrot.slane %v5281_v62, %v14873_v60  ;;  %12589 = vtanh.f32 %v5152_v31  ;;  %v5155_v56 = vmul.f32 0.5, %v15162_v61 }
 0x2ed   : > { %v6237_v45 = vmax.f32 %v6235_v6, %v6236_v53  ;;  %v6243_v22 = vrot.slane %v6242_v57, 1  ;;  %v6249_v52 = vmax.f32 %v6247_v7, %v6248_v5  ;;  %v6256_v10 = vmax.f32 %v6254_v16, %v6255_v12  ;;  %v17849_v6 = vld [vmem:[#allocation52_spill] sm:$0xff]  ;;  %v17850_v7 = vld [vmem:[#allocation51_spill] sm:$0xff] }
 0x2ee   : > { %v5535_v14 = vrot.slane %v5521_v46, %v14873_v60  ;;  %v5536_v41 = vcombine.high %v5528_v40, %v5528_v40  ;;  %v6315_v54 = vsel %vm6006_vm4, %v5528_v40, -inf  ;;  %12591 = vtanh.f32 %v5155_v56  ;;  %v17851_v16 = vld [vmem:[#allocation43_spill] sm:$0xff] }
 0x2ef   : > { %v6244_v8 = vmax.f32 %v6242_v57, %v6243_v22  ;;  %v6250_v43 = vrot.slane %v6249_v52, 1  ;;  %v6257_v18 = vrot.slane %v6256_v10, 1  ;;  %v15173_v29 = vsel %vm17360_vm14, %v6237_v45, -inf }
 0x2f0   : > { %v5537_v2 = vcombine.high %v5535_v14, %v5535_v14  ;;  %v6316_v58 = vrot.slane %v6315_v54, 4  ;;  %v6322_v23 = vsel %vm6006_vm4, %v5536_v41, -inf  ;;  %v6329_v55 = vsel %vm6006_vm4, %v5535_v14, -inf  ;;  %v15207_v41 = vpop.f32.mrb[24].mxu0 }
 0x2f1   : > { %v6251_v9 = vmax.f32 %v6249_v52, %v6250_v43  ;;  %v6258_v34 = vmax.f32 %v6256_v10, %v6257_v18  ;;  %v15178_v0 = vsel %vm17360_vm14, %v6244_v8, -inf  ;;  %v6323_v28 = vrot.slane %v6322_v23, 4 }
 0x2f2   : > { %v6317_v47 = vmax.f32 %v6315_v54, %v6316_v58  ;;  %v6330_v24 = vrot.slane %v6329_v55, 4  ;;  %v6336_v20 = vsel %vm6006_vm4, %v5537_v2, -inf  ;;  %v15182_v42 = vadd.f32 %v15159_v25, %v12197_v44 }
 0x2f3   : > { %v15185_v33 = vsel %vm17360_vm14, %v6251_v9, -inf  ;;  %v15188_v37 = vsel %vm17360_vm14, %v6258_v34, -inf  ;;  %v6324_v26 = vmax.f32 %v6322_v23, %v6323_v28  ;;  %v6337_v3 = vrot.slane %v6336_v20, 4 }
 0x2f4   : > { %v6318_v21 = vrot.slane %v6317_v47, 2  ;;  %v6331_v4 = vmax.f32 %v6329_v55, %v6330_v24  ;;  %v5154_v11 = vmul.f32 0.5, %v15182_v42  ;;  %v12198_v48 = vadd.f32 %v14912_v49, %v14766_v19 }
 0x2f5   : > { %v6325_v35 = vrot.slane %v6324_v26, 2  ;;  %v6338_v13 = vmax.f32 %v6336_v20, %v6337_v3  ;;  %v12199_v63 = vadd.f32 %v17849_v6, %v14775_v50  ;;  %v12200_v62 = vadd.f32 %v17851_v16, %v17850_v7 }
 0x2f6   : > { %v12590_v31 = vpop.eup %12589  ;;  %v6319_v44 = vmax.f32 %v6317_v47, %v6318_v21  ;;  %v6332_v53 = vrot.slane %v6331_v4, 2  ;;  %12593 = vtanh.f32 %v5154_v11  ;;  %v15198_v57 = vadd.f32 %v15159_v25, %v12198_v48 }
 0x2f7   : > { %v6326_v5 = vmax.f32 %v6324_v26, %v6325_v35  ;;  %v6339_v12 = vrot.slane %v6338_v13, 2  ;;  %v5216_v46 = vadd.f32 1.0, %v12590_v31  ;;  %v15201_v19 = vadd.f32 %v15159_v25, %v12199_v63 }
 0x2f8   : > { %v12592_v49 = vpop.eup %12591  ;;  %v6320_v40 = vrot.slane %v6319_v44, 1  ;;  %v6333_v56 = vmax.f32 %v6331_v4, %v6332_v53  ;;  %v5157_v50 = vmul.f32 0.5, %v15198_v57  ;;  %v15205_v45 = vadd.f32 %v15159_v25, %v12200_v62 }
 0x2f9   : > { %v6327_v22 = vrot.slane %v6326_v5, 1  ;;  %v6340_v52 = vmax.f32 %v6338_v13, %v6339_v12  ;;  %v5248_v10 = vmul.f32 0.5, %v5216_v46  ;;  %v5219_v14 = vadd.f32 1.0, %v12592_v49  ;;  %v15242_v46 = vpop.f32.mrb[25].mxu0 }
 0x2fa   : > { %v6321_v54 = vmax.f32 %v6319_v44, %v6320_v40  ;;  %v6334_v8 = vrot.slane %v6333_v56, 1  ;;  %12595 = vtanh.f32 %v5157_v50  ;;  %v5156_v43 = vmul.f32 0.5, %v15201_v19 }
 0x2fb   : > { %v6328_v18 = vmax.f32 %v6326_v5, %v6327_v22  ;;  %v6341_v2 = vrot.slane %v6340_v52, 1  ;;  %v5280_v58 = vmul.f32 %v5248_v10, %v15150_v51  ;;  %v5251_v23 = vmul.f32 0.5, %v5219_v14 }
 0x2fc   : > { %v6335_v55 = vmax.f32 %v6333_v56, %v6334_v8  ;;  %v15212_v9 = vsel %vm17360_vm14, %v6321_v54, -inf  ;;  %12597 = vtanh.f32 %v5156_v43  ;;  %v5159_v34 = vmul.f32 0.5, %v15205_v45 }
 0x2fd   : > { %v6342_v28 = vmax.f32 %v6340_v52, %v6341_v2  ;;  %v6966_v47 = vmax.f32 %v15123_v59, %v15212_v9  ;;  %v15218_v24 = vsel %vm17360_vm14, %v6328_v18, -inf  ;;  %v5504_v20 = vcombine.high %v5280_v58, %v5280_v58 }
 0x2fe   : > { %v6969_v26 = vmax.f32 %v15135_v1, %v15218_v24  ;;  %v15223_v51 = vsel %vm17360_vm14, %v6335_v55, -inf  ;;  %v5511_v3 = vrot.slane %v5280_v58, %v14873_v60  ;;  %v5283_v21 = vmul.f32 %v5251_v23, %v15162_v61 }
 0x2ff   : > { %v6972_v4 = vmax.f32 %v15141_v39, %v15223_v51  ;;  %v15230_v11 = vsel %vm17360_vm14, %v6342_v28, -inf  ;;  %v5518_v48 = vrot.slane %v5504_v20, %v14873_v60  ;;  %12599 = vtanh.f32 %v5159_v34 }
 0x300   : > { %v12594_v35 = vpop.eup %12593  ;;  %v5519_v6 = vcombine.high %v5511_v3, %v5511_v3  ;;  %v6287_v63 = vsel %vm6006_vm4, %v5511_v3, -inf  ;;  %v5555_v7 = vcombine.high %v5283_v21, %v5283_v21  ;;  %v5562_v31 = vrot.slane %v5283_v21, %v14873_v60 }
 0x301   : > { %v5520_v16 = vcombine.high %v5518_v48, %v5518_v48  ;;  %v6288_v62 = vrot.slane %v6287_v63, 4  ;;  %v6301_v61 = vsel %vm6006_vm4, %v5518_v48, -inf  ;;  %v15240_v12 = vadd.f32 1.0, %v12594_v35 }
 0x302   : > { %v6294_v44 = vsel %vm6006_vm4, %v5519_v6, -inf  ;;  %v6302_v53 = vrot.slane %v6301_v61, 4  ;;  %v5569_v5 = vrot.slane %v5555_v7, %v14873_v60  ;;  %v5570_v50 = vcombine.high %v5562_v31, %v5562_v31 }
 0x303   : > { %v6289_v49 = vmax.f32 %v6287_v63, %v6288_v62  ;;  %v6295_v40 = vrot.slane %v6294_v44, 4  ;;  %v6308_v56 = vsel %vm6006_vm4, %v5520_v16, -inf  ;;  %v6371_v54 = vsel %vm6006_vm4, %v5562_v31, -inf }
 0x304   : > { %v15245_v22 = vpop.eup %12595  ;;  %v6303_v52 = vmax.f32 %v6301_v61, %v6302_v53  ;;  %v6309_v10 = vrot.slane %v6308_v56, 4  ;;  %v5571_v14 = vcombine.high %v5569_v5, %v5569_v5  ;;  %v6372_v18 = vrot.slane %v6371_v54, 4 }
 0x305   : > { %v6290_v8 = vrot.slane %v6289_v49, 2  ;;  %v6296_v43 = vmax.f32 %v6294_v44, %v6295_v40  ;;  %v6378_v2 = vsel %vm6006_vm4, %v5570_v50, -inf  ;;  %v6385_v28 = vsel %vm6006_vm4, %v5569_v5, -inf }
 0x306   : > { %v12598_v58 = vpop.eup %12597  ;;  %v6304_v23 = vrot.slane %v6303_v52, 2  ;;  %v6310_v55 = vmax.f32 %v6308_v56, %v6309_v10  ;;  %v6379_v34 = vrot.slane %v6378_v2, 4  ;;  %v6373_v21 = vmax.f32 %v6371_v54, %v6372_v18 }
 0x307   : > { %v6291_v20 = vmax.f32 %v6289_v49, %v6290_v8  ;;  %v6297_v3 = vrot.slane %v6296_v43, 2  ;;  %v6386_v48 = vrot.slane %v6385_v28, 4  ;;  %v6392_v7 = vsel %vm6006_vm4, %v5571_v14, -inf }
 0x308   : > { %v6305_v35 = vmax.f32 %v6303_v52, %v6304_v23  ;;  %v6311_v6 = vrot.slane %v6310_v55, 2  ;;  %v6380_v63 = vmax.f32 %v6378_v2, %v6379_v34  ;;  %v6374_v31 = vrot.slane %v6373_v21, 2 }
 0x309   : > { %v12600_v16 = vpop.eup %12599  ;;  %v6292_v62 = vrot.slane %v6291_v20, 1  ;;  %v6298_v61 = vmax.f32 %v6296_v43, %v6297_v3  ;;  %v6387_v44 = vmax.f32 %v6385_v28, %v6386_v48  ;;  %v6393_v50 = vrot.slane %v6392_v7, 4 }
 0x30a   : > { %v6306_v53 = vrot.slane %v6305_v35, 1  ;;  %v6312_v40 = vmax.f32 %v6310_v55, %v6311_v6  ;;  %v6381_v56 = vrot.slane %v6380_v63, 2  ;;  %v6375_v49 = vmax.f32 %v6373_v21, %v6374_v31 }
 0x30b   : > { %v6293_v10 = vmax.f32 %v6291_v20, %v6292_v62  ;;  %v6299_v5 = vrot.slane %v6298_v61, 1  ;;  %v6388_v8 = vrot.slane %v6387_v44, 2  ;;  %v6394_v23 = vmax.f32 %v6392_v7, %v6393_v50 }
 0x30c   : > { %v6307_v54 = vmax.f32 %v6305_v35, %v6306_v53  ;;  %v6313_v18 = vrot.slane %v6312_v40, 1  ;;  %v6382_v52 = vmax.f32 %v6380_v63, %v6381_v56  ;;  %v6376_v34 = vrot.slane %v6375_v49, 1  ;;  %v15263_v53 = vpop.f32.mrb[26].mxu0 }
 0x30d   : > { %v6300_v2 = vmax.f32 %v6298_v61, %v6299_v5  ;;  %v6953_v14 = vsel %vm17360_vm14, %v6293_v10, -inf  ;;  %v6389_v13 = vmax.f32 %v6387_v44, %v6388_v8  ;;  %v6395_v62 = vrot.slane %v6394_v23, 2 }
 0x30e   : > { %v6314_v43 = vmax.f32 %v6312_v40, %v6313_v18  ;;  %v6954_v28 = vmax.f32 %v15173_v29, %v6953_v14  ;;  %v6959_v55 = vsel %vm17360_vm14, %v6307_v54, -inf  ;;  %v6383_v3 = vrot.slane %v6382_v52, 1 }
 0x30f   : > { %v6956_v20 = vsel %vm17360_vm14, %v6300_v2, -inf  ;;  %v6960_v21 = vmax.f32 %v15185_v33, %v6959_v55  ;;  %v6377_v48 = vmax.f32 %v6375_v49, %v6376_v34  ;;  %v6390_v35 = vrot.slane %v6389_v13, 1 }
 0x310   : > { %v6957_v6 = vmax.f32 %v15178_v0, %v6956_v20  ;;  %v6962_v63 = vsel %vm17360_vm14, %v6314_v43, -inf  ;;  %v6384_v7 = vmax.f32 %v6382_v52, %v6383_v3  ;;  %v5250_v44 = vmul.f32 0.5, %v15240_v12 }
 0x311   : > { %v6963_v61 = vmax.f32 %v15188_v37, %v6962_v63  ;;  %v6391_v31 = vmax.f32 %v6389_v13, %v6390_v35  ;;  %v15260_v29 = vsel %vm17360_vm14, %v6377_v48, -inf  ;;  %v6396_v40 = vmax.f32 %v6394_v23, %v6395_v62 }
 0x312   : > { %v7181_v33 = vsel %vm17343_vm7, %v6957_v6, %v6954_v28  ;;  %v15267_v56 = vsel %vm17360_vm14, %v6384_v7, -inf  ;;  %v5221_v0 = vadd.f32 1.0, %v15245_v22  ;;  %v5282_v13 = vmul.f32 %v5250_v44, %v15182_v42 }
 0x313   : > { %v7182_v50 = vsel %vm17344_vm10, %v6960_v21, %v7181_v33  ;;  %v15272_v37 = vsel %vm17360_vm14, %v6391_v31, -inf  ;;  %v5220_v10 = vadd.f32 1.0, %v12598_v58  ;;  %v6397_v5 = vrot.slane %v6396_v40, 1 }
 0x314   : > { %v7183_v12 = vsel %vm17347_vm5, %v6963_v61, %v7182_v50  ;;  %v5253_v49 = vmul.f32 0.5, %v5221_v0  ;;  %v5223_v8 = vadd.f32 1.0, %v12600_v16  ;;  %v5538_v18 = vcombine.high %v5282_v13, %v5282_v13  ;;  %v15288_v16 = vpop.f32.mrb[27].mxu0 }
 0x315   : > { %v7184_v54 = vsel %vm17346_vm9, %v6966_v47, %v7183_v12  ;;  %v5545_v22 = vrot.slane %v5282_v13, %v14873_v60  ;;  %v5252_v52 = vmul.f32 0.5, %v5220_v10  ;;  %v6398_v58 = vmax.f32 %v6396_v40, %v6397_v5 }
 0x316   : > { %v7185_v42 = vsel %vm17348_vm1, %v6969_v26, %v7184_v54  ;;  %v5285_v23 = vmul.f32 %v5253_v49, %v15198_v57  ;;  %v15286_v2 = vmul.f32 0.5, %v5223_v8  ;;  %v5552_v9 = vrot.slane %v5538_v18, %v14873_v60 }
 0x317   : > { %v7186_v59 = vsel %vm17338_vm8, %v6972_v4, %v7185_v42  ;;  %v5553_v47 = vcombine.high %v5545_v22, %v5545_v22  ;;  %v6343_v14 = vsel %vm6006_vm4, %v5545_v22, -inf  ;;  %v17852_v1 = vmax.f32 %v15146_v17, %v15230_v11 }
 0x318   : > { %v15301_v57 = vsel %vm17360_vm14, %v6398_v58, -inf  ;;  %v6344_v26 = vrot.slane %v6343_v14, 4  ;;  %v5589_v34 = vcombine.high %v5285_v23, %v5285_v23  ;;  %v5554_v39 = vcombine.high %v5552_v9, %v5552_v9 }
 0x319   : > { %v7187_v24 = vsel %vm17337_vm15, %v17852_v1, %v7186_v59  ;;  %v6350_v51 = vsel %vm6006_vm4, %v5553_v47, -inf  ;;  %v6357_v4 = vsel %vm6006_vm4, %v5552_v9, -inf  ;;  %v5596_v43 = vrot.slane %v5285_v23, %v14873_v60 }
 0x31a   : > { %7233 = vst.msk [vmem:[#allocation3 + $0x20] sm:$0xff] %vm17360_vm14, %v7187_v24  ;;  %v6345_v28 = vmax.f32 %v6343_v14, %v6344_v26  ;;  %v6351_v55 = vrot.slane %v6350_v51, 4  ;;  %v6358_v3 = vrot.slane %v6357_v4, 4  ;;  %v5603_v17 = vrot.slane %v5589_v34, %v14873_v60 }
 0x31b   : > { %v6364_v11 = vsel %vm6006_vm4, %v5554_v39, -inf  ;;  %v5604_v20 = vcombine.high %v5596_v43, %v5596_v43  ;;  %v6427_v21 = vsel %vm6006_vm4, %v5596_v43, -inf  ;;  %v5284_v48 = vmul.f32 %v5252_v52, %v15201_v19  ;;  %v7368_v19 = vld [vmem:[%s17120_s3 + $0x8] sm:$0xff] }
 0x31c   : > { %v6346_v35 = vrot.slane %v6345_v28, 2  ;;  %v6352_v6 = vmax.f32 %v6350_v51, %v6351_v55  ;;  %v6359_v63 = vmax.f32 %v6357_v4, %v6358_v3  ;;  %v6365_v7 = vrot.slane %v6364_v11, 4  ;;  %11881 = vmatprep.subr.mxu1 %v7368_v19 }
 0x31d   : > { %v5605_v62 = vcombine.high %v5603_v17, %v5603_v17  ;;  %v6428_v61 = vrot.slane %v6427_v21, 4  ;;  %v6434_v31 = vsel %vm6006_vm4, %v5604_v20, -inf  ;;  %v6441_v44 = vsel %vm6006_vm4, %v5603_v17, -inf  ;;  %11882 = vmatpush3.msra.mxu1 %v7368_v19 }
 0x31e   : > { %v6347_v33 = vmax.f32 %v6345_v28, %v6346_v35  ;;  %v6353_v40 = vrot.slane %v6352_v6, 2  ;;  %v6360_v0 = vrot.slane %v6359_v63, 2  ;;  %v6366_v50 = vmax.f32 %v6364_v11, %v6365_v7 }
 0x31f   : > { %v6429_v13 = vmax.f32 %v6427_v21, %v6428_v61  ;;  %v6435_v10 = vrot.slane %v6434_v31, 4  ;;  %v6442_v12 = vrot.slane %v6441_v44, 4  ;;  %v6448_v5 = vsel %vm6006_vm4, %v5605_v62, -inf  ;;  %v15326_v62 = vpop.f32.mrb[28].mxu0 }
 0x320   : > { %v6348_v49 = vrot.slane %v6347_v33, 1  ;;  %v6354_v8 = vmax.f32 %v6352_v6, %v6353_v40  ;;  %v6361_v54 = vmax.f32 %v6359_v63, %v6360_v0  ;;  %v6367_v18 = vrot.slane %v6366_v50, 2 }
 0x321   : > { %v6430_v22 = vrot.slane %v6429_v13, 2  ;;  %v6436_v52 = vmax.f32 %v6434_v31, %v6435_v10  ;;  %v6443_v42 = vmax.f32 %v6441_v44, %v6442_v12  ;;  %v6449_v58 = vrot.slane %v6448_v5, 4 }
 0x322   : > { %v6349_v23 = vmax.f32 %v6347_v33, %v6348_v49  ;;  %v6355_v59 = vrot.slane %v6354_v8, 1  ;;  %v6362_v9 = vrot.slane %v6361_v54, 1  ;;  %v6368_v47 = vmax.f32 %v6366_v50, %v6367_v18 }
 0x323   : > { %v6431_v14 = vmax.f32 %v6429_v13, %v6430_v22  ;;  %v6437_v1 = vrot.slane %v6436_v52, 2  ;;  %v6444_v24 = vrot.slane %v6443_v42, 2  ;;  %v6450_v26 = vmax.f32 %v6448_v5, %v6449_v58 }
 0x324   : > { %v6356_v34 = vmax.f32 %v6354_v8, %v6355_v59  ;;  %v6363_v39 = vmax.f32 %v6361_v54, %v6362_v9  ;;  %v6369_v51 = vrot.slane %v6368_v47, 1  ;;  %v15318_v4 = vsel %vm17360_vm14, %v6349_v23, -inf  ;;  %v15356_v59 = vpop.f32.mrb[29].mxu0 }
 0x325   : > { %v6432_v43 = vrot.slane %v6431_v14, 1  ;;  %v6438_v28 = vmax.f32 %v6436_v52, %v6437_v1  ;;  %v6445_v55 = vmax.f32 %v6443_v42, %v6444_v24  ;;  %v6451_v3 = vrot.slane %v6450_v26, 2 }
 0x326   : > { %v6370_v17 = vmax.f32 %v6368_v47, %v6369_v51  ;;  %v15321_v11 = vsel %vm17360_vm14, %v6356_v34, -inf  ;;  %v15324_v20 = vsel %vm17360_vm14, %v6363_v39, -inf  ;;  %v5572_v21 = vcombine.high %v5284_v48, %v5284_v48 }
 0x327   : > { %v6433_v35 = vmax.f32 %v6431_v14, %v6432_v43  ;;  %v6439_v6 = vrot.slane %v6438_v28, 1  ;;  %v6446_v63 = vrot.slane %v6445_v55, 1  ;;  %v6452_v7 = vmax.f32 %v6450_v26, %v6451_v3  ;;  %v17854_v3 = vld [vmem:[#allocation41_spill] sm:$0xff] }
 0x328   : > { %v15329_v61 = vsel %vm17360_vm14, %v6370_v17, -inf  ;;  %v5579_v31 = vrot.slane %v5284_v48, %v14873_v60  ;;  %v5586_v44 = vrot.slane %v5572_v21, %v14873_v60  ;;  %v5287_v33 = vmul.f32 %v15286_v2, %v15205_v45 }
 0x329   : > { %v6440_v40 = vmax.f32 %v6438_v28, %v6439_v6  ;;  %v6447_v0 = vmax.f32 %v6445_v55, %v6446_v63  ;;  %v6453_v50 = vrot.slane %v6452_v7, 1  ;;  %v15336_v13 = vsel %vm17360_vm14, %v6433_v35, -inf  ;;  %v17853_v55 = vld [vmem:[#allocation53_spill] sm:$0xff] }
 0x32a   : > { %v6990_v10 = vmax.f32 %v15260_v29, %v15336_v13  ;;  %v5587_v12 = vcombine.high %v5579_v31, %v5579_v31  ;;  %v5588_v5 = vcombine.high %v5586_v44, %v5586_v44  ;;  %v6399_v19 = vsel %vm6006_vm4, %v5579_v31, -inf }
 0x32b   : > { %v6454_v49 = vmax.f32 %v6452_v7, %v6453_v50  ;;  %v15342_v48 = vsel %vm17360_vm14, %v6440_v40, -inf  ;;  %v15345_v8 = vsel %vm17360_vm14, %v6447_v0, -inf  ;;  %v6400_v45 = vrot.slane %v6399_v19, 4 }
 0x32c   : > { %v6993_v2 = vmax.f32 %v15267_v56, %v15342_v48  ;;  %v6996_v54 = vmax.f32 %v15272_v37, %v15345_v8  ;;  %v6406_v18 = vsel %vm6006_vm4, %v5587_v12, -inf  ;;  %v6413_v22 = vsel %vm6006_vm4, %v5586_v44, -inf  ;;  %v17857_v56 = vld [vmem:[#allocation63_spill] sm:$0xff]  ;;  %v17858_v37 = vld [vmem:[#allocation16_spill] sm:$0xff] }
 0x32d   : > { %v15354_v52 = vsel %vm17360_vm14, %v6454_v49, -inf  ;;  %v6401_v42 = vmax.f32 %v6399_v19, %v6400_v45  ;;  %v6407_v58 = vrot.slane %v6406_v18, 4  ;;  %v6414_v23 = vrot.slane %v6413_v22, 4 }
 0x32e   : > { %v6999_v9 = vmax.f32 %v15301_v57, %v15354_v52  ;;  %v6420_v47 = vsel %vm6006_vm4, %v5588_v5, -inf  ;;  %v5623_v14 = vcombine.high %v5287_v33, %v5287_v33  ;;  %v5630_v1 = vrot.slane %v5287_v33, %v14873_v60  ;;  %v17860_v52 = vld [vmem:[#allocation18_spill] sm:$0xff] }
 0x32f   : > { %v6402_v24 = vrot.slane %v6401_v42, 2  ;;  %v6408_v26 = vmax.f32 %v6406_v18, %v6407_v58  ;;  %v6415_v34 = vmax.f32 %v6413_v22, %v6414_v23  ;;  %v6421_v39 = vrot.slane %v6420_v47, 4 }
 0x330   : > { %v5637_v51 = vrot.slane %v5623_v14, %v14873_v60  ;;  %v5638_v43 = vcombine.high %v5630_v1, %v5630_v1  ;;  %v6483_v28 = vsel %vm6006_vm4, %v5630_v1, -inf  ;;  %v12201_v17 = vadd.f32 %v17854_v3, %v17853_v55 }
 0x331   : > { %v6403_v21 = vmax.f32 %v6401_v42, %v6402_v24  ;;  %v6409_v35 = vrot.slane %v6408_v26, 2  ;;  %v6416_v6 = vrot.slane %v6415_v34, 2  ;;  %v6422_v63 = vmax.f32 %v6420_v47, %v6421_v39 }
 0x332   : > { %v5639_v7 = vcombine.high %v5637_v51, %v5637_v51  ;;  %v6484_v31 = vrot.slane %v6483_v28, 4  ;;  %v6490_v44 = vsel %vm6006_vm4, %v5638_v43, -inf  ;;  %v6497_v33 = vsel %vm6006_vm4, %v5637_v51, -inf }
 0x333   : > { %v6404_v40 = vrot.slane %v6403_v21, 1  ;;  %v6410_v0 = vmax.f32 %v6408_v26, %v6409_v35  ;;  %v6417_v50 = vmax.f32 %v6415_v34, %v6416_v6  ;;  %v6423_v12 = vrot.slane %v6422_v63, 2 }
 0x334   : > { %v6485_v5 = vmax.f32 %v6483_v28, %v6484_v31  ;;  %v6491_v19 = vrot.slane %v6490_v44, 4  ;;  %v6498_v49 = vrot.slane %v6497_v33, 4  ;;  %v6504_v45 = vsel %vm6006_vm4, %v5639_v7, -inf }
 0x335   : > { %v6405_v18 = vmax.f32 %v6403_v21, %v6404_v40  ;;  %v6411_v22 = vrot.slane %v6410_v0, 1  ;;  %v6418_v42 = vrot.slane %v6417_v50, 1  ;;  %v6424_v58 = vmax.f32 %v6422_v63, %v6423_v12 }
 0x336   : > { %v6486_v23 = vrot.slane %v6485_v5, 2  ;;  %v6492_v47 = vmax.f32 %v6490_v44, %v6491_v19  ;;  %v6499_v14 = vmax.f32 %v6497_v33, %v6498_v49  ;;  %v6505_v1 = vrot.slane %v6504_v45, 4 }
 0x337   : > { %v6412_v24 = vmax.f32 %v6410_v0, %v6411_v22  ;;  %v6419_v39 = vmax.f32 %v6417_v50, %v6418_v42  ;;  %v6425_v51 = vrot.slane %v6424_v58, 1  ;;  %v6977_v26 = vsel %vm17360_vm14, %v6405_v18, -inf  ;;  %v17855_v42 = vld [vmem:[#allocation55_spill] sm:$0xff] }
 0x338   : > { %v6978_v34 = vmax.f32 %v15318_v4, %v6977_v26  ;;  %v6487_v43 = vmax.f32 %v6485_v5, %v6486_v23  ;;  %v6493_v28 = vrot.slane %v6492_v47, 2  ;;  %v6500_v55 = vrot.slane %v6499_v14, 2 }
 0x339   : > { %v6426_v3 = vmax.f32 %v6424_v58, %v6425_v51  ;;  %v6980_v21 = vsel %vm17360_vm14, %v6412_v24, -inf  ;;  %v6983_v35 = vsel %vm17360_vm14, %v6419_v39, -inf  ;;  %v6506_v6 = vmax.f32 %v6504_v45, %v6505_v1 }
 0x33a   : > { %v6981_v63 = vmax.f32 %v15321_v11, %v6980_v21  ;;  %v6984_v7 = vmax.f32 %v15324_v20, %v6983_v35  ;;  %v6488_v31 = vrot.slane %v6487_v43, 1  ;;  %v6494_v44 = vmax.f32 %v6492_v47, %v6493_v28 }
 0x33b   : > { %v6986_v33 = vsel %vm17360_vm14, %v6426_v3, -inf  ;;  %v6501_v40 = vmax.f32 %v6499_v14, %v6500_v55  ;;  %v6507_v0 = vrot.slane %v6506_v6, 2  ;;  %v15377_v4 = vadd.f32 %v15159_v25, %v12201_v17  ;;  %v11880_v17 = vpop.f32.mrb[30].mxu0 }
 0x33c   : > { %v6987_v50 = vmax.f32 %v15329_v61, %v6986_v33  ;;  %v7188_v12 = vsel %vm17343_vm7, %v6981_v63, %v6978_v34  ;;  %v6489_v5 = vmax.f32 %v6487_v43, %v6488_v31  ;;  %v6495_v19 = vrot.slane %v6494_v44, 1  ;;  %v17859_v34 = vld [vmem:[#allocation30_spill] sm:$0xff] }
 0x33d   : > { %v7189_v49 = vsel %vm17344_vm10, %v6984_v7, %v7188_v12  ;;  %v6502_v11 = vrot.slane %v6501_v40, 1  ;;  %v6508_v45 = vmax.f32 %v6506_v6, %v6507_v0  ;;  %v5158_v20 = vmul.f32 0.5, %v15377_v4  ;;  %v17863_v7 = vld [vmem:[#allocation24_spill] sm:$0xff]  ;;  %v17864_v0 = vld [vmem:[#allocation22_spill] sm:$0xff] }
 0x33e   : > { %v7190_v18 = vsel %vm17347_vm5, %v6987_v50, %v7189_v49  ;;  %v6496_v22 = vmax.f32 %v6494_v44, %v6495_v19  ;;  %v12202_v58 = vadd.f32 %v15026_v27, %v17855_v42  ;;  %v15395_v1 = vsel %vm17360_vm14, %v6489_v5, -inf  ;;  %v17856_v27 = vld [vmem:[#allocation59_spill] sm:$0xff]  ;;  %v17865_v5 = vld [vmem:[#allocation32_spill] sm:$0xff]  ;;  %v17866_v49 = vld [vmem:[#allocation26_spill] sm:$0xff] }
 0x33f   : > { %v7191_v61 = vsel %vm17346_vm9, %v6990_v10, %v7190_v18  ;;  %v6503_v23 = vmax.f32 %v6501_v40, %v6502_v11  ;;  %v6509_v47 = vrot.slane %v6508_v45, 1  ;;  %12601 = vtanh.f32 %v5158_v20  ;;  %v17867_v42 = vld [vmem:[#allocation48_spill] sm:$0xff] }
 0x340   : > { %v7192_v14 = vsel %vm17348_vm1, %v6993_v2, %v7191_v61  ;;  %v15398_v24 = vadd.f32 %v15159_v25, %v12202_v58  ;;  %v12203_v39 = vadd.f32 %v15041_v32, %v17856_v27  ;;  %v15407_v10 = vsel %vm17360_vm14, %v6496_v22, -inf  ;;  %v5062_v2 = vpop.f32.mrb[31].mxu0  ;;  %v17868_v61 = vld [vmem:[#allocation39_spill] sm:$0xff] }
 0x341   : > { %v7193_v29 = vsel %vm17338_vm8, %v6996_v54, %v7192_v14  ;;  %v6510_v13 = vmax.f32 %v6508_v45, %v6509_v47  ;;  %v12204_v48 = vadd.f32 %v15072_v15, %v17857_v56  ;;  %v12205_v8 = vadd.f32 %v15095_v38, %v17858_v37  ;;  %v17861_v38 = vld [vmem:[#allocation17_spill] sm:$0xff] }
 0x342   : > { %v7194_v51 = vsel %vm17337_vm15, %v6999_v9, %v7193_v29  ;;  %v5161_v32 = vmul.f32 0.5, %v15398_v24  ;;  %v15417_v26 = vadd.f32 %v15159_v25, %v12203_v39  ;;  %v15423_v54 = vsel %vm17360_vm14, %v6503_v23, -inf }
 0x343   : > { %7234 = vst.msk [vmem:[#allocation3 + $0x28] sm:$0xff] %vm17360_vm14, %v7194_v51  ;;  %v15426_v15 = vadd.f32 %v15159_v25, %v12204_v48  ;;  %v12206_v57 = vadd.f32 %v15137_v30, %v17859_v34  ;;  %v12207_v9 = vadd.f32 %v15170_v36, %v17860_v52  ;;  %v15434_v28 = vadd.f32 %v15159_v25, %v12205_v8  ;;  %v17862_v30 = vld [vmem:[#allocation31_spill] sm:$0xff]  ;;  %v17869_v51 = vld [vmem:[#allocation8_spill] sm:$0xff] }
 0x344   : > { %12603 = vtanh.f32 %v5161_v32  ;;  %v5160_v43 = vmul.f32 0.5, %v15417_v26  ;;  %v12208_v55 = vadd.f32 %v15207_v41, %v17861_v38  ;;  %v12209_v36 = vadd.f32 %v15242_v46, %v17862_v30 }
 0x345   : > { %v5163_v3 = vmul.f32 0.5, %v15426_v15  ;;  %v15440_v21 = vadd.f32 %v15159_v25, %v12206_v57  ;;  %v15443_v35 = vadd.f32 %v15159_v25, %v12207_v9  ;;  %v5162_v6 = vmul.f32 0.5, %v15434_v28 }
 0x346   : > { %12605 = vtanh.f32 %v5160_v43  ;;  %v15449_v63 = vadd.f32 %v15159_v25, %v12208_v55  ;;  %v12210_v41 = vadd.f32 %v15263_v53, %v17863_v7  ;;  %v15456_v33 = vadd.f32 %v15159_v25, %v12209_v36 }
 0x347   : > { %12607 = vtanh.f32 %v5163_v3  ;;  %v5165_v31 = vmul.f32 0.5, %v15440_v21  ;;  %v5164_v44 = vmul.f32 0.5, %v15443_v35  ;;  %v12211_v50 = vadd.f32 %v15288_v16, %v17864_v0 }
 0x348   : > { %12609 = vtanh.f32 %v5162_v6  ;;  %v5167_v46 = vmul.f32 0.5, %v15449_v63  ;;  %v15460_v40 = vadd.f32 %v15159_v25, %v12210_v41  ;;  %v5166_v53 = vmul.f32 0.5, %v15456_v33 }
 0x349   : > { %v12602_v12 = vpop.eup %12601  ;;  %12611 = vtanh.f32 %v5165_v31  ;;  %v12212_v19 = vadd.f32 %v15326_v62, %v17865_v5  ;;  %v12213_v11 = vadd.f32 %v15356_v59, %v17866_v49  ;;  %v15471_v18 = vadd.f32 %v15159_v25, %v12211_v50 }
 0x34a   : > { %v5222_v45 = vadd.f32 1.0, %v12602_v12  ;;  %12613 = vtanh.f32 %v5164_v44  ;;  %v5169_v20 = vmul.f32 0.5, %v15460_v40  ;;  %v12214_v58 = vadd.f32 %v11880_v17, %v17867_v42 }
 0x34b   : > { %12615 = vtanh.f32 %v5167_v46  ;;  %v15474_v16 = vadd.f32 %v15159_v25, %v12212_v19  ;;  %v15477_v22 = vadd.f32 %v15159_v25, %v12213_v11  ;;  %v5168_v59 = vmul.f32 0.5, %v15471_v18 }
 0x34c   : > { %v5254_v62 = vmul.f32 0.5, %v5222_v45  ;;  %12617 = vtanh.f32 %v5166_v53  ;;  %v12215_v23 = vadd.f32 %v5062_v2, %v17868_v61  ;;  %v15485_v27 = vadd.f32 %v15159_v25, %v12214_v58 }
 0x34d   : > { %12619 = vtanh.f32 %v5169_v20  ;;  %v5171_v47 = vmul.f32 0.5, %v15474_v16  ;;  %v5170_v14 = vmul.f32 0.5, %v15477_v22  ;;  %v15488_v29 = vsel %vm17360_vm14, %v6510_v13, -inf }
 0x34e   : > { %v12604_v39 = vpop.eup %12603  ;;  %v5286_v17 = vmul.f32 %v5254_v62, %v15377_v4  ;;  %12621 = vtanh.f32 %v5168_v59  ;;  %v15492_v56 = vadd.f32 %v15159_v25, %v12215_v23  ;;  %v5173_v2 = vmul.f32 0.5, %v15485_v27 }
 0x34f   : > { %v5225_v48 = vadd.f32 1.0, %v12604_v39  ;;  %12623 = vtanh.f32 %v5171_v47  ;;  %v7247_v32 = vshra.s32 %v17869_v51, 3 }
 0x350   : > { %v12606_v37 = vpop.eup %12605  ;;  %v5606_v8 = vcombine.high %v5286_v17, %v5286_v17  ;;  %v5613_v34 = vrot.slane %v5286_v17, %v14873_v60  ;;  %12625 = vtanh.f32 %v5170_v14  ;;  %v15498_v13 = vmul.f32 0.5, %v15492_v56 }
 0x351   : > { %v12608_v57 = vpop.eup %12607  ;;  %v5257_v4 = vmul.f32 0.5, %v5225_v48  ;;  %v5224_v52 = vadd.f32 1.0, %v12606_v37  ;;  %12627 = vtanh.f32 %v5173_v2  ;;  %v15500_v25 = vand.u32 7, %v7247_v32 }
 0x352   : > { %v12610_v9 = vpop.eup %12609  ;;  %v5620_v43 = vrot.slane %v5606_v8, %v14873_v60  ;;  %v5621_v38 = vcombine.high %v5613_v34, %v5613_v34  ;;  %v6455_v55 = vsel %vm6006_vm4, %v5613_v34, -inf  ;;  %v5227_v3 = vadd.f32 1.0, %v12608_v57 }
 0x353   : > { %v15504_v30 = vpop.eup %12611  ;;  %v6456_v36 = vrot.slane %v6455_v55, 4  ;;  %v5289_v6 = vmul.f32 %v5257_v4, %v15398_v24  ;;  %v5256_v7 = vmul.f32 0.5, %v5224_v52  ;;  %v15507_v41 = vadd.f32 1.0, %v12610_v9 }
 0x354   : > { %v15509_v31 = vpop.eup %12613  ;;  %v5622_v44 = vcombine.high %v5620_v43, %v5620_v43  ;;  %v6462_v46 = vsel %vm6006_vm4, %v5621_v38, -inf  ;;  %v6469_v0 = vsel %vm6006_vm4, %v5620_v43, -inf  ;;  %v5259_v50 = vmul.f32 0.5, %v5227_v3 }
 0x355   : > { %v15513_v12 = vpop.eup %12615  ;;  %v6457_v53 = vmax.f32 %v6455_v55, %v6456_v36  ;;  %v6463_v5 = vrot.slane %v6462_v46, 4  ;;  %v6470_v19 = vrot.slane %v6469_v0, 4  ;;  %v5657_v49 = vcombine.high %v5289_v6, %v5289_v6 }
 0x356   : > { %v15515_v11 = vpop.eup %12617  ;;  %v6476_v24 = vsel %vm6006_vm4, %v5622_v44, -inf  ;;  %v5664_v45 = vrot.slane %v5289_v6, %v14873_v60  ;;  %v5288_v20 = vmul.f32 %v5256_v7, %v15417_v26  ;;  %v15521_v42 = vmul.f32 %v5259_v50, %v15426_v15 }
 0x357   : > { %v15523_v58 = vpop.eup %12619  ;;  %v6458_v62 = vrot.slane %v6457_v53, 2  ;;  %v6464_v59 = vmax.f32 %v6462_v46, %v6463_v5  ;;  %v6471_v61 = vmax.f32 %v6469_v0, %v6470_v19  ;;  %v6477_v23 = vrot.slane %v6476_v24, 4 }
 0x358   : > { %v15525_v47 = vpop.eup %12621  ;;  %v5671_v14 = vrot.slane %v5657_v49, %v14873_v60  ;;  %v5672_v39 = vcombine.high %v5664_v45, %v5664_v45  ;;  %v6539_v17 = vsel %vm6006_vm4, %v5664_v45, -inf  ;;  %v5640_v48 = vcombine.high %v5288_v20, %v5288_v20 }
 0x359   : > { %v15529_v2 = vpop.eup %12623  ;;  %v6459_v26 = vmax.f32 %v6457_v53, %v6458_v62  ;;  %v6465_v32 = vrot.slane %v6464_v59, 2  ;;  %v6472_v15 = vrot.slane %v6471_v61, 2  ;;  %v6478_v37 = vmax.f32 %v6476_v24, %v6477_v23 }
 0x35a   : > { %v15531_v8 = vpop.eup %12625  ;;  %v5673_v34 = vcombine.high %v5671_v14, %v5671_v14  ;;  %v6540_v57 = vrot.slane %v6539_v17, 4  ;;  %v6546_v4 = vsel %vm6006_vm4, %v5672_v39, -inf  ;;  %v6553_v52 = vsel %vm6006_vm4, %v5671_v14, -inf }
 0x35b   : > { %v15535_v9 = vpop.eup %12627  ;;  %v6460_v43 = vrot.slane %v6459_v26, 1  ;;  %v6466_v38 = vmax.f32 %v6464_v59, %v6465_v32  ;;  %v6473_v55 = vmax.f32 %v6471_v61, %v6472_v15  ;;  %v6479_v3 = vrot.slane %v6478_v37, 2 }
 0x35c   : > { %v6541_v36 = vmax.f32 %v6539_v17, %v6540_v57  ;;  %v6547_v6 = vrot.slane %v6546_v4, 4  ;;  %v6554_v7 = vrot.slane %v6553_v52, 4  ;;  %v6560_v44 = vsel %vm6006_vm4, %v5673_v34, -inf }
 0x35d   : > { %v6461_v46 = vmax.f32 %v6459_v26, %v6460_v43  ;;  %v6467_v0 = vrot.slane %v6466_v38, 1  ;;  %v6474_v50 = vrot.slane %v6473_v55, 1  ;;  %v6480_v53 = vmax.f32 %v6478_v37, %v6479_v3 }
 0x35e   : > { %v6542_v5 = vrot.slane %v6541_v36, 2  ;;  %v6548_v19 = vmax.f32 %v6546_v4, %v6547_v6  ;;  %v6555_v49 = vmax.f32 %v6553_v52, %v6554_v7  ;;  %v6561_v24 = vrot.slane %v6560_v44, 4 }
 0x35f   : > { %v6468_v45 = vmax.f32 %v6466_v38, %v6467_v0  ;;  %v6475_v62 = vmax.f32 %v6473_v55, %v6474_v50  ;;  %v6481_v23 = vrot.slane %v6480_v53, 1  ;;  %v15539_v59 = vsel %vm17360_vm14, %v6461_v46, -inf }
 0x360   : > { %v6543_v61 = vmax.f32 %v6541_v36, %v6542_v5  ;;  %v6549_v14 = vrot.slane %v6548_v19, 2  ;;  %v6556_v39 = vrot.slane %v6555_v49, 2  ;;  %v6562_v17 = vmax.f32 %v6560_v44, %v6561_v24 }
 0x361   : > { %v6482_v32 = vmax.f32 %v6480_v53, %v6481_v23  ;;  %v15542_v26 = vsel %vm17360_vm14, %v6468_v45, -inf  ;;  %v15545_v15 = vsel %vm17360_vm14, %v6475_v62, -inf  ;;  %v5647_v37 = vrot.slane %v5288_v20, %v14873_v60 }
 0x362   : > { %v6544_v34 = vrot.slane %v6543_v61, 1  ;;  %v6550_v57 = vmax.f32 %v6548_v19, %v6549_v14  ;;  %v6557_v4 = vmax.f32 %v6555_v49, %v6556_v39  ;;  %v6563_v52 = vrot.slane %v6562_v17, 2 }
 0x363   : > { %v15549_v43 = vsel %vm17360_vm14, %v6482_v32, -inf  ;;  %v5654_v38 = vrot.slane %v5640_v48, %v14873_v60  ;;  %v5655_v55 = vcombine.high %v5647_v37, %v5647_v37  ;;  %v6511_v3 = vsel %vm6006_vm4, %v5647_v37, -inf }
 0x364   : > { %v6545_v36 = vmax.f32 %v6543_v61, %v6544_v34  ;;  %v6551_v6 = vrot.slane %v6550_v57, 1  ;;  %v6558_v7 = vrot.slane %v6557_v4, 1  ;;  %v6564_v44 = vmax.f32 %v6562_v17, %v6563_v52 }
 0x365   : > { %v5656_v46 = vcombine.high %v5654_v38, %v5654_v38  ;;  %v6512_v0 = vrot.slane %v6511_v3, 4  ;;  %v6518_v20 = vsel %vm6006_vm4, %v5655_v55, -inf  ;;  %v6525_v50 = vsel %vm6006_vm4, %v5654_v38, -inf }
 0x366   : > { %v6552_v53 = vmax.f32 %v6550_v57, %v6551_v6  ;;  %v6559_v5 = vmax.f32 %v6557_v4, %v6558_v7  ;;  %v6565_v19 = vrot.slane %v6564_v44, 1  ;;  %v15556_v49 = vsel %vm17360_vm14, %v6545_v36, -inf }
 0x367   : > { %v6513_v24 = vmax.f32 %v6511_v3, %v6512_v0  ;;  %v6519_v45 = vrot.slane %v6518_v20, 4  ;;  %v6526_v62 = vrot.slane %v6525_v50, 4  ;;  %v6532_v39 = vsel %vm6006_vm4, %v5656_v46, -inf }
 0x368   : > { %v6566_v23 = vmax.f32 %v6564_v44, %v6565_v19  ;;  %v15561_v61 = vsel %vm17360_vm14, %v6552_v53, -inf  ;;  %v15564_v14 = vsel %vm17360_vm14, %v6559_v5, -inf  ;;  %v6533_v52 = vrot.slane %v6532_v39, 4 }
 0x369   : > { %v6514_v37 = vrot.slane %v6513_v24, 2  ;;  %v6520_v34 = vmax.f32 %v6518_v20, %v6519_v45  ;;  %v6527_v4 = vmax.f32 %v6525_v50, %v6526_v62  ;;  %v5691_v38 = vcombine.high %v15521_v42, %v15521_v42 }
 0x36a   : > { %v15572_v57 = vsel %vm17360_vm14, %v6566_v23, -inf  ;;  %v5698_v6 = vrot.slane %v15521_v42, %v14873_v60  ;;  %v6534_v44 = vmax.f32 %v6532_v39, %v6533_v52  ;;  %v5258_v0 = vmul.f32 0.5, %v15507_v41 }
 0x36b   : > { %v6515_v3 = vmax.f32 %v6513_v24, %v6514_v37  ;;  %v6521_v36 = vrot.slane %v6520_v34, 2  ;;  %v6528_v7 = vrot.slane %v6527_v4, 2  ;;  %v5705_v46 = vrot.slane %v5691_v38, %v14873_v60 }
 0x36c   : > { %v5706_v53 = vcombine.high %v5698_v6, %v5698_v6  ;;  %v6595_v5 = vsel %vm6006_vm4, %v5698_v6, -inf  ;;  %v6535_v45 = vrot.slane %v6534_v44, 2  ;;  %12629 = vtanh.f32 %v15498_v13 }
 0x36d   : > { %v6516_v20 = vrot.slane %v6515_v3, 1  ;;  %v6522_v50 = vmax.f32 %v6520_v34, %v6521_v36  ;;  %v6529_v19 = vmax.f32 %v6527_v4, %v6528_v7  ;;  %v5707_v62 = vcombine.high %v5705_v46, %v5705_v46 }
 0x36e   : > { %v6596_v23 = vrot.slane %v6595_v5, 4  ;;  %v6602_v55 = vsel %vm6006_vm4, %v5706_v53, -inf  ;;  %v6609_v42 = vsel %vm6006_vm4, %v5705_v46, -inf  ;;  %v6536_v52 = vmax.f32 %v6534_v44, %v6535_v45 }
 0x36f   : > { %v6517_v24 = vmax.f32 %v6515_v3, %v6516_v20  ;;  %v6523_v37 = vrot.slane %v6522_v50, 1  ;;  %v6530_v39 = vrot.slane %v6529_v19, 1  ;;  %v6603_v32 = vrot.slane %v6602_v55, 4 }
 0x370   : > { %v6597_v38 = vmax.f32 %v6595_v5, %v6596_v23  ;;  %v6610_v36 = vrot.slane %v6609_v42, 4  ;;  %v6616_v6 = vsel %vm6006_vm4, %v5707_v62, -inf  ;;  %v6537_v7 = vrot.slane %v6536_v52, 1 }
 0x371   : > { %v6524_v41 = vmax.f32 %v6522_v50, %v6523_v37  ;;  %v7001_v34 = vsel %vm17360_vm14, %v6517_v24, -inf  ;;  %v6531_v4 = vmax.f32 %v6529_v19, %v6530_v39  ;;  %v6604_v53 = vmax.f32 %v6602_v55, %v6603_v32 }
 0x372   : > { %v7002_v17 = vmax.f32 %v15539_v59, %v7001_v34  ;;  %v6598_v3 = vrot.slane %v6597_v38, 2  ;;  %v6611_v48 = vmax.f32 %v6609_v42, %v6610_v36  ;;  %v6617_v46 = vrot.slane %v6616_v6, 4 }
 0x373   : > { %v7004_v20 = vsel %vm17360_vm14, %v6524_v41, -inf  ;;  %v6538_v51 = vmax.f32 %v6536_v52, %v6537_v7  ;;  %v7007_v50 = vsel %vm17360_vm14, %v6531_v4, -inf  ;;  %v6605_v23 = vrot.slane %v6604_v53, 2 }
 0x374   : > { %v7005_v44 = vmax.f32 %v15542_v26, %v7004_v20  ;;  %v6599_v5 = vmax.f32 %v6597_v38, %v6598_v3  ;;  %v7008_v45 = vmax.f32 %v15545_v15, %v7007_v50  ;;  %v6612_v62 = vrot.slane %v6611_v48, 2 }
 0x375   : > { %v6618_v19 = vmax.f32 %v6616_v6, %v6617_v46  ;;  %v7010_v24 = vsel %vm17360_vm14, %v6538_v51, -inf  ;;  %v5290_v32 = vmul.f32 %v5258_v0, %v15434_v28  ;;  %v6606_v26 = vmax.f32 %v6604_v53, %v6605_v23 }
 0x376   : > { %v7195_v59 = vsel %vm17343_vm7, %v7005_v44, %v7002_v17  ;;  %v6600_v37 = vrot.slane %v6599_v5, 1  ;;  %v7011_v55 = vmax.f32 %v15549_v43, %v7010_v24  ;;  %v6613_v39 = vmax.f32 %v6611_v48, %v6612_v62 }
 0x377   : > { %v7196_v42 = vsel %vm17344_vm10, %v7008_v45, %v7195_v59  ;;  %v6619_v38 = vrot.slane %v6618_v19, 2  ;;  %v5674_v41 = vcombine.high %v5290_v32, %v5290_v32  ;;  %v5681_v15 = vrot.slane %v5290_v32, %v14873_v60 }
 0x378   : > { %v6601_v52 = vmax.f32 %v6599_v5, %v6600_v37  ;;  %v7197_v34 = vsel %vm17347_vm5, %v7011_v55, %v7196_v42  ;;  %v6607_v36 = vrot.slane %v6606_v26, 1  ;;  %v6614_v51 = vrot.slane %v6613_v39, 1 }
 0x379   : > { %v5229_v17 = vadd.f32 1.0, %v15504_v30  ;;  %v17870_v28 = vmax.f32 %v15395_v1, %v15556_v49  ;;  %v6620_v0 = vmax.f32 %v6618_v19, %v6619_v38  ;;  %v5688_v48 = vrot.slane %v5674_v41, %v14873_v60 }
 0x37a   : > { %v15605_v6 = vsel %vm17360_vm14, %v6601_v52, -inf  ;;  %v17871_v4 = vmax.f32 %v15407_v10, %v15561_v61  ;;  %v6608_v3 = vmax.f32 %v6606_v26, %v6607_v36  ;;  %v6615_v20 = vmax.f32 %v6613_v39, %v6614_v51 }
 0x37b   : > { %v7198_v43 = vsel %vm17346_vm9, %v17870_v28, %v7197_v34  ;;  %v5689_v53 = vcombine.high %v5681_v15, %v5681_v15  ;;  %v17872_v30 = vmax.f32 %v15423_v54, %v15564_v14  ;;  %v6621_v49 = vrot.slane %v6620_v0, 1 }
 0x37c   : > { %v7199_v7 = vsel %vm17348_vm1, %v17871_v4, %v7198_v43  ;;  %v5690_v46 = vcombine.high %v5688_v48, %v5688_v48  ;;  %v6567_v44 = vsel %vm6006_vm4, %v5681_v15, -inf  ;;  %v17873_v50 = vmax.f32 %v15488_v29, %v15572_v57 }
 0x37d   : > { %v7200_v1 = vsel %vm17338_vm8, %v17872_v30, %v7199_v7  ;;  %v15622_v10 = vsel %vm17360_vm14, %v6608_v3, -inf  ;;  %v15625_v61 = vsel %vm17360_vm14, %v6615_v20, -inf  ;;  %v6568_v45 = vrot.slane %v6567_v44, 4 }
 0x37e   : > { %v7201_v5 = vsel %vm17337_vm15, %v17873_v50, %v7200_v1  ;;  %v6622_v54 = vmax.f32 %v6620_v0, %v6621_v49  ;;  %v6574_v14 = vsel %vm6006_vm4, %v5689_v53, -inf  ;;  %v6581_v23 = vsel %vm6006_vm4, %v5688_v48, -inf }
 0x37f   : > { %7235 = vst.msk [vmem:[#allocation3 + $0x30] sm:$0xff] %vm17360_vm14, %v7201_v5  ;;  %v6588_v62 = vsel %vm6006_vm4, %v5690_v46, -inf  ;;  %v6569_v19 = vmax.f32 %v6567_v44, %v6568_v45  ;;  %v6575_v29 = vrot.slane %v6574_v14, 4  ;;  %v6582_v57 = vrot.slane %v6581_v23, 4 }
 0x380   : > { %v6589_v24 = vrot.slane %v6588_v62, 4  ;;  %v15632_v59 = vsel %vm17360_vm14, %v6622_v54, -inf  ;;  %v5261_v37 = vmul.f32 0.5, %v5229_v17  ;;  %v5228_v32 = vadd.f32 1.0, %v15509_v31 }
 0x381   : > { %v5231_v55 = vadd.f32 1.0, %v15513_v12  ;;  %v6570_v42 = vrot.slane %v6569_v19, 2  ;;  %v6576_v26 = vmax.f32 %v6574_v14, %v6575_v29  ;;  %v6583_v39 = vmax.f32 %v6581_v23, %v6582_v57 }
 0x382   : > { %v6590_v52 = vmax.f32 %v6588_v62, %v6589_v24  ;;  %v5293_v38 = vmul.f32 %v5261_v37, %v15440_v21  ;;  %v5260_v41 = vmul.f32 0.5, %v5228_v32  ;;  %v15638_v34 = vadd.f32 1.0, %v15515_v11  ;;  %v15648_v11 = vld [vmem:[%s17120_s3] sm:$0xff] }
 0x383   : > { %v5263_v15 = vmul.f32 0.5, %v5231_v55  ;;  %v6571_v36 = vmax.f32 %v6569_v19, %v6570_v42  ;;  %v6577_v51 = vrot.slane %v6576_v26, 2  ;;  %v6584_v28 = vrot.slane %v6583_v39, 2  ;;  %11895 = vmatprep.subr.mxu1 %v15648_v11 }
 0x384   : > { %v6591_v43 = vrot.slane %v6590_v52, 2  ;;  %v5725_v17 = vcombine.high %v5293_v38, %v5293_v38  ;;  %v5732_v31 = vrot.slane %v5293_v38, %v14873_v60  ;;  %v5292_v12 = vmul.f32 %v5260_v41, %v15443_v35 }
 0x385   : > { %v15643_v0 = vmul.f32 %v5263_v15, %v15449_v63  ;;  %v6572_v48 = vrot.slane %v6571_v36, 1  ;;  %v6578_v4 = vmax.f32 %v6576_v26, %v6577_v51  ;;  %v6585_v21 = vmax.f32 %v6583_v39, %v6584_v28 }
 0x386   : > { %v6592_v7 = vmax.f32 %v6590_v52, %v6591_v43  ;;  %v5739_v3 = vrot.slane %v5725_v17, %v14873_v60  ;;  %v5740_v20 = vcombine.high %v5732_v31, %v5732_v31  ;;  %v6651_v53 = vsel %vm6006_vm4, %v5732_v31, -inf }
 0x387   : > { %v5708_v30 = vcombine.high %v5292_v12, %v5292_v12  ;;  %v6573_v35 = vmax.f32 %v6571_v36, %v6572_v48  ;;  %v6579_v63 = vrot.slane %v6578_v4, 1  ;;  %v6586_v1 = vrot.slane %v6585_v21, 1 }
 0x388   : > { %v6593_v49 = vrot.slane %v6592_v7, 1  ;;  %v5741_v46 = vcombine.high %v5739_v3, %v5739_v3  ;;  %v6652_v44 = vrot.slane %v6651_v53, 4  ;;  %v6658_v50 = vsel %vm6006_vm4, %v5740_v20, -inf }
 0x389   : > { %v6665_v5 = vsel %vm6006_vm4, %v5739_v3, -inf  ;;  %v6580_v45 = vmax.f32 %v6578_v4, %v6579_v63  ;;  %v6587_v54 = vmax.f32 %v6585_v21, %v6586_v1  ;;  %v15656_v23 = vsel %vm17360_vm14, %v6573_v35, -inf }
 0x38a   : > { %v6594_v14 = vmax.f32 %v6592_v7, %v6593_v49  ;;  %v6653_v62 = vmax.f32 %v6651_v53, %v6652_v44  ;;  %v6659_v19 = vrot.slane %v6658_v50, 4  ;;  %v6666_v29 = vrot.slane %v6665_v5, 4 }
 0x38b   : > { %v6672_v57 = vsel %vm6006_vm4, %v5741_v46, -inf  ;;  %v15660_v24 = vsel %vm17360_vm14, %v6580_v45, -inf  ;;  %v15663_v37 = vsel %vm17360_vm14, %v6587_v54, -inf  ;;  %v5715_v52 = vrot.slane %v5292_v12, %v14873_v60 }
 0x38c   : > { %v15666_v32 = vsel %vm17360_vm14, %v6594_v14, -inf  ;;  %v6673_v55 = vrot.slane %v6672_v57, 4  ;;  %v6654_v42 = vrot.slane %v6653_v62, 2  ;;  %v6660_v26 = vmax.f32 %v6658_v50, %v6659_v19 }
 0x38d   : > { %v6667_v39 = vmax.f32 %v6665_v5, %v6666_v29  ;;  %v5722_v41 = vrot.slane %v5708_v30, %v14873_v60  ;;  %v5759_v15 = vcombine.high %v15643_v0, %v15643_v0  ;;  %v5766_v36 = vrot.slane %v15643_v0, %v14873_v60 }
 0x38e   : > { %v6674_v38 = vmax.f32 %v6672_v57, %v6673_v55  ;;  %v6655_v51 = vmax.f32 %v6653_v62, %v6654_v42  ;;  %v6661_v28 = vrot.slane %v6660_v26, 2  ;;  %v5723_v17 = vcombine.high %v5715_v52, %v5715_v52 }
 0x38f   : > { %v6668_v43 = vrot.slane %v6667_v39, 2  ;;  %v5724_v48 = vcombine.high %v5722_v41, %v5722_v41  ;;  %v6623_v4 = vsel %vm6006_vm4, %v5715_v52, -inf  ;;  %v6637_v21 = vsel %vm6006_vm4, %v5722_v41, -inf }
 0x390   : > { %v6675_v31 = vrot.slane %v6674_v38, 2  ;;  %v6656_v12 = vrot.slane %v6655_v51, 1  ;;  %v6662_v7 = vmax.f32 %v6660_v26, %v6661_v28  ;;  %v6624_v20 = vrot.slane %v6623_v4, 4 }
 0x391   : > { %v6669_v3 = vmax.f32 %v6667_v39, %v6668_v43  ;;  %v6630_v30 = vsel %vm6006_vm4, %v5723_v17, -inf  ;;  %v6638_v35 = vrot.slane %v6637_v21, 4  ;;  %v6644_v0 = vsel %vm6006_vm4, %v5724_v48, -inf }
 0x392   : > { %v6676_v53 = vmax.f32 %v6674_v38, %v6675_v31  ;;  %v6657_v63 = vmax.f32 %v6655_v51, %v6656_v12  ;;  %v6663_v1 = vrot.slane %v6662_v7, 1  ;;  %v6625_v46 = vmax.f32 %v6623_v4, %v6624_v20 }
 0x393   : > { %v6670_v49 = vrot.slane %v6669_v3, 1  ;;  %v6631_v50 = vrot.slane %v6630_v30, 4  ;;  %v6639_v5 = vmax.f32 %v6637_v21, %v6638_v35  ;;  %v6645_v45 = vrot.slane %v6644_v0, 4 }
 0x394   : > { %v6677_v44 = vrot.slane %v6676_v53, 1  ;;  %v6664_v54 = vmax.f32 %v6662_v7, %v6663_v1  ;;  %v15679_v62 = vsel %vm17360_vm14, %v6657_v63, -inf  ;;  %v6626_v19 = vrot.slane %v6625_v46, 2 }
 0x395   : > { %v6671_v14 = vmax.f32 %v6669_v3, %v6670_v49  ;;  %v7038_v57 = vmax.f32 %v15605_v6, %v15679_v62  ;;  %v6632_v55 = vmax.f32 %v6630_v30, %v6631_v50  ;;  %v6640_v42 = vrot.slane %v6639_v5, 2 }
 0x396   : > { %v6678_v29 = vmax.f32 %v6676_v53, %v6677_v44  ;;  %v15684_v26 = vsel %vm17360_vm14, %v6664_v54, -inf  ;;  %v6627_v52 = vmax.f32 %v6625_v46, %v6626_v19  ;;  %v6646_v38 = vmax.f32 %v6644_v0, %v6645_v45 }
 0x397   : > { %v15687_v39 = vsel %vm17360_vm14, %v6671_v14, -inf  ;;  %v7041_v41 = vmax.f32 %v15622_v10, %v15684_v26  ;;  %v6633_v43 = vrot.slane %v6632_v55, 2  ;;  %v6641_v48 = vmax.f32 %v6639_v5, %v6640_v42 }
 0x398   : > { %v7044_v51 = vmax.f32 %v15625_v61, %v15687_v39  ;;  %v15694_v28 = vsel %vm17360_vm14, %v6678_v29, -inf  ;;  %v6628_v31 = vrot.slane %v6627_v52, 1  ;;  %v6647_v4 = vrot.slane %v6646_v38, 2 }
 0x399   : > { %v7047_v17 = vmax.f32 %v15632_v59, %v15694_v28  ;;  %v6634_v21 = vmax.f32 %v6632_v55, %v6633_v43  ;;  %v5773_v12 = vrot.slane %v5759_v15, %v14873_v60  ;;  %v5774_v7 = vcombine.high %v5766_v36, %v5766_v36 }
 0x39a   : > { %v6707_v3 = vsel %vm6006_vm4, %v5766_v36, -inf  ;;  %v6629_v10 = vmax.f32 %v6627_v52, %v6628_v31  ;;  %v6642_v20 = vrot.slane %v6641_v48, 1  ;;  %v6648_v53 = vmax.f32 %v6646_v38, %v6647_v4 }
 0x39b   : > { %v6708_v30 = vrot.slane %v6707_v3, 4  ;;  %v6635_v35 = vrot.slane %v6634_v21, 1  ;;  %v5775_v0 = vcombine.high %v5773_v12, %v5773_v12  ;;  %v6714_v63 = vsel %vm6006_vm4, %v5774_v7, -inf }
 0x39c   : > { %v6721_v1 = vsel %vm6006_vm4, %v5773_v12, -inf  ;;  %v6643_v49 = vmax.f32 %v6641_v48, %v6642_v20  ;;  %v6649_v46 = vrot.slane %v6648_v53, 1  ;;  %v7025_v44 = vsel %vm17360_vm14, %v6629_v10, -inf }
 0x39d   : > { %v6709_v50 = vmax.f32 %v6707_v3, %v6708_v30  ;;  %v6636_v5 = vmax.f32 %v6634_v21, %v6635_v35  ;;  %v7026_v15 = vmax.f32 %v15656_v23, %v7025_v44  ;;  %v6715_v45 = vrot.slane %v6714_v63, 4 }
 0x39e   : > { %v6722_v36 = vrot.slane %v6721_v1, 4  ;;  %v6650_v54 = vmax.f32 %v6648_v53, %v6649_v46  ;;  %v7031_v14 = vsel %vm17360_vm14, %v6643_v49, -inf  ;;  %v6728_v29 = vsel %vm6006_vm4, %v5775_v0, -inf }
 0x39f   : > { %v6710_v19 = vrot.slane %v6709_v50, 2  ;;  %v7028_v55 = vsel %vm17360_vm14, %v6636_v5, -inf  ;;  %v7032_v42 = vmax.f32 %v15663_v37, %v7031_v14  ;;  %v6716_v26 = vmax.f32 %v6714_v63, %v6715_v45 }
 0x3a0   : > { %v6723_v52 = vmax.f32 %v6721_v1, %v6722_v36  ;;  %v7029_v38 = vmax.f32 %v15660_v24, %v7028_v55  ;;  %v7034_v43 = vsel %vm17360_vm14, %v6650_v54, -inf  ;;  %v6729_v23 = vrot.slane %v6728_v29, 4 }
 0x3a1   : > { %v6711_v31 = vmax.f32 %v6709_v50, %v6710_v19  ;;  %v7035_v48 = vmax.f32 %v15666_v32, %v7034_v43  ;;  %v6717_v4 = vrot.slane %v6716_v26, 2  ;;  %v5262_v12 = vmul.f32 0.5, %v15638_v34 }
 0x3a2   : > { %v6724_v21 = vrot.slane %v6723_v52, 2  ;;  %v7202_v7 = vsel %vm17343_vm7, %v7029_v38, %v7026_v15  ;;  %v6730_v10 = vmax.f32 %v6728_v29, %v6729_v23  ;;  %v5233_v37 = vadd.f32 1.0, %v15523_v58 }
 0x3a3   : > { %v6712_v3 = vrot.slane %v6711_v31, 1  ;;  %v7203_v20 = vsel %vm17344_vm10, %v7032_v42, %v7202_v7  ;;  %v6718_v53 = vmax.f32 %v6716_v26, %v6717_v4  ;;  %v5294_v30 = vmul.f32 %v5262_v12, %v15456_v33 }
 0x3a4   : > { %v6725_v24 = vmax.f32 %v6723_v52, %v6724_v21  ;;  %v7204_v35 = vsel %vm17347_vm5, %v7035_v48, %v7203_v20  ;;  %v6731_v32 = vrot.slane %v6730_v10, 2  ;;  %v5265_v63 = vmul.f32 0.5, %v5233_v37 }
 0x3a5   : > { %v6713_v0 = vmax.f32 %v6711_v31, %v6712_v3  ;;  %v7205_v34 = vsel %vm17346_vm9, %v7038_v57, %v7204_v35  ;;  %v6719_v1 = vrot.slane %v6718_v53, 1  ;;  %v5742_v46 = vcombine.high %v5294_v30, %v5294_v30 }
 0x3a6   : > { %v6726_v49 = vrot.slane %v6725_v24, 1  ;;  %v7206_v58 = vsel %vm17348_vm1, %v7041_v41, %v7205_v34  ;;  %v6732_v44 = vmax.f32 %v6730_v10, %v6731_v32  ;;  %v5749_v33 = vrot.slane %v5294_v30, %v14873_v60 }
 0x3a7   : > { %v15723_v50 = vsel %vm17360_vm14, %v6713_v0, -inf  ;;  %v7207_v5 = vsel %vm17338_vm8, %v7044_v51, %v7206_v58  ;;  %v6720_v15 = vmax.f32 %v6718_v53, %v6719_v1  ;;  %v5756_v62 = vrot.slane %v5742_v46, %v14873_v60 }
 0x3a8   : > { %v6727_v6 = vmax.f32 %v6725_v24, %v6726_v49  ;;  %v7208_v57 = vsel %vm17337_vm15, %v7047_v17, %v7207_v5  ;;  %v6733_v41 = vrot.slane %v6732_v44, 1  ;;  %v5757_v45 = vcombine.high %v5749_v33, %v5749_v33 }
 0x3a9   : > { %v6679_v36 = vsel %vm6006_vm4, %v5749_v33, -inf  ;;  %7236 = vst.msk [vmem:[#allocation3 + $0x38] sm:$0xff] %vm17360_vm14, %v7208_v57  ;;  %v15738_v54 = vsel %vm17360_vm14, %v6720_v15, -inf  ;;  %v5758_v39 = vcombine.high %v5756_v62, %v5756_v62  ;;  %v6693_v59 = vsel %vm6006_vm4, %v5756_v62, -inf }
 0x3aa   : > { %v15741_v61 = vsel %vm17360_vm14, %v6727_v6, -inf  ;;  %v6680_v51 = vrot.slane %v6679_v36, 4  ;;  %v6734_v14 = vmax.f32 %v6732_v44, %v6733_v41  ;;  %v6686_v19 = vsel %vm6006_vm4, %v5757_v45, -inf }
 0x3ab   : > { %v5297_v28 = vmul.f32 %v5265_v63, %v15460_v40  ;;  %v6687_v29 = vrot.slane %v6686_v19, 4  ;;  %v6694_v55 = vrot.slane %v6693_v59, 4  ;;  %v6700_v42 = vsel %vm6006_vm4, %v5758_v39, -inf }
 0x3ac   : > { %v6681_v17 = vmax.f32 %v6679_v36, %v6680_v51  ;;  %v15748_v26 = vsel %vm17360_vm14, %v6734_v14, -inf  ;;  %v6701_v52 = vrot.slane %v6700_v42, 4  ;;  %v5232_v4 = vadd.f32 1.0, %v15525_v47 }
 0x3ad   : > { %v5793_v38 = vcombine.high %v5297_v28, %v5297_v28  ;;  %v5800_v43 = vrot.slane %v5297_v28, %v14873_v60  ;;  %v6688_v23 = vmax.f32 %v6686_v19, %v6687_v29  ;;  %v6695_v48 = vmax.f32 %v6693_v59, %v6694_v55 }
 0x3ae   : > { %v6682_v31 = vrot.slane %v6681_v17, 2  ;;  %v6702_v21 = vmax.f32 %v6700_v42, %v6701_v52  ;;  %v5264_v55 = vmul.f32 0.5, %v5232_v4  ;;  %vm17351_vm11 = vcmp.ge.s32.totalorder %v15500_v25, 1 }
 0x3af   : > { %v5807_v40 = vrot.slane %v5793_v38, %v14873_v60  ;;  %v5808_v12 = vcombine.high %v5800_v43, %v5800_v43  ;;  %v6763_v7 = vsel %vm6006_vm4, %v5800_v43, -inf  ;;  %v6689_v10 = vrot.slane %v6688_v23, 2 }
 0x3b0   : > { %v6683_v3 = vmax.f32 %v6681_v17, %v6682_v31  ;;  %v6696_v37 = vrot.slane %v6695_v48, 2  ;;  %v6764_v20 = vrot.slane %v6763_v7, 4  ;;  %v6703_v53 = vrot.slane %v6702_v21, 2 }
 0x3b1   : > { %v5809_v24 = vcombine.high %v5807_v40, %v5807_v40  ;;  %v6770_v30 = vsel %vm6006_vm4, %v5808_v12, -inf  ;;  %v6777_v35 = vsel %vm6006_vm4, %v5807_v40, -inf  ;;  %v6690_v32 = vmax.f32 %v6688_v23, %v6689_v10 }
 0x3b2   : > { %v6684_v0 = vrot.slane %v6683_v3, 1  ;;  %v6697_v63 = vmax.f32 %v6695_v48, %v6696_v37  ;;  %v6765_v47 = vmax.f32 %v6763_v7, %v6764_v20  ;;  %v6704_v34 = vmax.f32 %v6702_v21, %v6703_v53 }
 0x3b3   : > { %v6771_v1 = vrot.slane %v6770_v30, 4  ;;  %v6778_v49 = vrot.slane %v6777_v35, 4  ;;  %v6784_v46 = vsel %vm6006_vm4, %v5809_v24, -inf  ;;  %v6691_v44 = vrot.slane %v6690_v32, 1 }
 0x3b4   : > { %v6685_v58 = vmax.f32 %v6683_v3, %v6684_v0  ;;  %v6698_v33 = vrot.slane %v6697_v63, 1  ;;  %v6766_v5 = vrot.slane %v6765_v47, 2  ;;  %v6705_v15 = vrot.slane %v6704_v34, 1 }
 0x3b5   : > { %v6772_v6 = vmax.f32 %v6770_v30, %v6771_v1  ;;  %v6779_v62 = vmax.f32 %v6777_v35, %v6778_v49  ;;  %v6785_v57 = vrot.slane %v6784_v46, 4  ;;  %v6692_v41 = vmax.f32 %v6690_v32, %v6691_v44 }
 0x3b6   : > { %v6699_v45 = vmax.f32 %v6697_v63, %v6698_v33  ;;  %v15758_v36 = vsel %vm17360_vm14, %v6685_v58, -inf  ;;  %v6767_v39 = vmax.f32 %v6765_v47, %v6766_v5  ;;  %v6706_v51 = vmax.f32 %v6704_v34, %v6705_v15 }
 0x3b7   : > { %v6773_v14 = vrot.slane %v6772_v6, 2  ;;  %v6780_v19 = vrot.slane %v6779_v62, 2  ;;  %v6786_v59 = vmax.f32 %v6784_v46, %v6785_v57  ;;  %v15761_v28 = vsel %vm17360_vm14, %v6692_v41, -inf }
 0x3b8   : > { %v15764_v17 = vsel %vm17360_vm14, %v6699_v45, -inf  ;;  %v6768_v29 = vrot.slane %v6767_v39, 1  ;;  %v15767_v42 = vsel %vm17360_vm14, %v6706_v51, -inf  ;;  %v5296_v23 = vmul.f32 %v5264_v55, %v15471_v18 }
 0x3b9   : > { %v6774_v52 = vmax.f32 %v6772_v6, %v6773_v14  ;;  %v6781_v38 = vmax.f32 %v6779_v62, %v6780_v19  ;;  %v6787_v43 = vrot.slane %v6786_v59, 2  ;;  %v5235_v48 = vadd.f32 1.0, %v15529_v2 }
 0x3ba   : > { %v6769_v31 = vmax.f32 %v6767_v39, %v6768_v29  ;;  %v5234_v21 = vadd.f32 1.0, %v15531_v8  ;;  %v5237_v3 = vadd.f32 1.0, %v15535_v9  ;;  %v5776_v10 = vcombine.high %v5296_v23, %v5296_v23 }
 0x3bb   : > { %v6775_v40 = vrot.slane %v6774_v52, 1  ;;  %v6782_v12 = vrot.slane %v6781_v38, 1  ;;  %v6788_v7 = vmax.f32 %v6786_v59, %v6787_v43  ;;  %v5783_v37 = vrot.slane %v5296_v23, %v14873_v60 }
 0x3bc   : > { %v15774_v4 = vsel %vm17360_vm14, %v6769_v31, -inf  ;;  %v5267_v20 = vmul.f32 0.5, %v5235_v48  ;;  %v5790_v2 = vrot.slane %v5776_v10, %v14873_v60  ;;  %v5266_v19 = vmul.f32 0.5, %v5234_v21 }
 0x3bd   : > { %v6776_v53 = vmax.f32 %v6774_v52, %v6775_v40  ;;  %v6783_v24 = vmax.f32 %v6781_v38, %v6782_v12  ;;  %v6789_v30 = vrot.slane %v6788_v7, 1  ;;  %v7062_v18 = vmax.f32 %v15723_v50, %v15774_v4 }
 0x3be   : > { %v5791_v8 = vcombine.high %v5783_v37, %v5783_v37  ;;  %v6735_v35 = vsel %vm6006_vm4, %v5783_v37, -inf  ;;  %v5299_v9 = vmul.f32 %v5267_v20, %v15474_v16  ;;  %v5792_v49 = vcombine.high %v5790_v2, %v5790_v2 }
 0x3bf   : > { %v6790_v0 = vmax.f32 %v6788_v7, %v6789_v30  ;;  %v15783_v32 = vsel %vm17360_vm14, %v6776_v53, -inf  ;;  %v15786_v63 = vsel %vm17360_vm14, %v6783_v24, -inf  ;;  %v6736_v47 = vrot.slane %v6735_v35, 4 }
 0x3c0   : > { %v7065_v34 = vmax.f32 %v15738_v54, %v15783_v32  ;;  %v7068_v1 = vmax.f32 %v15741_v61, %v15786_v63  ;;  %v6742_v46 = vsel %vm6006_vm4, %v5791_v8, -inf  ;;  %v6749_v33 = vsel %vm6006_vm4, %v5790_v2, -inf }
 0x3c1   : > { %v15794_v58 = vsel %vm17360_vm14, %v6790_v0, -inf  ;;  %v6737_v16 = vmax.f32 %v6735_v35, %v6736_v47  ;;  %v6743_v44 = vrot.slane %v6742_v46, 4  ;;  %v6750_v15 = vrot.slane %v6749_v33, 4 }
 0x3c2   : > { %v7071_v5 = vmax.f32 %v15748_v26, %v15794_v58  ;;  %v6756_v6 = vsel %vm6006_vm4, %v5792_v49, -inf  ;;  %v5827_v62 = vcombine.high %v5299_v9, %v5299_v9  ;;  %v5834_v39 = vrot.slane %v5299_v9, %v14873_v60 }
 0x3c3   : > { %v6738_v57 = vrot.slane %v6737_v16, 2  ;;  %v6744_v41 = vmax.f32 %v6742_v46, %v6743_v44  ;;  %v6757_v45 = vrot.slane %v6756_v6, 4  ;;  %v6751_v51 = vmax.f32 %v6749_v33, %v6750_v15 }
 0x3c4   : > { %v5841_v14 = vrot.slane %v5827_v62, %v14873_v60  ;;  %v5269_v59 = vmul.f32 0.5, %v5237_v3  ;;  %v5842_v38 = vcombine.high %v5834_v39, %v5834_v39  ;;  %v6819_v23 = vsel %vm6006_vm4, %v5834_v39, -inf }
 0x3c5   : > { %v6739_v29 = vmax.f32 %v6737_v16, %v6738_v57  ;;  %v6745_v55 = vrot.slane %v6744_v41, 2  ;;  %v6758_v52 = vmax.f32 %v6756_v6, %v6757_v45  ;;  %v6752_v43 = vrot.slane %v6751_v51, 2 }
 0x3c6   : > { %v5843_v31 = vcombine.high %v5841_v14, %v5841_v14  ;;  %v6833_v48 = vsel %vm6006_vm4, %v5841_v14, -inf  ;;  %v6820_v10 = vrot.slane %v6819_v23, 4  ;;  %v6826_v20 = vsel %vm6006_vm4, %v5842_v38, -inf }
 0x3c7   : > { %v6740_v40 = vrot.slane %v6739_v29, 1  ;;  %v6746_v12 = vmax.f32 %v6744_v41, %v6745_v55  ;;  %v6759_v7 = vrot.slane %v6758_v52, 2  ;;  %v6753_v37 = vmax.f32 %v6751_v51, %v6752_v43 }
 0x3c8   : > { %v6834_v53 = vrot.slane %v6833_v48, 4  ;;  %v6840_v21 = vsel %vm6006_vm4, %v5843_v31, -inf  ;;  %v6821_v2 = vmax.f32 %v6819_v23, %v6820_v10  ;;  %v6827_v35 = vrot.slane %v6826_v20, 4 }
 0x3c9   : > { %v6741_v3 = vmax.f32 %v6739_v29, %v6740_v40  ;;  %v6747_v24 = vrot.slane %v6746_v12, 1  ;;  %v6760_v30 = vmax.f32 %v6758_v52, %v6759_v7  ;;  %v6754_v8 = vrot.slane %v6753_v37, 1 }
 0x3ca   : > { %v6835_v9 = vmax.f32 %v6833_v48, %v6834_v53  ;;  %v6841_v0 = vrot.slane %v6840_v21, 4  ;;  %v6822_v16 = vrot.slane %v6821_v2, 2  ;;  %v6828_v15 = vmax.f32 %v6826_v20, %v6827_v35 }
 0x3cb   : > { %v6748_v47 = vmax.f32 %v6746_v12, %v6747_v24  ;;  %v6761_v49 = vrot.slane %v6760_v30, 1  ;;  %v7049_v46 = vsel %vm17360_vm14, %v6741_v3, -inf  ;;  %v6755_v44 = vmax.f32 %v6753_v37, %v6754_v8 }
 0x3cc   : > { %v7050_v33 = vmax.f32 %v15758_v36, %v7049_v46  ;;  %v6836_v6 = vrot.slane %v6835_v9, 2  ;;  %v6823_v41 = vmax.f32 %v6821_v2, %v6822_v16  ;;  %v6842_v45 = vmax.f32 %v6840_v21, %v6841_v0 }
 0x3cd   : > { %v6762_v62 = vmax.f32 %v6760_v30, %v6761_v49  ;;  %v7052_v57 = vsel %vm17360_vm14, %v6748_v47, -inf  ;;  %v7055_v51 = vsel %vm17360_vm14, %v6755_v44, -inf  ;;  %v6829_v14 = vrot.slane %v6828_v15, 2 }
 0x3ce   : > { %v7053_v39 = vmax.f32 %v15761_v28, %v7052_v57  ;;  %v6837_v29 = vmax.f32 %v6835_v9, %v6836_v6  ;;  %v7056_v55 = vmax.f32 %v15764_v17, %v7055_v51  ;;  %v6824_v38 = vrot.slane %v6823_v41, 1 }
 0x3cf   : > { %v7058_v52 = vsel %vm17360_vm14, %v6762_v62, -inf  ;;  %v6843_v43 = vrot.slane %v6842_v45, 2  ;;  %v6830_v23 = vmax.f32 %v6828_v15, %v6829_v14  ;;  %v5298_v7 = vmul.f32 %v5266_v19, %v15477_v22 }
 0x3d0   : > { %v7059_v36 = vmax.f32 %v15767_v42, %v7058_v52  ;;  %v7209_v31 = vsel %vm17343_vm7, %v7053_v39, %v7050_v33  ;;  %v6838_v48 = vrot.slane %v6837_v29, 1  ;;  %v6825_v12 = vmax.f32 %v6823_v41, %v6824_v38 }
 0x3d1   : > { %v7210_v40 = vsel %vm17344_vm10, %v7056_v55, %v7209_v31  ;;  %v6844_v28 = vmax.f32 %v6842_v45, %v6843_v43  ;;  %v6831_v37 = vrot.slane %v6830_v23, 1  ;;  %v5301_v20 = vmul.f32 %v5269_v59, %v15485_v27 }
 0x3d2   : > { %v7211_v10 = vsel %vm17347_vm5, %v7059_v36, %v7210_v40  ;;  %v6839_v17 = vmax.f32 %v6837_v29, %v6838_v48  ;;  %v15824_v21 = vsel %vm17360_vm14, %v6825_v12, -inf  ;;  %v5810_v3 = vcombine.high %v5298_v7, %v5298_v7 }
 0x3d3   : > { %v7212_v42 = vsel %vm17346_vm9, %v7062_v18, %v7211_v10  ;;  %v6845_v53 = vrot.slane %v6844_v28, 1  ;;  %v6832_v19 = vmax.f32 %v6830_v23, %v6831_v37  ;;  %v5817_v27 = vrot.slane %v5298_v7, %v14873_v60 }
 0x3d4   : > { %v7213_v22 = vsel %vm17348_vm1, %v7065_v34, %v7212_v42  ;;  %v15831_v24 = vsel %vm17360_vm14, %v6839_v17, -inf  ;;  %v5824_v18 = vrot.slane %v5810_v3, %v14873_v60  ;;  %v5861_v59 = vcombine.high %v5301_v20, %v5301_v20 }
 0x3d5   : > { %v7214_v50 = vsel %vm17338_vm8, %v7068_v1, %v7213_v22  ;;  %v6846_v4 = vmax.f32 %v6844_v28, %v6845_v53  ;;  %v15844_v32 = vsel %vm17360_vm14, %v6832_v19, -inf  ;;  %v5825_v34 = vcombine.high %v5817_v27, %v5817_v27  ;;  %v12630_v22 = vpop.eup %12629 }
 0x3d6   : > { %v7215_v54 = vsel %vm17337_vm15, %v7071_v5, %v7214_v50  ;;  %v6791_v30 = vsel %vm6006_vm4, %v5817_v27, -inf  ;;  %v5826_v63 = vcombine.high %v5824_v18, %v5824_v18  ;;  %v6805_v2 = vsel %vm6006_vm4, %v5824_v18, -inf }
 0x3d7   : > { %7237 = vst.msk [vmem:[#allocation3 + $0x40] sm:$0xff] %vm17360_vm14, %v7215_v54  ;;  %v15849_v61 = vsel %vm17360_vm14, %v6846_v4, -inf  ;;  %v6792_v1 = vrot.slane %v6791_v30, 4  ;;  %v6798_v8 = vsel %vm6006_vm4, %v5825_v34, -inf  ;;  %v6806_v26 = vrot.slane %v6805_v2, 4 }
 0x3d8   : > { %v5868_v58 = vrot.slane %v5301_v20, %v14873_v60  ;;  %v5875_v5 = vrot.slane %v5861_v59, %v14873_v60  ;;  %v6799_v9 = vrot.slane %v6798_v8, 4  ;;  %v6812_v0 = vsel %vm6006_vm4, %v5826_v63, -inf }
 0x3d9   : > { %v6793_v35 = vmax.f32 %v6791_v30, %v6792_v1  ;;  %v6807_v47 = vmax.f32 %v6805_v2, %v6806_v26  ;;  %v6813_v49 = vrot.slane %v6812_v0, 4  ;;  %v7336_v30 = vld [vmem:[#allocation3 + $0x8] sm:$0xff] }
 0x3da   : > { %v5876_v46 = vcombine.high %v5868_v58, %v5868_v58  ;;  %v5877_v16 = vcombine.high %v5875_v5, %v5875_v5  ;;  %v6800_v33 = vmax.f32 %v6798_v8, %v6799_v9  ;;  %v6875_v15 = vsel %vm6006_vm4, %v5868_v58, -inf }
 0x3db   : > { %v6794_v44 = vrot.slane %v6793_v35, 2  ;;  %v6889_v6 = vsel %vm6006_vm4, %v5875_v5, -inf  ;;  %v6808_v62 = vrot.slane %v6807_v47, 2  ;;  %v6814_v57 = vmax.f32 %v6812_v0, %v6813_v49 }
 0x3dc   : > { %v6876_v41 = vrot.slane %v6875_v15, 4  ;;  %v6882_v45 = vsel %vm6006_vm4, %v5876_v46, -inf  ;;  %v6801_v51 = vrot.slane %v6800_v33, 2  ;;  %v6890_v29 = vrot.slane %v6889_v6, 4 }
 0x3dd   : > { %v6795_v39 = vmax.f32 %v6793_v35, %v6794_v44  ;;  %v6883_v14 = vrot.slane %v6882_v45, 4  ;;  %v6809_v13 = vmax.f32 %v6807_v47, %v6808_v62  ;;  %v6815_v55 = vrot.slane %v6814_v57, 2 }
 0x3de   : > { %v6877_v52 = vmax.f32 %v6875_v15, %v6876_v41  ;;  %v6896_v38 = vsel %vm6006_vm4, %v5877_v16, -inf  ;;  %v6802_v36 = vmax.f32 %v6800_v33, %v6801_v51  ;;  %v6891_v23 = vmax.f32 %v6889_v6, %v6890_v29  ;;  %v17874_v16 = vld [vmem:[#allocation9_spill] sm:$0xff]  ;;  %v17875_v33 = vld [vmem:[#allocation10_spill] sm:$0xff] }
 0x3df   : > { %v6796_v43 = vrot.slane %v6795_v39, 1  ;;  %v6884_v31 = vmax.f32 %v6882_v45, %v6883_v14  ;;  %v6810_v48 = vrot.slane %v6809_v13, 1  ;;  %v6816_v40 = vmax.f32 %v6814_v57, %v6815_v55  ;;  %v15898_v55 = vld [vmem:[#allocation3 + $0x10] sm:$0xff] }
 0x3e0   : > { %v6878_v12 = vrot.slane %v6877_v52, 2  ;;  %v6897_v28 = vrot.slane %v6896_v38, 4  ;;  %v6803_v10 = vrot.slane %v6802_v36, 1  ;;  %v6892_v17 = vrot.slane %v6891_v23, 2 }
 0x3e1   : > { %v6797_v7 = vmax.f32 %v6795_v39, %v6796_v43  ;;  %v6885_v37 = vrot.slane %v6884_v31, 2  ;;  %v6811_v20 = vmax.f32 %v6809_v13, %v6810_v48  ;;  %v6817_v42 = vrot.slane %v6816_v40, 1  ;;  %v17878_v48 = vld [vmem:[#allocation13_spill] sm:$0xff] }
 0x3e2   : > { %v6879_v53 = vmax.f32 %v6877_v52, %v6878_v12  ;;  %v6898_v3 = vmax.f32 %v6896_v38, %v6897_v28  ;;  %v6804_v19 = vmax.f32 %v6802_v36, %v6803_v10  ;;  %v6893_v4 = vmax.f32 %v6891_v23, %v6892_v17  ;;  %v17876_v38 = vld [vmem:[#allocation11_spill] sm:$0xff] }
 0x3e3   : > { %v15862_v27 = vsel %vm17360_vm14, %v6797_v7, -inf  ;;  %v6886_v50 = vmax.f32 %v6884_v31, %v6885_v37  ;;  %v6818_v18 = vmax.f32 %v6816_v40, %v6817_v42  ;;  %v15865_v59 = vsel %vm17360_vm14, %v6811_v20, -inf  ;;  %v15907_v36 = vld [vmem:[#allocation3 + $0x18] sm:$0xff]  ;;  %v17877_v31 = vld [vmem:[#allocation12_spill] sm:$0xff] }
 0x3e4   : > { %v6880_v54 = vrot.slane %v6879_v53, 1  ;;  %v6899_v34 = vrot.slane %v6898_v3, 2  ;;  %v15868_v63 = vsel %vm17360_vm14, %v6804_v19, -inf  ;;  %v6894_v2 = vrot.slane %v6893_v4, 1  ;;  %v15921_v42 = vld [vmem:[#allocation3 + $0x20] sm:$0xff] }
 0x3e5   : > { %v6887_v1 = vrot.slane %v6886_v50, 1  ;;  %v5236_v8 = vadd.f32 1.0, %v12630_v22  ;;  %v15871_v26 = vsel %vm17360_vm14, %v6818_v18, -inf  ;;  %v7360_v47 = vsel %vm17351_vm11, %v7336_v30, 0.0 }
 0x3e6   : > { %v6881_v58 = vmax.f32 %v6879_v53, %v6880_v54  ;;  %v6900_v5 = vmax.f32 %v6898_v3, %v6899_v34  ;;  %v6895_v9 = vmax.f32 %v6893_v4, %v6894_v2  ;;  %11883 = vmatprep.mubr.msk.f32.mxu1 %vm17360_vm14, %v7360_v47  ;;  %v7248_v44 = vshra.s32 %v17874_v16, 3  ;;  %v15926_v53 = vld [vmem:[%s17120_s3 + $0x10] sm:$0xff] }
 0x3e7   : > { %v6888_v35 = vmax.f32 %v6886_v50, %v6887_v1  ;;  %v5268_v0 = vmul.f32 0.5, %v5236_v8  ;;  %v7249_v15 = vshra.s32 %v17875_v33, 3  ;;  %v7250_v43 = vshra.s32 %v17876_v38, 3 }
 0x3e8   : > { %v6901_v49 = vrot.slane %v6900_v5, 1  ;;  %v15877_v46 = vsel %vm17360_vm14, %v6881_v58, -inf  ;;  %v15888_v57 = vsel %vm17360_vm14, %v6895_v9, -inf  ;;  %v15895_v14 = vand.u32 7, %v7248_v44  ;;  %v15946_v9 = vld [vmem:[#allocation3 + $0x28] sm:$0xff] }
 0x3e9   : > { %v7086_v6 = vmax.f32 %v15824_v21, %v15877_v46  ;;  %v15885_v62 = vsel %vm17360_vm14, %v6888_v35, -inf  ;;  %v5300_v41 = vmul.f32 %v5268_v0, %v15492_v56  ;;  %v7092_v51 = vmax.f32 %v15831_v24, %v15888_v57  ;;  %v15948_v0 = vld [vmem:[#allocation3 + $0x30] sm:$0xff] }
 0x3ea   : > { %v6902_v45 = vmax.f32 %v6900_v5, %v6901_v49  ;;  %v7089_v39 = vmax.f32 %v15844_v32, %v15885_v62  ;;  %v15900_v52 = vand.u32 7, %v7249_v15  ;;  %vm17341_vm3 = vcmp.ge.s32.totalorder %v15895_v14, 1  ;;  %v17880_v49 = vld [vmem:[#allocation19_spill] sm:$0xff] }
 0x3eb   : > { %v5844_v29 = vcombine.high %v5300_v41, %v5300_v41  ;;  %v5851_v13 = vrot.slane %v5300_v41, %v14873_v60  ;;  %v7251_v23 = vshra.s32 %v17877_v31, 3  ;;  %v7252_v40 = vshra.s32 %v17878_v48, 3  ;;  %v16110_v46 = vld [vmem:[#allocation3 + $0x37] sm:$0xff] }
 0x3ec   : > { %v15904_v56 = vsel %vm17360_vm14, %v6902_v45, -inf  ;;  %v7361_v17 = vsel %vm17341_vm3, %v15898_v55, 0.0  ;;  %vm17342_vm0 = vcmp.ge.s32.totalorder %v15900_v52, 1  ;;  %v15919_v20 = vand.u32 7, %v7250_v43 }
 0x3ed   : > { %v7095_v12 = vmax.f32 %v15849_v61, %v15904_v56  ;;  %v5858_v28 = vrot.slane %v5844_v29, %v14873_v60  ;;  %v5859_v7 = vcombine.high %v5851_v13, %v5851_v13  ;;  %v6847_v10 = vsel %vm6006_vm4, %v5851_v13, -inf  ;;  %11884 = vmatmul.mubr.msk.f32.vlgmr.msra.gmra.mrb[32].mxu1 %vm17360_vm14, %v7361_v17  ;;  %v15966_v17 = vld [vmem:[#allocation3 + $0x38] sm:$0xff] }
 0x3ee   : > { %v6848_v37 = vrot.slane %v6847_v10, 4  ;;  %v7362_v50 = vsel %vm17342_vm0, %v15907_v36, 0.0  ;;  %vm17345_vm12 = vcmp.ge.s32.totalorder %v15919_v20, 1  ;;  %11896 = vmatpush3.msra.mxu1 %v15648_v11  ;;  %v15941_v1 = vand.u32 7, %v7251_v23  ;;  %v17879_v11 = vld [vmem:[#allocation14_spill] sm:$0xff]  ;;  %v16148_v56 = vld [vmem:[#allocation3 + $0x3f] sm:$0xff] }
 0x3ef   : > { %v5860_v3 = vcombine.high %v5858_v28, %v5858_v28  ;;  %v6854_v22 = vsel %vm6006_vm4, %v5859_v7, -inf  ;;  %v6861_v19 = vsel %vm6006_vm4, %v5858_v28, -inf  ;;  %11886 = vmatprep.mubr.msk.f32.mxu1 %vm17360_vm14, %v7362_v50  ;;  %v7363_v30 = vsel %vm17345_vm12, %v15921_v42, 0.0  ;;  %11909 = vmatprep.subr.mxu1 %v15926_v53 }
 0x3f0   : > { %v6849_v4 = vmax.f32 %v6847_v10, %v6848_v37  ;;  %v6855_v18 = vrot.slane %v6854_v22, 4  ;;  %v6862_v54 = vrot.slane %v6861_v19, 4  ;;  %v15943_v2 = vand.u32 7, %v7252_v40 }
 0x3f1   : > { %v6868_v34 = vsel %vm6006_vm4, %v5860_v3, -inf  ;;  %11887 = vmatmul.mubr.msk.f32.gmra.mrb[34].mxu1 %vm17360_vm14, %v7363_v30  ;;  %vm17350_vm13 = vcmp.ge.s32.totalorder %v15941_v1, 1  ;;  %v7253_v47 = vshra.s32 %v17879_v11, 3  ;;  %v7254_v44 = vshra.s32 %v17880_v49, 3  ;;  %v15968_v3 = vld [vmem:[#allocation3 + $0x40] sm:$0xff] }
 0x3f2   : > { %v6850_v8 = vrot.slane %v6849_v4, 2  ;;  %v6856_v58 = vmax.f32 %v6854_v22, %v6855_v18  ;;  %v6863_v5 = vmax.f32 %v6861_v19, %v6862_v54  ;;  %v6869_v35 = vrot.slane %v6868_v34, 4  ;;  %v17881_v22 = vld [vmem:[#allocation8_spill] sm:$0xff] }
 0x3f3   : > { %vm17349_vm2 = vcmp.ge.s32.totalorder %v15943_v2, 1  ;;  %v7364_v13 = vsel %vm17350_vm13, %v15946_v9, 0.0  ;;  %v15961_v23 = vand.u32 7, %v7253_v47  ;;  %v15963_v40 = vand.u32 7, %v7254_v44  ;;  %v7295_v30 = vld [vmem:[#allocation3 + $0x7] sm:$0xff]  ;;  %v15993_v47 = vld [vmem:[#allocation3 + $0xf] sm:$0xff] }
 0x3f4   : > { %v6851_v15 = vmax.f32 %v6849_v4, %v6850_v8  ;;  %v6857_v41 = vrot.slane %v6856_v58, 2  ;;  %v6864_v45 = vrot.slane %v6863_v5, 2  ;;  %v6870_v29 = vmax.f32 %v6868_v34, %v6869_v35  ;;  %11889 = vmatprep.mubr.msk.f32.mxu1 %vm17360_vm14, %v7364_v13 }
 0x3f5   : > { %v7365_v43 = vsel %vm17349_vm2, %v15948_v0, 0.0  ;;  %vm17340_vm6 = vcmp.ge.s32.totalorder %v15961_v23, 1  ;;  %vm17339_vm4 = vcmp.ge.s32.totalorder %v15963_v40, 1  ;;  %v7239_v19 = vand.u32 7, %v17881_v22 }
 0x3f6   : > { %v6852_v28 = vrot.slane %v6851_v15, 1  ;;  %v6858_v7 = vmax.f32 %v6856_v58, %v6857_v41  ;;  %v6865_v10 = vmax.f32 %v6863_v5, %v6864_v45  ;;  %v6871_v37 = vrot.slane %v6870_v29, 2  ;;  %11890 = vmatmul.mubr.msk.f32.gmra.mrb[36].mxu1 %vm17360_vm14, %v7365_v43 }
 0x3f7   : > { %v7240_v50 = vand.u32 7, %v17874_v16  ;;  %v7366_v8 = vsel %vm17340_vm6, %v15966_v17, 0.0  ;;  %v7367_v58 = vsel %vm17339_vm4, %v15968_v3, 0.0  ;;  %vm15983_vm15 = vcmp.ge.s32.totalorder %v7239_v19, 1  ;;  %v16359_v16 = vld [vmem:[#allocation3 + $0x31] sm:$0xff] }
 0x3f8   : > { %v6853_v4 = vmax.f32 %v6851_v15, %v6852_v28  ;;  %v6859_v18 = vrot.slane %v6858_v7, 1  ;;  %v6866_v54 = vrot.slane %v6865_v10, 1  ;;  %v6872_v34 = vmax.f32 %v6870_v29, %v6871_v37  ;;  %11892 = vmatprep.mubr.msk.f32.mxu1 %vm17360_vm14, %v7366_v8  ;;  %vm7303_vm4 = vmand %vm17351_vm11, %vm15983_vm15 }
 0x3f9   : > { %vm15989_vm8 = vcmp.ge.s32.totalorder %v7240_v50, 1  ;;  %v17884_v35 = vmov 0  ;;  %v7327_v13 = vsel %vm7303_vm4, %v7295_v30, 0.0  ;;  %v7241_v28 = vand.u32 7, %v17875_v33 }
 0x3fa   : > { %v17885_v35 = vsel %vm15989_vm8, 4294967295, %v17884_v35  ;;  %v6860_v44 = vmax.f32 %v6858_v7, %v6859_v18  ;;  %v6867_v15 = vmax.f32 %v6865_v10, %v6866_v54  ;;  %v6873_v41 = vrot.slane %v6872_v34, 1  ;;  %11893 = vmatmul.mubr.msk.f32.gmra.mrb[38].mxu1 %vm17360_vm14, %v7367_v58  ;;  %vm16007_vm6 = vmand %vm17341_vm3, %vm15989_vm8  ;;  %v16019_v18 = vld [vmem:[#allocation3 + $0x17] sm:$0xff]  ;;  %v16042_v58 = vld [vmem:[%s17120_s3 + $0x18] sm:$0xff] }
 0x3fb   : > { %v7073_v45 = vsel %vm17360_vm14, %v6853_v4, -inf  ;;  %v7242_v7 = vand.u32 7, %v17876_v38  ;;  %11897 = vmatprep.mubr.msk.f32.mxu1 %vm17360_vm14, %v7327_v13  ;;  %v7328_v4 = vsel %vm16007_vm6, %v15993_v47, 0.0  ;;  %vm16023_vm4 = vcmp.ge.s32.totalorder %v7241_v28, 1 }
 0x3fc   : > { %v7074_v29 = vmax.f32 %v15862_v27, %v7073_v45  ;;  %v6874_v10 = vmax.f32 %v6872_v34, %v6873_v41  ;;  %v7076_v37 = vsel %vm17360_vm14, %v6860_v44, -inf  ;;  %v7079_v27 = vsel %vm17360_vm14, %v6867_v15, -inf  ;;  %vm7305_vm6 = vmand %vm17342_vm0, %vm16023_vm4  ;;  %v16048_v45 = vld [vmem:[#allocation3 + $0x1f] sm:$0xff] }
 0x3fd   : > { %v7077_v54 = vmax.f32 %v15868_v63, %v7076_v37  ;;  %v7080_v30 = vmax.f32 %v15865_v59, %v7079_v27  ;;  %v17888_v33 = vmov 0  ;;  %vm16027_vm3 = vcmp.ge.s32.totalorder %v7242_v7, 1 }
 0x3fe   : > { %v17889_v33 = vsel %vm16023_vm4, 4294967295, %v17888_v33  ;;  %v17890_v38 = vmov 0  ;;  %v7082_v34 = vsel %vm17360_vm14, %v6874_v10, -inf  ;;  %v7243_v8 = vand.u32 7, %v17877_v31  ;;  %11898 = vmatmul.mubr.msk.f32.vlgmr.msra.gmra.mrb[32].mxu1 %vm17360_vm14, %v7328_v4  ;;  %vm16054_vm0 = vmand %vm17345_vm12, %vm16027_vm3  ;;  %v16095_v4 = vld [vmem:[#allocation3 + $0x2f] sm:$0xff] }
 0x3ff   : > { %v17891_v38 = vsel %vm16027_vm3, 4294967295, %v17890_v38  ;;  %v7244_v63 = vand.u32 7, %v17878_v48  ;;  %v7245_v59 = vand.u32 7, %v17879_v11  ;;  %v7083_v44 = vmax.f32 %v15871_v26, %v7082_v34  ;;  %11910 = vmatpush3.msra.mxu1 %v15926_v53 }
 0x400   : > { %v7216_v15 = vsel %vm17343_vm7, %v7077_v54, %v7074_v29  ;;  %v7329_v41 = vsel %vm7305_vm6, %v16019_v18, 0.0  ;;  %v7246_v48 = vand.u32 7, %v17880_v49  ;;  %vm16062_vm7 = vcmp.ge.s32.totalorder %v7243_v8, 1  ;;  %v16066_v29 = vld [vmem:[#allocation3 + $0x27] sm:$0xff]  ;;  %11923 = vmatprep.subr.mxu1 %v16042_v58 }
 0x401   : > { %v7217_v26 = vsel %vm17344_vm10, %v7080_v30, %v7216_v15  ;;  %11900 = vmatprep.mubr.msk.f32.mxu1 %vm17360_vm14, %v7329_v41  ;;  %v17894_v11 = vmov 0  ;;  %vm16068_vm6 = vcmp.ge.s32.totalorder %v7244_v63, 1  ;;  %v17896_v13 = vmov 0  ;;  %vm7307_vm10 = vmand %vm17350_vm13, %vm16062_vm7  ;;  %v16221_v41 = vld [vmem:[#allocation3 + $0x19] sm:$0xff] }
 0x402   : > { %v17895_v11 = vsel %vm16062_vm7, 4294967295, %v17894_v11  ;;  %v17897_v13 = vsel %vm16068_vm6, 4294967295, %v17896_v13  ;;  %v7218_v43 = vsel %vm17347_vm5, %v7083_v44, %v7217_v26  ;;  %vm16077_vm12 = vcmp.ge.s32.totalorder %v7245_v59, 1 }
 0x403   : > { %v17898_v53 = vmov 0  ;;  %v7219_v49 = vsel %vm17346_vm9, %v7086_v6, %v7218_v43  ;;  %v7330_v10 = vsel %vm16054_vm0, %v16048_v45, 0.0  ;;  %v7331_v27 = vsel %vm7307_vm10, %v16066_v29, 0.0  ;;  %vm7308_vm9 = vmand %vm17349_vm2, %vm16068_vm6 }
 0x404   : > { %v17899_v53 = vsel %vm16077_vm12, 4294967295, %v17898_v53  ;;  %v7220_v37 = vsel %vm17348_vm1, %v7089_v39, %v7219_v49  ;;  %11901 = vmatmul.mubr.msk.f32.gmra.mrb[34].mxu1 %vm17360_vm14, %v7330_v10  ;;  %vm16101_vm5 = vcmp.ge.s32.totalorder %v7246_v48, 1  ;;  %v17900_v21 = vmov 0 }
 0x405   : > { %v17901_v21 = vsel %vm16101_vm5, 4294967295, %v17900_v21  ;;  %vm17902_vm0 = vcmask 1046534   ;;  %11903 = vmatprep.mubr.msk.f32.mxu1 %vm17360_vm14, %v7331_v27  ;;  %vm17903_vm10 = vcmp.ge.s32.totalorder %v15961_v23, 1  ;;  %vm16118_vm2 = vcmp.le.s32.totalorder %v7239_v19, 6 }
 0x406   : > { %v7221_v32 = vsel %vm17902_vm0, %v7092_v51, %v7220_v37  ;;  %vm7309_vm1 = vmand %vm17903_vm10, %vm16077_vm12  ;;  %v17904_v6 = vmov 0  ;;  %vm17906_vm13 = vcmask 1047559   ;;  %vm16128_vm0 = vcmp.le.s32.totalorder %v7240_v50, 6  ;;  %v7627_v50 = vld [vmem:[#allocation3 + $0x9] sm:$0xff] }
 0x407   : > { %v17905_v6 = vsel %vm16118_vm2, 4294967295, %v17904_v6  ;;  %v7222_v24 = vsel %vm17906_vm13, %v7095_v12, %v7221_v32  ;;  %v17907_v62 = vmov 0  ;;  %v7332_v57 = vsel %vm7308_vm9, %v16095_v4, 0.0  ;;  %v7983_v32 = vld [vmem:[%s17120_s3 + $0x20] sm:$0xff] }
 0x408   : > { %v17908_v62 = vsel %vm16128_vm0, 4294967295, %v17907_v62  ;;  %7238 = vst.msk [vmem:[#allocation3 + $0x48] sm:$0xff] %vm17360_vm14, %v7222_v24  ;;  %vm17909_vm10 = vcmp.ge.s32.totalorder %v15963_v40, 1  ;;  %vm16142_vm12 = vcmp.le.s32.totalorder %v7241_v28, 6  ;;  %v17912_v61 = vmov 0  ;;  %11904 = vmatmul.mubr.msk.f32.gmra.mrb[36].mxu1 %vm17360_vm14, %v7332_v57 }
 0x409   : > { %vm16138_vm11 = vmand %vm17909_vm10, %vm16101_vm5  ;;  %v17913_v61 = vsel %vm16142_vm12, 4294967295, %v17912_v61  ;;  %v7333_v51 = vsel %vm7309_vm1, %v16110_v46, 0.0  ;;  %vm17914_vm9 = vcmp.ge.s32.totalorder %v15500_v25, 1  ;;  %vm16158_vm10 = vcmp.le.s32.totalorder %v7242_v7, 6 }
 0x40a   : > { %vm16154_vm13 = vmand %vm17914_vm9, %vm16118_vm2  ;;  %11906 = vmatprep.mubr.msk.f32.mxu1 %vm17360_vm14, %v7333_v51  ;;  %vm17919_vm1 = vcmp.ge.s32.totalorder %v15895_v14, 1  ;;  %vm16171_vm6 = vcmp.le.s32.totalorder %v7243_v8, 6  ;;  %v17922_v54 = vmov 0  ;;  %vm17924_vm9 = vcmp.ge.s32.totalorder %v15900_v52, 1  ;;  %v16287_v51 = vld [vmem:[#allocation3 + $0x21] sm:$0xff] }
 0x40b   : > { %vm16167_vm5 = vmand %vm17919_vm1, %vm16128_vm0  ;;  %v17923_v54 = vsel %vm16171_vm6, 4294967295, %v17922_v54  ;;  %vm16183_vm14 = vcmp.le.s32.totalorder %v7244_v63, 6  ;;  %vm16187_vm1 = vcmp.le.s32.totalorder %v7245_v59, 6  ;;  %v7334_v8 = vsel %vm16138_vm11, %v16148_v56, 0.0  ;;  %v16208_v59 = vld [vmem:[#allocation3 + $0x11] sm:$0xff] }
 0x40c   : > { %vm16179_vm2 = vmand %vm17924_vm9, %vm16142_vm12  ;;  %vm17931_vm0 = vcmp.ge.s32.totalorder %v15919_v20, 1  ;;  %vm17934_vm4 = vcmask 64512   ;;  %v7659_v63 = vsel %vm16154_vm13, %v7627_v50, 0.0  ;;  %vm17935_vm11 = vcmp.ge.s32.totalorder %v15941_v1, 1 }
 0x40d   : > { %vm16198_vm9 = vmand %vm17931_vm0, %vm16158_vm10  ;;  %11907 = vmatmul.mubr.msk.f32.gmra.mrb[38].mxu1 %vm17934_vm4, %v7334_v8  ;;  %v17942_v26 = vmov 0  ;;  %vm17944_vm7 = vcmp.le.s32.totalorder %v15500_v25, 6  ;;  %vm17949_vm12 = vcmp.le.s32.totalorder %v15900_v52, 6  ;;  %v7660_v27 = vsel %vm16167_vm5, %v16208_v59, 0.0  ;;  %v16315_v8 = vld [vmem:[#allocation3 + $0x29] sm:$0xff] }
 0x40e   : > { %vm16214_vm0 = vmand %vm17935_vm11, %vm16171_vm6  ;;  %vm16231_vm11 = vcmp.le.s32.totalorder %v7246_v48, 6  ;;  %v16239_v43 = vsel %vm17944_vm7, %v15907_v36, 0.0  ;;  %v16257_v10 = vsel %vm17949_vm12, %v15946_v9, 0.0  ;;  %vm17950_vm7 = vcmp.le.s32.totalorder %v15919_v20, 6 }
 0x40f   : > { %vm17938_vm3 = vmmov %vm17934_vm4  ;;  %vm17939_vm4 = vcmp.ge.s32.totalorder %v15943_v2, 1  ;;  %v17943_v26 = vsel %vm16231_vm11, 4294967295, %v17942_v26  ;;  %v16262_v37 = vsel %vm17950_vm7, %v15948_v0, 0.0  ;;  %v17952_v24 = vmov 0  ;;  %v8298_v34 = vld [vmem:[#allocation3 + $0x4f] sm:$0xff] }
 0x410   : > { %11911 = vmatprep.mubr.msk.f32.mxu1 %vm17938_vm3, %v7659_v63  ;;  %vm16227_vm13 = vmand %vm17939_vm4, %vm16183_vm14  ;;  %vm17945_vm3 = vcmp.ge.s32.totalorder %v15961_v23, 1  ;;  %vm17948_vm4 = vcmp.le.s32.totalorder %v15895_v14, 6  ;;  %vm17954_vm12 = vcmp.le.s32.totalorder %v15941_v1, 6  ;;  %vm17956_vm7 = vcmask 64512  }
 0x411   : > { %vm16245_vm6 = vmand %vm17945_vm3, %vm16187_vm1  ;;  %v16252_v48 = vsel %vm17948_vm4, %v15921_v42, 0.0  ;;  %vm17951_vm3 = vcmp.le.s32.totalorder %v15500_v25, 6  ;;  %v16281_v57 = vsel %vm17954_vm12, %v15966_v17, 0.0  ;;  %11912 = vmatmul.mubr.msk.f32.vlgmr.msra.gmra.mrb[32].mxu1 %vm17956_vm7, %v7660_v27  ;;  %v7661_v39 = vsel %vm16179_vm2, %v16221_v41, 0.0 }
 0x412   : > { %vm16274_vm4 = vmand %vm17951_vm3, %vm15983_vm15  ;;  %17955 = vst [vmem:[#allocation54_spill] sm:$0xff] %v16281_v57  ;;  %vm17957_vm5 = vcmp.ge.s32.totalorder %v15963_v40, 1  ;;  %vm17960_vm12 = vcmp.le.s32.totalorder %v15895_v14, 6  ;;  %v17961_v28 = vmov 0  ;;  %vm17963_vm2 = vcmp.le.s32.totalorder %v15943_v2, 6  ;;  %11924 = vmatpush3.msra.mxu1 %v16042_v58  ;;  %v16409_v57 = vld [vmem:[#allocation3 + $0x41] sm:$0xff] }
 0x413   : > { %v17953_v24 = vsel %vm16274_vm4, 4294967295, %v17952_v24  ;;  %vm16293_vm3 = vmand %vm17957_vm5, %vm16231_vm11  ;;  %v16311_v7 = vsel %vm17963_vm2, %v15968_v3, 0.0  ;;  %vm17965_vm5 = vcmask 64512   ;;  %vm17967_vm4 = vcmp.le.s32.totalorder %v15900_v52, 6  ;;  %11937 = vmatprep.subr.mxu1 %v7983_v32 }
 0x414   : > { %vm16304_vm7 = vmand %vm17960_vm12, %vm15989_vm8  ;;  %17964 = vst [vmem:[#allocation36_spill] sm:$0xff] %v16311_v7  ;;  %11914 = vmatprep.mubr.msk.f32.mxu1 %vm17965_vm5, %v7661_v39  ;;  %vm17966_vm12 = vnez %v17889_v33  ;;  %v17968_v27 = vmov 0  ;;  %vm17970_vm2 = vnez %v17891_v38  ;;  %vm17971_vm5 = vcmp.le.s32.totalorder %v15919_v20, 6 }
 0x415   : > { %v17962_v28 = vsel %vm16304_vm7, 4294967295, %v17961_v28  ;;  %vm16324_vm8 = vmand %vm17967_vm4, %vm17966_vm12  ;;  %v17972_v39 = vmov 0  ;;  %v7662_v63 = vsel %vm16198_vm9, %v16287_v51, 0.0  ;;  %vm17974_vm4 = vnez %v17895_v11  ;;  %v8331_v11 = vld [vmem:[%s17120_s3 + $0x30] sm:$0xff] }
 0x416   : > { %v17969_v27 = vsel %vm16324_vm8, 4294967295, %v17968_v27  ;;  %vm16335_vm11 = vmand %vm17971_vm5, %vm17970_vm2  ;;  %vm17975_vm8 = vcmp.le.s32.totalorder %v15941_v1, 6  ;;  %v17976_v58 = vmov 0  ;;  %vm17978_vm2 = vcmask 64512  }
 0x417   : > { %v17973_v39 = vsel %vm16335_vm11, 4294967295, %v17972_v39  ;;  %vm16350_vm12 = vmand %vm17975_vm8, %vm17974_vm4  ;;  %11915 = vmatmul.mubr.msk.f32.gmra.mrb[34].mxu1 %vm17978_vm2, %v7662_v63  ;;  %v7663_v44 = vsel %vm16214_vm0, %v16315_v8, 0.0  ;;  %vm17979_vm9 = vnez %v17897_v13  ;;  %vm17980_vm8 = vcmp.le.s32.totalorder %v15943_v2, 6  ;;  %v16373_v63 = vld [vmem:[#allocation3 + $0x39] sm:$0xff] }
 0x418   : > { %v17977_v58 = vsel %vm16350_vm12, 4294967295, %v17976_v58  ;;  %vm16368_vm7 = vmand %vm17980_vm8, %vm17979_vm9  ;;  %v17981_v22 = vmov 0  ;;  %vm17984_vm0 = vnez %v17899_v53  ;;  %v17986_v50 = vmov 0 }
 0x419   : > { %v17982_v22 = vsel %vm16368_vm7, 4294967295, %v17981_v22  ;;  %vm17983_vm5 = vmmov %vm17978_vm2  ;;  %vm17985_vm2 = vcmp.le.s32.totalorder %v15961_v23, 6  ;;  %vm17988_vm8 = vnez %v17901_v21  ;;  %vm17989_vm11 = vcmp.le.s32.totalorder %v15963_v40, 6  ;;  %v8128_v21 = vld [vmem:[#allocation3 + $0x49] sm:$0xff] }
 0x41a   : > { %11917 = vmatprep.mubr.msk.f32.mxu1 %vm17983_vm5, %v7663_v44  ;;  %vm16382_vm12 = vmand %vm17985_vm2, %vm17984_vm0  ;;  %v17990_v44 = vmov 0  ;;  %v7664_v15 = vsel %vm16227_vm13, %v16359_v16, 0.0  ;;  %vm17992_vm5 = vnez %v17905_v6  ;;  %vm17993_vm7 = vcmp.le.s32.totalorder %v15500_v25, 6 }
 0x41b   : > { %v17987_v50 = vsel %vm16382_vm12, 4294967295, %v17986_v50  ;;  %vm16390_vm9 = vmand %vm17989_vm11, %vm17988_vm8  ;;  %vm17996_vm12 = vcmask 64512   ;;  %v7665_v7 = vsel %vm16245_vm6, %v16373_v63, 0.0  ;;  %vm17997_vm13 = vnez %v17908_v62 }
 0x41c   : > { %v17991_v44 = vsel %vm16390_vm9, 4294967295, %v17990_v44  ;;  %vm16401_vm2 = vmand %vm17993_vm7, %vm17992_vm5  ;;  %11918 = vmatmul.mubr.msk.f32.gmra.mrb[36].mxu1 %vm17996_vm12, %v7664_v15  ;;  %vm17998_vm11 = vcmp.le.s32.totalorder %v15895_v14, 6  ;;  %v17999_v25 = vmov 0  ;;  %vm18002_vm6 = vnez %v17913_v61  ;;  %v8679_v61 = vld [vmem:[%s17120_s3 + $0x40] sm:$0xff] }
 0x41d   : > { %v8671_v31 = vsel %vm16401_vm2, %v16221_v41, 0.0  ;;  %vm16418_vm7 = vmand %vm17998_vm11, %vm17997_vm13  ;;  %v18004_v15 = vmov 0  ;;  %v18011_v14 = vmov 0  ;;  %v18019_v5 = vmov 0 }
 0x41e   : > { %v18000_v25 = vsel %vm16418_vm7, 4294967295, %v17999_v25  ;;  %vm18001_vm9 = vmmov %vm17996_vm12  ;;  %vm18003_vm12 = vcmp.le.s32.totalorder %v15900_v52, 6  ;;  %v7666_v52 = vsel %vm16293_vm3, %v16409_v57, 0.0  ;;  %vm18014_vm3 = vcmp.le.s32.totalorder %v15943_v2, 6 }
 0x41f   : > { %11920 = vmatprep.mubr.msk.f32.mxu1 %vm18001_vm9, %v7665_v7  ;;  %vm16430_vm5 = vmand %vm18003_vm12, %vm18002_vm6  ;;  %vm18006_vm9 = vcmp.le.s32.totalorder %v15919_v20, 6  ;;  %vm18009_vm12 = vnez %v17923_v54  ;;  %v7829_v20 = vsel %vm15983_vm15, %v15993_v47, 0.0  ;;  %vm18018_vm15 = vcmp.le.s32.totalorder %v15961_v23, 6 }
 0x420   : > { %v18005_v15 = vsel %vm16430_vm5, 4294967295, %v18004_v15  ;;  %vm16441_vm11 = vmand %vm18006_vm9, %vm16158_vm10  ;;  %vm18010_vm5 = vcmp.le.s32.totalorder %v15941_v1, 6  ;;  %vm18013_vm9 = vcmask 64512   ;;  %v18015_v1 = vmov 0 }
 0x421   : > { %v8674_v49 = vsel %vm16441_vm11, %v16359_v16, 0.0  ;;  %vm16455_vm7 = vmand %vm18010_vm5, %vm18009_vm12  ;;  %11921 = vmatmul.mubr.msk.f32.gmra.mrb[38].mxu1 %vm18013_vm9, %v7666_v52  ;;  %v18023_v2 = vmov 0  ;;  %v8151_v53 = vsel %vm16187_vm1, %v16409_v57, 0.0 }
 0x422   : > { %v18012_v14 = vsel %vm16455_vm7, 4294967295, %v18011_v14  ;;  %vm16470_vm11 = vmand %vm18014_vm3, %vm16183_vm14  ;;  %vm18021_vm7 = vnez %v17943_v26  ;;  %vm18022_vm3 = vcmp.le.s32.totalorder %v15963_v40, 6 }
 0x423   : > { %v18016_v1 = vsel %vm16470_vm11, 4294967295, %v18015_v1  ;;  %vm18017_vm5 = vmmov %vm18013_vm9 }
 0x424   : > { %11925 = vmatprep.mubr.msk.f32.mxu1 %vm18017_vm5, %v7829_v20  ;;  %vm16482_vm9 = vmand %vm18018_vm15, %vm16187_vm1  ;;  %vm18025_vm5 = vnez %v17885_v35  ;;  %v8153_v20 = vld [vmem:[%s17120_s3 + $0x28] sm:$0xff]  ;;  %vm18026_vm15 = vcmask 64512   ;;  %v7833_v35 = vsel %vm17974_vm4, %v16095_v4, 0.0 }
 0x425   : > { %v18020_v5 = vsel %vm16482_vm9, 4294967295, %v18019_v5  ;;  %vm16490_vm2 = vmand %vm18022_vm3, %vm18021_vm7  ;;  %v7830_v47 = vsel %vm18025_vm5, %v16019_v18, 0.0  ;;  %vm18027_vm9 = vnez %v17889_v33  ;;  %vm18029_vm3 = vnez %v17891_v38  ;;  %v7812_v38 = vld [vmem:[#allocation3 + $0x47] sm:$0xff] }
 0x426   : > { %v18024_v2 = vsel %vm16490_vm2, 4294967295, %v18023_v2  ;;  %11926 = vmatmul.mubr.msk.f32.vlgmr.msra.gmra.mrb[32].mxu1 %vm18026_vm15, %v7830_v47  ;;  %v7831_v52 = vsel %vm18027_vm9, %v16048_v45, 0.0  ;;  %vm18028_vm11 = vmmov %vm18026_vm15  ;;  %v7832_v12 = vsel %vm18029_vm3, %v16066_v29, 0.0  ;;  %vm18032_vm15 = vnez %v17897_v13 }
 0x427   : > { %11938 = vmatpush3.msra.mxu1 %v7983_v32  ;;  %11928 = vmatprep.mubr.msk.f32.mxu1 %vm18028_vm11, %v7831_v52  ;;  %vm18030_vm2 = vmmov %vm18028_vm11  ;;  %v7834_v33 = vsel %vm18032_vm15, %v16110_v46, 0.0  ;;  %v7835_v32 = vsel %vm17984_vm0, %v16148_v56, 0.0  ;;  %v8150_v13 = vsel %vm16183_vm14, %v16373_v63, 0.0  ;;  %vm18054_vm14 = vnez %v17962_v28  ;;  %v10971_v28 = vld [vmem:[%s17121_s4] ss:$0 sm:$0xff] }
 0x428   : > { %11951 = vmatprep.subr.mxu1 %v8153_v20  ;;  %vm18031_vm5 = vmmov %vm18030_vm2  ;;  %v18055_v19 = vsel %vm18054_vm14, %v16048_v45, 0.0 }
 0x429   : > { %vm18033_vm9 = vmmov %vm18030_vm2 }
 0x42a   : > { %11929 = vmatmul.mubr.msk.f32.gmra.mrb[34].mxu1 %vm18030_vm2, %v7832_v12  ;;  %vm18034_vm11 = vmmov %vm18030_vm2  ;;  %v7836_v12 = vsel %vm17988_vm8, %v7812_v38, 0.0 }
 0x42b   : > { %11931 = vmatprep.mubr.msk.f32.mxu1 %vm18031_vm5, %v7833_v35  ;;  %vm18035_vm4 = vmmov %vm18030_vm2 }
 0x42c   : > { %vm18036_vm3 = vmmov %vm18030_vm2 }
 0x42d   : > { %vm18037_vm0 = vmmov %vm18030_vm2 }
 0x42e   : > { %11932 = vmatmul.mubr.msk.f32.gmra.mrb[36].mxu1 %vm18033_vm9, %v7834_v33  ;;  %vm18038_vm5 = vmmov %vm18037_vm0 }
 0x42f   : > { %11934 = vmatprep.mubr.msk.f32.mxu1 %vm18034_vm11, %v7835_v32  ;;  %vm18039_vm8 = vmmov %vm18037_vm0 }
 0x430   : > { %vm18040_vm15 = vmmov %vm18037_vm0 }
 0x431   : > { %vm18041_vm9 = vmmov %vm18037_vm0 }
 0x432   : > { %11935 = vmatmul.mubr.msk.f32.gmra.mrb[38].mxu1 %vm18030_vm2, %v7836_v12  ;;  %vm18042_vm11 = vmmov %vm18037_vm0  ;;  %vm18043_vm2 = vnez %v17905_v6  ;;  %v8152_v6 = vsel %vm18021_vm7, %v8128_v21, 0.0  ;;  %vm18057_vm7 = vnez %v17969_v27 }
 0x433   : > { %11939 = vmatprep.mubr.msk.f32.mxu1 %vm18035_vm4, %v15898_v55  ;;  %v7982_v55 = vld [vmem:[#allocation3 + $0x48] sm:$0xff]  ;;  %vm18044_vm4 = vmmov %vm18037_vm0  ;;  %v18058_v54 = vsel %vm18057_vm7, %v16066_v29, 0.0 }
 0x434   : > { %vm18056_vm1 = vmmov %vm18037_vm0 }
 0x435   : > { %vm18075_vm14 = vmmov %vm18056_vm1 }
 0x436   : > { %11940 = vmatmul.mubr.msk.f32.vlgmr.msra.gmra.mrb[32].mxu1 %vm18036_vm3, %v15907_v36  ;;  %v8145_v36 = vsel %vm18043_vm2, %v16208_v59, 0.0  ;;  %vm18045_vm3 = vmmov %vm18037_vm0 }
 0x437   : > { %11952 = vmatpush3.msra.mxu1 %v8153_v20  ;;  %11942 = vmatprep.mubr.msk.f32.mxu1 %vm18037_vm0, %v15921_v42  ;;  %v8146_v42 = vsel %vm17997_vm13, %v16221_v41, 0.0  ;;  %vm18047_vm13 = vmmov %vm18037_vm0 }
 0x438   : > { %11965 = vmatprep.subr.mxu1 %v8331_v11  ;;  %vm18062_vm2 = vmmov %vm18037_vm0 }
 0x439   : > { %vm18077_vm7 = vmmov %vm18056_vm1 }
 0x43a   : > { %11943 = vmatmul.mubr.msk.f32.gmra.mrb[34].mxu1 %vm18038_vm5, %v15946_v9  ;;  %v8501_v9 = vld [vmem:[%s17120_s3 + $0x38] sm:$0xff]  ;;  %vm18046_vm5 = vmmov %vm18037_vm0 }
 0x43b   : > { %11945 = vmatprep.mubr.msk.f32.mxu1 %vm18039_vm8, %v15948_v0  ;;  %v8147_v0 = vsel %vm18002_vm6, %v16287_v51, 0.0  ;;  %vm18048_vm6 = vmmov %vm18037_vm0 }
 0x43c   : > { %vm18050_vm8 = vmmov %vm18037_vm0 }
 0x43e   : > { %11946 = vmatmul.mubr.msk.f32.gmra.mrb[36].mxu1 %vm18040_vm15, %v15966_v17  ;;  %v8148_v17 = vsel %vm16158_vm10, %v16315_v8, 0.0  ;;  %vm18049_vm10 = vmmov %vm18037_vm0 }
 0x43f   : > { %11948 = vmatprep.mubr.msk.f32.mxu1 %vm18041_vm9, %v15968_v3  ;;  %v8149_v3 = vsel %vm18009_vm12, %v16359_v16, 0.0  ;;  %vm18051_vm12 = vnez %v17953_v24  ;;  %vm18053_vm15 = vmmov %vm18037_vm0  ;;  %v9380_v24 = vld [vmem:[%s17122_s5] sm:$0xff] }
 0x440   : > { %v18052_v62 = vsel %vm18051_vm12, %v16019_v18, 0.0  ;;  %vm18059_vm9 = vmmov %vm18037_vm0 }
 0x441   : > { %vm18073_vm12 = vmmov %vm18056_vm1 }
 0x442   : > { %11949 = vmatmul.mubr.msk.f32.gmra.mrb[38].mxu1 %vm18042_vm11, %v7982_v55  ;;  %vm18060_vm11 = vnez %v17973_v39 }
 0x443   : > { %11953 = vmatprep.mubr.msk.f32.mxu1 %vm18044_vm4, %v8145_v36  ;;  %v18061_v18 = vsel %vm18060_vm11, %v16095_v4, 0.0  ;;  %vm18063_vm4 = vnez %v17977_v58  ;;  %vm18080_vm11 = vcmp.le.s32.totalorder %v15961_v23, 6 }
 0x444   : > { %v18064_v45 = vsel %vm18063_vm4, %v16110_v46, 0.0  ;;  %v8476_v46 = vld [vmem:[#allocation3 + $0x50] sm:$0xff]  ;;  %v8499_v59 = vsel %vm18080_vm11, %v7982_v55, 0.0  ;;  %vm18082_vm4 = vcmp.le.s32.totalorder %v15963_v40, 6  ;;  %vm18099_vm11 = vnez %v18020_v5 }
 0x445   : > { %v8500_v26 = vsel %vm18082_vm4, %v8476_v46, 0.0  ;;  %v8646_v40 = vld [vmem:[#allocation3 + $0x51] sm:$0xff]  ;;  %vm18101_vm4 = vnez %v18024_v2 }
 0x446   : > { %11954 = vmatmul.mubr.msk.f32.vlgmr.msra.gmra.mrb[32].mxu1 %vm18045_vm3, %v8146_v42  ;;  %vm18065_vm3 = vmmov %vm18037_vm0  ;;  %v8678_v16 = vsel %vm18101_vm4, %v8646_v40, 0.0 }
 0x447   : > { %11966 = vmatpush3.msra.mxu1 %v8331_v11  ;;  %11956 = vmatprep.mubr.msk.f32.mxu1 %vm18037_vm0, %v8147_v0  ;;  %vm18066_vm0 = vnez %v17982_v22  ;;  %v18076_v22 = vld [vmem:[#allocation54_spill] sm:$0xff] }
 0x448   : > { %11979 = vmatprep.subr.mxu1 %v8501_v9  ;;  %v18067_v30 = vsel %vm18066_vm0, %v16148_v56, 0.0  ;;  %v18078_v56 = vld [vmem:[#allocation36_spill] sm:$0xff]  ;;  %vm9048_vm0 = vcmask 123904  }
 0x44a   : > { %11957 = vmatmul.mubr.msk.f32.gmra.mrb[34].mxu1 %vm18046_vm5, %v8148_v17  ;;  %vm18068_vm5 = vmmov %vm18056_vm1 }
 0x44b   : > { %11959 = vmatprep.mubr.msk.f32.mxu1 %vm18047_vm13, %v8149_v3  ;;  %vm18069_vm13 = vnez %v17987_v50 }
 0x44c   : > { %v8329_v29 = vsel %vm18069_vm13, %v7812_v38, 0.0  ;;  %vm18086_vm13 = vnez %v18000_v25 }
 0x44e   : > { %11960 = vmatmul.mubr.msk.f32.gmra.mrb[36].mxu1 %vm18048_vm6, %v8150_v13  ;;  %vm18070_vm6 = vmmov %vm18056_vm1 }
 0x44f   : > { %11962 = vmatprep.mubr.msk.f32.mxu1 %vm18049_vm10, %v8151_v53  ;;  %vm18071_vm10 = vnez %v17991_v44 }
 0x450   : > { %v8330_v4 = vsel %vm18071_vm10, %v8298_v34, 0.0  ;;  %vm18089_vm10 = vnez %v18005_v15 }
 0x451   : > { %v18090_v23 = vsel %vm18089_vm10, %v16315_v8, 0.0  ;;  %vm18106_vm10 = vcmask 1043459  }
 0x452   : > { %11963 = vmatmul.mubr.msk.f32.gmra.mrb[38].mxu1 %vm18050_vm8, %v8152_v6  ;;  %vm18072_vm8 = vmmov %vm18056_vm1 }
 0x453   : > { %11967 = vmatprep.mubr.msk.f32.mxu1 %vm18053_vm15, %v18052_v62  ;;  %vm18074_vm15 = vmmov %vm18056_vm1 }
 0x456   : > { %11968 = vmatmul.mubr.msk.f32.vlgmr.msra.gmra.mrb[32].mxu1 %vm18056_vm1, %v18055_v19  ;;  %v18103_v19 = vld [vmem:[#allocation34_spill] sm:$0xff] }
 0x457   : > { %11980 = vmatpush3.msra.mxu1 %v8501_v9  ;;  %11970 = vmatprep.mubr.msk.f32.mxu1 %vm18059_vm9, %v18058_v54  ;;  %vm18079_vm9 = vmmov %vm18056_vm1 }
 0x458   : > { %11993 = vmatprep.subr.mxu1 %v8679_v61 }
 0x45a   : > { %11971 = vmatmul.mubr.msk.f32.gmra.mrb[34].mxu1 %vm18062_vm2, %v18061_v18  ;;  %vm18081_vm2 = vmmov %vm18056_vm1 }
 0x45b   : > { %11973 = vmatprep.mubr.msk.f32.mxu1 %vm18065_vm3, %v18064_v45  ;;  %vm18083_vm3 = vmmov %vm18056_vm1 }
 0x45e   : > { %11974 = vmatmul.mubr.msk.f32.gmra.mrb[36].mxu1 %vm18068_vm5, %v18067_v30  ;;  %vm18085_vm5 = vmmov %vm18056_vm1 }
 0x45f   : > { %11976 = vmatprep.mubr.msk.f32.mxu1 %vm18070_vm6, %v8329_v29  ;;  %vm18088_vm6 = vmmov %vm18056_vm1 }
 0x462   : > { %11977 = vmatmul.mubr.msk.f32.gmra.mrb[38].mxu1 %vm18072_vm8, %v8330_v4  ;;  %vm18091_vm8 = vmmov %vm18056_vm1 }
 0x463   : > { %11981 = vmatprep.mubr.msk.f32.mxu1 %vm18073_vm12, %v16239_v43  ;;  %v18087_v43 = vsel %vm18086_vm13, %v16287_v51, 0.0  ;;  %v9381_v51 = vld [vmem:[%s17122_s5 + $0x8] sm:$0xff]  ;;  %vm18104_vm13 = vcmask 1041409   ;;  %vm18108_vm12 = vcmask 1045509  }
 0x464   : > { %v16681_v50 = vpack.c.bf16 %v9381_v51, %v9380_v24  ;;  %vm18116_vm4 = vmmov %vm18108_vm12 }
 0x466   : > { %11982 = vmatmul.mubr.msk.f32.vlgmr.msra.gmra.mrb[32].mxu1 %vm18074_vm15, %v16252_v48  ;;  %vm18093_vm15 = vmmov %vm18056_vm1  ;;  %v8677_v48 = vsel %vm18099_vm11, %v8128_v21, 0.0 }
 0x467   : > { %11994 = vmatpush3.msra.mxu1 %v8679_v61  ;;  %11984 = vmatprep.mubr.msk.f32.mxu1 %vm18075_vm14, %v16257_v10  ;;  %vm18094_vm14 = vnez %v18012_v14  ;;  %v9390_v10 = vld [vmem:[%s17122_s5 + $0x10] sm:$0xff]  ;;  %vm18114_vm11 = vmmov %vm18106_vm10 }
 0x468   : > { %v18095_v60 = vsel %vm18094_vm14, %v16373_v63, 0.0  ;;  %vm18110_vm14 = vcmask 1047559  }
 0x46a   : > { %11985 = vmatmul.mubr.msk.f32.gmra.mrb[34].mxu1 %vm18056_vm1, %v16262_v37  ;;  %v9391_v37 = vld [vmem:[%s17122_s5 + $0x18] sm:$0xff] }
 0x46b   : > { %11987 = vmatprep.mubr.msk.f32.mxu1 %vm18077_vm7, %v18076_v22  ;;  %vm18096_vm7 = vnez %v18016_v1 }
 0x46c   : > { %v18097_v41 = vsel %vm18096_vm7, %v16409_v57, 0.0  ;;  %v12116_v57 = vpack.c.bf16 %v9391_v37, %v9390_v10  ;;  %vm18112_vm7 = vmmov %vm18104_vm13 }
 0x46e   : > { %11988 = vmatmul.mubr.msk.f32.gmra.mrb[36].mxu1 %vm18079_vm9, %v18078_v56  ;;  %vm18098_vm9 = vmmov %vm18056_vm1  ;;  %12117 = vmatprep.subr.bf16.mxu1 %v12116_v57 }
 0x46f   : > { %11990 = vmatprep.mubr.msk.f32.mxu1 %vm18081_vm2, %v8499_v59  ;;  %vm18100_vm2 = vmmov %vm18056_vm1 }
 0x472   : > { %11991 = vmatmul.mubr.msk.f32.gmra.mrb[38].mxu1 %vm18083_vm3, %v8500_v26  ;;  %vm18102_vm3 = vmmov %vm18056_vm1 }
 0x473   : > { %11995 = vmatprep.mubr.msk.f32.mxu1 %vm18085_vm5, %v8671_v31  ;;  %vm9273_vm5 = vcmask 130048  }
 0x476   : > { %11996 = vmatmul.mubr.msk.f32.vlgmr.msra.gmra.mrb[32].mxu1 %vm18088_vm6, %v18087_v43  ;;  %vm18105_vm6 = vcmask 1042434  }
 0x477   : > { %11998 = vmatprep.mubr.msk.f32.mxu1 %vm18091_vm8, %v18090_v23  ;;  %12119 = vmatpush3.bf16.msra.mxu1 %v12116_v57  ;;  %vm18107_vm8 = vcmask 1044484  }
 0x478   : > { %12121 = vmatprep.subr.bf16.mxu1 %v16681_v50 }
 0x47a   : > { %11999 = vmatmul.mubr.msk.f32.gmra.mrb[34].mxu1 %vm18093_vm15, %v8674_v49  ;;  %vm18109_vm15 = vcmask 1046534  }
 0x47b   : > { %12001 = vmatprep.mubr.msk.f32.mxu1 %vm18056_vm1, %v18095_v60 }
 0x47e   : > { %12002 = vmatmul.mubr.msk.f32.gmra.mrb[36].mxu1 %vm18098_vm9, %v18097_v41  ;;  %vm18113_vm9 = vmmov %vm18105_vm6 }
 0x47f   : > { %12004 = vmatprep.mubr.msk.f32.mxu1 %vm18100_vm2, %v8677_v48  ;;  %vm18115_vm2 = vmmov %vm18107_vm8 }
 0x482   : > { %12005 = vmatmul.mubr.msk.f32.gmra.mrb[38].mxu1 %vm18102_vm3, %v8678_v16  ;;  %vm18118_vm3 = vmmov %vm18109_vm15 }
 0x549   : > { %v11997_v8 = vpop.f32.mrb[32].mxu1 }
 0x54a   : > { %v8825_v27 = vadd.f32 %v11997_v8, %v10971_v28  ;;  %v8770_v58 = vpop.f32.mrb[33].mxu1 }
 0x54b   : > { %v8824_v39 = vadd.f32 %v10971_v28, %v8770_v58 }
 0x54c   : > { %v8833_v63 = vmul.f32 0.5, %v8825_v27 }
 0x54d   : > { %v8832_v44 = vmul.f32 0.5, %v8824_v39  ;;  %v12000_v31 = vpop.f32.mrb[34].mxu1 }
 0x54e   : > { %12631 = vtanh.f32 %v8833_v63  ;;  %v8827_v25 = vadd.f32 %v12000_v31, %v10971_v28  ;;  %v8780_v49 = vpop.f32.mrb[35].mxu1 }
 0x54f   : > { %12633 = vtanh.f32 %v8832_v44  ;;  %v16687_v15 = vadd.f32 %v10971_v28, %v8780_v49 }
 0x550   : > { %v8835_v14 = vmul.f32 0.5, %v8827_v25 }
 0x551   : > { %v8834_v7 = vmul.f32 0.5, %v16687_v15  ;;  %v12003_v1 = vpop.f32.mrb[36].mxu1 }
 0x552   : > { %12635 = vtanh.f32 %v8835_v14  ;;  %v8790_v52 = vpop.f32.mrb[37].mxu1  ;;  %v16690_v5 = vadd.f32 %v12003_v1, %v10971_v28 }
 0x553   : > { %12637 = vtanh.f32 %v8834_v7  ;;  %v16692_v47 = vadd.f32 %v10971_v28, %v8790_v52 }
 0x554   : > { %v8837_v11 = vmul.f32 0.5, %v16690_v5 }
 0x555   : > { %v12006_v2 = vpop.f32.mrb[38].mxu1  ;;  %v8836_v36 = vmul.f32 0.5, %v16692_v47 }
 0x556   : > { %v8800_v20 = vpop.f32.mrb[39].mxu1  ;;  %v16694_v35 = vadd.f32 %v12006_v2, %v10971_v28  ;;  %12639 = vtanh.f32 %v8837_v11 }
 0x557   : > { %v16696_v32 = vadd.f32 %v10971_v28, %v8800_v20  ;;  %12641 = vtanh.f32 %v8836_v36 }
 0x558   : > { %v12632_v33 = vpop.eup %12631  ;;  %v8839_v9 = vmul.f32 0.5, %v16694_v35 }
 0x559   : > { %v12634_v38 = vpop.eup %12633  ;;  %v8849_v12 = vadd.f32 1.0, %v12632_v33  ;;  %v8838_v3 = vmul.f32 0.5, %v16696_v32 }
 0x55a   : > { %v8848_v55 = vadd.f32 1.0, %v12634_v38  ;;  %12643 = vtanh.f32 %v8839_v9 }
 0x55b   : > { %v8857_v42 = vmul.f32 0.5, %v8849_v12  ;;  %12645 = vtanh.f32 %v8838_v3 }
 0x55c   : > { %v12636_v0 = vpop.eup %12635  ;;  %v8856_v17 = vmul.f32 0.5, %v8848_v55 }
 0x55d   : > { %v12638_v13 = vpop.eup %12637  ;;  %v8865_v53 = vmul.f32 %v8857_v42, %v8825_v27  ;;  %v8851_v21 = vadd.f32 1.0, %v12636_v0 }
 0x55e   : > { %v8864_v6 = vmul.f32 %v8856_v17, %v8824_v39  ;;  %v8850_v62 = vadd.f32 1.0, %v12638_v13 }
 0x55f   : > { %v8897_v61 = vcombine.high %v8865_v53, %v8865_v53  ;;  %v8904_v54 = vrot.slane %v8865_v53, %v18103_v19  ;;  %v8859_v18 = vmul.f32 0.5, %v8851_v21 }
 0x560   : > { %v8880_v45 = vcombine.high %v8864_v6, %v8864_v6  ;;  %v8887_v30 = vrot.slane %v8864_v6, %v18103_v19  ;;  %v16704_v29 = vmul.f32 0.5, %v8850_v62  ;;  %v12640_v63 = vpop.eup %12639 }
 0x561   : > { %v8911_v34 = vrot.slane %v8897_v61, %v18103_v19  ;;  %v8912_v4 = vcombine.high %v8904_v54, %v8904_v54  ;;  %v9077_v22 = vsel %vm9048_vm0, %v8904_v54, -inf  ;;  %v16708_v46 = vmul.f32 %v8859_v18, %v8827_v25  ;;  %v16718_v14 = vpop.eup %12641 }
 0x562   : > { %v9078_v56 = vrot.slane %v9077_v22, 4  ;;  %v8894_v59 = vrot.slane %v8880_v45, %v18103_v19  ;;  %v8895_v26 = vcombine.high %v8887_v30, %v8887_v30  ;;  %v9049_v43 = vsel %vm9048_vm0, %v8887_v30, -inf }
 0x563   : > { %v8913_v23 = vcombine.high %v8911_v34, %v8911_v34  ;;  %v9084_v60 = vsel %vm9048_vm0, %v8912_v4, -inf  ;;  %v9091_v40 = vsel %vm9048_vm0, %v8911_v34, -inf  ;;  %v9050_v41 = vrot.slane %v9049_v43, 4 }
 0x564   : > { %v9079_v48 = vmax.f32 %v9077_v22, %v9078_v56  ;;  %v9085_v16 = vrot.slane %v9084_v60, 4  ;;  %v9092_v10 = vrot.slane %v9091_v40, 4  ;;  %v8896_v37 = vcombine.high %v8894_v59, %v8894_v59  ;;  %v16720_v20 = vpop.eup %12643 }
 0x565   : > { %v9098_v24 = vsel %vm9048_vm0, %v8913_v23, -inf  ;;  %v9051_v57 = vmax.f32 %v9049_v43, %v9050_v41  ;;  %v9056_v51 = vsel %vm9048_vm0, %v8895_v26, -inf  ;;  %v9063_v28 = vsel %vm9048_vm0, %v8894_v59, -inf  ;;  %v16722_v55 = vpop.eup %12645 }
 0x566   : > { %v9080_v8 = vrot.slane %v9079_v48, 2  ;;  %v9086_v27 = vmax.f32 %v9084_v60, %v9085_v16  ;;  %v9093_v58 = vmax.f32 %v9091_v40, %v9092_v10  ;;  %v9099_v39 = vrot.slane %v9098_v24, 4 }
 0x567   : > { %v9052_v44 = vrot.slane %v9051_v57, 2  ;;  %v9057_v31 = vrot.slane %v9056_v51, 4  ;;  %v9064_v25 = vrot.slane %v9063_v28, 4  ;;  %v9070_v49 = vsel %vm9048_vm0, %v8896_v37, -inf }
 0x568   : > { %v9081_v7 = vmax.f32 %v9079_v48, %v9080_v8  ;;  %v9087_v1 = vrot.slane %v9086_v27, 2  ;;  %v9094_v52 = vrot.slane %v9093_v58, 2  ;;  %v9100_v2 = vmax.f32 %v9098_v24, %v9099_v39 }
 0x569   : > { %v9053_v33 = vmax.f32 %v9051_v57, %v9052_v44  ;;  %v9058_v38 = vmax.f32 %v9056_v51, %v9057_v31  ;;  %v9065_v12 = vmax.f32 %v9063_v28, %v9064_v25  ;;  %v9071_v11 = vrot.slane %v9070_v49, 4 }
 0x56a   : > { %v9082_v36 = vrot.slane %v9081_v7, 1  ;;  %v9088_v42 = vmax.f32 %v9086_v27, %v9087_v1  ;;  %v9095_v9 = vmax.f32 %v9093_v58, %v9094_v52  ;;  %v9101_v0 = vrot.slane %v9100_v2, 2 }
 0x56b   : > { %v9054_v17 = vrot.slane %v9053_v33, 1  ;;  %v9059_v3 = vrot.slane %v9058_v38, 2  ;;  %v9066_v13 = vrot.slane %v9065_v12, 2  ;;  %v9072_v53 = vmax.f32 %v9070_v49, %v9071_v11 }
 0x56c   : > { %v9083_v21 = vmax.f32 %v9081_v7, %v9082_v36  ;;  %v9089_v6 = vrot.slane %v9088_v42, 1  ;;  %v9096_v62 = vrot.slane %v9095_v9, 1  ;;  %v9102_v61 = vmax.f32 %v9100_v2, %v9101_v0 }
 0x56d   : > { %v9055_v54 = vmax.f32 %v9053_v33, %v9054_v17  ;;  %v9060_v18 = vmax.f32 %v9058_v38, %v9059_v3  ;;  %v9067_v45 = vmax.f32 %v9065_v12, %v9066_v13  ;;  %v9073_v30 = vrot.slane %v9072_v53, 2 }
 0x56e   : > { %v9090_v34 = vmax.f32 %v9088_v42, %v9089_v6  ;;  %v9097_v4 = vmax.f32 %v9095_v9, %v9096_v62  ;;  %v9103_v22 = vrot.slane %v9102_v61, 1  ;;  %v9275_v56 = vsel %vm9273_vm5, %v9083_v21, -inf }
 0x56f   : > { %v9061_v59 = vrot.slane %v9060_v18, 1  ;;  %v9068_v26 = vrot.slane %v9067_v45, 1  ;;  %v9074_v43 = vmax.f32 %v9072_v53, %v9073_v30  ;;  %v9274_v23 = vsel %vm9273_vm5, %v9055_v54, -inf }
 0x570   : > { %v9104_v60 = vmax.f32 %v9102_v61, %v9103_v22  ;;  %v9278_v40 = vsel %vm9273_vm5, %v9090_v34, -inf  ;;  %v9281_v41 = vsel %vm9273_vm5, %v9097_v4, -inf  ;;  %v9276_v48 = vmax.f32 %v9274_v23, %v9275_v56 }
 0x571   : > { %v9062_v16 = vmax.f32 %v9060_v18, %v9061_v59  ;;  %v9069_v10 = vmax.f32 %v9067_v45, %v9068_v26  ;;  %v9075_v37 = vrot.slane %v9074_v43, 1  ;;  %v8931_v24 = vcombine.high %v16708_v46, %v16708_v46 }
 0x572   : > { %v9284_v57 = vsel %vm9273_vm5, %v9104_v60, -inf  ;;  %v8938_v51 = vrot.slane %v16708_v46, %v18103_v19  ;;  %v8866_v28 = vmul.f32 %v16704_v29, %v16687_v15  ;;  %v8853_v8 = vadd.f32 1.0, %v12640_v63 }
 0x573   : > { %v9076_v27 = vmax.f32 %v9074_v43, %v9075_v37  ;;  %v9277_v58 = vsel %vm9273_vm5, %v9062_v16, -inf  ;;  %v9280_v39 = vsel %vm9273_vm5, %v9069_v10, -inf  ;;  %v8945_v44 = vrot.slane %v8931_v24, %v18103_v19 }
 0x574   : > { %v9279_v31 = vmax.f32 %v9277_v58, %v9278_v40  ;;  %v9282_v25 = vmax.f32 %v9280_v39, %v9281_v41  ;;  %v8946_v49 = vcombine.high %v8938_v51, %v8938_v51  ;;  %v9133_v7 = vsel %vm9048_vm0, %v8938_v51, -inf }
 0x575   : > { %v9283_v1 = vsel %vm9273_vm5, %v9076_v27, -inf  ;;  %v8947_v52 = vcombine.high %v8945_v44, %v8945_v44  ;;  %v9134_v46 = vrot.slane %v9133_v7, 4  ;;  %v9147_v2 = vsel %vm9048_vm0, %v8945_v44, -inf }
 0x576   : > { %v9285_v15 = vmax.f32 %v9283_v1, %v9284_v57  ;;  %v9338_v29 = vsel %vm18104_vm13, %v9279_v31, %v9276_v48  ;;  %v9140_v63 = vsel %vm9048_vm0, %v8946_v49, -inf  ;;  %v9148_v33 = vrot.slane %v9147_v2, 4 }
 0x577   : > { %v9339_v38 = vsel %vm18105_vm6, %v9282_v25, %v9338_v29  ;;  %v9135_v12 = vmax.f32 %v9133_v7, %v9134_v46  ;;  %v9141_v11 = vrot.slane %v9140_v63, 4  ;;  %v9154_v36 = vsel %vm9048_vm0, %v8947_v52, -inf }
 0x578   : > { %v9149_v42 = vmax.f32 %v9147_v2, %v9148_v33  ;;  %v9155_v9 = vrot.slane %v9154_v36, 4  ;;  %v8914_v0 = vcombine.high %v8866_v28, %v8866_v28  ;;  %v8921_v17 = vrot.slane %v8866_v28, %v18103_v19 }
 0x579   : > { %v9136_v3 = vrot.slane %v9135_v12, 2  ;;  %v9142_v13 = vmax.f32 %v9140_v63, %v9141_v11  ;;  %v16747_v53 = vsel %vm18106_vm10, %v9285_v15, %v9339_v38  ;;  %v8861_v21 = vmul.f32 0.5, %v8853_v8 }
 0x57a   : > { %v9150_v6 = vrot.slane %v9149_v42, 2  ;;  %v9156_v62 = vmax.f32 %v9154_v36, %v9155_v9  ;;  %v8928_v61 = vrot.slane %v8914_v0, %v18103_v19  ;;  %v8929_v54 = vcombine.high %v8921_v17, %v8921_v17 }
 0x57b   : > { %v9137_v18 = vmax.f32 %v9135_v12, %v9136_v3  ;;  %v9143_v45 = vrot.slane %v9142_v13, 2  ;;  %v9105_v30 = vsel %vm9048_vm0, %v8921_v17, -inf  ;;  %v8869_v34 = vmul.f32 %v8861_v21, %v16690_v5 }
 0x57c   : > { %v9151_v4 = vmax.f32 %v9149_v42, %v9150_v6  ;;  %v9157_v22 = vrot.slane %v9156_v62, 2  ;;  %v8930_v56 = vcombine.high %v8928_v61, %v8928_v61  ;;  %v9106_v59 = vrot.slane %v9105_v30, 4 }
 0x57d   : > { %v9138_v26 = vrot.slane %v9137_v18, 1  ;;  %v9144_v43 = vmax.f32 %v9142_v13, %v9143_v45  ;;  %v9112_v23 = vsel %vm9048_vm0, %v8929_v54, -inf  ;;  %v9119_v60 = vsel %vm9048_vm0, %v8928_v61, -inf }
 0x57e   : > { %v9152_v40 = vrot.slane %v9151_v4, 1  ;;  %v9158_v41 = vmax.f32 %v9156_v62, %v9157_v22  ;;  %v9107_v48 = vmax.f32 %v9105_v30, %v9106_v59  ;;  %v9113_v16 = vrot.slane %v9112_v23, 4 }
 0x57f   : > { %v9139_v10 = vmax.f32 %v9137_v18, %v9138_v26  ;;  %v9145_v37 = vrot.slane %v9144_v43, 1  ;;  %v9120_v24 = vrot.slane %v9119_v60, 4  ;;  %v9126_v57 = vsel %vm9048_vm0, %v8930_v56, -inf }
 0x580   : > { %v9153_v5 = vmax.f32 %v9151_v4, %v9152_v40  ;;  %v9159_v51 = vrot.slane %v9158_v41, 1  ;;  %v9108_v28 = vrot.slane %v9107_v48, 2  ;;  %v9114_v8 = vmax.f32 %v9112_v23, %v9113_v16 }
 0x581   : > { %v9146_v27 = vmax.f32 %v9144_v43, %v9145_v37  ;;  %v9287_v58 = vsel %vm9273_vm5, %v9139_v10, -inf  ;;  %v9121_v39 = vmax.f32 %v9119_v60, %v9120_v24  ;;  %v9127_v44 = vrot.slane %v9126_v57, 4 }
 0x582   : > { %v9160_v31 = vmax.f32 %v9158_v41, %v9159_v51  ;;  %v9293_v25 = vsel %vm9273_vm5, %v9153_v5, -inf  ;;  %v9109_v49 = vmax.f32 %v9107_v48, %v9108_v28  ;;  %v9115_v7 = vrot.slane %v9114_v8, 2 }
 0x583   : > { %v9290_v1 = vsel %vm9273_vm5, %v9146_v27, -inf  ;;  %v9122_v52 = vrot.slane %v9121_v39, 2  ;;  %v9128_v46 = vmax.f32 %v9126_v57, %v9127_v44  ;;  %v8965_v2 = vcombine.high %v8869_v34, %v8869_v34 }
 0x584   : > { %v9296_v15 = vsel %vm9273_vm5, %v9160_v31, -inf  ;;  %v9110_v29 = vrot.slane %v9109_v49, 1  ;;  %v9116_v63 = vmax.f32 %v9114_v8, %v9115_v7  ;;  %v8972_v33 = vrot.slane %v8869_v34, %v18103_v19 }
 0x585   : > { %v9123_v38 = vmax.f32 %v9121_v39, %v9122_v52  ;;  %v9129_v12 = vrot.slane %v9128_v46, 2  ;;  %v8979_v11 = vrot.slane %v8965_v2, %v18103_v19  ;;  %v8852_v36 = vadd.f32 1.0, %v16718_v14 }
 0x586   : > { %v9111_v42 = vmax.f32 %v9109_v49, %v9110_v29  ;;  %v9117_v9 = vrot.slane %v9116_v63, 1  ;;  %v8980_v0 = vcombine.high %v8972_v33, %v8972_v33  ;;  %v9189_v17 = vsel %vm9048_vm0, %v8972_v33, -inf }
 0x587   : > { %v9124_v3 = vrot.slane %v9123_v38, 1  ;;  %v9130_v13 = vmax.f32 %v9128_v46, %v9129_v12  ;;  %v8981_v21 = vcombine.high %v8979_v11, %v8979_v11  ;;  %v9190_v6 = vrot.slane %v9189_v17, 4 }
 0x588   : > { %v9118_v62 = vmax.f32 %v9116_v63, %v9117_v9  ;;  %v9286_v61 = vsel %vm9273_vm5, %v9111_v42, -inf  ;;  %v9196_v54 = vsel %vm9048_vm0, %v8980_v0, -inf  ;;  %v9203_v18 = vsel %vm9048_vm0, %v8979_v11, -inf }
 0x589   : > { %v9125_v45 = vmax.f32 %v9123_v38, %v9124_v3  ;;  %v9131_v30 = vrot.slane %v9130_v13, 1  ;;  %v9288_v34 = vmax.f32 %v9286_v61, %v9287_v58  ;;  %v9191_v14 = vmax.f32 %v9189_v17, %v9190_v6 }
 0x58a   : > { %v9289_v4 = vsel %vm9273_vm5, %v9118_v62, -inf  ;;  %v9197_v22 = vrot.slane %v9196_v54, 4  ;;  %v9204_v56 = vrot.slane %v9203_v18, 4  ;;  %v9210_v59 = vsel %vm9048_vm0, %v8981_v21, -inf }
 0x58b   : > { %v9132_v26 = vmax.f32 %v9130_v13, %v9131_v30  ;;  %v9291_v43 = vmax.f32 %v9289_v4, %v9290_v1  ;;  %v9292_v23 = vsel %vm9273_vm5, %v9125_v45, -inf  ;;  %v9341_v60 = vsel %vm18107_vm8, %v9288_v34, %v16747_v53 }
 0x58c   : > { %v9294_v40 = vmax.f32 %v9292_v23, %v9293_v25  ;;  %v9192_v41 = vrot.slane %v9191_v14, 2  ;;  %v9198_v48 = vmax.f32 %v9196_v54, %v9197_v22  ;;  %v9205_v16 = vmax.f32 %v9203_v18, %v9204_v56  ;;  %v18111_v25 = vld [vmem:[#allocation8_spill] sm:$0xff] }
 0x58d   : > { %v9295_v10 = vsel %vm9273_vm5, %v9132_v26, -inf  ;;  %v9342_v37 = vsel %vm18108_vm12, %v9291_v43, %v9341_v60  ;;  %v9211_v24 = vrot.slane %v9210_v59, 4  ;;  %v8860_v57 = vmul.f32 0.5, %v8852_v36 }
 0x58e   : > { %v9297_v5 = vmax.f32 %v9295_v10, %v9296_v15  ;;  %v9343_v51 = vsel %vm18109_vm15, %v9294_v40, %v9342_v37  ;;  %v9193_v28 = vmax.f32 %v9191_v14, %v9192_v41  ;;  %v9199_v8 = vrot.slane %v9198_v48, 2 }
 0x58f   : > { %v9206_v27 = vrot.slane %v9205_v16, 2  ;;  %v9212_v58 = vmax.f32 %v9210_v59, %v9211_v24  ;;  %v8868_v39 = vmul.f32 %v8860_v57, %v16692_v47  ;;  %v8855_v53 = vadd.f32 1.0, %v16720_v20 }
 0x590   : > { %v9344_v44 = vsel %vm18110_vm14, %v9297_v5, %v9343_v51  ;;  %v9200_v31 = vmax.f32 %v9198_v48, %v9199_v8  ;;  %v9358_v49 = vshra.s32 %v18111_v25, 2  ;;  %v9194_v46 = vrot.slane %v9193_v28, 1 }
 0x591   : > { %9354 = vst.msk [vmem:[#allocation4 + $0x8] sm:$0xff] %vm9273_vm5, %v9344_v44  ;;  %v9213_v7 = vrot.slane %v9212_v58, 2  ;;  %v8948_v1 = vcombine.high %v8868_v39, %v8868_v39  ;;  %v8955_v52 = vrot.slane %v8868_v39, %v18103_v19  ;;  %v8863_v2 = vmul.f32 0.5, %v8855_v53 }
 0x592   : > { %v9201_v15 = vrot.slane %v9200_v31, 1  ;;  %v9207_v29 = vmax.f32 %v9205_v16, %v9206_v27  ;;  %v16783_v38 = vand.u32 3, %v9358_v49  ;;  %v8854_v42 = vadd.f32 1.0, %v16722_v55 }
 0x593   : > { %v8962_v63 = vrot.slane %v8948_v1, %v18103_v19  ;;  %v8963_v47 = vcombine.high %v8955_v52, %v8955_v52  ;;  %v9161_v20 = vsel %vm9048_vm0, %v8955_v52, -inf  ;;  %v8871_v33 = vmul.f32 %v8863_v2, %v16694_v35 }
 0x594   : > { %v9214_v12 = vmax.f32 %v9212_v58, %v9213_v7  ;;  %v9162_v36 = vrot.slane %v9161_v20, 4  ;;  %v9195_v9 = vmax.f32 %v9193_v28, %v9194_v46  ;;  %v9202_v13 = vmax.f32 %v9200_v31, %v9201_v15 }
 0x595   : > { %v8964_v11 = vcombine.high %v8962_v63, %v8962_v63  ;;  %v9168_v0 = vsel %vm9048_vm0, %v8963_v47, -inf  ;;  %v9175_v17 = vsel %vm9048_vm0, %v8962_v63, -inf  ;;  %v8999_v3 = vcombine.high %v8871_v33, %v8871_v33 }
 0x596   : > { %v9208_v21 = vrot.slane %v9207_v29, 1  ;;  %v9163_v6 = vmax.f32 %v9161_v20, %v9162_v36  ;;  %v9169_v62 = vrot.slane %v9168_v0, 4  ;;  %v9176_v61 = vrot.slane %v9175_v17, 4 }
 0x597   : > { %v9182_v35 = vsel %vm9048_vm0, %v8964_v11, -inf  ;;  %v9006_v54 = vrot.slane %v8871_v33, %v18103_v19  ;;  %v9013_v18 = vrot.slane %v8999_v3, %v18103_v19  ;;  %v9215_v45 = vrot.slane %v9214_v12, 1 }
 0x598   : > { %v9164_v30 = vrot.slane %v9163_v6, 2  ;;  %v9170_v55 = vmax.f32 %v9168_v0, %v9169_v62  ;;  %v9183_v34 = vrot.slane %v9182_v35, 4  ;;  %v9177_v14 = vmax.f32 %v9175_v17, %v9176_v61  ;;  %v9382_v3 = vld [vmem:[#allocation4 + $0x4] sm:$0xff] }
 0x599   : > { %v9014_v4 = vcombine.high %v9006_v54, %v9006_v54  ;;  %v9015_v22 = vcombine.high %v9013_v18, %v9013_v18  ;;  %v9245_v56 = vsel %vm9048_vm0, %v9006_v54, -inf  ;;  %v9299_v59 = vsel %vm9273_vm5, %v9195_v9, -inf }
 0x59a   : > { %v9165_v26 = vmax.f32 %v9163_v6, %v9164_v30  ;;  %v9171_v43 = vrot.slane %v9170_v55, 2  ;;  %v9184_v23 = vmax.f32 %v9182_v35, %v9183_v34  ;;  %v9178_v60 = vrot.slane %v9177_v14, 2 }
 0x59b   : > { %v9246_v40 = vrot.slane %v9245_v56, 4  ;;  %v9252_v41 = vsel %vm9048_vm0, %v9014_v4, -inf  ;;  %v9259_v48 = vsel %vm9048_vm0, %v9013_v18, -inf  ;;  %v9209_v16 = vmax.f32 %v9207_v29, %v9208_v21 }
 0x59c   : > { %v9166_v10 = vrot.slane %v9165_v26, 1  ;;  %v9172_v37 = vmax.f32 %v9170_v55, %v9171_v43  ;;  %v9185_v24 = vrot.slane %v9184_v23, 2  ;;  %v9216_v57 = vmax.f32 %v9214_v12, %v9215_v45 }
 0x59d   : > { %v9179_v5 = vmax.f32 %v9177_v14, %v9178_v60  ;;  %v9253_v51 = vrot.slane %v9252_v41, 4  ;;  %v9266_v28 = vsel %vm9048_vm0, %v9015_v22, -inf  ;;  %v9260_v39 = vrot.slane %v9259_v48, 4 }
 0x59e   : > { %v9167_v8 = vmax.f32 %v9165_v26, %v9166_v10  ;;  %v9173_v27 = vrot.slane %v9172_v37, 1  ;;  %v9186_v58 = vmax.f32 %v9184_v23, %v9185_v24  ;;  %v9302_v53 = vsel %vm9273_vm5, %v9202_v13, -inf }
 0x59f   : > { %v9180_v44 = vrot.slane %v9179_v5, 1  ;;  %v9247_v31 = vmax.f32 %v9245_v56, %v9246_v40  ;;  %v8862_v49 = vmul.f32 0.5, %v8854_v42  ;;  %v9267_v46 = vrot.slane %v9266_v28, 4 }
 0x5a0   : > { %v9174_v7 = vmax.f32 %v9172_v37, %v9173_v27  ;;  %v9187_v1 = vrot.slane %v9186_v58, 1  ;;  %v9298_v52 = vsel %vm9273_vm5, %v9167_v8, -inf  ;;  %v9305_v2 = vsel %vm9273_vm5, %v9209_v16, -inf }
 0x5a1   : > { %v9181_v15 = vmax.f32 %v9179_v5, %v9180_v44  ;;  %v9300_v29 = vmax.f32 %v9298_v52, %v9299_v59  ;;  %v9254_v63 = vmax.f32 %v9252_v41, %v9253_v51  ;;  %v9308_v47 = vsel %vm9273_vm5, %v9216_v57, -inf }
 0x5a2   : > { %v9188_v20 = vmax.f32 %v9186_v58, %v9187_v1  ;;  %v9301_v33 = vsel %vm9273_vm5, %v9174_v7, -inf  ;;  %v9261_v12 = vmax.f32 %v9259_v48, %v9260_v39  ;;  %v9248_v42 = vrot.slane %v9247_v31, 2 }
 0x5a3   : > { %v9303_v11 = vmax.f32 %v9301_v33, %v9302_v53  ;;  %v9304_v36 = vsel %vm9273_vm5, %v9181_v15, -inf  ;;  %v9268_v17 = vmax.f32 %v9266_v28, %v9267_v46  ;;  %vm9366_vm1 = vcmp.ge.s32.totalorder %v16783_v38, 1 }
 0x5a4   : > { %v9306_v9 = vmax.f32 %v9304_v36, %v9305_v2  ;;  %v9307_v0 = vsel %vm9273_vm5, %v9188_v20, -inf  ;;  %v9255_v6 = vrot.slane %v9254_v63, 2  ;;  %v9262_v61 = vrot.slane %v9261_v12, 2 }
 0x5a5   : > { %v9309_v13 = vmax.f32 %v9307_v0, %v9308_v47  ;;  %v9345_v21 = vsel %vm18112_vm7, %v9303_v11, %v9300_v29  ;;  %v8870_v35 = vmul.f32 %v8862_v49, %v16696_v32  ;;  %v9249_v54 = vmax.f32 %v9247_v31, %v9248_v42 }
 0x5a6   : > { %v9346_v62 = vsel %vm18113_vm9, %v9306_v9, %v9345_v21  ;;  %v9388_v45 = vsel %vm9366_vm1, %v9382_v3, 0.0  ;;  %v9269_v30 = vrot.slane %v9268_v17, 2  ;;  %v9256_v14 = vmax.f32 %v9254_v63, %v9255_v6 }
 0x5a7   : > { %v9347_v18 = vsel %vm18114_vm11, %v9309_v13, %v9346_v62  ;;  %v8982_v55 = vcombine.high %v8870_v35, %v8870_v35  ;;  %v8989_v34 = vrot.slane %v8870_v35, %v18103_v19  ;;  %12011 = vmatprep.mubr.msk.f32.mxu1 %vm9273_vm5, %v9388_v45  ;;  %v9263_v4 = vmax.f32 %v9261_v12, %v9262_v61 }
 0x5a8   : > { %v9250_v32 = vrot.slane %v9249_v54, 1  ;;  %v9270_v43 = vmax.f32 %v9268_v17, %v9269_v30  ;;  %v9257_v10 = vrot.slane %v9256_v14, 1  ;;  %v18117_v30 = vld [vmem:[#allocation9_spill] sm:$0xff]  ;;  %vm9368_vm9 = vcmp.le.s32.totalorder %v16783_v38, 2 }
 0x5a9   : > { %v8996_v22 = vrot.slane %v8982_v55, %v18103_v19  ;;  %v8997_v56 = vcombine.high %v8989_v34, %v8989_v34  ;;  %v9217_v59 = vsel %vm9048_vm0, %v8989_v34, -inf  ;;  %v9264_v37 = vrot.slane %v9263_v4, 1  ;;  %v10355_v38 = vld [vmem:[%s17124_s7] sm:$0xff] }
 0x5aa   : > { %v9218_v26 = vrot.slane %v9217_v59, 4  ;;  %v9251_v8 = vmax.f32 %v9249_v54, %v9250_v32  ;;  %v9271_v27 = vrot.slane %v9270_v43, 1  ;;  %v9258_v31 = vmax.f32 %v9256_v14, %v9257_v10  ;;  %v9370_v32 = vld [vmem:[#allocation4 + $0x3] sm:$0xff] }
 0x5ab   : > { %v8998_v23 = vcombine.high %v8996_v22, %v8996_v22  ;;  %v9224_v60 = vsel %vm9048_vm0, %v8997_v56, -inf  ;;  %v9231_v40 = vsel %vm9048_vm0, %v8996_v22, -inf  ;;  %v9265_v49 = vmax.f32 %v9263_v4, %v9264_v37  ;;  %v9554_v10 = vld [vmem:[#allocation4 + $0x5] sm:$0xff]  ;;  %v10360_v56 = vld [vmem:[%s17124_s7 + $0x28] sm:$0xff] }
 0x5ac   : > { %v9219_v41 = vmax.f32 %v9217_v59, %v9218_v26  ;;  %v9225_v48 = vrot.slane %v9224_v60, 4  ;;  %v9232_v16 = vrot.slane %v9231_v40, 4  ;;  %v9272_v2 = vmax.f32 %v9270_v43, %v9271_v27  ;;  %v9565_v59 = vld [vmem:[%s17122_s5 + $0x28] sm:$0xff]  ;;  %v9649_v27 = vld [vmem:[#allocation4 + $0x7] sm:$0xff] }
 0x5ad   : > { %v9238_v24 = vsel %vm9048_vm0, %v8998_v23, -inf  ;;  %v9311_v15 = vsel %vm9273_vm5, %v9251_v8, -inf  ;;  %v9314_v33 = vsel %vm9273_vm5, %v9258_v31, -inf  ;;  %v9317_v12 = vsel %vm9273_vm5, %v9265_v49, -inf  ;;  %vm18119_vm0 = vmmov %vm18110_vm14  ;;  %v9838_v31 = vld [vmem:[%s17122_s5 + $0x58] sm:$0xff] }
 0x5ae   : > { %v9220_v57 = vrot.slane %v9219_v41, 2  ;;  %v9226_v5 = vmax.f32 %v9224_v60, %v9225_v48  ;;  %v9233_v51 = vmax.f32 %v9231_v40, %v9232_v16  ;;  %v9239_v28 = vrot.slane %v9238_v24, 4  ;;  %v9657_v48 = vld [vmem:[%s17122_s5 + $0x30] sm:$0xff]  ;;  %v9658_v16 = vld [vmem:[%s17122_s5 + $0x38] sm:$0xff] }
 0x5af   : > { %v9320_v17 = vsel %vm9273_vm5, %v9272_v2, -inf  ;;  %v9359_v55 = vshra.s32 %v18117_v30, 2  ;;  %v9356_v4 = vand.u32 3, %v18111_v25  ;;  %v9357_v25 = vand.u32 3, %v18117_v30  ;;  %v9933_v2 = vld [vmem:[%s17122_s5 + $0x68] sm:$0xff]  ;;  %v10357_v30 = vld [vmem:[%s17124_s7 + $0x10] sm:$0xff] }
 0x5b0   : > { %v9221_v58 = vmax.f32 %v9219_v41, %v9220_v57  ;;  %v9227_v39 = vrot.slane %v9226_v5, 2  ;;  %v9234_v53 = vrot.slane %v9233_v51, 2  ;;  %v9240_v44 = vmax.f32 %v9238_v24, %v9239_v28  ;;  %v9745_v28 = vld [vmem:[%s17122_s5 + $0x48] sm:$0xff]  ;;  %v10366_v40 = vld [vmem:[%s17124_s7 + $0x58] sm:$0xff] }
 0x5b1   : > { %v16832_v22 = vand.u32 3, %v9359_v55  ;;  %vm16834_vm13 = vcmp.ge.s32.totalorder %v9356_v4, 1  ;;  %vm16858_vm8 = vcmp.ge.s32.totalorder %v9357_v25, 1  ;;  %vm16862_vm12 = vcmp.le.s32.totalorder %v9356_v4, 2 }
 0x5b2   : > { %v9222_v7 = vrot.slane %v9221_v58, 1  ;;  %v9228_v1 = vmax.f32 %v9226_v5, %v9227_v39  ;;  %v9235_v52 = vmax.f32 %v9233_v51, %v9234_v53  ;;  %v9241_v46 = vrot.slane %v9240_v44, 2  ;;  %vm9372_vm10 = vmand %vm9366_vm1, %vm16834_vm13  ;;  %v9744_v51 = vld [vmem:[%s17122_s5 + $0x40] sm:$0xff] }
 0x5b3   : > { %vm9367_vm6 = vcmp.ge.s32.totalorder %v16832_v22, 1  ;;  %v9378_v60 = vsel %vm9372_vm10, %v9370_v32, 0.0  ;;  %vm9556_vm14 = vmand %vm9366_vm1, %vm16862_vm12  ;;  %v12128_v37 = vpack.c.bf16 %v9658_v16, %v9657_v48  ;;  %vm16882_vm7 = vcmp.le.s32.totalorder %v9357_v25, 2  ;;  %v10362_v32 = vld [vmem:[%s17124_s7 + $0x38] sm:$0xff]  ;;  %v10990_v48 = vld [vmem:[%s17123_s6] ss:$0 sm:$0xff] }
 0x5b4   : > { %v9223_v29 = vmax.f32 %v9221_v58, %v9222_v7  ;;  %v9229_v63 = vrot.slane %v9228_v1, 1  ;;  %v9236_v47 = vrot.slane %v9235_v52, 1  ;;  %v9242_v20 = vmax.f32 %v9240_v44, %v9241_v46  ;;  %vm9373_vm15 = vmand %vm9367_vm6, %vm16858_vm8  ;;  %v9837_v44 = vld [vmem:[%s17122_s5 + $0x50] sm:$0xff]  ;;  %v9932_v46 = vld [vmem:[%s17122_s5 + $0x60] sm:$0xff] }
 0x5b5   : > { %v9562_v57 = vsel %vm9556_vm14, %v9554_v10, 0.0  ;;  %vm9557_vm1 = vmand %vm9367_vm6, %vm16882_vm7  ;;  %v12132_v58 = vpack.c.bf16 %v9745_v28, %v9744_v51  ;;  %v9655_v53 = vsel %vm16834_vm13, %v9649_v27, 0.0  ;;  %v12136_v7 = vpack.c.bf16 %v9838_v31, %v9837_v44 }
 0x5b6   : > { %v9230_v11 = vmax.f32 %v9228_v1, %v9229_v63  ;;  %v9237_v36 = vmax.f32 %v9235_v52, %v9236_v47  ;;  %v9243_v42 = vrot.slane %v9242_v20, 1  ;;  %v9310_v9 = vsel %vm9273_vm5, %v9223_v29, -inf  ;;  %v9742_v52 = vld [vmem:[#allocation4 + $0x8] sm:$0xff]  ;;  %vm9924_vm11 = vmand %vm9368_vm9, %vm16834_vm13 }
 0x5b7   : > { %v9312_v0 = vmax.f32 %v9310_v9, %v9311_v15  ;;  %v12140_v29 = vpack.c.bf16 %v9933_v2, %v9932_v46  ;;  %v10120_v9 = vld [vmem:[%s17122_s5 + $0x80] sm:$0xff]  ;;  %v12722_v55 = vmov 0.0|0.0   ;;  %vm10325_vm13 = vcmask 261120  }
 0x5b8   : > { %v9244_v3 = vmax.f32 %v9242_v20, %v9243_v42  ;;  %v9313_v13 = vsel %vm9273_vm5, %v9230_v11, -inf  ;;  %v9316_v21 = vsel %vm9273_vm5, %v9237_v36, -inf  ;;  %v10025_v20 = vld [vmem:[%s17122_s5 + $0x70] sm:$0xff]  ;;  %vm10351_vm10 = vcmask 523264  }
 0x5b9   : > { %v9315_v6 = vmax.f32 %v9313_v13, %v9314_v33  ;;  %v9318_v62 = vmax.f32 %v9316_v21, %v9317_v12  ;;  %v9348_v61 = vsel %vm18115_vm2, %v9312_v0, %v9347_v18  ;;  %v9564_v18 = vld [vmem:[%s17122_s5 + $0x20] sm:$0xff]  ;;  %v10026_v33 = vld [vmem:[%s17122_s5 + $0x78] sm:$0xff]  ;;  %vm9369_vm2 = vcmp.le.s32.totalorder %v16832_v22, 2  ;;  %v10121_v0 = vld [vmem:[%s17122_s5 + $0x88] sm:$0xff] }
 0x5ba   : > { %v9319_v35 = vsel %vm9273_vm5, %v9244_v3, -inf  ;;  %v12124_v43 = vpack.c.bf16 %v9565_v59, %v9564_v18  ;;  %v12144_v11 = vpack.c.bf16 %v10026_v33, %v10025_v20  ;;  %v12148_v3 = vpack.c.bf16 %v10121_v0, %v10120_v9  ;;  %v10359_v22 = vld [vmem:[%s17124_s7 + $0x20] sm:$0xff]  ;;  %v10361_v59 = vld [vmem:[%s17124_s7 + $0x30] sm:$0xff] }
 0x5bb   : > { %v9321_v54 = vmax.f32 %v9319_v35, %v9320_v17  ;;  %v9349_v45 = vsel %vm18116_vm4, %v9315_v6, %v9348_v61  ;;  %vm9925_vm4 = vmand %vm9369_vm2, %vm16858_vm8  ;;  %v12159_v18 = vpack.c.bf16 %v10360_v56, %v10359_v22  ;;  %v12162_v25 = vpack.c.bf16 %v10362_v32, %v10361_v59  ;;  %v10368_v22 = vld [vmem:[%s17124_s7 + $0x68] sm:$0xff] }
 0x5bc   : > { %v9350_v34 = vsel %vm18118_vm3, %v9318_v62, %v9349_v45  ;;  %vm10112_vm3 = vmand %vm9368_vm9, %vm16862_vm12  ;;  %v10356_v45 = vld [vmem:[%s17124_s7 + $0x8] sm:$0xff] }
 0x5bd   : > { %v9351_v14 = vsel %vm18119_vm0, %v9321_v54, %v9350_v34  ;;  %vm10113_vm0 = vmand %vm9369_vm2, %vm16882_vm7  ;;  %v12153_v34 = vpack.c.bf16 %v10356_v45, %v10355_v38 }
 0x5be   : > { %9355 = vst.msk [vmem:[#allocation4 + $0x10] sm:$0xff] %vm9273_vm5, %v9351_v14  ;;  %v10358_v14 = vld [vmem:[%s17124_s7 + $0x18] sm:$0xff] }
 0x5bf   : > { %v12156_v4 = vpack.c.bf16 %v10358_v14, %v10357_v30 }
 0x5c5   : > { %v16850_v26 = vld [vmem:[#allocation4 + $0xc] sm:$0xff]  ;;  %v10018_v6 = vld [vmem:[#allocation4 + $0x14] sm:$0xff] }
 0x5c6   : > { %v9389_v23 = vsel %vm9367_vm6, %v16850_v26, 0.0  ;;  %v9555_v8 = vld [vmem:[#allocation4 + $0xd] sm:$0xff]  ;;  %v10023_v21 = vsel %vm9368_vm9, %v16850_v26, 0.0  ;;  %v10024_v62 = vsel %vm9369_vm2, %v10018_v6, 0.0  ;;  %v10111_v35 = vld [vmem:[#allocation4 + $0x15] sm:$0xff]  ;;  %vm12723_vm6 = vmmov 0  }
 0x5c7   : > { %12012 = vmatmul.mubr.msk.f32.vlgmr.msra.gmra.mrb[40].mxu1 %vm9273_vm5, %v9389_v23  ;;  %v9563_v39 = vsel %vm9557_vm1, %v9555_v8, 0.0  ;;  %v9650_v49 = vld [vmem:[#allocation4 + $0xf] sm:$0xff]  ;;  %v10118_v61 = vsel %vm10112_vm3, %v9555_v8, 0.0  ;;  %v10119_v54 = vsel %vm10113_vm0, %v10111_v35, 0.0 }
 0x5c8   : > { %12123 = vmatpush3.bf16.msra.mxu1 %v16681_v50  ;;  %12018 = vmatprep.mubr.msk.f32.mxu1 %vm9273_vm5, %v9378_v60  ;;  %v9371_v50 = vld [vmem:[#allocation4 + $0xb] sm:$0xff]  ;;  %v9656_v1 = vsel %vm16858_vm8, %v9650_v49, 0.0  ;;  %v9923_v17 = vld [vmem:[#allocation4 + $0x13] sm:$0xff]  ;;  %v10365_v60 = vld [vmem:[%s17124_s7 + $0x50] sm:$0xff]  ;;  %vm10353_vm8 = vcmask 785408  }
 0x5c9   : > { %12125 = vmatprep.subr.bf16.mxu1 %v12124_v43  ;;  %v9379_v24 = vsel %vm9373_vm15, %v9371_v50, 0.0  ;;  %v9829_v15 = vld [vmem:[#allocation4 + $0x9] sm:$0xff]  ;;  %v9830_v12 = vld [vmem:[#allocation4 + $0x11] sm:$0xff]  ;;  %v9930_v42 = vsel %vm9924_vm11, %v9371_v50, 0.0  ;;  %v9931_v13 = vsel %vm9925_vm4, %v9923_v17, 0.0  ;;  %v12168_v41 = vpack.c.bf16 %v10366_v40, %v10365_v60 }
 0x5ca   : > { %v9743_v63 = vld [vmem:[#allocation4 + $0x10] sm:$0xff]  ;;  %v9835_v47 = vsel %vm16862_vm12, %v9829_v15, 0.0  ;;  %v9836_v36 = vsel %vm16882_vm7, %v9830_v12, 0.0 }
 0x5cb   : > { %v10363_v26 = vld [vmem:[%s17124_s7 + $0x40] sm:$0xff] }
 0x5cf   : > { %12019 = vmatmul.mubr.msk.f32.vlgmr.msra.gmra.mrb[40].mxu1 %vm9273_vm5, %v9379_v24 }
 0x5d0   : > { %12127 = vmatpush3.bf16.msra.mxu1 %v12124_v43  ;;  %12025 = vmatprep.mubr.msk.f32.mxu1 %vm9273_vm5, %v9562_v57  ;;  %v10364_v43 = vld [vmem:[%s17124_s7 + $0x48] sm:$0xff] }
 0x5d1   : > { %12129 = vmatprep.subr.bf16.mxu1 %v12128_v37  ;;  %v12165_v23 = vpack.c.bf16 %v10364_v43, %v10363_v26 }
 0x5d7   : > { %12026 = vmatmul.mubr.msk.f32.vlgmr.msra.gmra.mrb[40].mxu1 %vm9273_vm5, %v9563_v39 }
 0x5d8   : > { %12131 = vmatpush3.bf16.msra.mxu1 %v12128_v37  ;;  %12032 = vmatprep.mubr.msk.f32.mxu1 %vm9273_vm5, %v9655_v53 }
 0x5d9   : > { %12133 = vmatprep.subr.bf16.mxu1 %v12132_v58 }
 0x5df   : > { %12033 = vmatmul.mubr.msk.f32.vlgmr.msra.gmra.mrb[40].mxu1 %vm9273_vm5, %v9656_v1 }
 0x5e0   : > { %12135 = vmatpush3.bf16.msra.mxu1 %v12132_v58  ;;  %12039 = vmatprep.mubr.msk.f32.mxu1 %vm9273_vm5, %v9742_v52 }
 0x5e1   : > { %12137 = vmatprep.subr.bf16.mxu1 %v12136_v7 }
 0x5e7   : > { %12040 = vmatmul.mubr.msk.f32.vlgmr.msra.gmra.mrb[40].mxu1 %vm9273_vm5, %v9743_v63 }
 0x5e8   : > { %12139 = vmatpush3.bf16.msra.mxu1 %v12136_v7  ;;  %12046 = vmatprep.mubr.msk.f32.mxu1 %vm9273_vm5, %v9835_v47 }
 0x5e9   : > { %12141 = vmatprep.subr.bf16.mxu1 %v12140_v29 }
 0x5ef   : > { %12047 = vmatmul.mubr.msk.f32.vlgmr.msra.gmra.mrb[40].mxu1 %vm9273_vm5, %v9836_v36 }
 0x5f0   : > { %12143 = vmatpush3.bf16.msra.mxu1 %v12140_v29  ;;  %12053 = vmatprep.mubr.msk.f32.mxu1 %vm9273_vm5, %v9930_v42 }
 0x5f1   : > { %12145 = vmatprep.subr.bf16.mxu1 %v12144_v11 }
 0x5f7   : > { %12054 = vmatmul.mubr.msk.f32.vlgmr.msra.gmra.mrb[40].mxu1 %vm9273_vm5, %v9931_v13 }
 0x5f8   : > { %12147 = vmatpush3.bf16.msra.mxu1 %v12144_v11  ;;  %12060 = vmatprep.mubr.msk.f32.mxu1 %vm9273_vm5, %v10023_v21 }
 0x5f9   : > { %12149 = vmatprep.subr.bf16.mxu1 %v12148_v3 }
 0x5ff   : > { %12061 = vmatmul.mubr.msk.f32.vlgmr.msra.gmra.mrb[40].mxu1 %vm9273_vm5, %v10024_v62 }
 0x600   : > { %12151 = vmatpush3.bf16.msra.mxu1 %v12148_v3  ;;  %12067 = vmatprep.mubr.msk.f32.mxu1 %vm9273_vm5, %v10118_v61 }
 0x601   : > { %12152 = vmatprep.subr.bf16.mxu1 %v12722_v55 }
 0x607   : > { %12068 = vmatmul.mubr.msk.f32.vlgmr.msra.gmra.mrb[40].mxu1 %vm9273_vm5, %v10119_v54  ;;  %vm10268_vm5 = vcmask 254976  }
 0x608   : > { %12154 = vmatpush3.bf16.msra.mxu1 %v12153_v34 }
 0x609   : > { %12155 = vmatprep.subr.bf16.mxu1 %v12722_v55 }
 0x60c   : > { %12157 = vmatpush3.bf16.msra.mxu1 %v12156_v4  ;;  %v10367_v4 = vld [vmem:[%s17124_s7 + $0x60] sm:$0xff] }
 0x60d   : > { %12158 = vmatprep.subr.bf16.mxu1 %v12722_v55 }
 0x610   : > { %12160 = vmatpush3.bf16.msra.mxu1 %v12159_v18 }
 0x611   : > { %12161 = vmatprep.subr.bf16.mxu1 %v12722_v55 }
 0x614   : > { %12163 = vmatpush3.bf16.msra.mxu1 %v12162_v25 }
 0x615   : > { %12164 = vmatprep.subr.bf16.mxu1 %v12722_v55 }
 0x618   : > { %12166 = vmatpush3.bf16.msra.mxu1 %v12165_v23 }
 0x619   : > { %12167 = vmatprep.subr.bf16.mxu1 %v12722_v55 }
 0x61c   : > { %12169 = vmatpush3.bf16.msra.mxu1 %v12168_v41  ;;  %v12171_v41 = vpack.c.bf16 %v10368_v22, %v10367_v4 }
 0x61d   : > { %12170 = vmatprep.subr.bf16.mxu1 %v12722_v55 }
 0x620   : > { %12172 = vmatpush3.bf16.msra.mxu1 %v12171_v41 }
 0x621   : > { %12173 = vmatprep.subr.bf16.mxu1 %v12722_v55 }
 0x6da   : > { %v12069_v16 = vpop.f32.mrb[40].mxu1 }
 0x6db   : > { %v10213_v50 = vadd.f32 %v12069_v16, %v10990_v48  ;;  %v10194_v10 = vpop.f32.mrb[41].mxu1 }
 0x6dc   : > { %v10212_v37 = vadd.f32 %v10990_v48, %v10194_v10 }
 0x6dd   : > { %v10215_v24 = vmul.f32 0.5, %v10213_v50 }
 0x6de   : > { %v10214_v57 = vmul.f32 0.5, %v10212_v37 }
 0x6df   : > { %12647 = vtanh.f32 %v10215_v24 }
 0x6e0   : > { %12649 = vtanh.f32 %v10214_v57 }
 0x6e9   : > { %v12648_v5 = vpop.eup %12647 }
 0x6ea   : > { %v12650_v51 = vpop.eup %12649  ;;  %v10219_v28 = vadd.f32 1.0, %v12648_v5  ;;  %v10369_v5 = vld [vmem:[%s17124_s7 + $0x70] sm:$0xff] }
 0x6eb   : > { %v10218_v8 = vadd.f32 1.0, %v12650_v51  ;;  %v10370_v51 = vld [vmem:[%s17124_s7 + $0x78] sm:$0xff] }
 0x6ec   : > { %v10221_v27 = vmul.f32 0.5, %v10219_v28 }
 0x6ed   : > { %v10220_v58 = vmul.f32 0.5, %v10218_v8 }
 0x6ee   : > { %v10223_v39 = vmul.f32 %v10221_v27, %v10213_v50 }
 0x6ef   : > { %v10222_v53 = vmul.f32 %v10220_v58, %v10212_v37 }
 0x6f0   : > { %v10243_v44 = vcombine.high %v10223_v39, %v10223_v39  ;;  %v10250_v31 = vrot.slane %v10223_v39, %v18103_v19 }
 0x6f1   : > { %v10226_v49 = vcombine.high %v10222_v53, %v10222_v53  ;;  %v10233_v7 = vrot.slane %v10222_v53, %v18103_v19 }
 0x6f2   : > { %v10257_v1 = vrot.slane %v10243_v44, %v18103_v19  ;;  %v10258_v52 = vcombine.high %v10250_v31, %v10250_v31  ;;  %v10297_v46 = vsel %vm10268_vm5, %v10250_v31, -inf }
 0x6f3   : > { %v10298_v2 = vrot.slane %v10297_v46, 4  ;;  %v10240_v15 = vrot.slane %v10226_v49, %v18103_v19  ;;  %v10241_v29 = vcombine.high %v10233_v7, %v10233_v7  ;;  %v10269_v63 = vsel %vm10268_vm5, %v10233_v7, -inf }
 0x6f4   : > { %v10259_v47 = vcombine.high %v10257_v1, %v10257_v1  ;;  %v10304_v20 = vsel %vm10268_vm5, %v10258_v52, -inf  ;;  %v10311_v33 = vsel %vm10268_vm5, %v10257_v1, -inf  ;;  %v10270_v12 = vrot.slane %v10269_v63, 4 }
 0x6f5   : > { %v10299_v11 = vmax.f32 %v10297_v46, %v10298_v2  ;;  %v10305_v36 = vrot.slane %v10304_v20, 4  ;;  %v10312_v42 = vrot.slane %v10311_v33, 4  ;;  %v10242_v9 = vcombine.high %v10240_v15, %v10240_v15 }
 0x6f6   : > { %v10271_v0 = vmax.f32 %v10269_v63, %v10270_v12  ;;  %v10276_v17 = vsel %vm10268_vm5, %v10241_v29, -inf  ;;  %v10283_v3 = vsel %vm10268_vm5, %v10240_v15, -inf  ;;  %v10318_v19 = vsel %vm10268_vm5, %v10259_v47, -inf }
 0x6f7   : > { %v10300_v13 = vrot.slane %v10299_v11, 2  ;;  %v10313_v21 = vmax.f32 %v10311_v33, %v10312_v42  ;;  %v10277_v6 = vrot.slane %v10276_v17, 4  ;;  %v10284_v62 = vrot.slane %v10283_v3, 4 }
 0x6f8   : > { %v10272_v61 = vrot.slane %v10271_v0, 2  ;;  %v10306_v35 = vmax.f32 %v10304_v20, %v10305_v36  ;;  %v10319_v54 = vrot.slane %v10318_v19, 4  ;;  %v10290_v38 = vsel %vm10268_vm5, %v10242_v9, -inf }
 0x6f9   : > { %v10285_v45 = vmax.f32 %v10283_v3, %v10284_v62  ;;  %v10278_v30 = vmax.f32 %v10276_v17, %v10277_v6  ;;  %v10291_v34 = vrot.slane %v10290_v38, 4  ;;  %v10301_v14 = vmax.f32 %v10299_v11, %v10300_v13 }
 0x6fa   : > { %v10273_v56 = vmax.f32 %v10271_v0, %v10272_v61  ;;  %v10307_v18 = vrot.slane %v10306_v35, 2  ;;  %v10320_v59 = vmax.f32 %v10318_v19, %v10319_v54  ;;  %v10314_v32 = vrot.slane %v10313_v21, 2  ;;  %v10448_v54 = vld [vmem:[%s17126_s9 + $0x8] sm:$0xff] }
 0x6fb   : > { %v10286_v25 = vrot.slane %v10285_v45, 2  ;;  %v10279_v26 = vrot.slane %v10278_v30, 2  ;;  %v10292_v43 = vmax.f32 %v10290_v38, %v10291_v34  ;;  %v10302_v24 = vrot.slane %v10301_v14, 1 }
 0x6fc   : > { %v10308_v23 = vmax.f32 %v10306_v35, %v10307_v18  ;;  %v10321_v60 = vrot.slane %v10320_v59, 2  ;;  %v10315_v40 = vmax.f32 %v10313_v21, %v10314_v32  ;;  %v10274_v50 = vrot.slane %v10273_v56, 1  ;;  %v10447_v35 = vld [vmem:[%s17126_s9] sm:$0xff] }
 0x6fd   : > { %v10280_v48 = vmax.f32 %v10278_v30, %v10279_v26  ;;  %v10293_v16 = vrot.slane %v10292_v43, 2  ;;  %v10287_v57 = vmax.f32 %v10285_v45, %v10286_v25  ;;  %v12174_v7 = vpack.c.bf16 %v10370_v51, %v10369_v5  ;;  %v10449_v45 = vld [vmem:[%s17126_s9 + $0x10] sm:$0xff]  ;;  %v10450_v30 = vld [vmem:[%s17126_s9 + $0x18] sm:$0xff]  ;;  %v10451_v26 = vld [vmem:[%s17127_s10] sm:$0x1] }
 0x6fe   : > { %v10309_v10 = vrot.slane %v10308_v23, 1  ;;  %v10322_v37 = vmax.f32 %v10320_v59, %v10321_v60  ;;  %v10316_v27 = vrot.slane %v10315_v40, 1  ;;  %v10275_v58 = vmax.f32 %v10273_v56, %v10274_v50 }
 0x6ff   : > { %v10281_v28 = vrot.slane %v10280_v48, 1  ;;  %v10294_v8 = vmax.f32 %v10292_v43, %v10293_v16  ;;  %v10288_v44 = vrot.slane %v10287_v57, 1  ;;  %v10303_v52 = vmax.f32 %v10301_v14, %v10302_v24  ;;  %12175 = vmatpush3.bf16.msra.mxu1 %v12174_v7  ;;  %v10371_v14 = vld [vmem:[%s17125_s8] sm:$0x1] }
 0x700   : > { %v10310_v39 = vmax.f32 %v10308_v23, %v10309_v10  ;;  %v10323_v53 = vrot.slane %v10322_v37, 1  ;;  %v10317_v29 = vmax.f32 %v10315_v40, %v10316_v27  ;;  %v10326_v63 = vsel %vm10325_vm13, %v10275_v58, -inf  ;;  %12176 = vmatprep.subr.bf16.mxu1 %v12722_v55 }
 0x701   : > { %v10282_v31 = vmax.f32 %v10280_v48, %v10281_v28  ;;  %v10295_v49 = vrot.slane %v10294_v8, 1  ;;  %v10289_v46 = vmax.f32 %v10287_v57, %v10288_v44  ;;  %v12724_v42 = vmov 0.0  }
 0x702   : > { %v10324_v1 = vmax.f32 %v10322_v37, %v10323_v53  ;;  %v10335_v2 = vsel %vm10325_vm13, %v10310_v39, -inf  ;;  %12102 = vmatprep.mubr.msk.f32.mxu1 %vm12723_vm6, %v12724_v42  ;;  %v10333_v0 = vsel %vm10325_vm13, %v10317_v29, -inf  ;;  %v10332_v17 = vsel %vm10325_vm13, %v10303_v52, -inf }
 0x703   : > { %v10296_v15 = vmax.f32 %v10294_v8, %v10295_v49  ;;  %v10327_v20 = vsel %vm10325_vm13, %v10289_v46, -inf  ;;  %v10329_v12 = vsel %vm10325_vm13, %v10282_v31, -inf  ;;  %v10334_v3 = vmax.f32 %v10332_v17, %v10333_v0 }
 0x704   : > { %v10336_v47 = vsel %vm10325_vm13, %v10324_v1, -inf  ;;  %v10328_v36 = vmax.f32 %v10326_v63, %v10327_v20  ;;  %v12177_v38 = vpack.c.bf16 %v10448_v54, %v10447_v35  ;;  %v12180_v34 = vpack.c.bf16 %v10450_v30, %v10449_v45 }
 0x705   : > { %v10337_v33 = vmax.f32 %v10335_v2, %v10336_v47  ;;  %v10330_v11 = vsel %vm10325_vm13, %v10296_v15, -inf }
 0x706   : > { %v10331_v9 = vmax.f32 %v10329_v12, %v10330_v11 }
 0x707   : > { %10347 = vrot.lane.b32.xlu1 %v10337_v33, %s12725_s22  ;;  %s10539_s22 = sshll.u32 %s12846_s16, 4  ;;  %s17074_s22 = int_to_ptr.vmem [resolvable:$true] %s10539_s22 }
 0x708   : > { %10339 = vrot.lane.b32.xlu0 %v10331_v9, %s12726_s24  ;;  %s12656_s13 = scalar_lea.vmem %s17074_s22, 16  ;;  %p12663_p1 = scmp.lt.s32.totalorder %s17074_s22, %s12661_s14 }
 0x709   : > { %p12657_p12 = scmp.ne.s32.totalorder %s17074_s22, %s12656_s13  ;;  %p12664_p2 = scmp.lt.s32.totalorder %s12662_s0, %s12656_s13 }
 0x70b   : > { %p12658_p13 = pnand %p12657_p12, %p12827_p5  ;;  %p12665_p3 = por %p12664_p2, %p12663_p1 }
 0x70c   : > { %10343 = vrot.lane.b32.xlu0 %v10334_v3, %s12727_s25 }
 0x70d   : > { %p12659_p0 = pneg %p12658_p13 }
 0x70f   : > { %p12666_p4 = pnand %p12665_p3, %p12659_p0 }
 0x779   : > { %v10348_v6 = vpop.permute.xlu1 %10347 }
 0x77a   : > { %v10340_v19 = vpop.permute.xlu0 %10339 }
 0x77b   : > { %v10350_v13 = vsel %vm10325_vm13, %v10328_v36, %v10340_v19 }
 0x77e   : > { %v10344_v21 = vpop.permute.xlu0 %10343 }
 0x77f   : > { %v10352_v62 = vsel %vm10351_vm10, %v10350_v13, %v10344_v21 }
 0x780   : > { %v10354_v61 = vsel %vm10353_vm8, %v10352_v62, %v10348_v6 }
 0x781   : > { %12103 = vmatmul.mubr.f32.vlgmr.msra.gmra.mrb[42].mxu1 %v10354_v61 }
 0x782   : > { %12113 = vmatprep.mubr.msk.f32.mxu1 %vm12723_vm6, %v12724_v42  ;;  %12178 = vmatpush3.bf16.msra.mxu1 %v12177_v38 }
 0x783   : > { %12179 = vmatprep.subr.bf16.mxu1 %v12722_v55 }
 0x786   : > { %12181 = vmatpush3.bf16.msra.mxu1 %v12180_v34 }
 0x854   : > { %v10438_v4 = vpop.f32.mrb[42].mxu1 }
 0x855   : > { %v10439_v22 = vadd.f32 %v10438_v4, %v10371_v14  ;;  %v12104_v56 = vpop.f32.mrb[43].mxu1 }
 0x857   : > { %v10442_v55 = vmul.f32 0.5, %v10439_v22 }
 0x859   : > { %12651 = vtanh.f32 %v10442_v55 }
 0x863   : > { %v12652_v18 = vpop.eup %12651 }
 0x864   : > { %v10444_v59 = vadd.f32 1.0, %v12652_v18 }
 0x866   : > { %v10445_v32 = vmul.f32 0.5, %v10444_v59 }
 0x868   : > { %v10446_v25 = vmul.f32 %v10445_v32, %v10439_v22 }
 0x86a   : > { %12114 = vmatmul.mubr.msk.f32.vlgmr.msra.gmra.mrb[44].mxu1 %vm10325_vm13, %v10446_v25 }
 0x93d   : > { %v10521_v43 = vpop.f32.mrb[44].mxu1 }
 0x93e   : > { %v10522_v23 = vadd.f32 %v10521_v43, %v10451_v26  ;;  %v12115_v60 = vpop.f32.mrb[45].mxu1 }
 0x940   : > { %10525 = vst [vmem:[%s12846_s16] sm:$0x1] %v10522_v23 }
 0x941   : > { %12669 = shalt.err (!%p12666_p4)
}
 0x942   : > { %s12670_s29 = scalar_lea.hbm %s17072_s30, 16  ;;  %s12674_s24 = scalar_lea.hbm %s17128_s11, 32 }
 0x943   : > { %p12671_p7 = scmp.ne.s32.totalorder %s17072_s30, %s12670_s29  ;;  %p12675_p10 = scmp.lt.u32.totalorder %s17072_s30, %s17128_s11 }
 0x944   : > { %p12676_p11 = scmp.lt.u32.totalorder %s12674_s24, %s12670_s29  ;;  %p12678_p13 = scmp.lt.u32.totalorder %s12670_s29, %s17072_s30 }
 0x945   : > { %p12672_p8 = pnand %p12671_p7, %p12827_p5 }
 0x946   : > { %p12677_p12 = por %p12676_p11, %p12675_p10 }
 0x947   : > { %p12673_p9 = pneg %p12672_p8 }
 0x948   : > { %p12679_p0 = por %p12678_p13, %p12677_p12 }
 0x94a   : > { %p12680_p1 = pnand %p12679_p0, %p12673_p9 }
 0x94c   : > { %12683 = shalt.err (!%p12680_p1)
}
 0x94d   : > { %12520 = dma.vmem_to_hbm [thread:$0]  (%p12827_p5), %s17074_s22, 16, %s17072_s30, %s10527_s12  }
 0x94e PF: > { %p12526_p2 = scmp.ge.s32.totalorder %s12718_s20, 2  ;;  %s10551_s0 = sand.u32 1, %s12706_s17  }
 0x94f   : > { %s10552_s13 = scalar_lea.sflag [#allocation6], %s10551_s0 }
 0x950   : > { %p12523_p3 = pnand %p12526_p2, %p12831_p6 }
 0x952   : > { %12701 = dma.done.wait (!%p12523_p3), %s10552_s13, 16  }
 0x953   : > { %12703 = vsyncadd (!%p12523_p3), %s10552_s13, 4294967280  ;;  %p21_p4 = scmp.ge.s32.totalorder %s12814_s23, 4   ;;  %s18128_s17 = smov %s12710_s18 }
 0x954   : > { %s18129_s18 = smov %s12714_s19  ;;  %s18130_s19 = smov %s12825_s26 }
 0x955   : > { %s18131_s20 = smov %s12814_s23  ;;  %23 = sbr.rel (!%p21_p4) target bundleno = 5 (0x5), region = 103 }
 0x95c   :  { %10556 = vsyncpa [#allocation6], 1 }
 0x95d   :  { %10558 = vsyncpa [#allocation6 + $0x1], 1 }

</bundles_post_ra>
